<compile_context>
chip_gen: v7x
topology: tpu7x:2x2x1
jax: 0.10.0
libtpu: 0.0.40
codegen_flags: <defaults>
</compile_context>

<pallas_src>
import jax
import jax.numpy as jnp
from jax import lax
from jax.experimental import pallas as pl
from jax.experimental.pallas import tpu as pltpu


# Static geometry for the 28x28x1 input implied by fc1 (64*12*12 = 9216).
_H = 28
_XW = 832            # 28*28 = 784 flat image, zero-padded to 832 lanes
_Y1W = 768           # conv1 output width (flat h*28+w incl. garbage cols) = 6*128
_Y2W = 704           # conv2 output / im2col width
_MW = 672            # pool-candidate width (24*28)
_NPOOL = 144         # 12*12 pooled positions
_OFFS = tuple(kh * _H + kw for kh in range(3) for kw in range(3))


# ----------------------------- Pallas kernels ------------------------------

def _conv_stack_kernel(x_ref, w1_ref, b1_ref, w2_ref, b2_ref, st_ref,
                       o_ref, col_ref):
    """Fused conv1+ReLU -> conv2 -> maxpool2 -> NCHW-flatten for one image."""
    # conv1 on the VPU: 9 shifted FMAs in f32.
    x = x_ref[0]                                          # (1, 832) f32
    w1 = w1_ref[...]                                      # (32, 9)  f32
    acc1 = w1[:, 0:1] * x[:, _OFFS[0]:_OFFS[0] + _Y1W]    # (32, 768)
    for o in range(1, 9):
        off = _OFFS[o]
        acc1 = acc1 + w1[:, o:o + 1] * x[:, off:off + _Y1W]
    y1 = jnp.maximum(acc1 + b1_ref[...], 0.0)             # (32, 768) f32
    y1 = y1.astype(jnp.bfloat16)

    # conv2 on the MXU as ONE matmul over a VMEM im2col buffer:
    # col[o*32 + ci, p] = y1[ci, off_o + p]  (static sublane-aligned stores).
    for o in range(9):
        off = _OFFS[o]
        col_ref[o * 32:(o + 1) * 32, :] = y1[:, off:off + _Y2W]
    y2 = jnp.dot(w2_ref[...], col_ref[...],
                 preferred_element_type=jnp.float32)      # (64, 704) f32

    # Fused 2x2/stride-2 max pool: elementwise max of 4 shifted views, then a
    # constant 0/1 selection matmul picks the 144 valid window corners and
    # emits out[c, hp*12+wp] -- i.e. PyTorch's NCHW flatten order for free.
    m = jnp.maximum(
        jnp.maximum(y2[:, 0:_MW], y2[:, 1:1 + _MW]),
        jnp.maximum(y2[:, _H:_H + _MW], y2[:, _H + 1:_H + 1 + _MW]))  # (64, 672)
    pooled = jnp.dot(m.astype(jnp.bfloat16), st_ref[...],
                     preferred_element_type=jnp.float32)  # (64, 144)
    o_ref[0] = (pooled + b2_ref[...]).astype(o_ref.dtype)


def _fc_head_kernel(flat_ref, w1_ref, b1_ref, w2_ref, b2_ref, o_ref):
    """fc1 (single bf16 MXU matmul, f32 acc) + ReLU + fc2 + log_softmax."""
    h = jnp.dot(flat_ref[...], w1_ref[...],
                preferred_element_type=jnp.float32) + b1_ref[...]   # (B, 128)
    h = jnp.maximum(h, 0.0)
    logits = jnp.dot(h.astype(jnp.bfloat16), w2_ref[...],
                     preferred_element_type=jnp.float32) + b2_ref[...]
    mx = jnp.max(logits, axis=-1, keepdims=True)
    lse = mx + jnp.log(jnp.sum(jnp.exp(logits - mx), axis=-1, keepdims=True))
    o_ref[...] = logits - lse


# --------------------------- parameter preparation --------------------------

def prepare_params(params):
    """One-time weight re-layout / casting (never done inside the forward)."""
    w1, b1, w2, b2, fw1, fb1, fw2, fb2 = params
    w1_r = w1.reshape(32, 9).astype(jnp.float32)                   # (Cout1, kh*3+kw)
    b1_c = b1.reshape(32, 1).astype(jnp.float32)
    # conv2 weight laid out for the single im2col matmul:
    # w2_s[co, (kh*3+kw)*32 + ci] = w2[co, ci, kh, kw]
    w2_s = jnp.transpose(w2, (0, 2, 3, 1)).reshape(64, 288).astype(jnp.bfloat16)
    b2_c = b2.reshape(64, 1).astype(jnp.float32)
    fw1_t = fw1.T.astype(jnp.bfloat16)                             # (9216, 128)
    fb1_r = fb1.reshape(1, 128).astype(jnp.float32)
    fw2_t = fw2.T.astype(jnp.bfloat16)                             # (128, 10)
    fb2_r = fb2.reshape(1, 10).astype(jnp.float32)
    # Pool/flatten selection matrix: column r=hp*12+wp picks flat position
    # p = 56*hp + 2*wp (the top-left corner of each 2x2 window).
    r = jnp.arange(_NPOOL)
    psel = 56 * (r // 12) + 2 * (r % 12)
    st = (jnp.arange(_MW)[:, None] == psel[None, :]).astype(jnp.bfloat16)
    return (w1_r, b1_c, w2_s, b2_c, st, fw1_t, fb1_r, fw2_t, fb2_r)


# --------------------------------- forward ----------------------------------

@jax.jit
def convnet_forward(x_nchw, prep):
    (w1_r, b1_c, w2_s, b2_c, st, fw1_t, fb1_r, fw2_t, fb2_r) = prep
    B = x_nchw.shape[0]

    # NCHW with Cin=1 -> flat (h*28+w) image per example, zero-padded (cheap glue).
    x_flat = x_nchw.reshape(B, _H * _H).astype(jnp.float32)
    x_pad = jnp.pad(x_flat, ((0, 0), (0, _XW - _H * _H))).reshape(B, 1, _XW)

    conv_out = pl.pallas_call(
        _conv_stack_kernel,
        out_shape=jax.ShapeDtypeStruct((B, 64, _NPOOL), jnp.bfloat16),
        grid_spec=pltpu.PrefetchScalarGridSpec(
            num_scalar_prefetch=0,
            grid=(B,),
            in_specs=[
                pl.BlockSpec((1, 1, _XW), lambda b: (b, 0, 0)),
                pl.BlockSpec((32, 9), lambda b: (0, 0)),
                pl.BlockSpec((32, 1), lambda b: (0, 0)),
                pl.BlockSpec((64, 288), lambda b: (0, 0)),
                pl.BlockSpec((64, 1), lambda b: (0, 0)),
                pl.BlockSpec((_MW, _NPOOL), lambda b: (0, 0)),
            ],
            out_specs=pl.BlockSpec((1, 64, _NPOOL), lambda b: (b, 0, 0)),
            scratch_shapes=[pltpu.VMEM((288, _Y2W), jnp.bfloat16)],
        ),
        compiler_params=pltpu.CompilerParams(
            dimension_semantics=("parallel",)),
    )(x_pad, w1_r, b1_c, w2_s, b2_c, st)

    # (B, 64, 144) -> (B, 9216): contiguous reshape that already equals
    # torch.flatten(NCHW, 1) order, so fc1's weight needs no permutation.
    flat = conv_out.reshape(B, 64 * _NPOOL)

    out = pl.pallas_call(
        _fc_head_kernel,
        out_shape=jax.ShapeDtypeStruct((B, 10), jnp.float32),
        grid_spec=pltpu.PrefetchScalarGridSpec(
            num_scalar_prefetch=0,
            grid=(1,),
            in_specs=[
                pl.BlockSpec((B, 64 * _NPOOL), lambda i: (0, 0)),
                pl.BlockSpec((64 * _NPOOL, 128), lambda i: (0, 0)),
                pl.BlockSpec((1, 128), lambda i: (0, 0)),
                pl.BlockSpec((128, 10), lambda i: (0, 0)),
                pl.BlockSpec((1, 10), lambda i: (0, 0)),
            ],
            out_specs=pl.BlockSpec((B, 10), lambda i: (0, 0)),
        ),
        compiler_params=pltpu.CompilerParams(
            dimension_semantics=("arbitrary",)),
    )(flat, fw1_t, fb1_r, fw2_t, fb2_r)
    return out


# -------------------------------- reference ---------------------------------

def reference(x, params):
    """Pure-JAX/XLA f32 reference implementing the same forward."""
    (w1, b1, w2, b2, fw1, fb1, fw2, fb2) = params
    dn = ('NCHW', 'OIHW', 'NCHW')
    y = lax.conv_general_dilated(x, w1, (1, 1), 'VALID', dimension_numbers=dn)
    y = jnp.maximum(y + b1[None, :, None, None], 0.0)
    y = lax.conv_general_dilated(y, w2, (1, 1), 'VALID', dimension_numbers=dn)
    y = y + b2[None, :, None, None]
    B, C, H, W = y.shape
    y = y.reshape(B, C, H // 2, 2, W // 2, 2).max(axis=(3, 5))
    y = y.reshape(B, -1)
    y = jnp.maximum(y @ fw1.T + fb1, 0.0)
    y = y @ fw2.T + fb2
    return jax.nn.log_softmax(y, axis=1)


# ---------------------------------- main ------------------------------------

if __name__ == "__main__":
    key = jax.random.PRNGKey(0)
    ks = jax.random.split(key, 9)
    B = 2
    # Input must be (B, 1, 28, 28): conv1 -> 26, conv2 -> 24, pool -> 12,
    # 64*12*12 = 9216 = fc1 in_features.
    x = jax.random.normal(ks[0], (B, 1, 28, 28), jnp.float32)

    def _init(k, shape, fan_in):
        return (jax.random.normal(k, shape, jnp.float32) / jnp.sqrt(fan_in)).astype(jnp.float32)

    w1 = _init(ks[1], (32, 1, 3, 3), 9.0)        # PyTorch conv weight (O, I, kH, kW)
    b1 = _init(ks[2], (32,), 9.0)
    w2 = _init(ks[3], (64, 32, 3, 3), 288.0)
    b2 = _init(ks[4], (64,), 288.0)
    fw1 = _init(ks[5], (128, 9216), 9216.0)      # PyTorch linear weight (out, in)
    fb1 = _init(ks[6], (128,), 9216.0)
    fw2 = _init(ks[7], (10, 128), 128.0)
    fb2 = _init(ks[8], (10,), 128.0)
    params = (w1, b1, w2, b2, fw1, fb1, fw2, fb2)

    prep = prepare_params(params)                # one-time weight re-layout

    out = jax.block_until_ready(convnet_forward(x, prep))
    ref = jax.block_until_ready(reference(x, params))

    assert out.shape == (B, 10), out.shape
    max_err = float(jnp.max(jnp.abs(out - ref)))
    assert max_err < 5e-2, f"max abs diff vs reference: {max_err}"
    print("KERNEL_OK")
</pallas_src>

<mosaic_0001>
module attributes {stable_mosaic.version = 11 : i64} {
  func.func @_fc_head_kernel(%arg0: i32, %arg1: memref<2x9216xbf16, #tpu.memory_space<vmem>>, %arg2: memref<9216x128xbf16, #tpu.memory_space<vmem>>, %arg3: memref<1x128xf32, #tpu.memory_space<vmem>>, %arg4: memref<128x10xbf16, #tpu.memory_space<vmem>>, %arg5: memref<1x10xf32, #tpu.memory_space<vmem>>, %arg6: memref<2x10xf32, #tpu.memory_space<vmem>>) attributes {dimension_semantics = [#tpu.dimension_semantics<arbitrary>], iteration_bounds = array<i64: 1>, scalar_prefetch = 0 : i64, scratch_operands = 0 : i64, tpu.core_type = #tpu.core_type<tc>, window_params = [{pipeline_mode = #tpu.pipeline_mode<synchronous>, transform_indices = @transform_0, window_bounds = array<i64: 2, 9216>}, {pipeline_mode = #tpu.pipeline_mode<synchronous>, transform_indices = @transform_1, window_bounds = array<i64: 9216, 128>}, {pipeline_mode = #tpu.pipeline_mode<synchronous>, transform_indices = @transform_2, window_bounds = array<i64: 1, 128>}, {pipeline_mode = #tpu.pipeline_mode<synchronous>, transform_indices = @transform_3, window_bounds = array<i64: 128, 10>}, {pipeline_mode = #tpu.pipeline_mode<synchronous>, transform_indices = @transform_4, window_bounds = array<i64: 1, 10>}, {pipeline_mode = #tpu.pipeline_mode<synchronous>, transform_indices = @transform_5, window_bounds = array<i64: 2, 10>}]} {
    %c0 = arith.constant 0 : index
    %c0_0 = arith.constant 0 : index
    %0 = vector.load %arg1[%c0, %c0_0] : memref<2x9216xbf16, #tpu.memory_space<vmem>>, vector<2x9216xbf16>
    %c0_1 = arith.constant 0 : index
    %c0_2 = arith.constant 0 : index
    %1 = vector.load %arg2[%c0_1, %c0_2] : memref<9216x128xbf16, #tpu.memory_space<vmem>>, vector<9216x128xbf16>
    %cst = arith.constant dense<0.000000e+00> : vector<2x128xf32>
    %2 = tpu.matmul %0, %1, %cst {dimension_numbers = #tpu.dot_dimension_numbers<[1], [0], [0], [1], [0, 0, 1, 1], [], []>} : vector<2x9216xbf16>, vector<9216x128xbf16>, vector<2x128xf32> -> vector<2x128xf32>
    %c0_3 = arith.constant 0 : index
    %c0_4 = arith.constant 0 : index
    %3 = vector.load %arg3[%c0_3, %c0_4] : memref<1x128xf32, #tpu.memory_space<vmem>>, vector<1x128xf32>
    %4 = vector.broadcast %3 : vector<1x128xf32> to vector<2x128xf32>
    %5 = arith.addf %2, %4 : vector<2x128xf32>
    %cst_5 = arith.constant 0.000000e+00 : f32
    %6 = vector.broadcast %cst_5 : f32 to vector<2x128xf32>
    %7 = arith.maximumf %5, %6 : vector<2x128xf32>
    %8 = arith.truncf %7 : vector<2x128xf32> to vector<2x128xbf16>
    %c0_6 = arith.constant 0 : index
    %c0_7 = arith.constant 0 : index
    %9 = vector.load %arg4[%c0_6, %c0_7] : memref<128x10xbf16, #tpu.memory_space<vmem>>, vector<128x10xbf16>
    %cst_8 = arith.constant dense<0.000000e+00> : vector<2x10xf32>
    %10 = tpu.matmul %8, %9, %cst_8 {dimension_numbers = #tpu.dot_dimension_numbers<[1], [0], [0], [1], [0, 0, 1, 1], [], []>} : vector<2x128xbf16>, vector<128x10xbf16>, vector<2x10xf32> -> vector<2x10xf32>
    %c0_9 = arith.constant 0 : index
    %c0_10 = arith.constant 0 : index
    %11 = vector.load %arg5[%c0_9, %c0_10] : memref<1x10xf32, #tpu.memory_space<vmem>>, vector<1x10xf32>
    %12 = vector.broadcast %11 : vector<1x10xf32> to vector<2x10xf32>
    %13 = arith.addf %10, %12 : vector<2x10xf32>
    %cst_11 = arith.constant dense<0xFF800000> : vector<2xf32>
    %14 = vector.multi_reduction <maximumf>, %13, %cst_11 [1] : vector<2x10xf32> to vector<2xf32>
    %15 = vector.shape_cast %14 : vector<2xf32> to vector<2x1xf32>
    %16 = vector.broadcast %15 : vector<2x1xf32> to vector<2x10xf32>
    %17 = arith.subf %13, %16 : vector<2x10xf32>
    %18 = math.exp %17 : vector<2x10xf32>
    %cst_12 = arith.constant dense<0.000000e+00> : vector<2xf32>
    %19 = vector.multi_reduction <add>, %18, %cst_12 [1] : vector<2x10xf32> to vector<2xf32>
    %20 = vector.shape_cast %19 : vector<2xf32> to vector<2x1xf32>
    %21 = math.log %20 : vector<2x1xf32>
    %22 = arith.addf %15, %21 : vector<2x1xf32>
    %23 = vector.broadcast %22 : vector<2x1xf32> to vector<2x10xf32>
    %24 = arith.subf %13, %23 : vector<2x10xf32>
    %c0_13 = arith.constant 0 : index
    %c0_14 = arith.constant 0 : index
    %25 = vector.load %arg6[%c0_13, %c0_14] : memref<2x10xf32, #tpu.memory_space<vmem>>, vector<2x10xf32>
    tpu.vector_store %arg6[%c0_13, %c0_14], %24 {strides = array<i32>} : memref<2x10xf32, #tpu.memory_space<vmem>>, vector<2x10xf32>,
    return
  }
  func.func @transform_0(%arg0: i32) -> (i32, i32) {
    %c0_i32 = arith.constant 0 : i32
    %c0_i32_0 = arith.constant 0 : i32
    %c0_i32_1 = arith.constant 0 : i32
    return %c0_i32, %c0_i32_0 : i32, i32
  }
  func.func @transform_1(%arg0: i32) -> (i32, i32) {
    %c0_i32 = arith.constant 0 : i32
    %c0_i32_0 = arith.constant 0 : i32
    %c0_i32_1 = arith.constant 0 : i32
    return %c0_i32, %c0_i32_0 : i32, i32
  }
  func.func @transform_2(%arg0: i32) -> (i32, i32) {
    %c0_i32 = arith.constant 0 : i32
    %c0_i32_0 = arith.constant 0 : i32
    %c0_i32_1 = arith.constant 0 : i32
    return %c0_i32, %c0_i32_0 : i32, i32
  }
  func.func @transform_3(%arg0: i32) -> (i32, i32) {
    %c0_i32 = arith.constant 0 : i32
    %c0_i32_0 = arith.constant 0 : i32
    %c0_i32_1 = arith.constant 0 : i32
    return %c0_i32, %c0_i32_0 : i32, i32
  }
  func.func @transform_4(%arg0: i32) -> (i32, i32) {
    %c0_i32 = arith.constant 0 : i32
    %c0_i32_0 = arith.constant 0 : i32
    %c0_i32_1 = arith.constant 0 : i32
    return %c0_i32, %c0_i32_0 : i32, i32
  }
  func.func @transform_5(%arg0: i32) -> (i32, i32) {
    %c0_i32 = arith.constant 0 : i32
    %c0_i32_0 = arith.constant 0 : i32
    %c0_i32_1 = arith.constant 0 : i32
    return %c0_i32, %c0_i32_0 : i32, i32
  }
}

module attributes {stable_mosaic.version = 11 : i64} {
  func.func @_conv_stack_kernel(%arg0: i32, %arg1: memref<1x1x832xf32, #tpu.memory_space<vmem>>, %arg2: memref<32x9xf32, #tpu.memory_space<vmem>>, %arg3: memref<32x1xf32, #tpu.memory_space<vmem>>, %arg4: memref<64x288xbf16, #tpu.memory_space<vmem>>, %arg5: memref<64x1xf32, #tpu.memory_space<vmem>>, %arg6: memref<672x144xbf16, #tpu.memory_space<vmem>>, %arg7: memref<1x64x144xbf16, #tpu.memory_space<vmem>>, %arg8: memref<288x704xbf16, #tpu.memory_space<vmem>>) attributes {dimension_semantics = [#tpu.dimension_semantics<parallel>], iteration_bounds = array<i64: 2>, scalar_prefetch = 0 : i64, scratch_operands = 1 : i64, tpu.core_type = #tpu.core_type<tc>, window_params = [{transform_indices = @transform_0, window_bounds = array<i64: 1, 1, 832>}, {pipeline_mode = #tpu.pipeline_mode<synchronous>, transform_indices = @transform_1, window_bounds = array<i64: 32, 9>}, {pipeline_mode = #tpu.pipeline_mode<synchronous>, transform_indices = @transform_2, window_bounds = array<i64: 32, 1>}, {pipeline_mode = #tpu.pipeline_mode<synchronous>, transform_indices = @transform_3, window_bounds = array<i64: 64, 288>}, {pipeline_mode = #tpu.pipeline_mode<synchronous>, transform_indices = @transform_4, window_bounds = array<i64: 64, 1>}, {pipeline_mode = #tpu.pipeline_mode<synchronous>, transform_indices = @transform_5, window_bounds = array<i64: 672, 144>}, {transform_indices = @transform_6, window_bounds = array<i64: 1, 64, 144>}]} {
    %c0 = arith.constant 0 : index
    %c0_0 = arith.constant 0 : index
    %c0_1 = arith.constant 0 : index
    %0 = vector.load %arg1[%c0, %c0_0, %c0_1] : memref<1x1x832xf32, #tpu.memory_space<vmem>>, vector<1x1x832xf32>
    %1 = vector.shape_cast %0 : vector<1x1x832xf32> to vector<1x832xf32>
    %c0_2 = arith.constant 0 : index
    %c0_3 = arith.constant 0 : index
    %2 = vector.load %arg2[%c0_2, %c0_3] : memref<32x9xf32, #tpu.memory_space<vmem>>, vector<32x9xf32>
    %3 = vector.extract_strided_slice %2 {offsets = [0, 0], sizes = [32, 1], strides = [1, 1]} : vector<32x9xf32> to vector<32x1xf32>
    %4 = vector.extract_strided_slice %1 {offsets = [0, 0], sizes = [1, 768], strides = [1, 1]} : vector<1x832xf32> to vector<1x768xf32>
    %5 = vector.broadcast %3 : vector<32x1xf32> to vector<32x768xf32>
    %6 = vector.broadcast %4 : vector<1x768xf32> to vector<32x768xf32>
    %7 = arith.mulf %5, %6 : vector<32x768xf32>
    %8 = vector.extract_strided_slice %2 {offsets = [0, 1], sizes = [32, 1], strides = [1, 1]} : vector<32x9xf32> to vector<32x1xf32>
    %9 = vector.extract_strided_slice %1 {offsets = [0, 1], sizes = [1, 768], strides = [1, 1]} : vector<1x832xf32> to vector<1x768xf32>
    %10 = vector.broadcast %8 : vector<32x1xf32> to vector<32x768xf32>
    %11 = vector.broadcast %9 : vector<1x768xf32> to vector<32x768xf32>
    %12 = arith.mulf %10, %11 : vector<32x768xf32>
    %13 = arith.addf %7, %12 : vector<32x768xf32>
    %14 = vector.extract_strided_slice %2 {offsets = [0, 2], sizes = [32, 1], strides = [1, 1]} : vector<32x9xf32> to vector<32x1xf32>
    %15 = vector.extract_strided_slice %1 {offsets = [0, 2], sizes = [1, 768], strides = [1, 1]} : vector<1x832xf32> to vector<1x768xf32>
    %16 = vector.broadcast %14 : vector<32x1xf32> to vector<32x768xf32>
    %17 = vector.broadcast %15 : vector<1x768xf32> to vector<32x768xf32>
    %18 = arith.mulf %16, %17 : vector<32x768xf32>
    %19 = arith.addf %13, %18 : vector<32x768xf32>
    %20 = vector.extract_strided_slice %2 {offsets = [0, 3], sizes = [32, 1], strides = [1, 1]} : vector<32x9xf32> to vector<32x1xf32>
    %21 = vector.extract_strided_slice %1 {offsets = [0, 28], sizes = [1, 768], strides = [1, 1]} : vector<1x832xf32> to vector<1x768xf32>
    %22 = vector.broadcast %20 : vector<32x1xf32> to vector<32x768xf32>
    %23 = vector.broadcast %21 : vector<1x768xf32> to vector<32x768xf32>
    %24 = arith.mulf %22, %23 : vector<32x768xf32>
    %25 = arith.addf %19, %24 : vector<32x768xf32>
    %26 = vector.extract_strided_slice %2 {offsets = [0, 4], sizes = [32, 1], strides = [1, 1]} : vector<32x9xf32> to vector<32x1xf32>
    %27 = vector.extract_strided_slice %1 {offsets = [0, 29], sizes = [1, 768], strides = [1, 1]} : vector<1x832xf32> to vector<1x768xf32>
    %28 = vector.broadcast %26 : vector<32x1xf32> to vector<32x768xf32>
    %29 = vector.broadcast %27 : vector<1x768xf32> to vector<32x768xf32>
    %30 = arith.mulf %28, %29 : vector<32x768xf32>
    %31 = arith.addf %25, %30 : vector<32x768xf32>
    %32 = vector.extract_strided_slice %2 {offsets = [0, 5], sizes = [32, 1], strides = [1, 1]} : vector<32x9xf32> to vector<32x1xf32>
    %33 = vector.extract_strided_slice %1 {offsets = [0, 30], sizes = [1, 768], strides = [1, 1]} : vector<1x832xf32> to vector<1x768xf32>
    %34 = vector.broadcast %32 : vector<32x1xf32> to vector<32x768xf32>
    %35 = vector.broadcast %33 : vector<1x768xf32> to vector<32x768xf32>
    %36 = arith.mulf %34, %35 : vector<32x768xf32>
    %37 = arith.addf %31, %36 : vector<32x768xf32>
    %38 = vector.extract_strided_slice %2 {offsets = [0, 6], sizes = [32, 1], strides = [1, 1]} : vector<32x9xf32> to vector<32x1xf32>
    %39 = vector.extract_strided_slice %1 {offsets = [0, 56], sizes = [1, 768], strides = [1, 1]} : vector<1x832xf32> to vector<1x768xf32>
    %40 = vector.broadcast %38 : vector<32x1xf32> to vector<32x768xf32>
    %41 = vector.broadcast %39 : vector<1x768xf32> to vector<32x768xf32>
    %42 = arith.mulf %40, %41 : vector<32x768xf32>
    %43 = arith.addf %37, %42 : vector<32x768xf32>
    %44 = vector.extract_strided_slice %2 {offsets = [0, 7], sizes = [32, 1], strides = [1, 1]} : vector<32x9xf32> to vector<32x1xf32>
    %45 = vector.extract_strided_slice %1 {offsets = [0, 57], sizes = [1, 768], strides = [1, 1]} : vector<1x832xf32> to vector<1x768xf32>
    %46 = vector.broadcast %44 : vector<32x1xf32> to vector<32x768xf32>
    %47 = vector.broadcast %45 : vector<1x768xf32> to vector<32x768xf32>
    %48 = arith.mulf %46, %47 : vector<32x768xf32>
    %49 = arith.addf %43, %48 : vector<32x768xf32>
    %50 = vector.extract_strided_slice %2 {offsets = [0, 8], sizes = [32, 1], strides = [1, 1]} : vector<32x9xf32> to vector<32x1xf32>
    %51 = vector.extract_strided_slice %1 {offsets = [0, 58], sizes = [1, 768], strides = [1, 1]} : vector<1x832xf32> to vector<1x768xf32>
    %52 = vector.broadcast %50 : vector<32x1xf32> to vector<32x768xf32>
    %53 = vector.broadcast %51 : vector<1x768xf32> to vector<32x768xf32>
    %54 = arith.mulf %52, %53 : vector<32x768xf32>
    %55 = arith.addf %49, %54 : vector<32x768xf32>
    %c0_4 = arith.constant 0 : index
    %c0_5 = arith.constant 0 : index
    %56 = vector.load %arg3[%c0_4, %c0_5] : memref<32x1xf32, #tpu.memory_space<vmem>>, vector<32x1xf32>
    %57 = vector.broadcast %56 : vector<32x1xf32> to vector<32x768xf32>
    %58 = arith.addf %55, %57 : vector<32x768xf32>
    %cst = arith.constant 0.000000e+00 : f32
    %59 = vector.broadcast %cst : f32 to vector<32x768xf32>
    %60 = arith.maximumf %58, %59 : vector<32x768xf32>
    %61 = arith.truncf %60 : vector<32x768xf32> to vector<32x768xbf16>
    %62 = vector.extract_strided_slice %61 {offsets = [0, 0], sizes = [32, 704], strides = [1, 1]} : vector<32x768xbf16> to vector<32x704xbf16>
    %c0_6 = arith.constant 0 : index
    %c0_7 = arith.constant 0 : index
    %63 = vector.load %arg8[%c0_6, %c0_7] : memref<288x704xbf16, #tpu.memory_space<vmem>>, vector<32x704xbf16>
    tpu.vector_store %arg8[%c0_6, %c0_7], %62 {strides = array<i32>} : memref<288x704xbf16, #tpu.memory_space<vmem>>, vector<32x704xbf16>,
    %64 = vector.extract_strided_slice %61 {offsets = [0, 1], sizes = [32, 704], strides = [1, 1]} : vector<32x768xbf16> to vector<32x704xbf16>
    %c32 = arith.constant 32 : index
    %c0_8 = arith.constant 0 : index
    %65 = vector.load %arg8[%c32, %c0_8] : memref<288x704xbf16, #tpu.memory_space<vmem>>, vector<32x704xbf16>
    tpu.vector_store %arg8[%c32, %c0_8], %64 {strides = array<i32>} : memref<288x704xbf16, #tpu.memory_space<vmem>>, vector<32x704xbf16>,
    %66 = vector.extract_strided_slice %61 {offsets = [0, 2], sizes = [32, 704], strides = [1, 1]} : vector<32x768xbf16> to vector<32x704xbf16>
    %c64 = arith.constant 64 : index
    %c0_9 = arith.constant 0 : index
    %67 = vector.load %arg8[%c64, %c0_9] : memref<288x704xbf16, #tpu.memory_space<vmem>>, vector<32x704xbf16>
    tpu.vector_store %arg8[%c64, %c0_9], %66 {strides = array<i32>} : memref<288x704xbf16, #tpu.memory_space<vmem>>, vector<32x704xbf16>,
    %68 = vector.extract_strided_slice %61 {offsets = [0, 28], sizes = [32, 704], strides = [1, 1]} : vector<32x768xbf16> to vector<32x704xbf16>
    %c96 = arith.constant 96 : index
    %c0_10 = arith.constant 0 : index
    %69 = vector.load %arg8[%c96, %c0_10] : memref<288x704xbf16, #tpu.memory_space<vmem>>, vector<32x704xbf16>
    tpu.vector_store %arg8[%c96, %c0_10], %68 {strides = array<i32>} : memref<288x704xbf16, #tpu.memory_space<vmem>>, vector<32x704xbf16>,
    %70 = vector.extract_strided_slice %61 {offsets = [0, 29], sizes = [32, 704], strides = [1, 1]} : vector<32x768xbf16> to vector<32x704xbf16>
    %c128 = arith.constant 128 : index
    %c0_11 = arith.constant 0 : index
    %71 = vector.load %arg8[%c128, %c0_11] : memref<288x704xbf16, #tpu.memory_space<vmem>>, vector<32x704xbf16>
    tpu.vector_store %arg8[%c128, %c0_11], %70 {strides = array<i32>} : memref<288x704xbf16, #tpu.memory_space<vmem>>, vector<32x704xbf16>,
    %72 = vector.extract_strided_slice %61 {offsets = [0, 30], sizes = [32, 704], strides = [1, 1]} : vector<32x768xbf16> to vector<32x704xbf16>
    %c160 = arith.constant 160 : index
    %c0_12 = arith.constant 0 : index
    %73 = vector.load %arg8[%c160, %c0_12] : memref<288x704xbf16, #tpu.memory_space<vmem>>, vector<32x704xbf16>
    tpu.vector_store %arg8[%c160, %c0_12], %72 {strides = array<i32>} : memref<288x704xbf16, #tpu.memory_space<vmem>>, vector<32x704xbf16>,
    %74 = vector.extract_strided_slice %61 {offsets = [0, 56], sizes = [32, 704], strides = [1, 1]} : vector<32x768xbf16> to vector<32x704xbf16>
    %c192 = arith.constant 192 : index
    %c0_13 = arith.constant 0 : index
    %75 = vector.load %arg8[%c192, %c0_13] : memref<288x704xbf16, #tpu.memory_space<vmem>>, vector<32x704xbf16>
    tpu.vector_store %arg8[%c192, %c0_13], %74 {strides = array<i32>} : memref<288x704xbf16, #tpu.memory_space<vmem>>, vector<32x704xbf16>,
    %76 = vector.extract_strided_slice %61 {offsets = [0, 57], sizes = [32, 704], strides = [1, 1]} : vector<32x768xbf16> to vector<32x704xbf16>
    %c224 = arith.constant 224 : index
    %c0_14 = arith.constant 0 : index
    %77 = vector.load %arg8[%c224, %c0_14] : memref<288x704xbf16, #tpu.memory_space<vmem>>, vector<32x704xbf16>
    tpu.vector_store %arg8[%c224, %c0_14], %76 {strides = array<i32>} : memref<288x704xbf16, #tpu.memory_space<vmem>>, vector<32x704xbf16>,
    %78 = vector.extract_strided_slice %61 {offsets = [0, 58], sizes = [32, 704], strides = [1, 1]} : vector<32x768xbf16> to vector<32x704xbf16>
    %c256 = arith.constant 256 : index
    %c0_15 = arith.constant 0 : index
    %79 = vector.load %arg8[%c256, %c0_15] : memref<288x704xbf16, #tpu.memory_space<vmem>>, vector<32x704xbf16>
    tpu.vector_store %arg8[%c256, %c0_15], %78 {strides = array<i32>} : memref<288x704xbf16, #tpu.memory_space<vmem>>, vector<32x704xbf16>,
    %c0_16 = arith.constant 0 : index
    %c0_17 = arith.constant 0 : index
    %80 = vector.load %arg4[%c0_16, %c0_17] : memref<64x288xbf16, #tpu.memory_space<vmem>>, vector<64x288xbf16>
    %c0_18 = arith.constant 0 : index
    %c0_19 = arith.constant 0 : index
    %81 = vector.load %arg8[%c0_18, %c0_19] : memref<288x704xbf16, #tpu.memory_space<vmem>>, vector<288x704xbf16>
    %cst_20 = arith.constant dense<0.000000e+00> : vector<64x704xf32>
    %82 = tpu.matmul %80, %81, %cst_20 {dimension_numbers = #tpu.dot_dimension_numbers<[1], [0], [0], [1], [0, 0, 1, 1], [], []>} : vector<64x288xbf16>, vector<288x704xbf16>, vector<64x704xf32> -> vector<64x704xf32>
    %83 = vector.extract_strided_slice %82 {offsets = [0, 0], sizes = [64, 672], strides = [1, 1]} : vector<64x704xf32> to vector<64x672xf32>
    %84 = vector.extract_strided_slice %82 {offsets = [0, 1], sizes = [64, 672], strides = [1, 1]} : vector<64x704xf32> to vector<64x672xf32>
    %85 = arith.maximumf %83, %84 : vector<64x672xf32>
    %86 = vector.extract_strided_slice %82 {offsets = [0, 28], sizes = [64, 672], strides = [1, 1]} : vector<64x704xf32> to vector<64x672xf32>
    %87 = vector.extract_strided_slice %82 {offsets = [0, 29], sizes = [64, 672], strides = [1, 1]} : vector<64x704xf32> to vector<64x672xf32>
    %88 = arith.maximumf %86, %87 : vector<64x672xf32>
    %89 = arith.maximumf %85, %88 : vector<64x672xf32>
    %90 = arith.truncf %89 : vector<64x672xf32> to vector<64x672xbf16>
    %c0_21 = arith.constant 0 : index
    %c0_22 = arith.constant 0 : index
    %91 = vector.load %arg6[%c0_21, %c0_22] : memref<672x144xbf16, #tpu.memory_space<vmem>>, vector<672x144xbf16>
    %cst_23 = arith.constant dense<0.000000e+00> : vector<64x144xf32>
    %92 = tpu.matmul %90, %91, %cst_23 {dimension_numbers = #tpu.dot_dimension_numbers<[1], [0], [0], [1], [0, 0, 1, 1], [], []>} : vector<64x672xbf16>, vector<672x144xbf16>, vector<64x144xf32> -> vector<64x144xf32>
    %c0_24 = arith.constant 0 : index
    %c0_25 = arith.constant 0 : index
    %93 = vector.load %arg5[%c0_24, %c0_25] : memref<64x1xf32, #tpu.memory_space<vmem>>, vector<64x1xf32>
    %94 = vector.broadcast %93 : vector<64x1xf32> to vector<64x144xf32>
    %95 = arith.addf %92, %94 : vector<64x144xf32>
    %96 = arith.truncf %95 : vector<64x144xf32> to vector<64x144xbf16>
    %c0_26 = arith.constant 0 : index
    %c0_27 = arith.constant 0 : index
    %c0_28 = arith.constant 0 : index
    %97 = vector.load %arg7[%c0_26, %c0_27, %c0_28] : memref<1x64x144xbf16, #tpu.memory_space<vmem>>, vector<1x64x144xbf16>
    %98 = vector.shape_cast %97 : vector<1x64x144xbf16> to vector<64x144xbf16>
    %99 = vector.shape_cast %96 : vector<64x144xbf16> to vector<1x64x144xbf16>
    tpu.vector_store %arg7[%c0_26, %c0_27, %c0_28], %99 {strides = array<i32>} : memref<1x64x144xbf16, #tpu.memory_space<vmem>>, vector<1x64x144xbf16>,
    return
  }
  func.func @transform_0(%arg0: i32) -> (i32, i32, i32) {
    %c0_i32 = arith.constant 0 : i32
    %c0_i32_0 = arith.constant 0 : i32
    %c0_i32_1 = arith.constant 0 : i32
    return %arg0, %c0_i32, %c0_i32_0 : i32, i32, i32
  }
  func.func @transform_1(%arg0: i32) -> (i32, i32) {
    %c0_i32 = arith.constant 0 : i32
    %c0_i32_0 = arith.constant 0 : i32
    %c0_i32_1 = arith.constant 0 : i32
    return %c0_i32, %c0_i32_0 : i32, i32
  }
  func.func @transform_2(%arg0: i32) -> (i32, i32) {
    %c0_i32 = arith.constant 0 : i32
    %c0_i32_0 = arith.constant 0 : i32
    %c0_i32_1 = arith.constant 0 : i32
    return %c0_i32, %c0_i32_0 : i32, i32
  }
  func.func @transform_3(%arg0: i32) -> (i32, i32) {
    %c0_i32 = arith.constant 0 : i32
    %c0_i32_0 = arith.constant 0 : i32
    %c0_i32_1 = arith.constant 0 : i32
    return %c0_i32, %c0_i32_0 : i32, i32
  }
  func.func @transform_4(%arg0: i32) -> (i32, i32) {
    %c0_i32 = arith.constant 0 : i32
    %c0_i32_0 = arith.constant 0 : i32
    %c0_i32_1 = arith.constant 0 : i32
    return %c0_i32, %c0_i32_0 : i32, i32
  }
  func.func @transform_5(%arg0: i32) -> (i32, i32) {
    %c0_i32 = arith.constant 0 : i32
    %c0_i32_0 = arith.constant 0 : i32
    %c0_i32_1 = arith.constant 0 : i32
    return %c0_i32, %c0_i32_0 : i32, i32
  }
  func.func @transform_6(%arg0: i32) -> (i32, i32, i32) {
    %c0_i32 = arith.constant 0 : i32
    %c0_i32_0 = arith.constant 0 : i32
    %c0_i32_1 = arith.constant 0 : i32
    return %arg0, %c0_i32, %c0_i32_0 : i32, i32, i32
  }
}

</mosaic_0001>

<bundles_post_ra>
// kernel: convnet_forward.2
= control target key start
LH: loop header
LB: loop body
LE: loop exit
PB: predicated region body
PF: predicated region fallthrough
CT: control target
= control target key end

     0   :  { %11 = vsyncpa [#allocation4], 0  ;;  %s5449_s21 = smov 0   ;;  %s8934_s0 = inlined_call_operand.vmem [shape: f32[2,1,832], index: 0, kind: input, shape index: {}]   ;;  %s8935_s1 = inlined_call_operand.vmem [shape: f32[32,9], index: 1, kind: input, shape index: {}]   ;;  %s8936_s2 = inlined_call_operand.vmem [shape: f32[32,1], index: 2, kind: input, shape index: {}]   ;;  %s8937_s3 = inlined_call_operand.hbm [shape: bf16[64,288], index: 3, kind: input, shape index: {}]   ;;  %s8938_s4 = inlined_call_operand.vmem [shape: f32[64,1], index: 4, kind: input, shape index: {}]   ;;  %s8939_s5 = inlined_call_operand.vmem [shape: bf16[672,144], index: 5, kind: input, shape index: {}]   ;;  %s8940_s6 = inlined_call_operand.vmem [shape: bf16[2,64,144], index: 6, kind: output, shape index: {}]  }
   0x1 LB: > { %s5455_s22 = sadd.s32 4294967295, %s5392_s21   ;;  %p4669_p0 = scmp.ge.s32.totalorder %s5392_s21, 1  ;;  %s5392_s21 = sphi %s5449_s21, %s17_s21  }
   0x2   : > { %p179_p1 = scmp.lt.s32.totalorder %s5392_s21, 3  ;;  %s5394_s23 = smov [#allocation3]  }
   0x3   : > { %s197_s24 = sshll.u32 %s5394_s23, 4  ;;  %p8941_p3 = scmp.eq.s32.totalorder %s5455_s22, 0  ;;  %s198_s24 = int_to_ptr.vmem [resolvable:$true] %s197_s24 }
   0x4   : > { %p5459_p2 = pnand %p4669_p0, %p179_p1  ;;  %s5354_s29 = scalar_lea.hbm %s8937_s3, 1536 }
   0x5   : > { %p5355_p6 = scmp.ne.s32.totalorder %s8937_s3, %s5354_s29  ;;  %p5361_p10 = scmp.lt.u32.totalorder %s5354_s29, %s8937_s3 }
   0x6   : > { %s9169_s25 = scalar_select %p5459_p2, 1, 0 }
   0x7   : > { %p4908_p4 = pneg %p5459_p2 }
   0x9   : > { %p5468_p5 = pnand %p8941_p3, %p4908_p4 }
   0xb   : > { %p5356_p7 = pneg %p5468_p5 }
   0xd   : > { %p5357_p8 = pnand %p5356_p7, %p5355_p6 }
   0xf   : > { %p5358_p9 = pneg %p5357_p8 }
  0x11   : > { %p5363_p11 = pnand %p5361_p10, %p5358_p9 }
  0x13   : > { %5366 = shalt.err (!%p5363_p11)
}
  0x14   : > { %s5367_s10 = scalar_lea.vmem %s198_s24, 1536  ;;  %p5375_p1 = scmp.lt.s32.totalorder %s198_s24, %s198_s24 }
  0x15   : > { %p5368_p12 = scmp.ne.s32.totalorder %s198_s24, %s5367_s10  ;;  %p5376_p4 = scmp.lt.s32.totalorder %s5367_s10, %s5367_s10 }
  0x17   : > { %p5370_p13 = pnand %p5368_p12, %p5356_p7  ;;  %p5377_p3 = por %p5376_p4, %p5375_p1 }
  0x19   : > { %p5371_p0 = pneg %p5370_p13 }
  0x1b   : > { %p5378_p2 = pnand %p5377_p3, %p5371_p0 }
  0x1d   : > { %5381 = shalt.err (!%p5378_p2)
}
  0x1e   : > { %s5395_s11 = smov 192   ;;  %s5396_s12 = smov 12  }
  0x1f   : > { %4911 = dma.hbm_to_vmem [thread:$0]  (!%p5468_p5), %s8937_s3, 1536, %s198_s24, [#allocation4], %s5395_s11, %s5395_s11, %s5396_s12  }
  0x20   : > { %p9171_p6 = scmp.ne.s32.totalorder %s9169_s25, 0 }
  0x22   : > { %226 = sbr.rel (%p9171_p6) target bundleno = 1983 (0x7bf), region = 44 }
  0x29   : > { %p9172_p8 = scmp.eq.s32.totalorder %s5455_s22, 0 }
  0x2b   : > { %5387 = dma.done.wait (%p9172_p8), [#allocation4], 1536   ;;  %p9173_p7 = pmov %p9172_p8 }
  0x2c   : > { %v5397_v0 = vmov 1   ;;  %v5398_v1 = vmov 2   ;;  %p255_p2 = scmp.lt.s32.totalorder %s5455_s22, 1  ;;  %v291_v2 = vlaneseq  ;;  %v5504_v4 = vld [vmem:[%s8935_s1] sm:$0xff]  ;;  %v5516_v8 = vld [vmem:[%s8935_s1 + $0x8] sm:$0xff]  ;;  %v268_v13 = vld [vmem:[%s8935_s1 + $0x10] sm:$0xff] }
  0x2d   : > { %5389 = vsyncadd (%p9173_p7), [#allocation4], 4294965760  ;;  %4942 = vset.pattern.permute.xlu0 %v5397_v0  ;;  %4943 = vset.pattern.permute.xlu1 %v5398_v1  ;;  %v269_v14 = vld [vmem:[%s8935_s1 + $0x18] sm:$0xff]  ;;  %v5399_v15 = vmov 3   ;;  %v5400_v16 = vmov 4   ;;  %v5401_v17 = vmov 5  }
  0x2e   : > { %s9569_s22 = smov (!%p255_p2, %s5455_s22), 1  ;;  %v5498_v3 = vshrl.u32 %v291_v2, 7  ;;  %346 = vperm.xlu0 %4942, %v5504_v4   ;;  %552 = vperm.xlu1 %4943, %v5504_v4   ;;  %v5402_v18 = vmov 6   ;;  %v5403_v19 = vmov 8   ;;  %v8943_v20 = vmov 0   ;;  %s5406_s29 = smov 127  }
  0x2f   : > { %s4903_s15 = smul.u32 7, %s9569_s22  ;;  %v5405_v21 = vmov 7   ;;  %s5407_s30 = smov 126   ;;  %vm478_vm0 = vcmask 1039360   ;;  %vm679_vm1 = vcmask 1031168   ;;  %vm880_vm2 = vcmask 818176  }
  0x30   : > { %v309_v5 = vsub.s32 4, %v5498_v3  ;;  %v313_v6 = vsub.s32 5, %v5498_v3  ;;  %v363_v7 = vsub.s32 6, %v5498_v3  ;;  %v301_v22 = vsub.s32 2, %v5498_v3  ;;  %s5408_s7 = smov 100   ;;  %s5409_s8 = smov 99  }
  0x31   : > { %s258_s20 = scalar_lea.vmem %s8934_s0, %s4903_s15  ;;  %v297_v23 = vsub.s32 1, %v5498_v3  ;;  %v305_v26 = vsub.s32 3, %v5498_v3  ;;  %v293_v35 = vsub.s32 0, %v5498_v3  ;;  %s5410_s9 = smov 98   ;;  %vm1081_vm3 = vcmask 809984  }
  0x32   : > { %v5519_v9 = vld [vmem:[%s258_s20] sm:$0x7f]  ;;  %350 = vperm.xlu0 %4942, %v5516_v8   ;;  %556 = vperm.xlu1 %4943, %v5516_v8   ;;  %s5411_s10 = smov 72   ;;  %s5412_s15 = smov 71   ;;  %vm1282_vm4 = vcmask 801792   ;;  %vm1483_vm5 = vcmask 588800  }
  0x33   : > { %v5522_v10 = vrot.slane %v5519_v9, %v309_v5  ;;  %v5525_v11 = vrot.slane %v5519_v9, %v313_v6  ;;  %v5528_v12 = vrot.slane %v5519_v9, %v363_v7  ;;  %v5557_v24 = vrot.slane %v5519_v9, %v301_v22  ;;  %s5413_s16 = smov 70  }
  0x34   : > { %v5560_v25 = vrot.slane %v5519_v9, %v297_v23  ;;  %v5572_v31 = vrot.slane %v5519_v9, %v305_v26  ;;  %v5592_v39 = vrot.slane %v5519_v9, %v293_v35  ;;  %vm1684_vm6 = vcmask 580608  }
  0x35   : > { %9174 = vst [vmem:[#allocation6_spill] sm:$0xff] %v5522_v10  ;;  %9175 = vst [vmem:[#allocation7_spill] sm:$0xff] %v5525_v11  ;;  %vm1885_vm7 = vcmask 572416   ;;  %vm2047_vm8 = vcmask 523264   ;;  %vm2723_vm9 = vcmask 261120   ;;  %vm4589_vm10 = vcmask 1043456  }
  0x36   : > { %9176 = vst [vmem:[#allocation8_spill] sm:$0xff] %v5528_v12  ;;  %354 = vperm.xlu0 %4942, %v268_v13   ;;  %4944 = vset.pattern.permute.xlu1 %v5397_v0  ;;  %9177 = vst [vmem:[#allocation9_spill] sm:$0xff] %v5557_v24  ;;  %vm4590_vm11 = vcmask 130052  }
  0x37   : > { %358 = vperm.xlu1 %4944, %v269_v14   ;;  %9178 = vst [vmem:[#allocation10_spill] sm:$0xff] %v5560_v25  ;;  %9181 = vst [vmem:[#allocation13_spill] sm:$0xff] %v5572_v31 }
  0x38   : > { %vm8903_vm12 = vmor %vm4590_vm11, %vm4589_vm10 }
  0x3a   : > { %4947 = vset.pattern.permute.xlu0 %v5398_v1 }
  0x3b   : > { %4945 = vset.pattern.permute.xlu1 %v5399_v15  ;;  %564 = vperm.xlu0 %4947, %v269_v14  }
  0x3c   : > { %757 = vperm.xlu1 %4945, %v5516_v8  }
  0x3f   : > { %4948 = vset.pattern.permute.xlu0 %v5399_v15 }
  0x40   : > { %4946 = vset.pattern.permute.xlu1 %v5398_v1  ;;  %753 = vperm.xlu0 %4948, %v5504_v4  }
  0x41   : > { %560 = vperm.xlu1 %4946, %v268_v13  }
  0x44   : > { %761 = vperm.xlu0 %4948, %v268_v13  }
  0x45   : > { %4949 = vset.pattern.permute.xlu1 %v5400_v16 }
  0x46   : > { %954 = vperm.xlu1 %4949, %v5504_v4  }
  0x48   : > { %4952 = vset.pattern.permute.xlu0 %v5401_v17 }
  0x49   : > { %1159 = vperm.xlu0 %4952, %v5516_v8  }
  0x4a   : > { %958 = vperm.xlu1 %4949, %v5516_v8  }
  0x4d   : > { %1167 = vperm.xlu0 %4952, %v269_v14  }
  0x4e   : > { %4950 = vset.pattern.permute.xlu1 %v5399_v15 }
  0x4f   : > { %765 = vperm.xlu1 %4950, %v269_v14  }
  0x51   : > { %4956 = vset.pattern.permute.xlu0 %v5402_v18 }
  0x52   : > { %1356 = vperm.xlu0 %4956, %v5504_v4  }
  0x53   : > { %4951 = vset.pattern.permute.xlu1 %v5401_v17 }
  0x54   : > { %1155 = vperm.xlu1 %4951, %v5504_v4  }
  0x56   : > { %1364 = vperm.xlu0 %4956, %v268_v13  }
  0x58   : > { %4953 = vset.pattern.permute.xlu1 %v5400_v16 }
  0x59   : > { %962 = vperm.xlu1 %4953, %v268_v13  }
  0x5a   : > { %4960 = vset.pattern.permute.xlu0 %v5403_v19 }
  0x5b   : > { %1762 = vperm.xlu0 %4960, %v5516_v8  }
  0x5d   : > { %966 = vperm.xlu1 %4953, %v269_v14  }
  0x5f   : > { %1766 = vperm.xlu0 %4960, %v268_v13  }
  0x61   : > { %4954 = vset.pattern.permute.xlu1 %v5402_v18 }
  0x62   : > { %1360 = vperm.xlu1 %4954, %v5516_v8  }
  0x63   : > { %4963 = vset.pattern.permute.xlu0 %v8943_v20 }
  0x64   : > { %272 = vperm.xlu0 %4963, %v5504_v4  }
  0x66   : > { %4955 = vset.pattern.permute.xlu1 %v5401_v17 }
  0x67   : > { %1163 = vperm.xlu1 %4955, %v268_v13  }
  0x68   : > { %287 = vperm.xlu0 %4963, %v269_v14  }
  0x6b   : > { %4957 = vset.pattern.permute.xlu1 %v5405_v21 }
  0x6c   : > { %1557 = vperm.xlu1 %4957, %v5504_v4  }
  0x70   : > { %1561 = vperm.xlu1 %4957, %v5516_v8  }
  0x74   : > { %4958 = vset.pattern.permute.xlu1 %v5402_v18 }
  0x75   : > { %1368 = vperm.xlu1 %4958, %v269_v14  }
  0x79   : > { %4959 = vset.pattern.permute.xlu1 %v5403_v19 }
  0x7a   : > { %1758 = vperm.xlu1 %4959, %v5504_v4  }
  0x7e   : > { %4961 = vset.pattern.permute.xlu1 %v5405_v21 }
  0x7f   : > { %1565 = vperm.xlu1 %4961, %v268_v13  }
  0x83   : > { %1569 = vperm.xlu1 %4961, %v269_v14  }
  0x87   : > { %4962 = vset.pattern.permute.xlu1 %v5403_v19 }
  0x88   : > { %1770 = vperm.xlu1 %4962, %v269_v14  }
  0x8c   : > { %4964 = vset.pattern.permute.xlu1 %v8943_v20 }
  0x8d   : > { %277 = vperm.xlu1 %4964, %v5516_v8  }
  0x91   : > { %282 = vperm.xlu1 %4964, %v268_v13  }
  0xad   : > { %v5563_v27 = vpop.permute.xlu0 %346  ;;  %v5565_v28 = vpop.permute.xlu1 %552 }
  0xae   : > { %9179 = vst [vmem:[#allocation11_spill] sm:$0xff] %v5563_v27  ;;  %9180 = vst [vmem:[#allocation12_spill] sm:$0xff] %v5565_v28  ;;  %v368_v29 = vmul.f32 %v5563_v27, %v5557_v24  ;;  %v367_v30 = vmul.f32 %v5563_v27, %v5560_v25  ;;  %v369_v34 = vmul.f32 %v5563_v27, %v5572_v31 }
  0xaf   : > { %v366_v42 = vmul.f32 %v5563_v27, %v5592_v39  ;;  %v569_v44 = vmul.f32 %v5565_v28, %v5557_v24  ;;  %v568_v45 = vmul.f32 %v5565_v28, %v5560_v25  ;;  %v570_v48 = vmul.f32 %v5565_v28, %v5572_v31 }
  0xb0   : > { %426 = vrot.lane.b32.xlu0 %v368_v29, %s5406_s29  ;;  %424 = vrot.lane.b32.xlu1 %v367_v30, %s5406_s29  ;;  %v567_v53 = vmul.f32 %v5565_v28, %v5592_v39 }
  0xb1   : > { %v5576_v32 = vpop.permute.xlu0 %350  ;;  %v5583_v36 = vpop.permute.xlu1 %556 }
  0xb2   : > { %9182 = vst [vmem:[#allocation14_spill] sm:$0xff] %v5576_v32  ;;  %v374_v33 = vmul.f32 %v5576_v32, %v5560_v25  ;;  %9183 = vst [vmem:[#allocation15_spill] sm:$0xff] %v5583_v36  ;;  %v376_v37 = vmul.f32 %v5576_v32, %v5572_v31  ;;  %v375_v38 = vmul.f32 %v5576_v32, %v5557_v24 }
  0xb3   : > { %v373_v41 = vmul.f32 %v5576_v32, %v5592_v39  ;;  %v575_v47 = vmul.f32 %v5583_v36, %v5560_v25  ;;  %v577_v50 = vmul.f32 %v5583_v36, %v5572_v31  ;;  %v576_v51 = vmul.f32 %v5583_v36, %v5557_v24 }
  0xb4   : > { %438 = vrot.lane.b32.xlu0 %v374_v33, %s5406_s29  ;;  %428 = vrot.lane.b32.xlu1 %v369_v34, %s5406_s29  ;;  %v574_v52 = vmul.f32 %v5583_v36, %v5592_v39 }
  0xb5   : > { %v5634_v55 = vpop.permute.xlu0 %354 }
  0xb6   : > { %v5594_v40 = vpop.permute.xlu1 %358  ;;  %9189 = vst [vmem:[#allocation21_spill] sm:$0xff] %v5634_v55  ;;  %v382_v56 = vmul.f32 %v5634_v55, %v5557_v24  ;;  %v381_v57 = vmul.f32 %v5634_v55, %v5560_v25  ;;  %v383_v61 = vmul.f32 %v5634_v55, %v5572_v31  ;;  %v380_v15 = vmul.f32 %v5634_v55, %v5592_v39 }
  0xb7   : > { %9184 = vst [vmem:[#allocation16_spill] sm:$0xff] %v5594_v40  ;;  %v388_v59 = vmul.f32 %v5594_v40, %v5560_v25  ;;  %v390_v63 = vmul.f32 %v5594_v40, %v5572_v31  ;;  %v389_v0 = vmul.f32 %v5594_v40, %v5557_v24  ;;  %v387_v14 = vmul.f32 %v5594_v40, %v5592_v39 }
  0xb8   : > { %442 = vrot.lane.b32.xlu0 %v376_v37, %s5406_s29  ;;  %440 = vrot.lane.b32.xlu1 %v375_v38, %s5406_s29 }
  0xba   : > { %v5648_v60 = vpop.permute.xlu0 %564 }
  0xbb   : > { %v5602_v43 = vpop.permute.xlu1 %757  ;;  %9191 = vst [vmem:[#allocation23_spill] sm:$0xff] %v5648_v60  ;;  %v589_v26 = vmul.f32 %v5648_v60, %v5560_v25  ;;  %v591_v34 = vmul.f32 %v5648_v60, %v5572_v31  ;;  %v590_v35 = vmul.f32 %v5648_v60, %v5557_v24 }
  0xbc   : > { %9185 = vst [vmem:[#allocation17_spill] sm:$0xff] %v5602_v43  ;;  %436 = vrot.lane.b32.xlu0 %v373_v41, %s5406_s29  ;;  %422 = vrot.lane.b32.xlu1 %v366_v42, %s5406_s29  ;;  %v776_v6 = vmul.f32 %v5602_v43, %v5560_v25  ;;  %v778_v9 = vmul.f32 %v5602_v43, %v5572_v31 }
  0xbd   : > { %v777_v13 = vmul.f32 %v5602_v43, %v5557_v24  ;;  %v775_v17 = vmul.f32 %v5602_v43, %v5592_v39 }
  0xbf   : > { %v5660_v1 = vpop.permute.xlu0 %753 }
  0xc0   : > { %627 = vrot.lane.b32.xlu0 %v569_v44, %s5407_s30  ;;  %625 = vrot.lane.b32.xlu1 %v568_v45, %s5407_s30  ;;  %v5612_v46 = vpop.permute.xlu1 %560  ;;  %9193 = vst [vmem:[#allocation25_spill] sm:$0xff] %v5660_v1  ;;  %v770_v2 = vmul.f32 %v5660_v1, %v5557_v24  ;;  %v769_v3 = vmul.f32 %v5660_v1, %v5560_v25 }
  0xc1   : > { %9186 = vst [vmem:[#allocation18_spill] sm:$0xff] %v5612_v46  ;;  %v771_v7 = vmul.f32 %v5660_v1, %v5572_v31  ;;  %v768_v18 = vmul.f32 %v5660_v1, %v5592_v39  ;;  %v583_v22 = vmul.f32 %v5612_v46, %v5557_v24  ;;  %v582_v23 = vmul.f32 %v5612_v46, %v5560_v25 }
  0xc2   : > { %v584_v29 = vmul.f32 %v5612_v46, %v5572_v31 }
  0xc3   : > { %v5704_v21 = vpop.permute.xlu0 %761 }
  0xc4   : > { %639 = vrot.lane.b32.xlu0 %v575_v47, %s5407_s30  ;;  %629 = vrot.lane.b32.xlu1 %v570_v48, %s5407_s30  ;;  %9199 = vst [vmem:[#allocation31_spill] sm:$0xff] %v5704_v21 }
  0xc5   : > { %v5620_v49 = vpop.permute.xlu1 %954 }
  0xc6   : > { %9187 = vst [vmem:[#allocation19_spill] sm:$0xff] %v5620_v49  ;;  %v971_v41 = vmul.f32 %v5620_v49, %v5557_v24  ;;  %v970_v42 = vmul.f32 %v5620_v49, %v5560_v25  ;;  %v972_v45 = vmul.f32 %v5620_v49, %v5572_v31 }
  0xc8   : > { %643 = vrot.lane.b32.xlu0 %v577_v50, %s5407_s30  ;;  %641 = vrot.lane.b32.xlu1 %v576_v51, %s5407_s30  ;;  %v5718_v33 = vpop.permute.xlu0 %1159 }
  0xc9   : > { %v5632_v54 = vpop.permute.xlu1 %958  ;;  %9201 = vst [vmem:[#allocation33_spill] sm:$0xff] %v5718_v33 }
  0xca   : > { %9188 = vst [vmem:[#allocation20_spill] sm:$0xff] %v5632_v54  ;;  %v977_v44 = vmul.f32 %v5632_v54, %v5560_v25  ;;  %v979_v50 = vmul.f32 %v5632_v54, %v5572_v31  ;;  %v978_v51 = vmul.f32 %v5632_v54, %v5557_v24 }
  0xcc   : > { %637 = vrot.lane.b32.xlu0 %v574_v52, %s5407_s30  ;;  %623 = vrot.lane.b32.xlu1 %v567_v53, %s5407_s30  ;;  %v5730_v38 = vpop.permute.xlu0 %1167 }
  0xcd   : > { %9203 = vst [vmem:[#allocation35_spill] sm:$0xff] %v5730_v38 }
  0xce   : > { %v5642_v58 = vpop.permute.xlu1 %765 }
  0xcf   : > { %9190 = vst [vmem:[#allocation22_spill] sm:$0xff] %v5642_v58 }
  0xd0   : > { %454 = vrot.lane.b32.xlu0 %v382_v56, %s5406_s29  ;;  %452 = vrot.lane.b32.xlu1 %v381_v57, %s5406_s29  ;;  %v588_v56 = vmul.f32 %v5648_v60, %v5592_v39  ;;  %v581_v57 = vmul.f32 %v5612_v46, %v5592_v39 }
  0xd1   : > { %v5744_v48 = vpop.permute.xlu0 %1356 }
  0xd2   : > { %9205 = vst [vmem:[#allocation37_spill] sm:$0xff] %v5744_v48 }
  0xd3   : > { %v5652_v62 = vpop.permute.xlu1 %1155 }
  0xd4   : > { %9192 = vst [vmem:[#allocation24_spill] sm:$0xff] %v5652_v62  ;;  %466 = vrot.lane.b32.xlu0 %v388_v59, %s5406_s29  ;;  %456 = vrot.lane.b32.xlu1 %v383_v61, %s5406_s29  ;;  %v976_v59 = vmul.f32 %v5632_v54, %v5592_v39  ;;  %v969_v61 = vmul.f32 %v5620_v49, %v5592_v39 }
  0xd5   : > { %v5756_v53 = vpop.permute.xlu0 %1364 }
  0xd6   : > { %9207 = vst [vmem:[#allocation39_spill] sm:$0xff] %v5756_v53 }
  0xd8   : > { %470 = vrot.lane.b32.xlu0 %v390_v63, %s5406_s29  ;;  %468 = vrot.lane.b32.xlu1 %v389_v0, %s5406_s29  ;;  %v5668_v4 = vpop.permute.xlu1 %962 }
  0xd9   : > { %9194 = vst [vmem:[#allocation26_spill] sm:$0xff] %v5668_v4 }
  0xda   : > { %v5770_v0 = vpop.permute.xlu0 %1762 }
  0xdb   : > { %9209 = vst [vmem:[#allocation41_spill] sm:$0xff] %v5770_v0 }
  0xdc   : > { %828 = vrot.lane.b32.xlu0 %v770_v2, %s5408_s7  ;;  %826 = vrot.lane.b32.xlu1 %v769_v3, %s5408_s7  ;;  %v5672_v5 = vpop.permute.xlu1 %966  ;;  %v784_v2 = vmul.f32 %v5704_v21, %v5557_v24  ;;  %v783_v3 = vmul.f32 %v5704_v21, %v5560_v25 }
  0xdd   : > { %9195 = vst [vmem:[#allocation27_spill] sm:$0xff] %v5672_v5 }
  0xe0   : > { %840 = vrot.lane.b32.xlu0 %v776_v6, %s5408_s7  ;;  %830 = vrot.lane.b32.xlu1 %v771_v7, %s5408_s7  ;;  %v5782_v7 = vpop.permute.xlu0 %1766 }
  0xe1   : > { %v5680_v8 = vpop.permute.xlu1 %1360  ;;  %9211 = vst [vmem:[#allocation43_spill] sm:$0xff] %v5782_v7 }
  0xe2   : > { %9196 = vst [vmem:[#allocation28_spill] sm:$0xff] %v5680_v8 }
  0xe4   : > { %844 = vrot.lane.b32.xlu0 %v778_v9, %s5408_s7  ;;  %842 = vrot.lane.b32.xlu1 %v777_v13, %s5408_s7  ;;  %v790_v9 = vmul.f32 %v5642_v58, %v5560_v25  ;;  %v785_v13 = vmul.f32 %v5704_v21, %v5572_v31 }
  0xe6   : > { %v5692_v16 = vpop.permute.xlu1 %1163 }
  0xe7   : > { %9197 = vst [vmem:[#allocation29_spill] sm:$0xff] %v5692_v16 }
  0xe8   : > { %464 = vrot.lane.b32.xlu0 %v387_v14, %s5406_s29  ;;  %450 = vrot.lane.b32.xlu1 %v380_v15, %s5406_s29  ;;  %v792_v14 = vmul.f32 %v5642_v58, %v5572_v31  ;;  %v791_v15 = vmul.f32 %v5642_v58, %v5557_v24 }
  0xeb   : > { %v5702_v19 = vpop.permute.xlu1 %1557 }
  0xec   : > { %838 = vrot.lane.b32.xlu0 %v775_v17, %s5408_s7  ;;  %824 = vrot.lane.b32.xlu1 %v768_v18, %s5408_s7  ;;  %9198 = vst [vmem:[#allocation30_spill] sm:$0xff] %v5702_v19  ;;  %v5796_v18 = vpop.permute.xlu0 %272  ;;  %v1575_v55 = vmul.f32 %v5702_v19, %v5572_v31 }
  0xed   : > { %9213 = vst [vmem:[#allocation45_spill] sm:$0xff] %v5796_v18 }
  0xef   : > { %v5716_v30 = vpop.permute.xlu1 %1561 }
  0xf0   : > { %655 = vrot.lane.b32.xlu0 %v583_v22, %s5407_s30  ;;  %653 = vrot.lane.b32.xlu1 %v582_v23, %s5407_s30  ;;  %9200 = vst [vmem:[#allocation32_spill] sm:$0xff] %v5716_v30  ;;  %v1172_v22 = vmul.f32 %v5652_v62, %v5557_v24  ;;  %v1171_v23 = vmul.f32 %v5652_v62, %v5560_v25 }
  0xf4   : > { %667 = vrot.lane.b32.xlu0 %v589_v26, %s5407_s30  ;;  %657 = vrot.lane.b32.xlu1 %v584_v29, %s5407_s30  ;;  %v5728_v37 = vpop.permute.xlu1 %1368  ;;  %v5808_v29 = vpop.permute.xlu0 %287 }
  0xf5   : > { %9202 = vst [vmem:[#allocation34_spill] sm:$0xff] %v5728_v37  ;;  %9215 = vst [vmem:[#allocation47_spill] sm:$0xff] %v5808_v29 }
  0xf8   : > { %671 = vrot.lane.b32.xlu0 %v591_v34, %s5407_s30  ;;  %669 = vrot.lane.b32.xlu1 %v590_v35, %s5407_s30  ;;  %v1178_v34 = vmul.f32 %v5718_v33, %v5560_v25  ;;  %v1173_v35 = vmul.f32 %v5652_v62, %v5572_v31 }
  0xf9   : > { %v5742_v47 = vpop.permute.xlu1 %1758 }
  0xfa   : > { %9204 = vst [vmem:[#allocation36_spill] sm:$0xff] %v5742_v47 }
  0xfc   : > { %1029 = vrot.lane.b32.xlu0 %v971_v41, %s5409_s8  ;;  %1027 = vrot.lane.b32.xlu1 %v970_v42, %s5409_s8 }
  0xfe   : > { %v5754_v52 = vpop.permute.xlu1 %1565 }
  0xff   : > { %9206 = vst [vmem:[#allocation38_spill] sm:$0xff] %v5754_v52 }
 0x100   : > { %1041 = vrot.lane.b32.xlu0 %v977_v44, %s5409_s8  ;;  %1031 = vrot.lane.b32.xlu1 %v972_v45, %s5409_s8  ;;  %v1180_v44 = vmul.f32 %v5718_v33, %v5572_v31  ;;  %v1179_v45 = vmul.f32 %v5718_v33, %v5557_v24 }
 0x102   : > { %v5768_v63 = vpop.permute.xlu1 %1569 }
 0x103   : > { %9208 = vst [vmem:[#allocation40_spill] sm:$0xff] %v5768_v63 }
 0x104   : > { %1045 = vrot.lane.b32.xlu0 %v979_v50, %s5409_s8  ;;  %1043 = vrot.lane.b32.xlu1 %v978_v51, %s5409_s8 }
 0x107   : > { %v5780_v6 = vpop.permute.xlu1 %1770 }
 0x108   : > { %665 = vrot.lane.b32.xlu0 %v588_v56, %s5407_s30  ;;  %651 = vrot.lane.b32.xlu1 %v581_v57, %s5407_s30  ;;  %9210 = vst [vmem:[#allocation42_spill] sm:$0xff] %v5780_v6  ;;  %v789_v56 = vmul.f32 %v5642_v58, %v5592_v39  ;;  %v782_v57 = vmul.f32 %v5704_v21, %v5592_v39 }
 0x10c   : > { %1039 = vrot.lane.b32.xlu0 %v976_v59, %s5409_s8  ;;  %1025 = vrot.lane.b32.xlu1 %v969_v61, %s5409_s8  ;;  %v5794_v17 = vpop.permute.xlu1 %277 }
 0x10d   : > { %9212 = vst [vmem:[#allocation44_spill] sm:$0xff] %v5794_v17 }
 0x110   : > { %856 = vrot.lane.b32.xlu0 %v784_v2, %s5408_s7  ;;  %854 = vrot.lane.b32.xlu1 %v783_v3, %s5408_s7  ;;  %v5806_v26 = vpop.permute.xlu1 %282  ;;  %v1177_v2 = vmul.f32 %v5718_v33, %v5592_v39  ;;  %v1170_v3 = vmul.f32 %v5652_v62, %v5592_v39 }
 0x111   : > { %9214 = vst [vmem:[#allocation46_spill] sm:$0xff] %v5806_v26 }
 0x114   : > { %868 = vrot.lane.b32.xlu0 %v790_v9, %s5408_s7  ;;  %858 = vrot.lane.b32.xlu1 %v785_v13, %s5408_s7 }
 0x118   : > { %872 = vrot.lane.b32.xlu0 %v792_v14, %s5408_s7  ;;  %870 = vrot.lane.b32.xlu1 %v791_v15, %s5408_s7  ;;  %v985_v14 = vmul.f32 %v5668_v4, %v5557_v24  ;;  %v984_v15 = vmul.f32 %v5668_v4, %v5560_v25 }
 0x11c   : > { %1230 = vrot.lane.b32.xlu0 %v1172_v22, %s5410_s9  ;;  %1228 = vrot.lane.b32.xlu1 %v1171_v23, %s5410_s9 }
 0x120   : > { %1242 = vrot.lane.b32.xlu0 %v1178_v34, %s5410_s9  ;;  %1232 = vrot.lane.b32.xlu1 %v1173_v35, %s5410_s9  ;;  %v991_v34 = vmul.f32 %v5672_v5, %v5560_v25  ;;  %v986_v35 = vmul.f32 %v5668_v4, %v5572_v31 }
 0x122   : > { %v5816_v41 = vpop.permute.xlu0 %426  ;;  %v5818_v42 = vpop.permute.xlu1 %424 }
 0x124   : > { %1246 = vrot.lane.b32.xlu0 %v1180_v44, %s5410_s9  ;;  %1244 = vrot.lane.b32.xlu1 %v1179_v45, %s5410_s9 }
 0x126   : > { %v5826_v50 = vpop.permute.xlu0 %438  ;;  %v5828_v51 = vpop.permute.xlu1 %428 }
 0x127   : > { %9216 = vst [vmem:[#allocation48_spill] sm:$0xff] %v5828_v51 }
 0x128   : > { %866 = vrot.lane.b32.xlu0 %v789_v56, %s5408_s7  ;;  %852 = vrot.lane.b32.xlu1 %v782_v57, %s5408_s7  ;;  %v993_v56 = vmul.f32 %v5672_v5, %v5572_v31  ;;  %v992_v57 = vmul.f32 %v5672_v5, %v5557_v24 }
 0x12a   : > { %v5836_v59 = vpop.permute.xlu0 %442  ;;  %v5838_v61 = vpop.permute.xlu1 %440 }
 0x12b   : > { %9217 = vst [vmem:[#allocation49_spill] sm:$0xff] %v5836_v59 }
 0x12c   : > { %1240 = vrot.lane.b32.xlu0 %v1177_v2, %s5410_s9  ;;  %1226 = vrot.lane.b32.xlu1 %v1170_v3, %s5410_s9 }
 0x12e   : > { %v5846_v9 = vpop.permute.xlu0 %436  ;;  %v5848_v13 = vpop.permute.xlu1 %422 }
 0x130   : > { %1057 = vrot.lane.b32.xlu0 %v985_v14, %s5409_s8  ;;  %1055 = vrot.lane.b32.xlu1 %v984_v15, %s5409_s8  ;;  %v1373_v14 = vmul.f32 %v5744_v48, %v5557_v24  ;;  %v1372_v15 = vmul.f32 %v5744_v48, %v5560_v25 }
 0x132   : > { %v5856_v22 = vpop.permute.xlu0 %627  ;;  %v5858_v23 = vpop.permute.xlu1 %625 }
 0x134   : > { %1069 = vrot.lane.b32.xlu0 %v991_v34, %s5409_s8  ;;  %1059 = vrot.lane.b32.xlu1 %v986_v35, %s5409_s8 }
 0x136   : > { %v5866_v44 = vpop.permute.xlu0 %639  ;;  %v5868_v45 = vpop.permute.xlu1 %629 }
 0x138   : > { %1073 = vrot.lane.b32.xlu0 %v993_v56, %s5409_s8  ;;  %1071 = vrot.lane.b32.xlu1 %v992_v57, %s5409_s8  ;;  %v1379_v56 = vmul.f32 %v5680_v8, %v5560_v25  ;;  %v1374_v57 = vmul.f32 %v5744_v48, %v5572_v31 }
 0x13a   : > { %v5876_v2 = vpop.permute.xlu0 %643  ;;  %v5878_v3 = vpop.permute.xlu1 %641 }
 0x13c   : > { %1431 = vrot.lane.b32.xlu0 %v1373_v14, %s5411_s10  ;;  %1429 = vrot.lane.b32.xlu1 %v1372_v15, %s5411_s10  ;;  %v1381_v14 = vmul.f32 %v5680_v8, %v5572_v31  ;;  %v1380_v15 = vmul.f32 %v5680_v8, %v5557_v24 }
 0x13e   : > { %v5886_v34 = vpop.permute.xlu0 %637  ;;  %v5888_v35 = vpop.permute.xlu1 %623 }
 0x140   : > { %1443 = vrot.lane.b32.xlu0 %v1379_v56, %s5411_s10  ;;  %1433 = vrot.lane.b32.xlu1 %v1374_v57, %s5411_s10  ;;  %v1959_v56 = vld [vmem:[%s8936_s2 + $0x8] sm:$0xff]  ;;  %v1958_v57 = vld [vmem:[%s8936_s2] sm:$0xff] }
 0x142   : > { %v5896_v20 = vpop.permute.xlu0 %454  ;;  %v5898_v12 = vpop.permute.xlu1 %452 }
 0x143   : > { %9218 = vst [vmem:[#allocation50_spill] sm:$0xff] %v5896_v20  ;;  %9219 = vst [vmem:[#allocation51_spill] sm:$0xff] %v5898_v12 }
 0x144   : > { %1447 = vrot.lane.b32.xlu0 %v1381_v14, %s5411_s10  ;;  %1445 = vrot.lane.b32.xlu1 %v1380_v15, %s5411_s10  ;;  %v990_v14 = vmul.f32 %v5672_v5, %v5592_v39  ;;  %v983_v15 = vmul.f32 %v5668_v4, %v5592_v39 }
 0x146   : > { %v5912_v33 = vpop.permute.xlu0 %466  ;;  %v5914_v62 = vpop.permute.xlu1 %456 }
 0x147   : > { %9220 = vst [vmem:[#allocation52_spill] sm:$0xff] %v5912_v33  ;;  %9221 = vst [vmem:[#allocation53_spill] sm:$0xff] %v5914_v62 }
 0x148   : > { %1969 = vperm.xlu0 %4963, %v1959_v56   ;;  %1964 = vperm.xlu1 %4964, %v1958_v57   ;;  %v1378_v56 = vmul.f32 %v5680_v8, %v5592_v39  ;;  %v1371_v57 = vmul.f32 %v5744_v48, %v5592_v39 }
 0x14a   : > { %v5916_v58 = vpop.permute.xlu0 %470  ;;  %v5918_v21 = vpop.permute.xlu1 %468 }
 0x14b   : > { %9222 = vst [vmem:[#allocation54_spill] sm:$0xff] %v5916_v58  ;;  %9223 = vst [vmem:[#allocation55_spill] sm:$0xff] %v5918_v21  ;;  %v1789_v58 = vmul.f32 %v5782_v7, %v5557_v24 }
 0x14c   : > { %1067 = vrot.lane.b32.xlu0 %v990_v14, %s5409_s8  ;;  %1053 = vrot.lane.b32.xlu1 %v983_v15, %s5409_s8  ;;  %v1186_v14 = vmul.f32 %v5692_v16, %v5557_v24  ;;  %v1185_v15 = vmul.f32 %v5692_v16, %v5560_v25 }
 0x14e   : > { %v5926_v54 = vpop.permute.xlu0 %828  ;;  %v5928_v49 = vpop.permute.xlu1 %826 }
 0x150   : > { %1441 = vrot.lane.b32.xlu0 %v1378_v56, %s5411_s10  ;;  %1427 = vrot.lane.b32.xlu1 %v1371_v57, %s5411_s10  ;;  %v1192_v56 = vmul.f32 %v5730_v38, %v5560_v25  ;;  %v1187_v57 = vmul.f32 %v5692_v16, %v5572_v31 }
 0x152   : > { %v5936_v5 = vpop.permute.xlu0 %840  ;;  %v5938_v4 = vpop.permute.xlu1 %830 }
 0x153   : > { %9224 = vst [vmem:[#allocation56_spill] sm:$0xff] %v5938_v4 }
 0x154   : > { %1258 = vrot.lane.b32.xlu0 %v1186_v14, %s5410_s9  ;;  %1256 = vrot.lane.b32.xlu1 %v1185_v15, %s5410_s9  ;;  %v1194_v14 = vmul.f32 %v5730_v38, %v5572_v31  ;;  %v1193_v15 = vmul.f32 %v5730_v38, %v5557_v24 }
 0x156   : > { %v5946_v8 = vpop.permute.xlu0 %844  ;;  %v5948_v48 = vpop.permute.xlu1 %842 }
 0x158   : > { %1270 = vrot.lane.b32.xlu0 %v1192_v56, %s5410_s9  ;;  %1260 = vrot.lane.b32.xlu1 %v1187_v57, %s5410_s9  ;;  %v1574_v56 = vmul.f32 %v5702_v19, %v5557_v24  ;;  %v1573_v57 = vmul.f32 %v5702_v19, %v5560_v25 }
 0x15a   : > { %v5956_v60 = vpop.permute.xlu0 %464  ;;  %v5958_v46 = vpop.permute.xlu1 %450 }
 0x15b   : > { %9225 = vst [vmem:[#allocation57_spill] sm:$0xff] %v5956_v60  ;;  %9226 = vst [vmem:[#allocation58_spill] sm:$0xff] %v5958_v46 }
 0x15c   : > { %1274 = vrot.lane.b32.xlu0 %v1194_v14, %s5410_s9  ;;  %1272 = vrot.lane.b32.xlu1 %v1193_v15, %s5410_s9  ;;  %v1580_v15 = vmul.f32 %v5716_v30, %v5560_v25 }
 0x15e   : > { %v5966_v43 = vpop.permute.xlu0 %838  ;;  %v5968_v1 = vpop.permute.xlu1 %824 }
 0x160   : > { %1632 = vrot.lane.b32.xlu0 %v1574_v56, %s5412_s15  ;;  %1630 = vrot.lane.b32.xlu1 %v1573_v57, %s5412_s15  ;;  %v1582_v56 = vmul.f32 %v5716_v30, %v5572_v31  ;;  %v1581_v57 = vmul.f32 %v5716_v30, %v5557_v24 }
 0x162   : > { %v5976_v40 = vpop.permute.xlu0 %655  ;;  %v5978_v14 = vpop.permute.xlu1 %653 }
 0x163   : > { %9227 = vst [vmem:[#allocation59_spill] sm:$0xff] %v5976_v40  ;;  %9228 = vst [vmem:[#allocation60_spill] sm:$0xff] %v5978_v14 }
 0x164   : > { %1644 = vrot.lane.b32.xlu0 %v1580_v15, %s5412_s15  ;;  %1634 = vrot.lane.b32.xlu1 %v1575_v55, %s5412_s15  ;;  %v1191_v55 = vmul.f32 %v5730_v38, %v5592_v39  ;;  %v1184_v15 = vmul.f32 %v5692_v16, %v5592_v39 }
 0x166   : > { %v5986_v36 = vpop.permute.xlu0 %667  ;;  %v5988_v28 = vpop.permute.xlu1 %657 }
 0x167   : > { %9229 = vst [vmem:[#allocation61_spill] sm:$0xff] %v5986_v36  ;;  %9230 = vst [vmem:[#allocation62_spill] sm:$0xff] %v5988_v28 }
 0x168   : > { %1648 = vrot.lane.b32.xlu0 %v1582_v56, %s5412_s15  ;;  %1646 = vrot.lane.b32.xlu1 %v1581_v57, %s5412_s15  ;;  %v1579_v56 = vmul.f32 %v5716_v30, %v5592_v39  ;;  %v1572_v57 = vmul.f32 %v5702_v19, %v5592_v39 }
 0x16a   : > { %v5996_v32 = vpop.permute.xlu0 %671  ;;  %v5998_v11 = vpop.permute.xlu1 %669 }
 0x16b   : > { %9231 = vst [vmem:[#allocation63_spill] sm:$0xff] %v5996_v32  ;;  %9232 = vst [vmem:[#allocation64_spill] sm:$0xff] %v5998_v11 }
 0x16c   : > { %1268 = vrot.lane.b32.xlu0 %v1191_v55, %s5410_s9  ;;  %1254 = vrot.lane.b32.xlu1 %v1184_v15, %s5410_s9  ;;  %v1387_v55 = vmul.f32 %v5756_v53, %v5557_v24  ;;  %v1386_v15 = vmul.f32 %v5756_v53, %v5560_v25 }
 0x16e   : > { %v6006_v27 = vpop.permute.xlu0 %1029  ;;  %v6008_v10 = vpop.permute.xlu1 %1027 }
 0x170   : > { %1642 = vrot.lane.b32.xlu0 %v1579_v56, %s5412_s15  ;;  %1628 = vrot.lane.b32.xlu1 %v1572_v57, %s5412_s15  ;;  %v1393_v56 = vmul.f32 %v5728_v37, %v5560_v25  ;;  %v1388_v57 = vmul.f32 %v5756_v53, %v5572_v31 }
 0x172   : > { %v6016_v38 = vpop.permute.xlu0 %1041  ;;  %v6018_v16 = vpop.permute.xlu1 %1031 }
 0x174   : > { %1459 = vrot.lane.b32.xlu0 %v1387_v55, %s5411_s10  ;;  %1457 = vrot.lane.b32.xlu1 %v1386_v15, %s5411_s10  ;;  %v1395_v55 = vmul.f32 %v5728_v37, %v5572_v31  ;;  %v1394_v15 = vmul.f32 %v5728_v37, %v5557_v24 }
 0x176   : > { %v6026_v30 = vpop.permute.xlu0 %1045  ;;  %v6028_v19 = vpop.permute.xlu1 %1043 }
 0x178   : > { %1471 = vrot.lane.b32.xlu0 %v1393_v56, %s5411_s10  ;;  %1461 = vrot.lane.b32.xlu1 %v1388_v57, %s5411_s10  ;;  %v1775_v56 = vmul.f32 %v5742_v47, %v5557_v24  ;;  %v1774_v57 = vmul.f32 %v5742_v47, %v5560_v25 }
 0x17a   : > { %v6036_v32 = vpop.permute.xlu0 %665  ;;  %v6038_v36 = vpop.permute.xlu1 %651 }
 0x17b   : > { %9233 = vst [vmem:[#allocation65_spill] sm:$0xff] %v6036_v32  ;;  %9234 = vst [vmem:[#allocation66_spill] sm:$0xff] %v6038_v36  ;;  %v1776_v32 = vmul.f32 %v5742_v47, %v5572_v31 }
 0x17c   : > { %1475 = vrot.lane.b32.xlu0 %v1395_v55, %s5411_s10  ;;  %1473 = vrot.lane.b32.xlu1 %v1394_v15, %s5411_s10  ;;  %v1781_v15 = vmul.f32 %v5770_v0, %v5560_v25 }
 0x17e   : > { %v6046_v11 = vpop.permute.xlu0 %1039  ;;  %v6048_v28 = vpop.permute.xlu1 %1025 }
 0x17f   : > { %9235 = vst [vmem:[#allocation67_spill] sm:$0xff] %v6046_v11  ;;  %9236 = vst [vmem:[#allocation68_spill] sm:$0xff] %v6048_v28  ;;  %v681_v28 = vsel %vm679_vm1, %v5858_v23, %v5856_v22 }
 0x180   : > { %1833 = vrot.lane.b32.xlu0 %v1775_v56, %s5413_s16  ;;  %1831 = vrot.lane.b32.xlu1 %v1774_v57, %s5413_s16  ;;  %v1783_v56 = vmul.f32 %v5770_v0, %v5572_v31  ;;  %v1782_v57 = vmul.f32 %v5770_v0, %v5557_v24 }
 0x182   : > { %v6056_v36 = vpop.permute.xlu0 %856  ;;  %v6058_v55 = vpop.permute.xlu1 %854 }
 0x183   : > { %9237 = vst [vmem:[#allocation69_spill] sm:$0xff] %v6056_v36  ;;  %9238 = vst [vmem:[#allocation70_spill] sm:$0xff] %v6058_v55 }
 0x184   : > { %1845 = vrot.lane.b32.xlu0 %v1781_v15, %s5413_s16  ;;  %1835 = vrot.lane.b32.xlu1 %v1776_v32, %s5413_s16  ;;  %v1961_v15 = vld [vmem:[%s8936_s2 + $0x18] sm:$0xff]  ;;  %v1960_v32 = vld [vmem:[%s8936_s2 + $0x10] sm:$0xff] }
 0x186   : > { %v6066_v14 = vpop.permute.xlu0 %868  ;;  %v6068_v40 = vpop.permute.xlu1 %858 }
 0x187   : > { %9239 = vst [vmem:[#allocation71_spill] sm:$0xff] %v6066_v14  ;;  %9240 = vst [vmem:[#allocation72_spill] sm:$0xff] %v6068_v40 }
 0x188   : > { %1849 = vrot.lane.b32.xlu0 %v1783_v56, %s5413_s16  ;;  %1847 = vrot.lane.b32.xlu1 %v1782_v57, %s5413_s16  ;;  %v1392_v56 = vmul.f32 %v5728_v37, %v5592_v39  ;;  %v1385_v57 = vmul.f32 %v5756_v53, %v5592_v39 }
 0x18a   : > { %v6082_v14 = vpop.permute.xlu0 %872  ;;  %v6084_v40 = vpop.permute.xlu1 %870 }
 0x18b   : > { %9241 = vst [vmem:[#allocation73_spill] sm:$0xff] %v6082_v14  ;;  %9242 = vst [vmem:[#allocation74_spill] sm:$0xff] %v6084_v40  ;;  %v1596_v40 = vmul.f32 %v5768_v63, %v5572_v31 }
 0x18c   : > { %1979 = vperm.xlu0 %4963, %v1961_v15   ;;  %1974 = vperm.xlu1 %4964, %v1960_v32   ;;  %v1780_v15 = vmul.f32 %v5770_v0, %v5592_v39  ;;  %v1773_v32 = vmul.f32 %v5742_v47, %v5592_v39 }
 0x18e   : > { %v6086_v55 = vpop.permute.xlu0 %1230  ;;  %v6088_v36 = vpop.permute.xlu1 %1228 }
 0x190   : > { %1469 = vrot.lane.b32.xlu0 %v1392_v56, %s5411_s10  ;;  %1455 = vrot.lane.b32.xlu1 %v1385_v57, %s5411_s10  ;;  %v1588_v56 = vmul.f32 %v5754_v52, %v5557_v24  ;;  %v1587_v57 = vmul.f32 %v5754_v52, %v5560_v25 }
 0x192   : > { %v6096_v46 = vpop.permute.xlu0 %1242  ;;  %v6098_v14 = vpop.permute.xlu1 %1232 }
 0x194   : > { %1843 = vrot.lane.b32.xlu0 %v1780_v15, %s5413_s16  ;;  %1829 = vrot.lane.b32.xlu1 %v1773_v32, %s5413_s16  ;;  %v1594_v15 = vmul.f32 %v5768_v63, %v5560_v25  ;;  %v1589_v32 = vmul.f32 %v5754_v52, %v5572_v31 }
 0x196   : > { %v6106_v37 = vpop.permute.xlu0 %1246  ;;  %v6108_v53 = vpop.permute.xlu1 %1244 }
 0x197   : > { %9243 = vst [vmem:[#allocation75_spill] sm:$0xff] %v6106_v37 }
 0x198   : > { %1660 = vrot.lane.b32.xlu0 %v1588_v56, %s5412_s15  ;;  %1658 = vrot.lane.b32.xlu1 %v1587_v57, %s5412_s15  ;;  %v1595_v56 = vmul.f32 %v5768_v63, %v5557_v24 }
 0x19a   : > { %v6116_v0 = vpop.permute.xlu0 %866  ;;  %v6118_v47 = vpop.permute.xlu1 %852 }
 0x19b   : > { %9244 = vst [vmem:[#allocation76_spill] sm:$0xff] %v6116_v0  ;;  %9245 = vst [vmem:[#allocation77_spill] sm:$0xff] %v6118_v47  ;;  %v1593_v47 = vmul.f32 %v5768_v63, %v5592_v39 }
 0x19c   : > { %1672 = vrot.lane.b32.xlu0 %v1594_v15, %s5412_s15  ;;  %1662 = vrot.lane.b32.xlu1 %v1589_v32, %s5412_s15  ;;  %v1586_v15 = vmul.f32 %v5754_v52, %v5592_v39  ;;  %v1797_v52 = vmul.f32 %v5780_v6, %v5572_v31 }
 0x19e   : > { %v6130_v57 = vpop.permute.xlu0 %1240  ;;  %v6132_v0 = vpop.permute.xlu1 %1226 }
 0x19f   : > { %9246 = vst [vmem:[#allocation78_spill] sm:$0xff] %v6130_v57  ;;  %9247 = vst [vmem:[#allocation79_spill] sm:$0xff] %v6132_v0  ;;  %v480_v0 = vsel %vm478_vm0, %v5818_v42, %v5816_v41  ;;  %v323_v57 = vmul.f32 %v5557_v24, %v5796_v18 }
 0x1a0   : > { %1676 = vrot.lane.b32.xlu0 %v1596_v40, %s5412_s15  ;;  %1674 = vrot.lane.b32.xlu1 %v1595_v56, %s5412_s15  ;;  %v1788_v40 = vmul.f32 %v5782_v7, %v5560_v25  ;;  %v1795_v56 = vmul.f32 %v5780_v6, %v5560_v25 }
 0x1a2   : > { %v6142_v32 = vpop.permute.xlu0 %1057  ;;  %v6144_v60 = vpop.permute.xlu1 %1055 }
 0x1a3   : > { %9248 = vst [vmem:[#allocation80_spill] sm:$0xff] %v6142_v32  ;;  %9249 = vst [vmem:[#allocation81_spill] sm:$0xff] %v6144_v60 }
 0x1a4   : > { %1670 = vrot.lane.b32.xlu0 %v1593_v47, %s5412_s15  ;;  %1656 = vrot.lane.b32.xlu1 %v1586_v15, %s5412_s15  ;;  %v1790_v47 = vmul.f32 %v5782_v7, %v5572_v31 }
 0x1a6   : > { %v6156_v15 = vpop.permute.xlu0 %1069  ;;  %v6158_v63 = vpop.permute.xlu1 %1059 }
 0x1a7   : > { %9250 = vst [vmem:[#allocation82_spill] sm:$0xff] %v6156_v15  ;;  %9251 = vst [vmem:[#allocation83_spill] sm:$0xff] %v6158_v63  ;;  %v1794_v15 = vmul.f32 %v5780_v6, %v5592_v39 }
 0x1a8   : > { %1861 = vrot.lane.b32.xlu0 %v1789_v58, %s5413_s16  ;;  %1859 = vrot.lane.b32.xlu1 %v1788_v40, %s5413_s16  ;;  %v1796_v58 = vmul.f32 %v5780_v6, %v5557_v24 }
 0x1aa   : > { %v6168_v40 = vpop.permute.xlu0 %1073  ;;  %v6170_v60 = vpop.permute.xlu1 %1071 }
 0x1ab   : > { %9252 = vst [vmem:[#allocation84_spill] sm:$0xff] %v6168_v40  ;;  %9253 = vst [vmem:[#allocation85_spill] sm:$0xff] %v6170_v60 }
 0x1ac   : > { %1873 = vrot.lane.b32.xlu0 %v1795_v56, %s5413_s16  ;;  %1863 = vrot.lane.b32.xlu1 %v1790_v47, %s5413_s16  ;;  %v1787_v56 = vmul.f32 %v5782_v7, %v5592_v39 }
 0x1ae   : > { %v6178_v47 = vpop.permute.xlu0 %1431  ;;  %v6180_v31 = vpop.permute.xlu1 %1429 }
 0x1b0   : > { %1877 = vrot.lane.b32.xlu0 %v1797_v52, %s5413_s16  ;;  %1875 = vrot.lane.b32.xlu1 %v1796_v58, %s5413_s16 }
 0x1b2   : > { %v6182_v52 = vpop.permute.xlu0 %1443  ;;  %v6184_v58 = vpop.permute.xlu1 %1433 }
 0x1b3   : > { %9254 = vst [vmem:[#allocation86_spill] sm:$0xff] %v6184_v58 }
 0x1b4   : > { %1871 = vrot.lane.b32.xlu0 %v1794_v15, %s5413_s16  ;;  %1857 = vrot.lane.b32.xlu1 %v1787_v56, %s5413_s16 }
 0x1b6   : > { %v6186_v40 = vpop.permute.xlu0 %1447  ;;  %v6188_v60 = vpop.permute.xlu1 %1445 }
 0x1b7   : > { %9255 = vst [vmem:[#allocation87_spill] sm:$0xff] %v6186_v40 }
 0x1c7   : > { %v6190_v6 = vpop.permute.xlu0 %1969  ;;  %v6192_v63 = vpop.permute.xlu1 %1964 }
 0x1c8   : > { %9256 = vst [vmem:[#allocation88_spill] sm:$0xff] %v6190_v6  ;;  %9257 = vst [vmem:[#allocation89_spill] sm:$0xff] %v6192_v63  ;;  %v487_v6 = vsel %vm478_vm0, %v5838_v61, %v5836_v59  ;;  %v6256_v63 = vmul.f32 %v5592_v39, %v5796_v18 }
 0x1cb   : > { %v6194_v7 = vpop.permute.xlu0 %1067  ;;  %v6196_v15 = vpop.permute.xlu1 %1053 }
 0x1cc   : > { %9258 = vst [vmem:[#allocation90_spill] sm:$0xff] %v6194_v7  ;;  %9259 = vst [vmem:[#allocation91_spill] sm:$0xff] %v6196_v15 }
 0x1cf   : > { %v6198_v56 = vpop.permute.xlu0 %1441  ;;  %v6200_v32 = vpop.permute.xlu1 %1427 }
 0x1d0   : > { %9260 = vst [vmem:[#allocation92_spill] sm:$0xff] %v6198_v56  ;;  %9261 = vst [vmem:[#allocation93_spill] sm:$0xff] %v6200_v32 }
 0x1d3   : > { %v6202_v33 = vpop.permute.xlu0 %1258  ;;  %v6204_v21 = vpop.permute.xlu1 %1256 }
 0x1d4   : > { %9262 = vst [vmem:[#allocation94_spill] sm:$0xff] %v6202_v33  ;;  %9263 = vst [vmem:[#allocation95_spill] sm:$0xff] %v6204_v21 }
 0x1d7   : > { %v6206_v26 = vpop.permute.xlu0 %1270  ;;  %v6208_v62 = vpop.permute.xlu1 %1260 }
 0x1d8   : > { %9264 = vst [vmem:[#allocation96_spill] sm:$0xff] %v6206_v26  ;;  %9265 = vst [vmem:[#allocation97_spill] sm:$0xff] %v6208_v62 }
 0x1db   : > { %v6210_v12 = vpop.permute.xlu0 %1274  ;;  %v6212_v20 = vpop.permute.xlu1 %1272 }
 0x1dc   : > { %9266 = vst [vmem:[#allocation98_spill] sm:$0xff] %v6210_v12  ;;  %9267 = vst [vmem:[#allocation99_spill] sm:$0xff] %v6212_v20  ;;  %v322_v20 = vmul.f32 %v5560_v25, %v5796_v18 }
 0x1df   : > { %v6214_v29 = vpop.permute.xlu0 %1632  ;;  %v6216_v7 = vpop.permute.xlu1 %1630 }
 0x1e3   : > { %v6218_v15 = vpop.permute.xlu0 %1644  ;;  %v6220_v56 = vpop.permute.xlu1 %1634 }
 0x1e4   : > { %9268 = vst [vmem:[#allocation100_spill] sm:$0xff] %v6220_v56 }
 0x1e7   : > { %v6222_v32 = vpop.permute.xlu0 %1648  ;;  %v6224_v33 = vpop.permute.xlu1 %1646 }
 0x1e8   : > { %9269 = vst [vmem:[#allocation101_spill] sm:$0xff] %v6222_v32 }
 0x1eb   : > { %v6226_v21 = vpop.permute.xlu0 %1268  ;;  %v6228_v26 = vpop.permute.xlu1 %1254 }
 0x1ec   : > { %9270 = vst [vmem:[#allocation102_spill] sm:$0xff] %v6226_v21  ;;  %9271 = vst [vmem:[#allocation103_spill] sm:$0xff] %v6228_v26 }
 0x1ef   : > { %v6230_v62 = vpop.permute.xlu0 %1642  ;;  %v6232_v12 = vpop.permute.xlu1 %1628 }
 0x1f0   : > { %9272 = vst [vmem:[#allocation104_spill] sm:$0xff] %v6230_v62  ;;  %9273 = vst [vmem:[#allocation105_spill] sm:$0xff] %v6232_v12  ;;  %v481_v12 = vsel %vm478_vm0, %v5816_v41, %v5828_v51  ;;  %v486_v62 = vsel %vm478_vm0, %v5826_v50, %v5838_v61  ;;  %v327_v41 = vmul.f32 %v5592_v39, %v5794_v17 }
 0x1f1   : > { %v528_v51 = vadd.f32 %v480_v0, %v322_v20  ;;  %v682_v61 = vsel %vm679_vm1, %v5856_v22, %v5868_v45  ;;  %v529_v59 = vadd.f32 %v481_v12, %v323_v57  ;;  %v687_v20 = vsel %vm679_vm1, %v5866_v44, %v5878_v3 }
 0x1f2   : > { %v688_v0 = vsel %vm679_vm1, %v5878_v3, %v5876_v2  ;;  %v882_v12 = vsel %vm880_vm2, %v5928_v49, %v5926_v54  ;;  %v1083_v22 = vsel %vm1081_vm3, %v6008_v10, %v6006_v27 }
 0x1f3   : > { %v6241_v21 = vpop.permute.xlu0 %1459  ;;  %v6243_v26 = vpop.permute.xlu1 %1457 }
 0x1f4   : > { %9274 = vst [vmem:[#allocation106_spill] sm:$0xff] %v6241_v21  ;;  %9275 = vst [vmem:[#allocation107_spill] sm:$0xff] %v6243_v26  ;;  %v329_v21 = vmul.f32 %v5557_v24, %v5794_v17  ;;  %v328_v26 = vmul.f32 %v5560_v25, %v5794_v17  ;;  %v485_v25 = vsel %vm478_vm0, %v5846_v9, %v5826_v50 }
 0x1f5   : > { %v533_v50 = vadd.f32 %v485_v25, %v327_v41  ;;  %v888_v9 = vsel %vm880_vm2, %v5936_v5, %v5948_v48  ;;  %v686_v25 = vsel %vm679_vm1, %v5886_v34, %v5866_v44  ;;  %v1089_v44 = vsel %vm1081_vm3, %v6016_v38, %v6028_v19 }
 0x1f6   : > { %v534_v18 = vadd.f32 %v486_v62, %v328_v26  ;;  %v535_v24 = vadd.f32 %v487_v6, %v329_v21  ;;  %v883_v62 = vsel %vm880_vm2, %v5926_v54, %v5938_v4  ;;  %v479_v21 = vsel %vm478_vm0, %v5848_v13, %v5818_v42 }
 0x1f7   : > { %v6273_v11 = vpop.permute.xlu0 %1471  ;;  %v6275_v17 = vpop.permute.xlu1 %1461  ;;  %v729_v6 = vadd.f32 %v681_v28, %v528_v51  ;;  %v730_v26 = vadd.f32 %v682_v61, %v529_v59  ;;  %v1084_v54 = vsel %vm1081_vm3, %v6006_v27, %v6018_v16  ;;  %v889_v59 = vsel %vm880_vm2, %v5948_v48, %v5946_v8 }
 0x1f8   : > { %9276 = vst [vmem:[#allocation108_spill] sm:$0xff] %v6275_v17  ;;  %v735_v3 = vadd.f32 %v687_v20, %v534_v18  ;;  %v736_v57 = vadd.f32 %v688_v0, %v535_v24  ;;  %v1284_v27 = vsel %vm1282_vm4, %v6088_v36, %v6086_v55  ;;  %v1285_v24 = vsel %vm1282_vm4, %v6086_v55, %v6098_v14 }
 0x1f9   : > { %v930_v4 = vadd.f32 %v882_v12, %v729_v6  ;;  %v931_v42 = vadd.f32 %v883_v62, %v730_v26  ;;  %v1090_v48 = vsel %vm1081_vm3, %v6028_v19, %v6026_v30  ;;  %v1485_v34 = vsel %vm1483_vm5, %v6180_v31, %v6178_v47 }
 0x1fa   : > { %v936_v18 = vadd.f32 %v888_v9, %v735_v3  ;;  %v1486_v55 = vsel %vm1483_vm5, %v6178_v47, %v6184_v58  ;;  %v937_v61 = vadd.f32 %v889_v59, %v736_v57  ;;  %v1290_v62 = vsel %vm1282_vm4, %v6096_v46, %v6108_v53 }
 0x1fb   : > { %v6301_v28 = vpop.permute.xlu0 %1475  ;;  %v6303_v51 = vpop.permute.xlu1 %1473  ;;  %v1131_v13 = vadd.f32 %v1083_v22, %v930_v4  ;;  %v1132_v41 = vadd.f32 %v1084_v54, %v931_v42  ;;  %v1291_v19 = vsel %vm1282_vm4, %v6108_v53, %v6106_v37  ;;  %v1686_v6 = vsel %vm1684_vm6, %v6216_v7, %v6214_v29 }
 0x1fc   : > { %9277 = vst [vmem:[#allocation109_spill] sm:$0xff] %v6301_v28  ;;  %v1687_v47 = vsel %vm1684_vm6, %v6214_v29, %v6220_v56  ;;  %v1137_v26 = vadd.f32 %v1089_v44, %v936_v18  ;;  %v1138_v9 = vadd.f32 %v1090_v48, %v937_v61  ;;  %v680_v3 = vsel %vm679_vm1, %v5888_v35, %v5858_v23 }
 0x1fd   : > { %v1332_v4 = vadd.f32 %v1284_v27, %v1131_v13  ;;  %v1333_v20 = vadd.f32 %v1285_v24, %v1132_v41  ;;  %v1491_v53 = vsel %vm1483_vm5, %v6182_v52, %v6188_v60  ;;  %v1492_v57 = vsel %vm1483_vm5, %v6188_v60, %v6186_v40 }
 0x1fe   : > { %v1338_v29 = vadd.f32 %v1290_v62, %v1137_v26  ;;  %v1339_v59 = vadd.f32 %v1291_v19, %v1138_v9  ;;  %v527_v23 = vadd.f32 %v479_v21, %v6256_v63  ;;  %v1692_v35 = vsel %vm1684_vm6, %v6218_v15, %v6224_v33 }
 0x1ff   : > { %v1834_v0 = vpop.permute.xlu0 %1833  ;;  %v6329_v12 = vpop.permute.xlu1 %1831  ;;  %v1533_v22 = vadd.f32 %v1485_v34, %v1332_v4  ;;  %v1534_v54 = vadd.f32 %v1486_v55, %v1333_v20  ;;  %v1693_v60 = vsel %vm1684_vm6, %v6224_v33, %v6222_v32  ;;  %v734_v61 = vadd.f32 %v686_v25, %v533_v50  ;;  %v9281_v50 = vld [vmem:[#allocation68_spill] sm:$0xff] }
 0x200   : > { %v1887_v42 = vsel %vm1885_vm7, %v6329_v12, %v1834_v0  ;;  %v1539_v44 = vadd.f32 %v1491_v53, %v1338_v29  ;;  %v1540_v48 = vadd.f32 %v1492_v57, %v1339_v59  ;;  %v728_v4 = vadd.f32 %v680_v3, %v527_v23  ;;  %v9283_v3 = vld [vmem:[#allocation88_spill] sm:$0xff]  ;;  %v9286_v59 = vld [vmem:[#allocation78_spill] sm:$0xff] }
 0x201   : > { %v1734_v27 = vadd.f32 %v1686_v6, %v1533_v22  ;;  %v1735_v24 = vadd.f32 %v1687_v47, %v1534_v54  ;;  %v887_v63 = vsel %vm880_vm2, %v5966_v43, %v5936_v5  ;;  %v881_v21 = vsel %vm880_vm2, %v5968_v1, %v5928_v49  ;;  %v9282_v5 = vld [vmem:[#allocation89_spill] sm:$0xff] }
 0x202   : > { %v1740_v20 = vadd.f32 %v1692_v35, %v1539_v44  ;;  %v1741_v62 = vadd.f32 %v1693_v60, %v1540_v48  ;;  %v1082_v25 = vsel %vm1081_vm3, %v9281_v50, %v6008_v10  ;;  %v935_v22 = vadd.f32 %v887_v63, %v734_v61  ;;  %v9288_v48 = vld [vmem:[#allocation92_spill] sm:$0xff] }
 0x203   : > { %v1846_v18 = vpop.permute.xlu0 %1845  ;;  %v6354_v13 = vpop.permute.xlu1 %1835  ;;  %v1935_v34 = vadd.f32 %v1887_v42, %v1734_v27  ;;  %v929_v54 = vadd.f32 %v881_v21, %v728_v4  ;;  %v1289_v27 = vsel %vm1282_vm4, %v9286_v59, %v6096_v46 }
 0x204   : > { %9278 = vst [vmem:[#allocation110_spill] sm:$0xff] %v6354_v13  ;;  %v1888_v41 = vsel %vm1885_vm7, %v1834_v0, %v6354_v13  ;;  %v9280_v0 = vld [vmem:[#allocation67_spill] sm:$0xff] }
 0x205   : > { %v1936_v55 = vadd.f32 %v1888_v41, %v1735_v24  ;;  %v1088_v6 = vsel %vm1081_vm3, %v9280_v0, %v6016_v38  ;;  %v1983_v49 = vadd.f32 %v9282_v5, %v1935_v34  ;;  %v1130_v29 = vadd.f32 %v1082_v25, %v929_v54  ;;  %v9287_v24 = vld [vmem:[#allocation79_spill] sm:$0xff] }
 0x206   : > { %v1136_v42 = vadd.f32 %v1088_v6, %v935_v22  ;;  %v1283_v23 = vsel %vm1282_vm4, %v9287_v24, %v6088_v36  ;;  %v1490_v34 = vsel %vm1483_vm5, %v9288_v48, %v6182_v52  ;;  %v9291_v52 = vld [vmem:[#allocation105_spill] sm:$0xff] }
 0x207   : > { %v6371_v33 = vpop.permute.xlu0 %1849  ;;  %v1848_v19 = vpop.permute.xlu1 %1847  ;;  %v1984_v1 = vadd.f32 %v9282_v5, %v1936_v55  ;;  %v2007_v35 = vmax.f32 %v1983_v49, 0.0  ;;  %v9289_v55 = vld [vmem:[#allocation93_spill] sm:$0xff]  ;;  %v1331_v63 = vadd.f32 %v1283_v23, %v1130_v29  ;;  %v1685_v0 = vsel %vm1684_vm6, %v9291_v52, %v6216_v7 }
 0x208   : > { %9279 = vst [vmem:[#allocation111_spill] sm:$0xff] %v6371_v33  ;;  %v1893_v47 = vsel %vm1885_vm7, %v1846_v18, %v1848_v19  ;;  %v1894_v43 = vsel %vm1885_vm7, %v1848_v19, %v6371_v33  ;;  %v1484_v61 = vsel %vm1483_vm5, %v9289_v55, %v6180_v31  ;;  %v1337_v4 = vadd.f32 %v1289_v27, %v1136_v42  ;;  %v9294_v29 = vld [vmem:[#allocation9_spill] sm:$0xff]  ;;  %v9296_v27 = vld [vmem:[#allocation51_spill] sm:$0xff] }
 0x209   : > { %v1941_v26 = vadd.f32 %v1893_v47, %v1740_v20  ;;  %v1942_v9 = vadd.f32 %v1894_v43, %v1741_v62  ;;  %v2008_v60 = vmax.f32 %v1984_v1, 0.0  ;;  %v9290_v62 = vld [vmem:[#allocation104_spill] sm:$0xff]  ;;  %v1532_v31 = vadd.f32 %v1484_v61, %v1331_v63  ;;  %v9297_v23 = vld [vmem:[#allocation53_spill] sm:$0xff]  ;;  %v9299_v55 = vld [vmem:[#allocation55_spill] sm:$0xff] }
 0x20a   : > { %v1691_v19 = vsel %vm1684_vm6, %v9290_v62, %v6218_v15  ;;  %v1538_v6 = vadd.f32 %v1490_v34, %v1337_v4  ;;  %v9300_v61 = vld [vmem:[#allocation52_spill] sm:$0xff]  ;;  %v9301_v63 = vld [vmem:[#allocation54_spill] sm:$0xff]  ;;  %v9324_v33 = vld [vmem:[#allocation83_spill] sm:$0xff] }
 0x20b   : > { %v1989_v53 = vadd.f32 %v9283_v3, %v1941_v26  ;;  %v1990_v38 = vadd.f32 %v9283_v3, %v1942_v9  ;;  %v6386_v57 = vpop.permute.xlu0 %1979  ;;  %v6388_v10 = vpop.permute.xlu1 %1974  ;;  %v1733_v15 = vadd.f32 %v1685_v0, %v1532_v31  ;;  %v498_v4 = vsel %vm478_vm0, %v9300_v61, %v9299_v55 }
 0x20c   : > { %9284 = vst [vmem:[#allocation67_spill] sm:$0xff] %v6386_v57  ;;  %9285 = vst [vmem:[#allocation68_spill] sm:$0xff] %v6388_v10  ;;  %v1739_v50 = vadd.f32 %v1691_v19, %v1538_v6  ;;  %v499_v62 = vsel %vm478_vm0, %v9299_v55, %v9301_v63  ;;  %v9302_v19 = vld [vmem:[#allocation57_spill] sm:$0xff]  ;;  %v9303_v6 = vld [vmem:[#allocation58_spill] sm:$0xff] }
 0x20d   : > { %v2013_v41 = vmax.f32 %v1989_v53, 0.0  ;;  %v2014_v44 = vmax.f32 %v1990_v38, 0.0  ;;  %v9292_v53 = vld [vmem:[#allocation47_spill] sm:$0xff]  ;;  %v9293_v38 = vld [vmem:[#allocation10_spill] sm:$0xff]  ;;  %v497_v52 = vsel %vm478_vm0, %v9302_v19, %v9300_v61  ;;  %v491_v31 = vsel %vm478_vm0, %v9303_v6, %v9296_v27  ;;  %v9316_v6 = vld [vmem:[#allocation72_spill] sm:$0xff] }
 0x20e   : > { %v340_v42 = vmul.f32 %v9293_v38, %v9292_v53  ;;  %v341_v59 = vmul.f32 %v9294_v29, %v9292_v53  ;;  %v9312_v55 = vld [vmem:[#allocation66_spill] sm:$0xff] }
 0x20f   : > { %v6402_v21 = vpack.c.bf16 %v2013_v41, %v2007_v35  ;;  %v6404_v46 = vpack.c.bf16 %v2014_v44, %v2008_v60  ;;  %v6406_v20 = vpop.permute.xlu0 %1469  ;;  %v6408_v36 = vpop.permute.xlu1 %1455  ;;  %v9298_v44 = vld [vmem:[#allocation46_spill] sm:$0xff] }
 0x210   : > { %v334_v48 = vmul.f32 %v9293_v38, %v9298_v44  ;;  %v335_v34 = vmul.f32 %v9294_v29, %v9298_v44  ;;  %v333_v0 = vmul.f32 %v5592_v39, %v9298_v44  ;;  %v547_v38 = vadd.f32 %v499_v62, %v341_v59  ;;  %v9308_v29 = vld [vmem:[#allocation64_spill] sm:$0xff]  ;;  %v9314_v62 = vld [vmem:[#allocation70_spill] sm:$0xff] }
 0x211   : > { %2043 = vst [vmem:[#allocation2 + $0x8] sm:$0xff] %v6402_v21  ;;  %2044 = vst [vmem:[#allocation2 + $0x10] sm:$0xff] %v6404_v46  ;;  %2071 = vrot.lane.b32.xlu0 %v6404_v46, %s5406_s29  ;;  %2069 = vrot.lane.b32.xlu1 %v6402_v21, %s5406_s29  ;;  %v9337_v63 = vld [vmem:[#allocation98_spill] sm:$0xff] }
 0x212   : > { %2736 = vmatprep.subr.bf16.mxu0 %v6402_v21 }
 0x213   : > { %v1844_v25 = vpop.permute.xlu0 %1843  ;;  %v1830_v47 = vpop.permute.xlu1 %1829 }
 0x214   : > { %v1892_v7 = vsel %vm1885_vm7, %v1844_v25, %v1846_v18  ;;  %v1886_v43 = vsel %vm1885_vm7, %v1830_v47, %v6329_v12  ;;  %v339_v18 = vmul.f32 %v5592_v39, %v9292_v53  ;;  %v9295_v12 = vld [vmem:[#allocation50_spill] sm:$0xff] }
 0x215   : > { %v1940_v49 = vadd.f32 %v1892_v7, %v1739_v50  ;;  %v1934_v1 = vadd.f32 %v1886_v43, %v1733_v15  ;;  %v492_v24 = vsel %vm478_vm0, %v9296_v27, %v9295_v12  ;;  %v493_v35 = vsel %vm478_vm0, %v9295_v12, %v9297_v23  ;;  %v9305_v43 = vld [vmem:[#allocation59_spill] sm:$0xff]  ;;  %v9309_v12 = vld [vmem:[#allocation61_spill] sm:$0xff] }
 0x216   : > { %v540_v47 = vadd.f32 %v492_v24, %v334_v48  ;;  %v541_v7 = vadd.f32 %v493_v35, %v335_v34  ;;  %v699_v27 = vsel %vm679_vm1, %v9309_v12, %v9308_v29  ;;  %v545_v24 = vadd.f32 %v497_v52, %v339_v18 }
 0x217   : > { %v1988_v26 = vadd.f32 %v9283_v3, %v1940_v49  ;;  %v1982_v9 = vadd.f32 %v9282_v5, %v1934_v1  ;;  %v6428_v22 = vpop.permute.xlu0 %1660  ;;  %v6430_v54 = vpop.permute.xlu1 %1658  ;;  %v9306_v49 = vld [vmem:[#allocation60_spill] sm:$0xff]  ;;  %v539_v35 = vadd.f32 %v491_v31, %v333_v0 }
 0x218   : > { %v693_v1 = vsel %vm679_vm1, %v9306_v49, %v9305_v43  ;;  %v692_v61 = vsel %vm679_vm1, %v9312_v55, %v9306_v49  ;;  %v9321_v55 = vld [vmem:[#allocation80_spill] sm:$0xff] }
 0x219   : > { %v2012_v60 = vmax.f32 %v1988_v26, 0.0  ;;  %v2006_v41 = vmax.f32 %v1982_v9, 0.0  ;;  %v9307_v26 = vld [vmem:[#allocation62_spill] sm:$0xff]  ;;  %v546_v9 = vadd.f32 %v498_v4, %v340_v42  ;;  %v9311_v42 = vld [vmem:[#allocation65_spill] sm:$0xff]  ;;  %v741_v48 = vadd.f32 %v693_v1, %v540_v47 }
 0x21a   : > { %v694_v39 = vsel %vm679_vm1, %v9305_v43, %v9307_v26  ;;  %v698_v59 = vsel %vm679_vm1, %v9311_v42, %v9309_v12  ;;  %v9313_v4 = vld [vmem:[#allocation69_spill] sm:$0xff]  ;;  %v9317_v43 = vld [vmem:[#allocation74_spill] sm:$0xff]  ;;  %v9320_v12 = vld [vmem:[#allocation76_spill] sm:$0xff] }
 0x21b   : > { %v6462_v50 = vpack.c.bf16 %v2012_v60, %v2006_v41  ;;  %v6464_v15 = vpop.permute.xlu0 %1672  ;;  %v6466_v25 = vpop.permute.xlu1 %1662  ;;  %v9310_v60 = vld [vmem:[#allocation63_spill] sm:$0xff]  ;;  %v742_v34 = vadd.f32 %v694_v39, %v541_v7  ;;  %v894_v19 = vsel %vm880_vm2, %v9314_v62, %v9313_v4  ;;  %v747_v0 = vadd.f32 %v699_v27, %v546_v9  ;;  %v9319_v7 = vld [vmem:[#allocation73_spill] sm:$0xff] }
 0x21c   : > { %9304 = vst [vmem:[#allocation78_spill] sm:$0xff] %v6466_v25  ;;  %v700_v41 = vsel %vm679_vm1, %v9308_v29, %v9310_v60  ;;  %v895_v31 = vsel %vm880_vm2, %v9313_v4, %v9316_v6  ;;  %v9318_v29 = vld [vmem:[#allocation71_spill] sm:$0xff]  ;;  %v901_v49 = vsel %vm880_vm2, %v9317_v43, %v9319_v7  ;;  %v746_v39 = vadd.f32 %v698_v59, %v545_v24  ;;  %v9322_v9 = vld [vmem:[#allocation81_spill] sm:$0xff]  ;;  %v9325_v59 = vld [vmem:[#allocation94_spill] sm:$0xff] }
 0x21d   : > { %2042 = vst [vmem:[#allocation2] sm:$0xff] %v6462_v50  ;;  %2067 = vrot.lane.b32.xlu1 %v6462_v50, %s5406_s29  ;;  %2737 = vmatpush1.bf16.msra.mxu0 %v6462_v50  ;;  %v900_v47 = vsel %vm880_vm2, %v9318_v29, %v9317_v43  ;;  %v748_v1 = vadd.f32 %v700_v41, %v547_v38  ;;  %v9323_v6 = vld [vmem:[#allocation77_spill] sm:$0xff]  ;;  %v9326_v7 = vld [vmem:[#allocation95_spill] sm:$0xff] }
 0x21e   : > { %v899_v42 = vsel %vm880_vm2, %v9320_v12, %v9318_v29  ;;  %v1095_v27 = vsel %vm1081_vm3, %v9322_v9, %v9321_v55  ;;  %v740_v60 = vadd.f32 %v692_v61, %v539_v35  ;;  %v942_v4 = vadd.f32 %v894_v19, %v741_v48  ;;  %v9327_v48 = vld [vmem:[#allocation85_spill] sm:$0xff]  ;;  %v9328_v61 = vld [vmem:[#allocation82_spill] sm:$0xff] }
 0x21f   : > { %v6493_v18 = vpop.permute.xlu0 %1676  ;;  %v1675_v52 = vpop.permute.xlu1 %1674  ;;  %v893_v3 = vsel %vm880_vm2, %v9323_v6, %v9314_v62  ;;  %v1096_v43 = vsel %vm1081_vm3, %v9321_v55, %v9324_v33  ;;  %v943_v38 = vadd.f32 %v895_v31, %v742_v34  ;;  %v948_v24 = vadd.f32 %v900_v47, %v747_v0  ;;  %v9329_v62 = vld [vmem:[#allocation97_spill] sm:$0xff]  ;;  %v9330_v0 = vld [vmem:[#allocation84_spill] sm:$0xff]  ;;  %v9331_v47 = vld [vmem:[#allocation106_spill] sm:$0xff] }
 0x220   : > { %9315 = vst [vmem:[#allocation79_spill] sm:$0xff] %v6493_v18  ;;  %v949_v41 = vadd.f32 %v901_v49, %v748_v1  ;;  %v1296_v29 = vsel %vm1282_vm4, %v9326_v7, %v9325_v59  ;;  %v947_v26 = vadd.f32 %v899_v42, %v746_v39  ;;  %v1143_v35 = vadd.f32 %v1095_v27, %v942_v4  ;;  %v9332_v49 = vld [vmem:[#allocation107_spill] sm:$0xff]  ;;  %v9333_v39 = vld [vmem:[#allocation90_spill] sm:$0xff] }
 0x221   : > { %v1101_v19 = vsel %vm1081_vm3, %v9328_v61, %v9327_v48  ;;  %v1297_v6 = vsel %vm1282_vm4, %v9325_v59, %v9329_v62  ;;  %v941_v55 = vadd.f32 %v893_v3, %v740_v60  ;;  %v1144_v34 = vadd.f32 %v1096_v43, %v943_v38  ;;  %v9334_v27 = vld [vmem:[#allocation91_spill] sm:$0xff]  ;;  %v9336_v59 = vld [vmem:[#allocation96_spill] sm:$0xff] }
 0x222   : > { %v1102_v31 = vsel %vm1081_vm3, %v9327_v48, %v9330_v0  ;;  %v1497_v1 = vsel %vm1483_vm5, %v9332_v49, %v9331_v47  ;;  %v1100_v42 = vsel %vm1081_vm3, %v9333_v39, %v9328_v61  ;;  %v1094_v4 = vsel %vm1081_vm3, %v9334_v27, %v9322_v9  ;;  %v9335_v38 = vld [vmem:[#allocation99_spill] sm:$0xff] }
 0x223   : > { %v1671_v12 = vpop.permute.xlu0 %1670  ;;  %v1657_v5 = vpop.permute.xlu1 %1656  ;;  %v1344_v33 = vadd.f32 %v1296_v29, %v1143_v35  ;;  %v1498_v3 = vsel %vm1483_vm5, %v9331_v47, %v6275_v17  ;;  %v1149_v60 = vadd.f32 %v1101_v19, %v948_v24  ;;  %v1345_v43 = vadd.f32 %v1297_v6, %v1144_v34 }
 0x224   : > { %v1302_v48 = vsel %vm1282_vm4, %v9336_v59, %v9335_v38  ;;  %v1698_v0 = vsel %vm1684_vm6, %v6430_v54, %v6428_v22  ;;  %v1150_v62 = vadd.f32 %v1102_v31, %v949_v41  ;;  %v1303_v9 = vsel %vm1282_vm4, %v9335_v38, %v9337_v63 }
 0x225   : > { %v1545_v29 = vadd.f32 %v1497_v1, %v1344_v33  ;;  %v1699_v24 = vsel %vm1684_vm6, %v6428_v22, %v6466_v25  ;;  %v1148_v35 = vadd.f32 %v1100_v42, %v947_v26  ;;  %v1142_v19 = vadd.f32 %v1094_v4, %v941_v55  ;;  %v9338_v1 = vld [vmem:[#allocation102_spill] sm:$0xff]  ;;  %v9339_v26 = vld [vmem:[#allocation103_spill] sm:$0xff] }
 0x226   : > { %v1546_v6 = vadd.f32 %v1498_v3, %v1345_v43  ;;  %v1350_v47 = vadd.f32 %v1302_v48, %v1149_v60  ;;  %v1503_v27 = vsel %vm1483_vm5, %v6273_v11, %v6303_v51  ;;  %v1504_v41 = vsel %vm1483_vm5, %v6303_v51, %v6301_v28 }
 0x227   : > { %v1862_v61 = vpop.permute.xlu0 %1861  ;;  %v1860_v39 = vpop.permute.xlu1 %1859  ;;  %v1746_v31 = vadd.f32 %v1698_v0, %v1545_v29  ;;  %v1351_v33 = vadd.f32 %v1303_v9, %v1150_v62  ;;  %v1301_v22 = vsel %vm1282_vm4, %v9338_v1, %v9336_v59  ;;  %v1295_v55 = vsel %vm1282_vm4, %v9339_v26, %v9326_v7 }
 0x228   : > { %v1899_v34 = vsel %vm1885_vm7, %v1860_v39, %v1862_v61  ;;  %v1747_v42 = vadd.f32 %v1699_v24, %v1546_v6  ;;  %v1704_v60 = vsel %vm1684_vm6, %v6464_v15, %v1675_v52  ;;  %v1705_v51 = vsel %vm1684_vm6, %v1675_v52, %v6493_v18 }
 0x229   : > { %v1947_v0 = vadd.f32 %v1899_v34, %v1746_v31  ;;  %v1551_v43 = vadd.f32 %v1503_v27, %v1350_v47  ;;  %v1552_v38 = vadd.f32 %v1504_v41, %v1351_v33  ;;  %v1349_v48 = vadd.f32 %v1301_v22, %v1148_v35 }
 0x22a   : > { %v1343_v9 = vadd.f32 %v1295_v55, %v1142_v19  ;;  %v1502_v7 = vsel %vm1483_vm5, %v6406_v20, %v6273_v11  ;;  %v1496_v29 = vsel %vm1483_vm5, %v6408_v36, %v9332_v49  ;;  %v1703_v52 = vsel %vm1684_vm6, %v1671_v12, %v6464_v15 }
 0x22b   : > { %v1874_v4 = vpop.permute.xlu0 %1873  ;;  %v6565_v3 = vpop.permute.xlu1 %1863  ;;  %v1752_v24 = vadd.f32 %v1704_v60, %v1551_v43  ;;  %v1753_v6 = vadd.f32 %v1705_v51, %v1552_v38  ;;  %v1995_v19 = vadd.f32 %v6388_v10, %v1947_v0  ;;  %v1550_v36 = vadd.f32 %v1502_v7, %v1349_v48  ;;  %v9343_v7 = vld [vmem:[#allocation11_spill] sm:$0xff] }
 0x22c   : > { %9340 = vst [vmem:[#allocation92_spill] sm:$0xff] %v6565_v3  ;;  %v1900_v62 = vsel %vm1885_vm7, %v1862_v61, %v6565_v3  ;;  %v1697_v61 = vsel %vm1684_vm6, %v1657_v5, %v6430_v54  ;;  %v1544_v49 = vadd.f32 %v1496_v29, %v1343_v9  ;;  %v9342_v9 = vld [vmem:[#allocation6_spill] sm:$0xff] }
 0x22d   : > { %v1948_v59 = vadd.f32 %v1900_v62, %v1747_v42  ;;  %v1751_v15 = vadd.f32 %v1703_v52, %v1550_v36  ;;  %v2019_v1 = vmax.f32 %v1995_v19, 0.0  ;;  %v370_v29 = vmul.f32 %v9343_v7, %v9342_v9  ;;  %v9345_v52 = vld [vmem:[#allocation14_spill] sm:$0xff]  ;;  %v9346_v19 = vld [vmem:[#allocation12_spill] sm:$0xff] }
 0x22e   : > { %v1745_v12 = vadd.f32 %v1697_v61, %v1544_v49  ;;  %v377_v61 = vmul.f32 %v9345_v52, %v9342_v9 }
 0x22f   : > { %v6583_v34 = vpop.permute.xlu0 %1877  ;;  %v1876_v35 = vpop.permute.xlu1 %1875  ;;  %v1996_v47 = vadd.f32 %v6388_v10, %v1948_v59 }
 0x230   : > { %9341 = vst [vmem:[#allocation93_spill] sm:$0xff] %v6583_v34  ;;  %v1905_v11 = vsel %vm1885_vm7, %v1874_v4, %v1876_v35  ;;  %v1906_v20 = vsel %vm1885_vm7, %v1876_v35, %v6583_v34 }
 0x231   : > { %v1953_v27 = vadd.f32 %v1905_v11, %v1752_v24  ;;  %v1954_v41 = vadd.f32 %v1906_v20, %v1753_v6  ;;  %v2020_v22 = vmax.f32 %v1996_v47, 0.0  ;;  %v9344_v24 = vld [vmem:[#allocation7_spill] sm:$0xff]  ;;  %v571_v47 = vmul.f32 %v9346_v19, %v9342_v9 }
 0x232   : > { %v371_v6 = vmul.f32 %v9343_v7, %v9344_v24  ;;  %v378_v35 = vmul.f32 %v9345_v52, %v9344_v24  ;;  %v572_v11 = vmul.f32 %v9346_v19, %v9344_v24  ;;  %v9347_v20 = vld [vmem:[#allocation15_spill] sm:$0xff] }
 0x233   : > { %v2001_v5 = vadd.f32 %v6386_v57, %v1953_v27  ;;  %v2002_v54 = vadd.f32 %v6386_v57, %v1954_v41  ;;  %v1872_v31 = vpop.permute.xlu0 %1871  ;;  %v1858_v33 = vpop.permute.xlu1 %1857  ;;  %v578_v36 = vmul.f32 %v9347_v20, %v9342_v9  ;;  %v579_v49 = vmul.f32 %v9347_v20, %v9344_v24  ;;  %v9348_v27 = vld [vmem:[#allocation21_spill] sm:$0xff] }
 0x234   : > { %v1904_v26 = vsel %vm1885_vm7, %v1872_v31, %v1874_v4  ;;  %v1898_v55 = vsel %vm1885_vm7, %v1858_v33, %v1860_v39  ;;  %v384_v41 = vmul.f32 %v9348_v27, %v9342_v9  ;;  %v9350_v31 = vld [vmem:[#allocation25_spill] sm:$0xff] }
 0x235   : > { %v2025_v42 = vmax.f32 %v2001_v5, 0.0  ;;  %v2026_v60 = vmax.f32 %v2002_v54, 0.0  ;;  %v1952_v51 = vadd.f32 %v1904_v26, %v1751_v15  ;;  %v1946_v0 = vadd.f32 %v1898_v55, %v1745_v12  ;;  %v9349_v12 = vld [vmem:[#allocation16_spill] sm:$0xff] }
 0x236   : > { %v385_v15 = vmul.f32 %v9348_v27, %v9344_v24  ;;  %v391_v5 = vmul.f32 %v9349_v12, %v9342_v9  ;;  %v392_v54 = vmul.f32 %v9349_v12, %v9344_v24  ;;  %v772_v33 = vmul.f32 %v9350_v31, %v9342_v9 }
 0x237   : > { %v6594_v62 = vpack.c.bf16 %v2025_v42, %v2019_v1  ;;  %v6596_v43 = vpack.c.bf16 %v2026_v60, %v2020_v22  ;;  %v2000_v38 = vadd.f32 %v6386_v57, %v1952_v51  ;;  %v1994_v59 = vadd.f32 %v6388_v10, %v1946_v0  ;;  %v9351_v22 = vld [vmem:[#allocation17_spill] sm:$0xff]  ;;  %v9352_v42 = vld [vmem:[#allocation18_spill] sm:$0xff]  ;;  %v9353_v0 = vld [vmem:[#allocation23_spill] sm:$0xff] }
 0x238   : > { %v773_v1 = vmul.f32 %v9350_v31, %v9344_v24  ;;  %v779_v26 = vmul.f32 %v9351_v22, %v9342_v9  ;;  %v780_v55 = vmul.f32 %v9351_v22, %v9344_v24  ;;  %v585_v60 = vmul.f32 %v9352_v42, %v9342_v9 }
 0x239   : > { %2050 = vst [vmem:[#allocation2 + $0x38] sm:$0xff] %v6594_v62  ;;  %2051 = vst [vmem:[#allocation2 + $0x40] sm:$0xff] %v6596_v43  ;;  %v2024_v48 = vmax.f32 %v2000_v38, 0.0  ;;  %v2018_v4 = vmax.f32 %v1994_v59, 0.0  ;;  %2081 = vrot.lane.b32.xlu0 %v6594_v62, %s5406_s29  ;;  %2083 = vrot.lane.b32.xlu1 %v6596_v43, %s5406_s29  ;;  %v586_v51 = vmul.f32 %v9352_v42, %v9344_v24 }
 0x23a   : > { %2738 = vmatprep.subr.bf16.mxu0 %v6594_v62  ;;  %v592_v38 = vmul.f32 %v9353_v0, %v9342_v9  ;;  %v593_v59 = vmul.f32 %v9353_v0, %v9344_v24 }
 0x23b   : > { %v6607_v39 = vpack.c.bf16 %v2024_v48, %v2018_v4  ;;  %v9354_v48 = vld [vmem:[#allocation19_spill] sm:$0xff] }
 0x23c   : > { %v973_v4 = vmul.f32 %v9354_v48, %v9342_v9 }
 0x23d   : > { %2049 = vst [vmem:[#allocation2 + $0x30] sm:$0xff] %v6607_v39  ;;  %2079 = vrot.lane.b32.xlu0 %v6607_v39, %s5406_s29  ;;  %2128 = vrot.lane.b32.xlu1 %v6402_v21, %s5407_s30 }
 0x23e   : > { %2739 = vmatpush1.bf16.msra.mxu0 %v6607_v39 }
 0x241   : > { %2130 = vrot.lane.b32.xlu0 %v6404_v46, %s5407_s30  ;;  %2126 = vrot.lane.b32.xlu1 %v6462_v50, %s5407_s30 }
 0x245   : > { %430 = vrot.lane.b32.xlu0 %v370_v29, %s5406_s29  ;;  %432 = vrot.lane.b32.xlu1 %v371_v6, %s5406_s29  ;;  %v974_v29 = vmul.f32 %v9354_v48, %v9344_v24  ;;  %v9355_v6 = vld [vmem:[#allocation20_spill] sm:$0xff] }
 0x249   : > { %444 = vrot.lane.b32.xlu0 %v377_v61, %s5406_s29  ;;  %446 = vrot.lane.b32.xlu1 %v378_v35, %s5406_s29  ;;  %v980_v61 = vmul.f32 %v9355_v6, %v9342_v9  ;;  %v981_v35 = vmul.f32 %v9355_v6, %v9344_v24 }
 0x24d   : > { %2140 = vrot.lane.b32.xlu0 %v6594_v62, %s5407_s30  ;;  %2142 = vrot.lane.b32.xlu1 %v6596_v43, %s5407_s30 }
 0x251   : > { %2138 = vrot.lane.b32.xlu0 %v6607_v39, %s5407_s30  ;;  %631 = vrot.lane.b32.xlu1 %v571_v47, %s5407_s30  ;;  %v9356_v47 = vld [vmem:[#allocation31_spill] sm:$0xff] }
 0x255   : > { %633 = vrot.lane.b32.xlu0 %v572_v11, %s5407_s30  ;;  %645 = vrot.lane.b32.xlu1 %v578_v36, %s5407_s30  ;;  %v786_v11 = vmul.f32 %v9356_v47, %v9342_v9  ;;  %v787_v36 = vmul.f32 %v9356_v47, %v9344_v24 }
 0x259   : > { %647 = vrot.lane.b32.xlu0 %v579_v49, %s5407_s30  ;;  %458 = vrot.lane.b32.xlu1 %v384_v41, %s5406_s29 }
 0x25d   : > { %460 = vrot.lane.b32.xlu0 %v385_v15, %s5406_s29  ;;  %472 = vrot.lane.b32.xlu1 %v391_v5, %s5406_s29  ;;  %v9358_v15 = vld [vmem:[#allocation22_spill] sm:$0xff] }
 0x25e   : > { %v793_v5 = vmul.f32 %v9358_v15, %v9342_v9 }
 0x261   : > { %474 = vrot.lane.b32.xlu0 %v392_v54, %s5406_s29  ;;  %832 = vrot.lane.b32.xlu1 %v772_v33, %s5408_s7  ;;  %v794_v54 = vmul.f32 %v9358_v15, %v9344_v24 }
 0x265   : > { %834 = vrot.lane.b32.xlu0 %v773_v1, %s5408_s7  ;;  %846 = vrot.lane.b32.xlu1 %v779_v26, %s5408_s7  ;;  %v9359_v1 = vld [vmem:[#allocation24_spill] sm:$0xff] }
 0x266   : > { %v1174_v26 = vmul.f32 %v9359_v1, %v9342_v9 }
 0x269   : > { %848 = vrot.lane.b32.xlu0 %v780_v55, %s5408_s7  ;;  %2187 = vrot.lane.b32.xlu1 %v6402_v21, %s5408_s7  ;;  %v1175_v55 = vmul.f32 %v9359_v1, %v9344_v24 }
 0x26d   : > { %2189 = vrot.lane.b32.xlu0 %v6404_v46, %s5408_s7  ;;  %2185 = vrot.lane.b32.xlu1 %v6462_v50, %s5408_s7 }
 0x271   : > { %659 = vrot.lane.b32.xlu0 %v585_v60, %s5407_s30  ;;  %661 = vrot.lane.b32.xlu1 %v586_v51, %s5407_s30  ;;  %v9360_v60 = vld [vmem:[#allocation33_spill] sm:$0xff] }
 0x272   : > { %v1181_v51 = vmul.f32 %v9360_v60, %v9342_v9 }
 0x275   : > { %673 = vrot.lane.b32.xlu0 %v592_v38, %s5407_s30  ;;  %675 = vrot.lane.b32.xlu1 %v593_v59, %s5407_s30  ;;  %v1182_v38 = vmul.f32 %v9360_v60, %v9344_v24 }
 0x279   : > { %1033 = vrot.lane.b32.xlu0 %v973_v4, %s5409_s8  ;;  %1035 = vrot.lane.b32.xlu1 %v974_v29, %s5409_s8  ;;  %v9361_v29 = vld [vmem:[#allocation26_spill] sm:$0xff] }
 0x27d   : > { %1047 = vrot.lane.b32.xlu0 %v980_v61, %s5409_s8  ;;  %1049 = vrot.lane.b32.xlu1 %v981_v35, %s5409_s8  ;;  %v987_v61 = vmul.f32 %v9361_v29, %v9342_v9  ;;  %v988_v35 = vmul.f32 %v9361_v29, %v9344_v24 }
 0x281   : > { %860 = vrot.lane.b32.xlu0 %v786_v11, %s5408_s7  ;;  %862 = vrot.lane.b32.xlu1 %v787_v36, %s5408_s7  ;;  %v9362_v11 = vld [vmem:[#allocation27_spill] sm:$0xff] }
 0x282   : > { %v994_v36 = vmul.f32 %v9362_v11, %v9342_v9 }
 0x283   : > { %v6709_v49 = vpop.permute.xlu0 %2071  ;;  %v2070_v41 = vpop.permute.xlu1 %2069 }
 0x284   : > { %9357 = vst [vmem:[#allocation104_spill] sm:$0xff] %v6709_v49  ;;  %v2093_v33 = vsel %vm478_vm0, %v2070_v41, %v6709_v49  ;;  %v9369_v49 = vld [vmem:[#allocation32_spill] sm:$0xff] }
 0x285   : > { %874 = vrot.lane.b32.xlu0 %v793_v5, %s5408_s7  ;;  %876 = vrot.lane.b32.xlu1 %v794_v54, %s5408_s7  ;;  %v9363_v5 = vld [vmem:[#allocation37_spill] sm:$0xff]  ;;  %v1583_v57 = vmul.f32 %v9369_v49, %v9342_v9 }
 0x286   : > { %2740 = vmatprep.subr.bf16.mxu0 %v2093_v33  ;;  %v1375_v54 = vmul.f32 %v9363_v5, %v9342_v9  ;;  %v1376_v33 = vmul.f32 %v9363_v5, %v9344_v24 }
 0x289   : > { %1234 = vrot.lane.b32.xlu0 %v1174_v26, %s5410_s9  ;;  %1236 = vrot.lane.b32.xlu1 %v1175_v55, %s5410_s9  ;;  %v9364_v26 = vld [vmem:[#allocation28_spill] sm:$0xff] }
 0x28a   : > { %v1382_v55 = vmul.f32 %v9364_v26, %v9342_v9 }
 0x28d   : > { %1248 = vrot.lane.b32.xlu0 %v1181_v51, %s5410_s9  ;;  %1250 = vrot.lane.b32.xlu1 %v1182_v38, %s5410_s9  ;;  %v1383_v51 = vmul.f32 %v9364_v26, %v9344_v24  ;;  %v9365_v38 = vld [vmem:[#allocation29_spill] sm:$0xff] }
 0x28f   : > { %v2068_v59 = vpop.permute.xlu1 %2067 }
 0x290   : > { %v2092_v4 = vsel %vm478_vm0, %v2068_v59, %v2070_v41  ;;  %v995_v41 = vmul.f32 %v9362_v11, %v9344_v24  ;;  %v1188_v59 = vmul.f32 %v9365_v38, %v9342_v9 }
 0x291   : > { %2199 = vrot.lane.b32.xlu0 %v6594_v62, %s5408_s7  ;;  %2201 = vrot.lane.b32.xlu1 %v6596_v43, %s5408_s7 }
 0x292   : > { %2741 = vmatpush1.bf16.msra.mxu0 %v2092_v4  ;;  %v1189_v4 = vmul.f32 %v9365_v38, %v9344_v24 }
 0x295   : > { %2197 = vrot.lane.b32.xlu0 %v6607_v39, %s5408_s7  ;;  %1061 = vrot.lane.b32.xlu1 %v987_v61, %s5409_s8  ;;  %v9366_v61 = vld [vmem:[#allocation35_spill] sm:$0xff] }
 0x299   : > { %1063 = vrot.lane.b32.xlu0 %v988_v35, %s5409_s8  ;;  %1075 = vrot.lane.b32.xlu1 %v994_v36, %s5409_s8  ;;  %v1195_v35 = vmul.f32 %v9366_v61, %v9342_v9 }
 0x29d   : > { %1077 = vrot.lane.b32.xlu0 %v995_v41, %s5409_s8  ;;  %1435 = vrot.lane.b32.xlu1 %v1375_v54, %s5411_s10  ;;  %v1196_v54 = vmul.f32 %v9366_v61, %v9344_v24 }
 0x2a1   : > { %1437 = vrot.lane.b32.xlu0 %v1376_v33, %s5411_s10  ;;  %1449 = vrot.lane.b32.xlu1 %v1382_v55, %s5411_s10  ;;  %v9368_v33 = vld [vmem:[#allocation30_spill] sm:$0xff] }
 0x2a2   : > { %v1576_v55 = vmul.f32 %v9368_v33, %v9342_v9 }
 0x2a5   : > { %1451 = vrot.lane.b32.xlu0 %v1383_v51, %s5411_s10  ;;  %1262 = vrot.lane.b32.xlu1 %v1188_v59, %s5410_s9 }
 0x2a9   : > { %1264 = vrot.lane.b32.xlu0 %v1189_v4, %s5410_s9  ;;  %1276 = vrot.lane.b32.xlu1 %v1195_v35, %s5410_s9  ;;  %v1577_v35 = vmul.f32 %v9368_v33, %v9344_v24 }
 0x2ab   : > { %v2082_v36 = vpop.permute.xlu0 %2081  ;;  %v6771_v41 = vpop.permute.xlu1 %2083 }
 0x2ac   : > { %9367 = vst [vmem:[#allocation105_spill] sm:$0xff] %v6771_v41  ;;  %v2098_v51 = vsel %vm478_vm0, %v2082_v36, %v6771_v41 }
 0x2ad   : > { %1278 = vrot.lane.b32.xlu0 %v1196_v54, %s5410_s9  ;;  %1636 = vrot.lane.b32.xlu1 %v1576_v55, %s5412_s15  ;;  %v1584_v55 = vmul.f32 %v9369_v49, %v9344_v24 }
 0x2ae   : > { %2742 = vmatprep.subr.bf16.mxu0 %v2098_v51 }
 0x2af   : > { %v2080_v59 = vpop.permute.xlu0 %2079  ;;  %v2129_v4 = vpop.permute.xlu1 %2128 }
 0x2b0   : > { %v2097_v10 = vsel %vm478_vm0, %v2080_v59, %v2082_v36 }
 0x2b1   : > { %1638 = vrot.lane.b32.xlu0 %v1577_v35, %s5412_s15  ;;  %1650 = vrot.lane.b32.xlu1 %v1583_v57, %s5412_s15 }
 0x2b2   : > { %2743 = vmatpush1.bf16.msra.mxu0 %v2097_v10 }
 0x2b3   : > { %v6788_v41 = vpop.permute.xlu0 %2130  ;;  %v2127_v54 = vpop.permute.xlu1 %2126 }
 0x2b4   : > { %9370 = vst [vmem:[#allocation10_spill] sm:$0xff] %v6788_v41  ;;  %v2152_v51 = vsel %vm679_vm1, %v2129_v4, %v6788_v41  ;;  %v2151_v34 = vsel %vm679_vm1, %v2127_v54, %v2129_v4  ;;  %v9372_v4 = vld [vmem:[#allocation39_spill] sm:$0xff] }
 0x2b5   : > { %1652 = vrot.lane.b32.xlu0 %v1584_v55, %s5412_s15  ;;  %2246 = vrot.lane.b32.xlu1 %v6402_v21, %s5409_s8  ;;  %v1389_v35 = vmul.f32 %v9372_v4, %v9342_v9  ;;  %v1390_v54 = vmul.f32 %v9372_v4, %v9344_v24 }
 0x2b6   : > { %2744 = vmatprep.subr.bf16.mxu0 %v2152_v51  ;;  %v9374_v51 = vld [vmem:[#allocation34_spill] sm:$0xff] }
 0x2b7   : > { %v6798_v36 = vpop.permute.xlu0 %430  ;;  %v6800_v57 = vpop.permute.xlu1 %432  ;;  %2745 = vmatpush1.bf16.msra.mxu0 %v2151_v34  ;;  %v1396_v41 = vmul.f32 %v9374_v51, %v9342_v9  ;;  %v1397_v3 = vmul.f32 %v9374_v51, %v9344_v24 }
 0x2b8   : > { %9371 = vst [vmem:[#allocation9_spill] sm:$0xff] %v6800_v57 }
 0x2b9   : > { %2248 = vrot.lane.b32.xlu0 %v6404_v46, %s5409_s8  ;;  %2244 = vrot.lane.b32.xlu1 %v6462_v50, %s5409_s8 }
 0x2bb   : > { %v6806_v10 = vpop.permute.xlu0 %444  ;;  %v6808_v59 = vpop.permute.xlu1 %446 }
 0x2bd   : > { %1463 = vrot.lane.b32.xlu0 %v1389_v35, %s5411_s10  ;;  %1465 = vrot.lane.b32.xlu1 %v1390_v54, %s5411_s10  ;;  %v9375_v54 = vld [vmem:[#allocation36_spill] sm:$0xff] }
 0x2be   : > { %v1777_v25 = vmul.f32 %v9375_v54, %v9342_v9  ;;  %v1778_v63 = vmul.f32 %v9375_v54, %v9344_v24 }
 0x2bf   : > { %v2141_v34 = vpop.permute.xlu0 %2140  ;;  %v6816_v55 = vpop.permute.xlu1 %2142 }
 0x2c0   : > { %9373 = vst [vmem:[#allocation50_spill] sm:$0xff] %v6816_v55  ;;  %v2157_v18 = vsel %vm679_vm1, %v2141_v34, %v6816_v55 }
 0x2c1   : > { %1477 = vrot.lane.b32.xlu0 %v1396_v41, %s5411_s10  ;;  %1479 = vrot.lane.b32.xlu1 %v1397_v3, %s5411_s10 }
 0x2c2   : > { %2746 = vmatprep.subr.bf16.mxu0 %v2157_v18  ;;  %v9376_v18 = vld [vmem:[#allocation41_spill] sm:$0xff] }
 0x2c3   : > { %v2139_v35 = vpop.permute.xlu0 %2138  ;;  %v6826_v28 = vpop.permute.xlu1 %631  ;;  %v1784_v55 = vmul.f32 %v9376_v18, %v9342_v9  ;;  %v1785_v23 = vmul.f32 %v9376_v18, %v9344_v24 }
 0x2c4   : > { %v2156_v17 = vsel %vm679_vm1, %v2139_v35, %v2141_v34 }
 0x2c5   : > { %1837 = vrot.lane.b32.xlu0 %v1777_v25, %s5413_s16  ;;  %1839 = vrot.lane.b32.xlu1 %v1778_v63, %s5413_s16 }
 0x2c6   : > { %2747 = vmatpush1.bf16.msra.mxu0 %v2156_v17  ;;  %v9378_v17 = vld [vmem:[#allocation38_spill] sm:$0xff] }
 0x2c7   : > { %v6835_v41 = vpop.permute.xlu0 %633  ;;  %v6837_v3 = vpop.permute.xlu1 %645  ;;  %v1590_v63 = vmul.f32 %v9378_v17, %v9342_v9  ;;  %v1591_v35 = vmul.f32 %v9378_v17, %v9344_v24 }
 0x2c9   : > { %1851 = vrot.lane.b32.xlu0 %v1784_v55, %s5413_s16  ;;  %1853 = vrot.lane.b32.xlu1 %v1785_v23, %s5413_s16  ;;  %v9381_v23 = vld [vmem:[#allocation40_spill] sm:$0xff] }
 0x2ca   : > { %v1597_v55 = vmul.f32 %v9381_v23, %v9342_v9 }
 0x2cb   : > { %v6845_v34 = vpop.permute.xlu0 %647  ;;  %v6847_v25 = vpop.permute.xlu1 %458 }
 0x2cc   : > { %9377 = vst [vmem:[#allocation51_spill] sm:$0xff] %v6847_v25  ;;  %v1598_v25 = vmul.f32 %v9381_v23, %v9344_v24  ;;  %v9383_v23 = vld [vmem:[#allocation43_spill] sm:$0xff] }
 0x2cd   : > { %1664 = vrot.lane.b32.xlu0 %v1590_v63, %s5412_s15  ;;  %1666 = vrot.lane.b32.xlu1 %v1591_v35, %s5412_s15 }
 0x2cf   : > { %v6855_v44 = vpop.permute.xlu0 %460  ;;  %v6857_v13 = vpop.permute.xlu1 %472 }
 0x2d0   : > { %9379 = vst [vmem:[#allocation55_spill] sm:$0xff] %v6855_v44  ;;  %9380 = vst [vmem:[#allocation52_spill] sm:$0xff] %v6857_v13  ;;  %v1791_v13 = vmul.f32 %v9383_v23, %v9342_v9  ;;  %v9384_v44 = vld [vmem:[#allocation42_spill] sm:$0xff] }
 0x2d1   : > { %1678 = vrot.lane.b32.xlu0 %v1597_v55, %s5412_s15  ;;  %1680 = vrot.lane.b32.xlu1 %v1598_v25, %s5412_s15  ;;  %v1798_v54 = vmul.f32 %v9384_v44, %v9342_v9  ;;  %v1799_v40 = vmul.f32 %v9384_v44, %v9344_v24  ;;  %v9394_v44 = vld [vmem:[#allocation8_spill] sm:$0xff] }
 0x2d2   : > { %v379_v58 = vmul.f32 %v9394_v44, %v9345_v52 }
 0x2d3   : > { %v6865_v32 = vpop.permute.xlu0 %474  ;;  %v6867_v17 = vpop.permute.xlu1 %832 }
 0x2d4   : > { %9382 = vst [vmem:[#allocation57_spill] sm:$0xff] %v6865_v32  ;;  %v1792_v32 = vmul.f32 %v9383_v23, %v9344_v24 }
 0x2d5   : > { %2258 = vrot.lane.b32.xlu0 %v6594_v62, %s5409_s8  ;;  %2260 = vrot.lane.b32.xlu1 %v6596_v43, %s5409_s8 }
 0x2d7   : > { %v6873_v63 = vpop.permute.xlu0 %834  ;;  %v6875_v35 = vpop.permute.xlu1 %846 }
 0x2d9   : > { %2256 = vrot.lane.b32.xlu0 %v6607_v39, %s5409_s8  ;;  %1865 = vrot.lane.b32.xlu1 %v1791_v13, %s5413_s16 }
 0x2db   : > { %v6882_v25 = vpop.permute.xlu0 %848  ;;  %v2188_v55 = vpop.permute.xlu1 %2187 }
 0x2dd   : > { %1867 = vrot.lane.b32.xlu0 %v1792_v32, %s5413_s16  ;;  %1879 = vrot.lane.b32.xlu1 %v1798_v54, %s5413_s16 }
 0x2df   : > { %v6890_v51 = vpop.permute.xlu0 %2189  ;;  %v2186_v56 = vpop.permute.xlu1 %2185 }
 0x2e0   : > { %9385 = vst [vmem:[#allocation58_spill] sm:$0xff] %v6890_v51  ;;  %v2211_v13 = vsel %vm880_vm2, %v2188_v55, %v6890_v51  ;;  %v2210_v49 = vsel %vm880_vm2, %v2186_v56, %v2188_v55 }
 0x2e1   : > { %1881 = vrot.lane.b32.xlu0 %v1799_v40, %s5413_s16  ;;  %2305 = vrot.lane.b32.xlu1 %v6402_v21, %s5410_s9 }
 0x2e2   : > { %2748 = vmatprep.subr.bf16.mxu0 %v2211_v13 }
 0x2e3   : > { %v6900_v32 = vpop.permute.xlu0 %659  ;;  %v6902_v54 = vpop.permute.xlu1 %661  ;;  %2749 = vmatpush1.bf16.msra.mxu0 %v2210_v49 }
 0x2e4   : > { %9386 = vst [vmem:[#allocation59_spill] sm:$0xff] %v6900_v32  ;;  %9387 = vst [vmem:[#allocation60_spill] sm:$0xff] %v6902_v54  ;;  %v372_v32 = vmul.f32 %v9394_v44, %v9343_v7 }
 0x2e5   : > { %2307 = vrot.lane.b32.xlu0 %v6404_v46, %s5410_s9  ;;  %2303 = vrot.lane.b32.xlu1 %v6462_v50, %s5410_s9 }
 0x2e7   : > { %v6908_v51 = vpop.permute.xlu0 %673  ;;  %v6910_v56 = vpop.permute.xlu1 %675 }
 0x2e8   : > { %9388 = vst [vmem:[#allocation64_spill] sm:$0xff] %v6908_v51  ;;  %9389 = vst [vmem:[#allocation61_spill] sm:$0xff] %v6910_v56 }
 0x2e9   : > { %2317 = vrot.lane.b32.xlu0 %v6594_v62, %s5410_s9  ;;  %2319 = vrot.lane.b32.xlu1 %v6596_v43, %s5410_s9 }
 0x2eb   : > { %v6916_v40 = vpop.permute.xlu0 %1033  ;;  %v6918_v55 = vpop.permute.xlu1 %1035 }
 0x2ed   : > { %2315 = vrot.lane.b32.xlu0 %v6607_v39, %s5410_s9  ;;  %2364 = vrot.lane.b32.xlu1 %v6402_v21, %s5411_s10 }
 0x2ef   : > { %v6924_v49 = vpop.permute.xlu0 %1047  ;;  %v6926_v13 = vpop.permute.xlu1 %1049 }
 0x2f1   : > { %2366 = vrot.lane.b32.xlu0 %v6404_v46, %s5411_s10  ;;  %2362 = vrot.lane.b32.xlu1 %v6462_v50, %s5411_s10 }
 0x2f3   : > { %v6932_v24 = vpop.permute.xlu0 %860  ;;  %v6934_v56 = vpop.permute.xlu1 %862 }
 0x2f4   : > { %9390 = vst [vmem:[#allocation65_spill] sm:$0xff] %v6932_v24  ;;  %9391 = vst [vmem:[#allocation66_spill] sm:$0xff] %v6934_v56 }
 0x2f5   : > { %2376 = vrot.lane.b32.xlu0 %v6594_v62, %s5411_s10  ;;  %2378 = vrot.lane.b32.xlu1 %v6596_v43, %s5411_s10 }
 0x2f7   : > { %v6940_v51 = vpop.permute.xlu0 %874  ;;  %v6942_v54 = vpop.permute.xlu1 %876 }
 0x2f8   : > { %9392 = vst [vmem:[#allocation69_spill] sm:$0xff] %v6940_v51  ;;  %9393 = vst [vmem:[#allocation70_spill] sm:$0xff] %v6942_v54  ;;  %v573_v51 = vmul.f32 %v9346_v19, %v9394_v44 }
 0x2f9   : > { %2374 = vrot.lane.b32.xlu0 %v6607_v39, %s5411_s10  ;;  %434 = vrot.lane.b32.xlu1 %v372_v32, %s5406_s29 }
 0x2fb   : > { %v6949_v24 = vpop.permute.xlu0 %1234  ;;  %v6951_v56 = vpop.permute.xlu1 %1236 }
 0x2fd   : > { %448 = vrot.lane.b32.xlu0 %v379_v58, %s5406_s29  ;;  %2423 = vrot.lane.b32.xlu1 %v6402_v21, %s5412_s15  ;;  %v580_v58 = vmul.f32 %v9347_v20, %v9394_v44 }
 0x2ff   : > { %v6958_v54 = vpop.permute.xlu0 %1248  ;;  %v6960_v7 = vpop.permute.xlu1 %1250 }
 0x301   : > { %2425 = vrot.lane.b32.xlu0 %v6404_v46, %s5412_s15  ;;  %635 = vrot.lane.b32.xlu1 %v573_v51, %s5407_s30  ;;  %v386_v46 = vmul.f32 %v9394_v44, %v9348_v27  ;;  %v393_v51 = vmul.f32 %v9394_v44, %v9349_v12  ;;  %v781_v27 = vmul.f32 %v9351_v22, %v9394_v44 }
 0x302   : > { %v587_v22 = vmul.f32 %v9352_v42, %v9394_v44 }
 0x303   : > { %v2200_v32 = vpop.permute.xlu0 %2199  ;;  %v6967_v37 = vpop.permute.xlu1 %2201 }
 0x304   : > { %9395 = vst [vmem:[#allocation74_spill] sm:$0xff] %v6967_v37  ;;  %v2216_v21 = vsel %vm880_vm2, %v2200_v32, %v6967_v37 }
 0x305   : > { %649 = vrot.lane.b32.xlu0 %v580_v58, %s5407_s30  ;;  %2421 = vrot.lane.b32.xlu1 %v6462_v50, %s5412_s15 }
 0x306   : > { %2750 = vmatprep.subr.bf16.mxu0 %v2216_v21  ;;  %v774_v21 = vmul.f32 %v9350_v31, %v9394_v44 }
 0x307   : > { %v2198_v52 = vpop.permute.xlu0 %2197  ;;  %v6976_v19 = vpop.permute.xlu1 %1061 }
 0x308   : > { %v2215_v20 = vsel %vm880_vm2, %v2198_v52, %v2200_v32 }
 0x309   : > { %462 = vrot.lane.b32.xlu0 %v386_v46, %s5406_s29  ;;  %476 = vrot.lane.b32.xlu1 %v393_v51, %s5406_s29  ;;  %v594_v46 = vmul.f32 %v9353_v0, %v9394_v44 }
 0x30a   : > { %2751 = vmatpush1.bf16.msra.mxu0 %v2215_v20  ;;  %v982_v20 = vmul.f32 %v9355_v6, %v9394_v44  ;;  %v795_v6 = vmul.f32 %v9358_v15, %v9394_v44  ;;  %v1377_v15 = vmul.f32 %v9363_v5, %v9394_v44  ;;  %v9400_v5 = vld [vmem:[#allocation45_spill] sm:$0xff] }
 0x30b   : > { %v6985_v58 = vpop.permute.xlu0 %1063  ;;  %v6987_v50 = vpop.permute.xlu1 %1075 }
 0x30d   : > { %836 = vrot.lane.b32.xlu0 %v774_v21, %s5408_s7  ;;  %850 = vrot.lane.b32.xlu1 %v781_v27, %s5408_s7  ;;  %v788_v21 = vmul.f32 %v9356_v47, %v9394_v44 }
 0x30f   : > { %v6995_v12 = vpop.permute.xlu0 %1077  ;;  %v6997_v32 = vpop.permute.xlu1 %1435 }
 0x310   : > { %9396 = vst [vmem:[#allocation71_spill] sm:$0xff] %v6995_v12 }
 0x311   : > { %2435 = vrot.lane.b32.xlu0 %v6594_v62, %s5412_s15  ;;  %2437 = vrot.lane.b32.xlu1 %v6596_v43, %s5412_s15  ;;  %v975_v43 = vmul.f32 %v9354_v48, %v9394_v44 }
 0x313   : > { %v7003_v52 = vpop.permute.xlu0 %1437  ;;  %v7005_v31 = vpop.permute.xlu1 %1449 }
 0x315   : > { %663 = vrot.lane.b32.xlu0 %v587_v22, %s5407_s30  ;;  %677 = vrot.lane.b32.xlu1 %v594_v46, %s5407_s30  ;;  %v1176_v22 = vmul.f32 %v9359_v1, %v9394_v44  ;;  %v7054_v1 = vmul.f32 %v9366_v61, %v9394_v44  ;;  %v9402_v61 = vld [vmem:[#allocation48_spill] sm:$0xff] }
 0x317   : > { %v7013_v51 = vpop.permute.xlu0 %1451  ;;  %v7015_v62 = vpop.permute.xlu1 %1262 }
 0x319   : > { %1037 = vrot.lane.b32.xlu0 %v975_v43, %s5409_s8  ;;  %1051 = vrot.lane.b32.xlu1 %v982_v20, %s5409_s8  ;;  %v989_v43 = vmul.f32 %v9361_v29, %v9394_v44  ;;  %v996_v20 = vmul.f32 %v9362_v11, %v9394_v44  ;;  %v7066_v29 = vmul.f32 %v9376_v18, %v9394_v44 }
 0x31a   : > { %v7077_v11 = vmul.f32 %v9383_v23, %v9394_v44  ;;  %v483_v18 = vsel %vm478_vm0, %v6798_v36, %v6800_v57  ;;  %v9403_v23 = vld [vmem:[#allocation49_spill] sm:$0xff]  ;;  %v1578_v57 = vmul.f32 %v9368_v33, %v9394_v44  ;;  %v689_v33 = vsel %vm679_vm1, %v5876_v2, %v6837_v3 }
 0x31b   : > { %v7023_v42 = vpop.permute.xlu0 %1264  ;;  %v7025_v0 = vpop.permute.xlu1 %1276  ;;  %v890_v2 = vsel %vm880_vm2, %v5946_v8, %v6875_v35  ;;  %v1085_v8 = vsel %vm1081_vm3, %v6018_v16, %v6916_v40  ;;  %v1092_v16 = vsel %vm1081_vm3, %v6924_v49, %v6926_v13 }
 0x31c   : > { %9397 = vst [vmem:[#allocation76_spill] sm:$0xff] %v7023_v42  ;;  %9398 = vst [vmem:[#allocation80_spill] sm:$0xff] %v7025_v0 }
 0x31d   : > { %2433 = vrot.lane.b32.xlu0 %v6607_v39, %s5412_s15  ;;  %864 = vrot.lane.b32.xlu1 %v788_v21, %s5408_s7  ;;  %v1183_v39 = vmul.f32 %v9360_v60, %v9394_v44  ;;  %v7062_v60 = vmul.f32 %v9372_v4, %v9394_v44  ;;  %v9401_v21 = vld [vmem:[#allocation13_spill] sm:$0xff]  ;;  %v325_v4 = vmul.f32 %v9342_v9, %v9400_v5 }
 0x31f   : > { %v7032_v48 = vpop.permute.xlu0 %1278  ;;  %v7034_v27 = vpop.permute.xlu1 %1636 }
 0x320   : > { %9399 = vst [vmem:[#allocation81_spill] sm:$0xff] %v7032_v48  ;;  %v488_v48 = vsel %vm478_vm0, %v9403_v23, %v6806_v10  ;;  %v531_v23 = vadd.f32 %v483_v18, %v325_v4 }
 0x321   : > { %878 = vrot.lane.b32.xlu0 %v795_v6, %s5408_s7  ;;  %1238 = vrot.lane.b32.xlu1 %v1176_v22, %s5410_s9  ;;  %v324_v6 = vmul.f32 %v9401_v21, %v9400_v5  ;;  %v482_v22 = vsel %vm478_vm0, %v9402_v61, %v6798_v36  ;;  %v7090_v61 = vmul.f32 %v9342_v9, %v9292_v53 }
 0x322   : > { %v489_v5 = vsel %vm478_vm0, %v6806_v10, %v6808_v59  ;;  %v1190_v36 = vmul.f32 %v9365_v38, %v9394_v44  ;;  %v683_v10 = vsel %vm679_vm1, %v5868_v45, %v6826_v28  ;;  %v684_v38 = vsel %vm679_vm1, %v6826_v28, %v6835_v41 }
 0x323   : > { %v7042_v47 = vpop.permute.xlu0 %1638  ;;  %v7044_v46 = vpop.permute.xlu1 %1650  ;;  %v530_v0 = vadd.f32 %v482_v22, %v324_v6  ;;  %v885_v28 = vsel %vm880_vm2, %v6867_v17, %v6873_v63 }
 0x325   : > { %1252 = vrot.lane.b32.xlu0 %v1183_v39, %s5410_s9  ;;  %1065 = vrot.lane.b32.xlu1 %v989_v43, %s5409_s8  ;;  %v1384_v39 = vmul.f32 %v9364_v26, %v9394_v44  ;;  %v7086_v43 = vmul.f32 %v9401_v21, %v9292_v53  ;;  %v9404_v53 = vld [vmem:[#allocation44_spill] sm:$0xff] }
 0x326   : > { %v330_v12 = vmul.f32 %v9401_v21, %v9404_v53  ;;  %v331_v42 = vmul.f32 %v9342_v9, %v9404_v53 }
 0x327   : > { %v7092_v26 = vpop.permute.xlu0 %1652  ;;  %v2247_v37 = vpop.permute.xlu1 %2246 }
 0x328   : > { %v536_v6 = vadd.f32 %v488_v48, %v330_v12  ;;  %v537_v22 = vadd.f32 %v489_v5, %v331_v42  ;;  %v731_v42 = vadd.f32 %v683_v10, %v530_v0  ;;  %v732_v48 = vadd.f32 %v684_v38, %v531_v23  ;;  %v5205_v0 = vld [vmem:[#allocation3 + $0x4] ss:$12 sps:$4 sm:$0xff]  }
 0x329   : > { %1079 = vrot.lane.b32.xlu0 %v996_v20, %s5409_s8  ;;  %1439 = vrot.lane.b32.xlu1 %v1377_v15, %s5411_s10  ;;  %v690_v20 = vsel %vm679_vm1, %v6837_v3, %v6845_v34  ;;  %v9405_v15 = vld [vmem:[#allocation56_spill] sm:$0xff] }
 0x32a   : > { %v884_v4 = vsel %vm880_vm2, %v9405_v15, %v6867_v17  ;;  %v737_v5 = vadd.f32 %v689_v33, %v536_v6  ;;  %v738_v15 = vadd.f32 %v690_v20, %v537_v22  ;;  %v891_v17 = vsel %vm880_vm2, %v6875_v35, %v6882_v25  ;;  %2768 = vmatprep.mubr.bf16.mxu0 %v5205_v0 }
 0x32b   : > { %v7125_v18 = vpop.permute.xlu0 %2248  ;;  %v2245_v45 = vpop.permute.xlu1 %2244  ;;  %v932_v23 = vadd.f32 %v884_v4, %v731_v42  ;;  %v933_v10 = vadd.f32 %v885_v28, %v732_v48  ;;  %v1287_v33 = vsel %vm1282_vm4, %v6949_v24, %v6951_v56  ;;  %2914 = vmatprep.mubr.bf16.mxu1 %v5205_v0  ;;  %v1293_v48 = vsel %vm1282_vm4, %v6958_v54, %v6960_v7 }
 0x32c   : > { %9406 = vst [vmem:[#allocation77_spill] sm:$0xff] %v7125_v18  ;;  %v2270_v12 = vsel %vm1081_vm3, %v2247_v37, %v7125_v18  ;;  %v2269_v3 = vsel %vm1081_vm3, %v2245_v45, %v2247_v37  ;;  %v1086_v37 = vsel %vm1081_vm3, %v6916_v40, %v6918_v55  ;;  %v1286_v40 = vsel %vm1282_vm4, %v6098_v14, %v6949_v24  ;;  %v9408_v14 = vld [vmem:[#allocation86_spill] sm:$0xff]  ;;  %v9409_v45 = vld [vmem:[#allocation32_spill] sm:$0xff] }
 0x32d   : > { %1453 = vrot.lane.b32.xlu0 %v1384_v39, %s5411_s10  ;;  %1266 = vrot.lane.b32.xlu1 %v1190_v36, %s5410_s9  ;;  %v938_v39 = vadd.f32 %v890_v2, %v737_v5  ;;  %v1091_v36 = vsel %vm1081_vm3, %v6026_v30, %v6924_v49  ;;  %v939_v30 = vadd.f32 %v891_v17, %v738_v15  ;;  %v9407_v49 = vld [vmem:[#allocation75_spill] sm:$0xff]  ;;  %v7463_v18 = vld [vmem:[#allocation3 + $0x18] ss:$12 sps:$4 sm:$0xff]  }
 0x32e   : > { %2752 = vmatprep.subr.bf16.mxu0 %v2270_v12  ;;  %v1133_v6 = vadd.f32 %v1085_v8, %v932_v23  ;;  %v1134_v22 = vadd.f32 %v1086_v37, %v933_v10  ;;  %v1292_v20 = vsel %vm1282_vm4, %v9407_v49, %v6958_v54  ;;  %v1487_v4 = vsel %vm1483_vm5, %v9408_v14, %v6997_v32  ;;  %v9410_v5 = vld [vmem:[#allocation87_spill] sm:$0xff]  ;;  %v9412_v10 = vld [vmem:[#allocation34_spill] sm:$0xff] }
 0x32f   : > { %v7150_v38 = vpop.permute.xlu0 %1463  ;;  %v7152_v35 = vpop.permute.xlu1 %1465  ;;  %2753 = vmatpush1.bf16.msra.mxu0 %v2269_v3  ;;  %v1488_v24 = vsel %vm1483_vm5, %v6997_v32, %v7003_v52  ;;  %v1585_v28 = vmul.f32 %v9409_v45, %v9394_v44  ;;  %v1139_v2 = vadd.f32 %v1091_v36, %v938_v39  ;;  %v1140_v12 = vadd.f32 %v1092_v16, %v939_v30  ;;  %v9411_v32 = vld [vmem:[#allocation100_spill] sm:$0xff] }
 0x330   : > { %v1335_v3 = vadd.f32 %v1287_v33, %v1134_v22  ;;  %v1493_v15 = vsel %vm1483_vm5, %v9410_v5, %v7005_v31  ;;  %v1688_v17 = vsel %vm1684_vm6, %v9411_v32, %v7034_v27  ;;  %v1689_v8 = vsel %vm1684_vm6, %v7034_v27, %v7042_v47  ;;  %v9413_v36 = vld [vmem:[#allocation36_spill] sm:$0xff]  ;;  %v9414_v27 = vld [vmem:[#allocation38_spill] sm:$0xff]  ;;  %v9419_v5 = vld [vmem:[#allocation53_spill] sm:$0xff]  ;;  %9473 = vst [vmem:[#allocation15_spill] sm:$0xff] %v7463_v18 }
 0x331   : > { %1280 = vrot.lane.b32.xlu0 %v7054_v1, %s5410_s9  ;;  %1640 = vrot.lane.b32.xlu1 %v1578_v57, %s5412_s15  ;;  %v1334_v1 = vadd.f32 %v1286_v40, %v1133_v6  ;;  %v1340_v37 = vadd.f32 %v1292_v20, %v1139_v2  ;;  %v1494_v54 = vsel %vm1483_vm5, %v7005_v31, %v7013_v51  ;;  %v9420_v32 = vld [vmem:[#allocation55_spill] sm:$0xff] }
 0x332   : > { %v1536_v23 = vadd.f32 %v1488_v24, %v1335_v3  ;;  %v1398_v39 = vmul.f32 %v9412_v10, %v9394_v44  ;;  %v1779_v16 = vmul.f32 %v9413_v36, %v9394_v44  ;;  %v1592_v40 = vmul.f32 %v9414_v27, %v9394_v44  ;;  %v9425_v27 = vld [vmem:[#allocation62_spill] sm:$0xff] }
 0x333   : > { %v7177_v57 = vpop.permute.xlu0 %1477  ;;  %v7179_v42 = vpop.permute.xlu1 %1479  ;;  %v1535_v0 = vadd.f32 %v1487_v4, %v1334_v1  ;;  %v1341_v33 = vadd.f32 %v1293_v48, %v1140_v12  ;;  %v1541_v30 = vadd.f32 %v1493_v15, %v1340_v37  ;;  %v1695_v14 = vsel %vm1684_vm6, %v7044_v46, %v7092_v26  ;;  %v9416_v4 = vld [vmem:[#allocation110_spill] sm:$0xff]  ;;  %v9418_v48 = vld [vmem:[#allocation51_spill] sm:$0xff] }
 0x334   : > { %v1737_v22 = vadd.f32 %v1689_v8, %v1536_v23  ;;  %v9417_v1 = vld [vmem:[#allocation46_spill] sm:$0xff]  ;;  %v9421_v8 = vld [vmem:[#allocation52_spill] sm:$0xff]  ;;  %v9423_v23 = vld [vmem:[#allocation57_spill] sm:$0xff] }
 0x335   : > { %1654 = vrot.lane.b32.xlu0 %v1585_v28, %s5412_s15  ;;  %1467 = vrot.lane.b32.xlu1 %v7062_v60, %s5411_s10  ;;  %v1736_v6 = vadd.f32 %v1688_v17, %v1535_v0  ;;  %v9415_v60 = vld [vmem:[#allocation101_spill] sm:$0xff]  ;;  %v1542_v28 = vadd.f32 %v1494_v54, %v1341_v33  ;;  %v336_v3 = vmul.f32 %v9401_v21, %v9417_v1  ;;  %v9422_v37 = vld [vmem:[#allocation54_spill] sm:$0xff] }
 0x336   : > { %v1694_v31 = vsel %vm1684_vm6, %v9415_v60, %v7044_v46  ;;  %v494_v46 = vsel %vm478_vm0, %v9419_v5, %v9418_v48  ;;  %v337_v15 = vmul.f32 %v9342_v9, %v9417_v1  ;;  %v495_v17 = vsel %vm478_vm0, %v9418_v48, %v9420_v32  ;;  %v9426_v33 = vld [vmem:[#allocation89_spill] sm:$0xff] }
 0x337   : > { %v1838_v49 = vpop.permute.xlu0 %1837  ;;  %v7205_v20 = vpop.permute.xlu1 %1839  ;;  %v500_v0 = vsel %vm478_vm0, %v9422_v37, %v9421_v8  ;;  %v501_v54 = vsel %vm478_vm0, %v9421_v8, %v9423_v23  ;;  %v1742_v21 = vadd.f32 %v1694_v31, %v1541_v30  ;;  %v1743_v10 = vadd.f32 %v1695_v14, %v1542_v28  ;;  %v9430_v8 = vld [vmem:[#allocation60_spill] sm:$0xff] }
 0x338   : > { %v1889_v24 = vsel %vm1885_vm7, %v9416_v4, %v1838_v49  ;;  %v1890_v45 = vsel %vm1885_vm7, %v1838_v49, %v7205_v20  ;;  %v542_v31 = vadd.f32 %v494_v46, %v336_v3  ;;  %v543_v14 = vadd.f32 %v495_v17, %v337_v15  ;;  %v9431_v37 = vld [vmem:[#allocation88_spill] sm:$0xff]  ;;  %v9433_v17 = vld [vmem:[#allocation63_spill] sm:$0xff] }
 0x339   : > { %v1937_v2 = vadd.f32 %v1889_v24, %v1736_v6  ;;  %v1938_v12 = vadd.f32 %v1890_v45, %v1737_v22  ;;  %1481 = vrot.lane.b32.xlu0 %v1398_v39, %s5411_s10  ;;  %1841 = vrot.lane.b32.xlu1 %v1779_v16, %s5413_s16  ;;  %v9424_v16 = vld [vmem:[#allocation59_spill] sm:$0xff]  ;;  %v9428_v45 = vld [vmem:[#allocation40_spill] sm:$0xff]  ;;  %v548_v5 = vadd.f32 %v500_v0, %v7086_v43  ;;  %v9434_v43 = vld [vmem:[#allocation65_spill] sm:$0xff] }
 0x33a   : > { %v695_v9 = vsel %vm679_vm1, %v9425_v27, %v9424_v16  ;;  %v9427_v22 = vld [vmem:[#allocation111_spill] sm:$0xff]  ;;  %v1599_v28 = vmul.f32 %v9428_v45, %v9394_v44  ;;  %v549_v3 = vadd.f32 %v501_v54, %v7090_v61  ;;  %v9432_v15 = vld [vmem:[#allocation64_spill] sm:$0xff]  ;;  %v9436_v61 = vld [vmem:[#allocation61_spill] sm:$0xff] }
 0x33b   : > { %v1852_v39 = vpop.permute.xlu0 %1851  ;;  %v7235_v36 = vpop.permute.xlu1 %1853  ;;  %v1985_v6 = vadd.f32 %v9426_v33, %v1937_v2  ;;  %v1986_v4 = vadd.f32 %v9426_v33, %v1938_v12  ;;  %v9429_v2 = vld [vmem:[#allocation42_spill] sm:$0xff]  ;;  %v696_v12 = vsel %vm679_vm1, %v9424_v16, %v9430_v8  ;;  %v743_v46 = vadd.f32 %v695_v9, %v542_v31  ;;  %v9435_v0 = vld [vmem:[#allocation72_spill] sm:$0xff]  ;;  %v9439_v31 = vld [vmem:[#allocation69_spill] sm:$0xff] }
 0x33c   : > { %v1895_v49 = vsel %vm1885_vm7, %v9427_v22, %v1852_v39  ;;  %v1896_v60 = vsel %vm1885_vm7, %v1852_v39, %v7235_v36  ;;  %v1800_v48 = vmul.f32 %v9429_v2, %v9394_v44  ;;  %v701_v44 = vsel %vm679_vm1, %v9433_v17, %v9432_v15  ;;  %v9437_v9 = vld [vmem:[#allocation66_spill] sm:$0xff]  ;;  %v9440_v45 = vld [vmem:[#allocation73_spill] sm:$0xff] }
 0x33d   : > { %v1943_v24 = vadd.f32 %v1895_v49, %v1742_v21  ;;  %v1944_v30 = vadd.f32 %v1896_v60, %v1743_v10  ;;  %1855 = vrot.lane.b32.xlu0 %v7066_v29, %s5413_s16  ;;  %1668 = vrot.lane.b32.xlu1 %v1592_v40, %s5412_s15  ;;  %v896_v39 = vsel %vm880_vm2, %v9435_v0, %v9434_v43  ;;  %v2009_v16 = vmax.f32 %v1985_v6, 0.0  ;;  %v9445_v17 = vld [vmem:[#allocation97_spill] sm:$0xff] }
 0x33e   : > { %v2010_v27 = vmax.f32 %v1986_v4, 0.0  ;;  %v744_v60 = vadd.f32 %v696_v12, %v543_v14  ;;  %v702_v54 = vsel %vm679_vm1, %v9432_v15, %v9436_v61  ;;  %v944_v4 = vadd.f32 %v896_v39, %v743_v46 }
 0x33f   : > { %v1991_v21 = vadd.f32 %v9431_v37, %v1943_v24  ;;  %v1992_v29 = vadd.f32 %v9431_v37, %v1944_v30  ;;  %v7259_v10 = vpop.permute.xlu0 %1664  ;;  %v7261_v40 = vpop.permute.xlu1 %1666  ;;  %v897_v24 = vsel %vm880_vm2, %v9434_v43, %v9437_v9  ;;  %v9438_v30 = vld [vmem:[#allocation83_spill] sm:$0xff]  ;;  %v1098_v46 = vsel %vm1081_vm3, %v6976_v19, %v6985_v58 }
 0x340   : > { %v1097_v6 = vsel %vm1081_vm3, %v9438_v30, %v6976_v19  ;;  %v1298_v43 = vsel %vm1282_vm4, %v9445_v17, %v7015_v62  ;;  %v750_v0 = vadd.f32 %v702_v54, %v549_v3  ;;  %v945_v39 = vadd.f32 %v897_v24, %v744_v60  ;;  %v9448_v30 = vld [vmem:[#allocation108_spill] sm:$0xff]  ;;  %v9449_v24 = vld [vmem:[#allocation71_spill] sm:$0xff] }
 0x341   : > { %v2015_v22 = vmax.f32 %v1991_v21, 0.0  ;;  %v2016_v49 = vmax.f32 %v1992_v29, 0.0  ;;  %1682 = vrot.lane.b32.xlu0 %v1599_v28, %s5412_s15  ;;  %1869 = vrot.lane.b32.xlu1 %v7077_v11, %s5413_s16  ;;  %v902_v28 = vsel %vm880_vm2, %v9440_v45, %v9439_v31  ;;  %v749_v21 = vadd.f32 %v701_v44, %v548_v5  ;;  %v9444_v29 = vld [vmem:[#allocation70_spill] sm:$0xff]  ;;  %v9446_v44 = vld [vmem:[#allocation84_spill] sm:$0xff] }
 0x342   : > { %v903_v15 = vsel %vm880_vm2, %v9439_v31, %v9444_v29  ;;  %v1499_v3 = vsel %vm1483_vm5, %v9448_v30, %v7150_v38  ;;  %v2557_v60 = vld [vmem:[#allocation2 + $0x10] sm:$0xff]  ;;  %v1146_v54 = vadd.f32 %v1098_v46, %v945_v39  ;;  %v1500_v17 = vsel %vm1483_vm5, %v7150_v38, %v7152_v35  ;;  %v9454_v30 = vld [vmem:[#allocation109_spill] sm:$0xff] }
 0x343   : > { %v7285_v2 = vpack.c.bf16 %v2015_v22, %v2009_v16  ;;  %v7287_v11 = vpack.c.bf16 %v2016_v49, %v2010_v27  ;;  %v7289_v14 = vpop.permute.xlu0 %1678  ;;  %v7291_v12 = vpop.permute.xlu1 %1680  ;;  %v1145_v16 = vadd.f32 %v1097_v6, %v944_v4  ;;  %v5347_v27 = vld [vmem:[#allocation2 + $0x8] sm:$0xff]  ;;  %v950_v5 = vadd.f32 %v902_v28, %v749_v21  ;;  %v9447_v49 = vld [vmem:[#allocation76_spill] sm:$0xff] }
 0x344   : > { %9443 = vst [vmem:[#allocation85_spill] sm:$0xff] %v7291_v12  ;;  %v1103_v22 = vsel %vm1081_vm3, %v9446_v44, %v6987_v50  ;;  %v1299_v19 = vsel %vm1282_vm4, %v7015_v62, %v9447_v49  ;;  %v1104_v6 = vsel %vm1081_vm3, %v6987_v50, %v9449_v24  ;;  %v9451_v28 = vld [vmem:[#allocation80_spill] sm:$0xff]  ;;  %v9452_v62 = vld [vmem:[#allocation98_spill] sm:$0xff]  ;;  %v1505_v38 = vsel %vm1483_vm5, %v9454_v30, %v7177_v57 }
 0x345   : > { %9441 = vst [vmem:[#allocation94_spill] sm:$0xff] %v7285_v2  ;;  %9442 = vst [vmem:[#allocation95_spill] sm:$0xff] %v7287_v11  ;;  %1883 = vrot.lane.b32.xlu0 %v1800_v48, %s5413_s16  ;;  %2482 = vrot.lane.b32.xlu1 %v5347_v27, %s5413_s16  ;;  %v951_v48 = vadd.f32 %v903_v15, %v750_v0  ;;  %v1346_v4 = vadd.f32 %v1298_v43, %v1145_v16  ;;  %v9453_v15 = vld [vmem:[#allocation78_spill] sm:$0xff]  ;;  %v5348_v16 = vld [vmem:[#allocation2 + $0x10] sm:$0xff] }
 0x346   : > { %2882 = vmatprep.subr.bf16.mxu1 %v7285_v2  ;;  %v1304_v21 = vsel %vm1282_vm4, %v9452_v62, %v9451_v28  ;;  %v1700_v46 = vsel %vm1684_vm6, %v9453_v15, %v7259_v10  ;;  %v1151_v43 = vadd.f32 %v1103_v22, %v950_v5  ;;  %v1347_v0 = vadd.f32 %v1299_v19, %v1146_v54  ;;  %v5349_v27 = vld [vmem:[#allocation2] sm:$0xff]  ;;  %v9455_v62 = vld [vmem:[#allocation81_spill] sm:$0xff] }
 0x347   : > { %v2259_v31 = vpop.permute.xlu0 %2258  ;;  %v7317_v45 = vpop.permute.xlu1 %2260  ;;  %2883 = vmatpush1.bf16.msra.mxu1 %v2557_v60  ;;  %v1547_v39 = vadd.f32 %v1499_v3, %v1346_v4  ;;  %v1152_v44 = vadd.f32 %v1104_v6, %v951_v48  ;;  %v1305_v15 = vsel %vm1282_vm4, %v9451_v28, %v9455_v62  ;;  %v1701_v54 = vsel %vm1684_vm6, %v7259_v10, %v7261_v40  ;;  %v9456_v48 = vld [vmem:[#allocation79_spill] sm:$0xff] }
 0x348   : > { %9450 = vst [vmem:[#allocation82_spill] sm:$0xff] %v7317_v45  ;;  %v2275_v50 = vsel %vm1081_vm3, %v2259_v31, %v7317_v45  ;;  %v1352_v60 = vadd.f32 %v1304_v21, %v1151_v43  ;;  %v1548_v5 = vadd.f32 %v1500_v17, %v1347_v0  ;;  %v1706_v6 = vsel %vm1684_vm6, %v9456_v48, %v7289_v14  ;;  %v5351_v0 = vld [vmem:[#allocation2 + $0x40] sm:$0xff] }
 0x349   : > { %2484 = vrot.lane.b32.xlu0 %v5348_v16, %s5413_s16  ;;  %2480 = vrot.lane.b32.xlu1 %v5349_v27, %s5413_s16  ;;  %v1748_v22 = vadd.f32 %v1700_v46, %v1547_v39  ;;  %v1506_v28 = vsel %vm1483_vm5, %v7177_v57, %v7179_v42  ;;  %v5350_v46 = vld [vmem:[#allocation2 + $0x38] sm:$0xff]  ;;  %v1353_v10 = vadd.f32 %v1305_v15, %v1152_v44 }
 0x34a   : > { %2754 = vmatprep.subr.bf16.mxu0 %v2275_v50  ;;  %v9457_v50 = vld [vmem:[#allocation92_spill] sm:$0xff]  ;;  %v1553_v43 = vadd.f32 %v1505_v38, %v1352_v60  ;;  %v1749_v39 = vadd.f32 %v1701_v54, %v1548_v5  ;;  %v1707_v38 = vsel %vm1684_vm6, %v7289_v14, %v7291_v12  ;;  %v9459_v60 = vld [vmem:[#allocation93_spill] sm:$0xff] }
 0x34b   : > { %v2257_v19 = vpop.permute.xlu0 %2256  ;;  %v1866_v3 = vpop.permute.xlu1 %1865  ;;  %v1554_v30 = vadd.f32 %v1506_v28, %v1353_v10  ;;  %v5352_v5 = vld [vmem:[#allocation2 + $0x30] sm:$0xff] }
 0x34c   : > { %v2274_v4 = vsel %vm1081_vm3, %v2257_v19, %v2259_v31  ;;  %v1901_v21 = vsel %vm1885_vm7, %v9457_v50, %v1866_v3  ;;  %v1754_v16 = vadd.f32 %v1706_v6, %v1553_v43  ;;  %v9460_v19 = vld [vmem:[#allocation68_spill] sm:$0xff]  ;;  %v9461_v6 = vld [vmem:[#allocation67_spill] sm:$0xff] }
 0x34d   : > { %v1949_v17 = vadd.f32 %v1901_v21, %v1748_v22  ;;  %2494 = vrot.lane.b32.xlu0 %v5350_v46, %s5413_s16  ;;  %2496 = vrot.lane.b32.xlu1 %v5351_v0, %s5413_s16  ;;  %v1755_v54 = vadd.f32 %v1707_v38, %v1554_v30 }
 0x34e   : > { %2755 = vmatpush1.bf16.msra.mxu0 %v2274_v4 }
 0x34f   : > { %v7352_v31 = vpop.permute.xlu0 %1867  ;;  %v1880_v27 = vpop.permute.xlu1 %1879  ;;  %v1997_v48 = vadd.f32 %v9460_v19, %v1949_v17 }
 0x350   : > { %9458 = vst [vmem:[#allocation106_spill] sm:$0xff] %v7352_v31  ;;  %v1902_v57 = vsel %vm1885_vm7, %v1866_v3, %v7352_v31  ;;  %v1907_v22 = vsel %vm1885_vm7, %v9459_v60, %v1880_v27 }
 0x351   : > { %v1950_v44 = vadd.f32 %v1902_v57, %v1749_v39  ;;  %v1955_v15 = vadd.f32 %v1907_v22, %v1754_v16  ;;  %2492 = vrot.lane.b32.xlu0 %v5352_v5, %s5413_s16  ;;  %2073 = vrot.lane.b32.xlu1 %v7285_v2, %s5406_s29  ;;  %v2021_v21 = vmax.f32 %v1997_v48, 0.0  ;;  %v2563_v57 = vld [vmem:[#allocation2 + $0x40] sm:$0xff] }
 0x353   : > { %v2003_v4 = vadd.f32 %v9461_v6, %v1955_v15  ;;  %v7366_v14 = vpop.permute.xlu0 %1881  ;;  %v2306_v50 = vpop.permute.xlu1 %2305  ;;  %v1998_v43 = vadd.f32 %v9460_v19, %v1950_v44 }
 0x354   : > { %9462 = vst [vmem:[#allocation107_spill] sm:$0xff] %v7366_v14  ;;  %v1908_v3 = vsel %vm1885_vm7, %v1880_v27, %v7366_v14 }
 0x355   : > { %v2027_v28 = vmax.f32 %v2003_v4, 0.0  ;;  %v1956_v17 = vadd.f32 %v1908_v3, %v1755_v54  ;;  %2075 = vrot.lane.b32.xlu0 %v7287_v11, %s5406_s29  ;;  %v2022_v30 = vmax.f32 %v1998_v43, 0.0 }
 0x357   : > { %v7373_v46 = vpack.c.bf16 %v2027_v28, %v2021_v21  ;;  %v2004_v0 = vadd.f32 %v9461_v6, %v1956_v17  ;;  %v7376_v10 = vpop.permute.xlu0 %2307  ;;  %v2304_v39 = vpop.permute.xlu1 %2303 }
 0x358   : > { %9464 = vst [vmem:[#allocation91_spill] sm:$0xff] %v7376_v10  ;;  %v2329_v16 = vsel %vm1282_vm4, %v2306_v50, %v7376_v10  ;;  %v2328_v27 = vsel %vm1282_vm4, %v2304_v39, %v2306_v50 }
 0x359   : > { %9463 = vst [vmem:[#allocation90_spill] sm:$0xff] %v7373_v46  ;;  %v2028_v38 = vmax.f32 %v2004_v0, 0.0  ;;  %2085 = vrot.lane.b32.xlu1 %v7373_v46, %s5406_s29  ;;  %2756 = vmatprep.subr.bf16.mxu0 %v2329_v16 }
 0x35a   : > { %2884 = vmatprep.subr.bf16.mxu1 %v7373_v46  ;;  %2757 = vmatpush1.bf16.msra.mxu0 %v2328_v27 }
 0x35b   : > { %v7384_v60 = vpack.c.bf16 %v2028_v38, %v2022_v30  ;;  %v2318_v22 = vpop.permute.xlu0 %2317  ;;  %v7386_v48 = vpop.permute.xlu1 %2319  ;;  %2885 = vmatpush1.bf16.msra.mxu1 %v2563_v57 }
 0x35c   : > { %9466 = vst [vmem:[#allocation96_spill] sm:$0xff] %v7386_v48  ;;  %v2334_v44 = vsel %vm1282_vm4, %v2318_v22, %v7386_v48  ;;  %v7457_v48 = vld [vmem:[#allocation3 + $0x1c] ss:$12 sps:$4 sm:$0xff]  }
 0x35d   : > { %9465 = vst [vmem:[#allocation99_spill] sm:$0xff] %v7384_v60  ;;  %2087 = vrot.lane.b32.xlu0 %v7384_v60, %s5406_s29  ;;  %2132 = vrot.lane.b32.xlu1 %v7285_v2, %s5407_s30  ;;  %9472 = vst [vmem:[#allocation12_spill] sm:$0xff] %v7457_v48 }
 0x35e   : > { %2758 = vmatprep.subr.bf16.mxu0 %v2334_v44 }
 0x35f   : > { %v2316_v15 = vpop.permute.xlu0 %2315  ;;  %v2365_v5 = vpop.permute.xlu1 %2364 }
 0x360   : > { %v2333_v54 = vsel %vm1282_vm4, %v2316_v15, %v2318_v22 }
 0x361   : > { %2134 = vrot.lane.b32.xlu0 %v7287_v11, %s5407_s30  ;;  %2144 = vrot.lane.b32.xlu1 %v7373_v46, %s5407_s30 }
 0x362   : > { %2759 = vmatpush1.bf16.msra.mxu0 %v2333_v54 }
 0x363   : > { %v7399_v4 = vpop.permute.xlu0 %2366  ;;  %v2363_v50 = vpop.permute.xlu1 %2362 }
 0x364   : > { %9467 = vst [vmem:[#allocation102_spill] sm:$0xff] %v7399_v4  ;;  %v2388_v3 = vsel %vm1483_vm5, %v2365_v5, %v7399_v4  ;;  %v2387_v21 = vsel %vm1483_vm5, %v2363_v50, %v2365_v5  ;;  %v7455_v4 = vld [vmem:[#allocation3] ss:$12 sps:$4 sm:$0xff]  }
 0x365   : > { %2146 = vrot.lane.b32.xlu0 %v7384_v60, %s5407_s30  ;;  %2191 = vrot.lane.b32.xlu1 %v7285_v2, %s5408_s7  ;;  %9471 = vst [vmem:[#allocation14_spill] sm:$0xff] %v7455_v4 }
 0x366   : > { %2760 = vmatprep.subr.bf16.mxu0 %v2388_v3 }
 0x367   : > { %v2377_v43 = vpop.permute.xlu0 %2376  ;;  %v7408_v28 = vpop.permute.xlu1 %2378  ;;  %2761 = vmatpush1.bf16.msra.mxu0 %v2387_v21 }
 0x368   : > { %9468 = vst [vmem:[#allocation103_spill] sm:$0xff] %v7408_v28  ;;  %v2393_v17 = vsel %vm1483_vm5, %v2377_v43, %v7408_v28 }
 0x369   : > { %2193 = vrot.lane.b32.xlu0 %v7287_v11, %s5408_s7  ;;  %2486 = vrot.lane.b32.xlu1 %v7285_v2, %s5413_s16 }
 0x36a   : > { %2762 = vmatprep.subr.bf16.mxu0 %v2393_v17 }
 0x36b   : > { %v2375_v0 = vpop.permute.xlu0 %2374  ;;  %v435_v39 = vpop.permute.xlu1 %434 }
 0x36c   : > { %v2392_v16 = vsel %vm1483_vm5, %v2375_v0, %v2377_v43 }
 0x36d   : > { %2488 = vrot.lane.b32.xlu0 %v7287_v11, %s5413_s16  ;;  %2203 = vrot.lane.b32.xlu1 %v7373_v46, %s5408_s7 }
 0x36e   : > { %2763 = vmatpush1.bf16.msra.mxu0 %v2392_v16 }
 0x36f   : > { %v449_v27 = vpop.permute.xlu0 %448  ;;  %v2424_v30 = vpop.permute.xlu1 %2423 }
 0x370   : > { %v490_v31 = vsel %vm478_vm0, %v6808_v59, %v449_v27 }
 0x371   : > { %2205 = vrot.lane.b32.xlu0 %v7384_v60, %s5408_s7  ;;  %2498 = vrot.lane.b32.xlu1 %v7373_v46, %s5413_s16 }
 0x373   : > { %v7425_v38 = vpop.permute.xlu0 %2425  ;;  %v636_v57 = vpop.permute.xlu1 %635 }
 0x374   : > { %9469 = vst [vmem:[#allocation6_spill] sm:$0xff] %v7425_v38  ;;  %v2447_v22 = vsel %vm1684_vm6, %v2424_v30, %v7425_v38 }
 0x375   : > { %2500 = vrot.lane.b32.xlu0 %v7384_v60, %s5413_s16  ;;  %2250 = vrot.lane.b32.xlu1 %v7285_v2, %s5409_s8 }
 0x376   : > { %2764 = vmatprep.subr.bf16.mxu0 %v2447_v22 }
 0x377   : > { %v650_v44 = vpop.permute.xlu0 %649  ;;  %v2422_v15 = vpop.permute.xlu1 %2421 }
 0x378   : > { %v2446_v5 = vsel %vm1684_vm6, %v2422_v15, %v2424_v30 }
 0x379   : > { %2252 = vrot.lane.b32.xlu0 %v7287_v11, %s5409_s8  ;;  %2262 = vrot.lane.b32.xlu1 %v7373_v46, %s5409_s8 }
 0x37a   : > { %2765 = vmatpush1.bf16.msra.mxu0 %v2446_v5 }
 0x37b   : > { %v463_v54 = vpop.permute.xlu0 %462  ;;  %v7438_v50 = vpop.permute.xlu1 %476 }
 0x37d   : > { %2264 = vrot.lane.b32.xlu0 %v7384_v60, %s5409_s8  ;;  %2309 = vrot.lane.b32.xlu1 %v7285_v2, %s5410_s9  ;;  %v9475_v2 = vld [vmem:[#allocation45_spill] sm:$0xff]  ;;  %v9476_v60 = vld [vmem:[#allocation7_spill] sm:$0xff] }
 0x37e   : > { %v326_v6 = vmul.f32 %v9476_v60, %v9475_v2 }
 0x37f   : > { %v837_v3 = vpop.permute.xlu0 %836  ;;  %v851_v21 = vpop.permute.xlu1 %850 }
 0x380   : > { %v886_v12 = vsel %vm880_vm2, %v6873_v63, %v837_v3  ;;  %v496_v63 = vsel %vm478_vm0, %v9420_v32, %v463_v54  ;;  %v892_v3 = vsel %vm880_vm2, %v6882_v25, %v851_v21 }
 0x381   : > { %2311 = vrot.lane.b32.xlu0 %v7287_v11, %s5410_s9 }
 0x383   : > { %v2436_v43 = vpop.permute.xlu0 %2435  ;;  %v7446_v17 = vpop.permute.xlu1 %2437 }
 0x384   : > { %9470 = vst [vmem:[#allocation11_spill] sm:$0xff] %v7446_v17  ;;  %v2452_v0 = vsel %vm1684_vm6, %v2436_v43, %v7446_v17 }
 0x385   : > { %2321 = vrot.lane.b32.xlu0 %v7373_v46, %s5410_s9  ;;  %2766 = vmatprep.subr.bf16.mxu0 %v2452_v0  ;;  %v7465_v46 = vld [vmem:[#allocation3 + $0x34] ss:$12 sps:$4 sm:$0xff]  }
 0x387   : > { %v664_v16 = vpop.permute.xlu0 %663  ;;  %v7452_v30 = vpop.permute.xlu1 %677 }
 0x38b   : > { %v1038_v22 = vpop.permute.xlu0 %1037  ;;  %v1052_v15 = vpop.permute.xlu1 %1051 }
 0x38c   : > { %v1093_v32 = vsel %vm1081_vm3, %v6926_v13, %v1052_v15 }
 0x38f   : > { %v2434_v5 = vpop.permute.xlu0 %2433  ;;  %v865_v38 = vpop.permute.xlu1 %864 }
 0x390   : > { %v2451_v28 = vsel %vm1684_vm6, %v2434_v5, %v2436_v43  ;;  %v9474_v5 = vld [vmem:[#allocation9_spill] sm:$0xff]  ;;  %v898_v21 = vsel %vm880_vm2, %v9437_v9, %v865_v38 }
 0x391   : > { %2767 = vmatpush1.bf16.msra.mxu0 %v2451_v28  ;;  %v484_v28 = vsel %vm478_vm0, %v9474_v5, %v435_v39  ;;  %v7481_v39 = vld [vmem:[#allocation3 + $0x30] ss:$12 sps:$4 sm:$0xff]   ;;  %v332_v5 = vmul.f32 %v9476_v60, %v9404_v53 }
 0x393   : > { %v7459_v10 = vpop.permute.xlu0 %878  ;;  %v1239_v17 = vpop.permute.xlu1 %1238 }
 0x394   : > { %2769 = vmatmul.mubr.bf16.vlgmr.msra.gmra.mrb[0].mxu0 %v7455_v4  ;;  %v532_v4 = vadd.f32 %v484_v28, %v326_v6  ;;  %v1087_v6 = vsel %vm1081_vm3, %v6918_v55, %v1038_v22  ;;  %v1288_v53 = vsel %vm1282_vm4, %v6951_v56, %v1239_v17  ;;  %v7516_v17 = vld [vmem:[#allocation3 + $0x48] ss:$12 sps:$4 sm:$0xff]  }
 0x395   : > { %2778 = vmatprep.mubr.bf16.mxu0 %v7457_v48  ;;  %v685_v48 = vsel %vm679_vm1, %v6835_v41, %v636_v57  ;;  %v691_v41 = vsel %vm679_vm1, %v6845_v34, %v650_v44  ;;  %v538_v57 = vadd.f32 %v490_v31, %v332_v5  ;;  %v338_v34 = vmul.f32 %v9476_v60, %v9417_v1 }
 0x396   : > { %v733_v2 = vadd.f32 %v685_v48, %v532_v4  ;;  %v502_v1 = vsel %vm478_vm0, %v9423_v23, %v7438_v50  ;;  %v703_v23 = vsel %vm679_vm1, %v9436_v61, %v7452_v30 }
 0x397   : > { %v1253_v0 = vpop.permute.xlu0 %1252  ;;  %v1066_v45 = vpop.permute.xlu1 %1065  ;;  %v739_v48 = vadd.f32 %v691_v41, %v538_v57  ;;  %v544_v31 = vadd.f32 %v496_v63, %v338_v34 }
 0x398   : > { %v934_v28 = vadd.f32 %v886_v12, %v733_v2  ;;  %v697_v12 = vsel %vm679_vm1, %v9430_v8, %v664_v16  ;;  %v1294_v8 = vsel %vm1282_vm4, %v6960_v7, %v1253_v0  ;;  %v1099_v9 = vsel %vm1081_vm3, %v6985_v58, %v1066_v45 }
 0x399   : > { %v940_v56 = vadd.f32 %v892_v3, %v739_v48  ;;  %v745_v22 = vadd.f32 %v697_v12, %v544_v31 }
 0x39a   : > { %v1135_v55 = vadd.f32 %v1087_v6, %v934_v28  ;;  %v9478_v6 = vmov 0  }
 0x39b   : > { %v7467_v11 = vpop.permute.xlu0 %1079  ;;  %v1440_v43 = vpop.permute.xlu1 %1439  ;;  %v1141_v15 = vadd.f32 %v1093_v32, %v940_v56  ;;  %v9480_v32 = vld [vmem:[#allocation106_spill] sm:$0xff] }
 0x39c   : > { %2779 = vmatmul.mubr.bf16.gmra.mrb[4].mxu0 %v7463_v18  ;;  %v7485_v18 = vld [vmem:[#allocation3 + $0x4c] ss:$12 sps:$4 sm:$0xff]   ;;  %v1489_v25 = vsel %vm1483_vm5, %v7003_v52, %v1440_v43  ;;  %v1336_v4 = vadd.f32 %v1288_v53, %v1135_v55 }
 0x39d   : > { %2788 = vmatprep.mubr.bf16.mxu0 %v7465_v46  ;;  %v9477_v52 = vld [vmem:[#allocation47_spill] sm:$0xff]  ;;  %v1342_v50 = vadd.f32 %v1294_v8, %v1141_v15 }
 0x39e   : > { %v344_v16 = vmul.f32 %v9476_v60, %v9477_v52  ;;  %v1537_v43 = vadd.f32 %v1489_v25, %v1336_v4  ;;  %v904_v60 = vsel %vm880_vm2, %v9444_v29, %v7459_v10  ;;  %v1105_v29 = vsel %vm1081_vm3, %v9449_v24, %v7467_v11  ;;  %v9483_v52 = vld [vmem:[#allocation67_spill] sm:$0xff] }
 0x39f   : > { %v1454_v19 = vpop.permute.xlu0 %1453  ;;  %v1267_v14 = vpop.permute.xlu1 %1266 }
 0x3a0   : > { %v1495_v7 = vsel %vm1483_vm5, %v7013_v51, %v1454_v19  ;;  %v550_v38 = vadd.f32 %v502_v1, %v344_v16  ;;  %v1300_v41 = vsel %vm1282_vm4, %v9447_v49, %v1267_v14 }
 0x3a1   : > { %v1543_v19 = vadd.f32 %v1495_v7, %v1342_v50 }
 0x3a2   : > { %v751_v51 = vadd.f32 %v703_v23, %v550_v38  ;;  %v9484_v38 = vld [vmem:[#allocation99_spill] sm:$0xff] }
 0x3a3   : > { %v1281_v59 = vpop.permute.xlu0 %1280  ;;  %v1641_v27 = vpop.permute.xlu1 %1640 }
 0x3a4   : > { %2789 = vmatmul.mubr.bf16.gmra.mrb[8].mxu0 %v7481_v39  ;;  %v1690_v13 = vsel %vm1684_vm6, %v7042_v47, %v1641_v27  ;;  %v946_v47 = vadd.f32 %v898_v21, %v745_v22  ;;  %v952_v14 = vadd.f32 %v904_v60, %v751_v51  ;;  %v1306_v28 = vsel %vm1282_vm4, %v9455_v62, %v1281_v59  ;;  %v9479_v59 = vld [vmem:[#allocation85_spill] sm:$0xff]  ;;  %v9482_v21 = vld [vmem:[#allocation68_spill] sm:$0xff] }
 0x3a5   : > { %2798 = vmatprep.mubr.bf16.mxu0 %v7485_v18  ;;  %v1738_v0 = vadd.f32 %v1690_v13, %v1537_v43 }
 0x3a6   : > { %v1147_v45 = vadd.f32 %v1099_v9, %v946_v47  ;;  %v1153_v3 = vadd.f32 %v1105_v29, %v952_v14 }
 0x3a7   : > { %v1655_v44 = vpop.permute.xlu0 %1654  ;;  %v1468_v54 = vpop.permute.xlu1 %1467 }
 0x3a8   : > { %v1696_v61 = vsel %vm1684_vm6, %v7092_v26, %v1655_v44  ;;  %v1501_v49 = vsel %vm1483_vm5, %v7152_v35, %v1468_v54  ;;  %v1348_v26 = vadd.f32 %v1300_v41, %v1147_v45  ;;  %v1354_v48 = vadd.f32 %v1306_v28, %v1153_v3  ;;  %v9487_v45 = vld [vmem:[#allocation95_spill] sm:$0xff] }
 0x3a9   : > { %v1744_v10 = vadd.f32 %v1696_v61, %v1543_v19  ;;  %v7593_v19 = vld [vmem:[#allocation3 + $0x8] ss:$12 sps:$4 sm:$0xff]  }
 0x3aa   : > { %v1549_v53 = vadd.f32 %v1501_v49, %v1348_v26  ;;  %v9488_v49 = vld [vmem:[#allocation90_spill] sm:$0xff]  ;;  %v9489_v26 = vld [vmem:[#allocation105_spill] sm:$0xff] }
 0x3ab   : > { %v1482_v5 = vpop.permute.xlu0 %1481  ;;  %v1842_v2 = vpop.permute.xlu1 %1841 }
 0x3ac   : > { %v1891_v58 = vsel %vm1885_vm7, %v7205_v20, %v1842_v2  ;;  %2799 = vmatmul.mubr.bf16.gmra.mrb[12].mxu0 %v7516_v17  ;;  %v1507_v35 = vsel %vm1483_vm5, %v7179_v42, %v1482_v5  ;;  %v9485_v2 = vld [vmem:[#allocation94_spill] sm:$0xff] }
 0x3ad   : > { %v1939_v30 = vadd.f32 %v1891_v58, %v1738_v0  ;;  %2841 = vmatprep.mubr.bf16.mxu0 %v9478_v6  ;;  %v1555_v25 = vadd.f32 %v1507_v35, %v1354_v48  ;;  %v9486_v58 = vld [vmem:[#allocation104_spill] sm:$0xff]  ;;  %v9491_v35 = vld [vmem:[#allocation50_spill] sm:$0xff] }
 0x3af   : > { %v1856_v57 = vpop.permute.xlu0 %1855  ;;  %v1669_v20 = vpop.permute.xlu1 %1668  ;;  %v1987_v11 = vadd.f32 %v9426_v33, %v1939_v30 }
 0x3b0   : > { %v1897_v27 = vsel %vm1885_vm7, %v7235_v36, %v1856_v57  ;;  %v1702_v63 = vsel %vm1684_vm6, %v7261_v40, %v1669_v20  ;;  %v7612_v57 = vld [vmem:[#allocation3 + $0x20] ss:$12 sps:$4 sm:$0xff]  }
 0x3b1   : > { %v1945_v24 = vadd.f32 %v1897_v27, %v1744_v10  ;;  %v1750_v55 = vadd.f32 %v1702_v63, %v1549_v53  ;;  %v2011_v31 = vmax.f32 %v1987_v11, 0.0  ;;  %v9490_v63 = vld [vmem:[#allocation10_spill] sm:$0xff] }
 0x3b3   : > { %v1993_v34 = vadd.f32 %v9431_v37, %v1945_v24  ;;  %v1683_v12 = vpop.permute.xlu0 %1682  ;;  %v1870_v62 = vpop.permute.xlu1 %1869  ;;  %v9481_v37 = vld [vmem:[#allocation107_spill] sm:$0xff] }
 0x3b4   : > { %v1708_v36 = vsel %vm1684_vm6, %v9479_v59, %v1683_v12  ;;  %v1903_v40 = vsel %vm1885_vm7, %v9480_v32, %v1870_v62  ;;  %v9492_v59 = vld [vmem:[#allocation58_spill] sm:$0xff] }
 0x3b5   : > { %v2017_v56 = vmax.f32 %v1993_v34, 0.0  ;;  %v1951_v33 = vadd.f32 %v1903_v40, %v1750_v55  ;;  %v1756_v42 = vadd.f32 %v1708_v36, %v1555_v25  ;;  %v7637_v34 = vld [vmem:[#allocation3 + $0x38] ss:$12 sps:$4 sm:$0xff]  }
 0x3b7   : > { %v7557_v4 = vpack.c.bf16 %v2017_v56, %v2011_v31  ;;  %v1884_v44 = vpop.permute.xlu0 %1883  ;;  %v2483_v54 = vpop.permute.xlu1 %2482  ;;  %v1999_v8 = vadd.f32 %v9482_v21, %v1951_v33  ;;  %v7662_v56 = vld [vmem:[#allocation3 + $0x50] ss:$12 sps:$4 sm:$0xff]  }
 0x3b8   : > { %v1909_v1 = vsel %vm1885_vm7, %v9481_v37, %v1884_v44 }
 0x3b9   : > { %v1957_v13 = vadd.f32 %v1909_v1, %v1756_v42  ;;  %2077 = vrot.lane.b32.xlu1 %v7557_v4, %s5406_s29  ;;  %2048 = vst.msk [vmem:[#allocation2 + $0x28] sm:$0xff] %vm2047_vm8, %v7557_v4  ;;  %v2023_v9 = vmax.f32 %v1999_v8, 0.0 }
 0x3bb   : > { %v2005_v16 = vadd.f32 %v9483_v52, %v1957_v13  ;;  %v7567_v22 = vpop.permute.xlu0 %2484  ;;  %v2481_v15 = vpop.permute.xlu1 %2480 }
 0x3bc   : > { %v2506_v43 = vsel %vm1885_vm7, %v2483_v54, %v7567_v22  ;;  %v2505_v23 = vsel %vm1885_vm7, %v2481_v15, %v2483_v54  ;;  %v9493_v54 = vld [vmem:[#allocation74_spill] sm:$0xff]  ;;  %v9494_v15 = vld [vmem:[#allocation77_spill] sm:$0xff] }
 0x3bd   : > { %v2029_v7 = vmax.f32 %v2005_v16, 0.0  ;;  %2323 = vrot.lane.b32.xlu1 %v9484_v38, %s5410_s9  ;;  %2809 = vmatprep.subr.bf16.mxu0 %v2506_v43 }
 0x3be   : > { %2810 = vmatpush1.bf16.msra.mxu0 %v2505_v23 }
 0x3bf   : > { %v7574_v47 = vpack.c.bf16 %v2029_v7, %v2023_v9  ;;  %v2495_v50 = vpop.permute.xlu0 %2494  ;;  %v7576_v0 = vpop.permute.xlu1 %2496 }
 0x3c0   : > { %v2511_v5 = vsel %vm1885_vm7, %v2495_v50, %v7576_v0  ;;  %v2560_v7 = vld [vmem:[#allocation2 + $0x28] sm:$0xff] }
 0x3c1   : > { %2368 = vrot.lane.b32.xlu1 %v9485_v2, %s5411_s10  ;;  %2089 = vrot.lane.b32.xlu0 %v7574_v47, %s5406_s29  ;;  %2054 = vst.msk [vmem:[#allocation2 + $0x58] sm:$0xff] %vm2047_vm8, %v7574_v47 }
 0x3c2   : > { %2811 = vmatprep.subr.bf16.mxu0 %v2511_v5 }
 0x3c3   : > { %v2493_v60 = vpop.permute.xlu0 %2492  ;;  %v2074_v41 = vpop.permute.xlu1 %2073 }
 0x3c4   : > { %v2510_v61 = vsel %vm1885_vm7, %v2493_v60, %v2495_v50  ;;  %v2094_v51 = vsel %vm478_vm0, %v9486_v58, %v2074_v41 }
 0x3c5   : > { %2136 = vrot.lane.b32.xlu1 %v7557_v4, %s5407_s30  ;;  %2370 = vrot.lane.b32.xlu0 %v9487_v45, %s5411_s10 }
 0x3c6   : > { %2812 = vmatpush1.bf16.msra.mxu0 %v2510_v61  ;;  %v9496_v61 = vld [vmem:[#allocation91_spill] sm:$0xff] }
 0x3c7   : > { %v7595_v30 = vpop.permute.xlu0 %2075 }
 0x3c8   : > { %v2095_v29 = vsel %vm478_vm0, %v2074_v41, %v7595_v30  ;;  %v2566_v60 = vld [vmem:[#allocation2 + $0x58] sm:$0xff] }
 0x3c9   : > { %2382 = vrot.lane.b32.xlu1 %v9484_v38, %s5411_s10  ;;  %2380 = vrot.lane.b32.xlu0 %v9488_v49, %s5411_s10 }
 0x3ca   : > { %2886 = vmatprep.subr.bf16.mxu1 %v2095_v29  ;;  %4688 = vmatmul.mubr.msk.bf16.vlgmr.msra.gmra.mrb[0].mxu0 %vm2723_vm9, %v7593_v19  ;;  %v9497_v29 = vld [vmem:[#allocation96_spill] sm:$0xff] }
 0x3cb   : > { %v2086_v14 = vpop.permute.xlu1 %2085  ;;  %2887 = vmatpush1.bf16.msra.mxu1 %v2094_v51  ;;  %2851 = vmatprep.mubr.bf16.mxu0 %v9478_v6 }
 0x3cc   : > { %v2099_v10 = vsel %vm478_vm0, %v9489_v26, %v2086_v14 }
 0x3cd   : > { %2427 = vrot.lane.b32.xlu1 %v9485_v2, %s5412_s15  ;;  %2148 = vrot.lane.b32.xlu0 %v7574_v47, %s5407_s30 }
 0x3cf   : > { %v7614_v20 = vpop.permute.xlu0 %2087  ;;  %v2133_v28 = vpop.permute.xlu1 %2132 }
 0x3d0   : > { %v2100_v27 = vsel %vm478_vm0, %v2086_v14, %v7614_v20  ;;  %v2153_v3 = vsel %vm679_vm1, %v9490_v63, %v2133_v28 }
 0x3d1   : > { %2195 = vrot.lane.b32.xlu1 %v7557_v4, %s5408_s7  ;;  %2429 = vrot.lane.b32.xlu0 %v9487_v45, %s5412_s15 }
 0x3d2   : > { %2888 = vmatprep.subr.bf16.mxu1 %v2100_v27  ;;  %4689 = vmatmul.mubr.msk.bf16.gmra.mrb[4].mxu0 %vm2723_vm9, %v7612_v57 }
 0x3d3   : > { %v7626_v53 = vpop.permute.xlu0 %2134  ;;  %v2145_v11 = vpop.permute.xlu1 %2144  ;;  %2889 = vmatpush1.bf16.msra.mxu1 %v2099_v10  ;;  %2861 = vmatprep.mubr.bf16.mxu0 %v9478_v6 }
 0x3d4   : > { %v2154_v24 = vsel %vm679_vm1, %v2133_v28, %v7626_v53  ;;  %v2158_v48 = vsel %vm679_vm1, %v9491_v35, %v2145_v11 }
 0x3d5   : > { %2441 = vrot.lane.b32.xlu1 %v9484_v38, %s5412_s15  ;;  %2439 = vrot.lane.b32.xlu0 %v9488_v49, %s5412_s15 }
 0x3d6   : > { %2890 = vmatprep.subr.bf16.mxu1 %v2154_v24  ;;  %v9498_v24 = vld [vmem:[#allocation102_spill] sm:$0xff] }
 0x3d7   : > { %v7639_v55 = vpop.permute.xlu0 %2146  ;;  %v2192_v12 = vpop.permute.xlu1 %2191  ;;  %2891 = vmatpush1.bf16.msra.mxu1 %v2153_v3 }
 0x3d8   : > { %v2159_v62 = vsel %vm679_vm1, %v2145_v11, %v7639_v55  ;;  %v2212_v36 = vsel %vm880_vm2, %v9492_v59, %v2192_v12 }
 0x3d9   : > { %2254 = vrot.lane.b32.xlu1 %v7557_v4, %s5409_s8  ;;  %2207 = vrot.lane.b32.xlu0 %v7574_v47, %s5408_s7 }
 0x3da   : > { %2892 = vmatprep.subr.bf16.mxu1 %v2159_v62  ;;  %4690 = vmatmul.mubr.msk.bf16.gmra.mrb[8].mxu0 %vm2723_vm9, %v7637_v34 }
 0x3db   : > { %v7651_v32 = vpop.permute.xlu0 %2193  ;;  %v2487_v40 = vpop.permute.xlu1 %2486  ;;  %2893 = vmatpush1.bf16.msra.mxu1 %v2158_v48  ;;  %2871 = vmatprep.mubr.bf16.mxu0 %v9478_v6 }
 0x3dc   : > { %v2213_v25 = vsel %vm880_vm2, %v2192_v12, %v7651_v32  ;;  %v2507_v31 = vsel %vm1885_vm7, %v7567_v22, %v2487_v40 }
 0x3dd   : > { %2313 = vrot.lane.b32.xlu1 %v7557_v4, %s5410_s9  ;;  %2266 = vrot.lane.b32.xlu0 %v7574_v47, %s5409_s8 }
 0x3de   : > { %2894 = vmatprep.subr.bf16.mxu1 %v2213_v25 }
 0x3df   : > { %v7664_v33 = vpop.permute.xlu0 %2488  ;;  %v2204_v42 = vpop.permute.xlu1 %2203  ;;  %2895 = vmatpush1.bf16.msra.mxu1 %v2212_v36 }
 0x3e0   : > { %v2508_v44 = vsel %vm1885_vm7, %v2487_v40, %v7664_v33  ;;  %v2217_v37 = vsel %vm880_vm2, %v9493_v54, %v2204_v42  ;;  %v9499_v40 = vld [vmem:[#allocation103_spill] sm:$0xff] }
 0x3e1   : > { %2372 = vrot.lane.b32.xlu1 %v7557_v4, %s5411_s10  ;;  %2325 = vrot.lane.b32.xlu0 %v7574_v47, %s5410_s9 }
 0x3e2   : > { %2955 = vmatprep.subr.bf16.mxu0 %v2508_v44  ;;  %4691 = vmatmul.mubr.msk.bf16.gmra.mrb[12].mxu0 %vm2723_vm9, %v7662_v56 }
 0x3e3   : > { %v7676_v1 = vpop.permute.xlu0 %2205  ;;  %v2499_v21 = vpop.permute.xlu1 %2498  ;;  %2956 = vmatpush1.bf16.msra.mxu0 %v2507_v31  ;;  %2987 = vmatprep.mubr.bf16.mxu0 %v9478_v6 }
 0x3e4   : > { %v2218_v8 = vsel %vm880_vm2, %v2204_v42, %v7676_v1  ;;  %v2512_v13 = vsel %vm1885_vm7, %v7576_v0, %v2499_v21  ;;  %v9495_v0 = vld [vmem:[#allocation82_spill] sm:$0xff] }
 0x3e5   : > { %2431 = vrot.lane.b32.xlu1 %v7557_v4, %s5412_s15  ;;  %2384 = vrot.lane.b32.xlu0 %v7574_v47, %s5411_s10 }
 0x3e6   : > { %2896 = vmatprep.subr.bf16.mxu1 %v2218_v8 }
 0x3e7   : > { %v7687_v52 = vpop.permute.xlu0 %2500  ;;  %v2251_v16 = vpop.permute.xlu1 %2250  ;;  %2897 = vmatpush1.bf16.msra.mxu1 %v2217_v37  ;;  %v9500_v37 = vld [vmem:[#allocation6_spill] sm:$0xff] }
 0x3e8   : > { %v2513_v22 = vsel %vm1885_vm7, %v2499_v21, %v7687_v52  ;;  %v2271_v43 = vsel %vm1081_vm3, %v9494_v15, %v2251_v16 }
 0x3e9   : > { %2490 = vrot.lane.b32.xlu1 %v7557_v4, %s5413_s16  ;;  %2443 = vrot.lane.b32.xlu0 %v7574_v47, %s5412_s15  ;;  %s4798_s15 = sshll.u32 %s9569_s22, 6 }
 0x3ea   : > { %2957 = vmatprep.subr.bf16.mxu0 %v2513_v22  ;;  %s8901_s18 = scalar_lea.vmem %s8940_s6, %s4798_s15 }
 0x3eb   : > { %v7697_v23 = vpop.permute.xlu0 %2252  ;;  %v2263_v9 = vpop.permute.xlu1 %2262  ;;  %2958 = vmatpush1.bf16.msra.mxu0 %v2512_v13 }
 0x3ec   : > { %v2272_v50 = vsel %vm1081_vm3, %v2251_v16, %v7697_v23  ;;  %v2276_v5 = vsel %vm1081_vm3, %v9495_v0, %v2263_v9  ;;  %3028 = vmatprep.subr.bf16.mxu0 %v2560_v7 }
 0x3ed   : > { %2502 = vrot.lane.b32.xlu0 %v7574_v47, %s5413_s16  ;;  %2898 = vmatprep.subr.bf16.mxu1 %v2272_v50 }
 0x3ee   : > { %2899 = vmatpush1.bf16.msra.mxu1 %v2271_v43  ;;  %4692 = vmatmul.mubr.msk.bf16.vlgmr.msra.gmra.mrb[16].mxu0 %vm2723_vm9, %v7593_v19 }
 0x3ef   : > { %v7707_v4 = vpop.permute.xlu0 %2264  ;;  %v2310_v2 = vpop.permute.xlu1 %2309  ;;  %3029 = vmatpush1.bf16.msra.mxu0 %v9487_v45  ;;  %2997 = vmatprep.mubr.bf16.mxu0 %v9478_v6 }
 0x3f0   : > { %v2277_v41 = vsel %vm1081_vm3, %v2263_v9, %v7707_v4  ;;  %v2330_v58 = vsel %vm1282_vm4, %v9496_v61, %v2310_v2  ;;  %3030 = vmatprep.subr.bf16.mxu0 %v2566_v60  ;;  %v9501_v9 = vld [vmem:[#allocation11_spill] sm:$0xff]  ;;  %v9503_v61 = vld [vmem:[#allocation12_spill] sm:$0xff] }
 0x3f1   : > { %2900 = vmatprep.subr.bf16.mxu1 %v2277_v41  ;;  %v9502_v41 = vld [vmem:[#allocation14_spill] sm:$0xff] }
 0x3f2   : > { %2901 = vmatpush1.bf16.msra.mxu1 %v2276_v5 }
 0x3f3   : > { %v7715_v47 = vpop.permute.xlu0 %2311  ;;  %3031 = vmatpush1.bf16.msra.mxu0 %v9484_v38  ;;  %v5353_v38 = vld [vmem:[#allocation3 + $0x4] ss:$12 sps:$4 sm:$0xff]  }
 0x3f4   : > { %v2331_v51 = vsel %vm1282_vm4, %v2310_v2, %v7715_v47 }
 0x3f5   : > { %2902 = vmatprep.subr.bf16.mxu1 %v2331_v51 }
 0x3f6   : > { %2903 = vmatpush1.bf16.msra.mxu1 %v2330_v58  ;;  %4693 = vmatmul.mubr.msk.bf16.gmra.mrb[20].mxu0 %vm2723_vm9, %v7612_v57 }
 0x3f7   : > { %v2322_v45 = vpop.permute.xlu0 %2321  ;;  %3007 = vmatprep.mubr.bf16.mxu0 %v9478_v6 }
 0x3f8   : > { %v2335_v49 = vsel %vm1282_vm4, %v9497_v29, %v2322_v45 }
 0x3fe   : > { %4694 = vmatmul.mubr.msk.bf16.gmra.mrb[24].mxu0 %vm2723_vm9, %v7637_v34 }
 0x3ff   : > { %3017 = vmatprep.mubr.bf16.mxu0 %v9478_v6 }
 0x406   : > { %4695 = vmatmul.mubr.msk.bf16.gmra.mrb[28].mxu0 %vm2723_vm9, %v7662_v56 }
 0x407   : > { %3060 = vmatprep.mubr.bf16.mxu0 %v5353_v38 }
 0x42b   : > { %v2078_v14 = vpop.permute.xlu1 %2077 }
 0x42c   : > { %v2096_v26 = vsel %vm478_vm0, %v7595_v30, %v2078_v14  ;;  %2119 = vst.msk [vmem:[#allocation2 + $0x88] sm:$0xff] %vm2047_vm8, %v2078_v14 }
 0x42f   : > { %v7733_v10 = vpop.permute.xlu1 %2323 }
 0x430   : > { %v2336_v28 = vsel %vm1282_vm4, %v2322_v45, %v7733_v10 }
 0x431   : > { %2904 = vmatprep.subr.bf16.mxu1 %v2336_v28 }
 0x432   : > { %2905 = vmatpush1.bf16.msra.mxu1 %v2335_v49 }
 0x433   : > { %v2090_v27 = vpop.permute.xlu0 %2089  ;;  %v2369_v63 = vpop.permute.xlu1 %2368  ;;  %v2572_v3 = vld [vmem:[#allocation2 + $0x88] sm:$0xff] }
 0x434   : > { %v2101_v11 = vsel %vm478_vm0, %v7614_v20, %v2090_v27  ;;  %2125 = vst.msk [vmem:[#allocation2 + $0xb8] sm:$0xff] %vm2047_vm8, %v2090_v27  ;;  %v2389_v30 = vsel %vm1483_vm5, %v9498_v24, %v2369_v63  ;;  %3032 = vmatprep.subr.bf16.mxu0 %v2572_v3 }
 0x435   : > { %3033 = vmatpush1.bf16.msra.mxu0 %v2096_v26  ;;  %v9504_v26 = vld [vmem:[#allocation15_spill] sm:$0xff] }
 0x437   : > { %v7742_v35 = vpop.permute.xlu0 %2370  ;;  %v2137_v48 = vpop.permute.xlu1 %2136 }
 0x438   : > { %v2390_v12 = vsel %vm1483_vm5, %v2369_v63, %v7742_v35  ;;  %v2155_v62 = vsel %vm679_vm1, %v7626_v53, %v2137_v48  ;;  %2178 = vst.msk [vmem:[#allocation2 + $0xe8] sm:$0xff] %vm2047_vm8, %v2137_v48 }
 0x439   : > { %2906 = vmatprep.subr.bf16.mxu1 %v2390_v12 }
 0x43a   : > { %2907 = vmatpush1.bf16.msra.mxu1 %v2389_v30 }
 0x43b   : > { %v2381_v20 = vpop.permute.xlu0 %2380  ;;  %v7749_v59 = vpop.permute.xlu1 %2382  ;;  %v2578_v36 = vld [vmem:[#allocation2 + $0xb8] sm:$0xff] }
 0x43c   : > { %v2394_v25 = vsel %vm1483_vm5, %v9499_v40, %v2381_v20  ;;  %v2395_v31 = vsel %vm1483_vm5, %v2381_v20, %v7749_v59  ;;  %3034 = vmatprep.subr.bf16.mxu0 %v2578_v36 }
 0x43d   : > { %3035 = vmatpush1.bf16.msra.mxu0 %v2101_v11  ;;  %2908 = vmatprep.subr.bf16.mxu1 %v2395_v31 }
 0x43e   : > { %2909 = vmatpush1.bf16.msra.mxu1 %v2394_v25 }
 0x43f   : > { %v2149_v42 = vpop.permute.xlu0 %2148  ;;  %v2428_v53 = vpop.permute.xlu1 %2427  ;;  %v2584_v44 = vld [vmem:[#allocation2 + $0xe8] sm:$0xff] }
 0x440   : > { %v2160_v54 = vsel %vm679_vm1, %v7639_v55, %v2149_v42  ;;  %2184 = vst.msk [vmem:[#allocation2 + $0x118] sm:$0xff] %vm2047_vm8, %v2149_v42  ;;  %v2448_v21 = vsel %vm1684_vm6, %v9500_v37, %v2428_v53  ;;  %3036 = vmatprep.subr.bf16.mxu0 %v2584_v44 }
 0x441   : > { %3037 = vmatpush1.bf16.msra.mxu0 %v2155_v62 }
 0x443   : > { %v2430_v8 = vpop.permute.xlu0 %2429  ;;  %v2196_v13 = vpop.permute.xlu1 %2195 }
 0x444   : > { %v2449_v16 = vsel %vm1684_vm6, %v2428_v53, %v2430_v8  ;;  %v2214_v22 = vsel %vm880_vm2, %v7651_v32, %v2196_v13  ;;  %2237 = vst.msk [vmem:[#allocation2 + $0x148] sm:$0xff] %vm2047_vm8, %v2196_v13 }
 0x445   : > { %2910 = vmatprep.subr.bf16.mxu1 %v2449_v16 }
 0x446   : > { %2911 = vmatpush1.bf16.msra.mxu1 %v2448_v21 }
 0x447   : > { %v2440_v15 = vpop.permute.xlu0 %2439  ;;  %v2442_v55 = vpop.permute.xlu1 %2441  ;;  %v2590_v43 = vld [vmem:[#allocation2 + $0x118] sm:$0xff] }
 0x448   : > { %v2453_v7 = vsel %vm1684_vm6, %v9501_v9, %v2440_v15  ;;  %v2454_v50 = vsel %vm1684_vm6, %v2440_v15, %v2442_v55  ;;  %3038 = vmatprep.subr.bf16.mxu0 %v2590_v43 }
 0x449   : > { %3039 = vmatpush1.bf16.msra.mxu0 %v2160_v54  ;;  %2912 = vmatprep.subr.bf16.mxu1 %v2454_v50 }
 0x44a   : > { %2913 = vmatpush1.bf16.msra.mxu1 %v2453_v7 }
 0x44b   : > { %v2208_v0 = vpop.permute.xlu0 %2207  ;;  %v2255_v5 = vpop.permute.xlu1 %2254  ;;  %v2596_v2 = vld [vmem:[#allocation2 + $0x148] sm:$0xff] }
 0x44c   : > { %v2219_v32 = vsel %vm880_vm2, %v7676_v1, %v2208_v0  ;;  %2243 = vst.msk [vmem:[#allocation2 + $0x178] sm:$0xff] %vm2047_vm8, %v2208_v0  ;;  %v2273_v60 = vsel %vm1081_vm3, %v7697_v23, %v2255_v5  ;;  %2296 = vst.msk [vmem:[#allocation2 + $0x1a8] sm:$0xff] %vm2047_vm8, %v2255_v5  ;;  %3040 = vmatprep.subr.bf16.mxu0 %v2596_v2 }
 0x44d   : > { %3041 = vmatpush1.bf16.msra.mxu0 %v2214_v22  ;;  %2915 = vmatmul.mubr.bf16.vlgmr.msra.gmra.mrb[0].mxu1 %v9502_v41 }
 0x44e   : > { %2924 = vmatprep.mubr.bf16.mxu1 %v9503_v61 }
 0x44f   : > { %v2267_v58 = vpop.permute.xlu0 %2266  ;;  %v2314_v51 = vpop.permute.xlu1 %2313 }
 0x450   : > { %v2278_v45 = vsel %vm1081_vm3, %v7707_v4, %v2267_v58  ;;  %2302 = vst.msk [vmem:[#allocation2 + $0x1d8] sm:$0xff] %vm2047_vm8, %v2267_v58  ;;  %v2332_v1 = vsel %vm1282_vm4, %v7715_v47, %v2314_v51  ;;  %2355 = vst.msk [vmem:[#allocation2 + $0x208] sm:$0xff] %vm2047_vm8, %v2314_v51 }
 0x453   : > { %v2326_v23 = vpop.permute.xlu0 %2325  ;;  %v2373_v29 = vpop.permute.xlu1 %2372  ;;  %v2602_v49 = vld [vmem:[#allocation2 + $0x178] sm:$0xff]  ;;  %v2608_v4 = vld [vmem:[#allocation2 + $0x1a8] sm:$0xff] }
 0x454   : > { %v2337_v38 = vsel %vm1282_vm4, %v7733_v10, %v2326_v23  ;;  %2361 = vst.msk [vmem:[#allocation2 + $0x238] sm:$0xff] %vm2047_vm8, %v2326_v23  ;;  %v2391_v14 = vsel %vm1483_vm5, %v7742_v35, %v2373_v29  ;;  %2414 = vst.msk [vmem:[#allocation2 + $0x268] sm:$0xff] %vm2047_vm8, %v2373_v29  ;;  %3042 = vmatprep.subr.bf16.mxu0 %v2602_v49 }
 0x455   : > { %3043 = vmatpush1.bf16.msra.mxu0 %v2219_v32  ;;  %2925 = vmatmul.mubr.bf16.gmra.mrb[4].mxu1 %v9504_v26 }
 0x456   : > { %3044 = vmatprep.subr.bf16.mxu0 %v2608_v4  ;;  %2934 = vmatprep.mubr.bf16.mxu1 %v7465_v46 }
 0x457   : > { %v2385_v47 = vpop.permute.xlu0 %2384  ;;  %v2432_v28 = vpop.permute.xlu1 %2431  ;;  %v2614_v63 = vld [vmem:[#allocation2 + $0x1d8] sm:$0xff]  ;;  %v2620_v35 = vld [vmem:[#allocation2 + $0x208] sm:$0xff] }
 0x458   : > { %v2396_v10 = vsel %vm1483_vm5, %v7749_v59, %v2385_v47  ;;  %2420 = vst.msk [vmem:[#allocation2 + $0x298] sm:$0xff] %vm2047_vm8, %v2385_v47  ;;  %v2450_v27 = vsel %vm1684_vm6, %v2430_v8, %v2432_v28  ;;  %2473 = vst.msk [vmem:[#allocation2 + $0x2c8] sm:$0xff] %vm2047_vm8, %v2432_v28 }
 0x459   : > { %3045 = vmatpush1.bf16.msra.mxu0 %v2273_v60 }
 0x45a   : > { %3046 = vmatprep.subr.bf16.mxu0 %v2614_v63 }
 0x45b   : > { %v2444_v3 = vpop.permute.xlu0 %2443  ;;  %v2491_v11 = vpop.permute.xlu1 %2490  ;;  %v2626_v62 = vld [vmem:[#allocation2 + $0x238] sm:$0xff] }
 0x45c   : > { %v2455_v24 = vsel %vm1684_vm6, %v2442_v55, %v2444_v3  ;;  %2479 = vst.msk [vmem:[#allocation2 + $0x2f8] sm:$0xff] %vm2047_vm8, %v2444_v3  ;;  %v2509_v30 = vsel %vm1885_vm7, %v7664_v33, %v2491_v11  ;;  %2532 = vst.msk [vmem:[#allocation2 + $0x328] sm:$0xff] %vm2047_vm8, %v2491_v11  ;;  %v2632_v33 = vld [vmem:[#allocation2 + $0x268] sm:$0xff] }
 0x45d   : > { %3047 = vmatpush1.bf16.msra.mxu0 %v2278_v45  ;;  %2935 = vmatmul.mubr.bf16.gmra.mrb[8].mxu1 %v7481_v39 }
 0x45e   : > { %3048 = vmatprep.subr.bf16.mxu0 %v2620_v35  ;;  %2944 = vmatprep.mubr.bf16.mxu1 %v7485_v18 }
 0x45f   : > { %v2503_v48 = vpop.permute.xlu0 %2502  ;;  %v2638_v20 = vld [vmem:[#allocation2 + $0x298] sm:$0xff]  ;;  %v2644_v59 = vld [vmem:[#allocation2 + $0x2c8] sm:$0xff] }
 0x460   : > { %v2514_v12 = vsel %vm1885_vm7, %v7687_v52, %v2503_v48  ;;  %2538 = vst.msk [vmem:[#allocation2 + $0x358] sm:$0xff] %vm2047_vm8, %v2503_v48 }
 0x461   : > { %3049 = vmatpush1.bf16.msra.mxu0 %v2332_v1 }
 0x462   : > { %3050 = vmatprep.subr.bf16.mxu0 %v2626_v62 }
 0x463   : > { %v2650_v36 = vld [vmem:[#allocation2 + $0x2f8] sm:$0xff]  ;;  %v2656_v52 = vld [vmem:[#allocation2 + $0x328] sm:$0xff] }
 0x465   : > { %3051 = vmatpush1.bf16.msra.mxu0 %v2337_v38  ;;  %2945 = vmatmul.mubr.bf16.gmra.mrb[12].mxu1 %v7516_v17 }
 0x466   : > { %3052 = vmatprep.subr.bf16.mxu0 %v2632_v33 }
 0x467   : > { %v2662_v40 = vld [vmem:[#allocation2 + $0x358] sm:$0xff] }
 0x469   : > { %3053 = vmatpush1.bf16.msra.mxu0 %v2391_v14 }
 0x46a   : > { %3054 = vmatprep.subr.bf16.mxu0 %v2638_v20 }
 0x46d   : > { %3055 = vmatpush1.bf16.msra.mxu0 %v2396_v10 }
 0x46e   : > { %3056 = vmatprep.subr.bf16.mxu0 %v2644_v59 }
 0x471   : > { %3057 = vmatpush1.bf16.msra.mxu0 %v2450_v27 }
 0x472   : > { %3058 = vmatprep.subr.bf16.mxu0 %v2650_v36 }
 0x475   : > { %3059 = vmatpush1.bf16.msra.mxu0 %v2455_v24 }
 0x476   : > { %3101 = vmatprep.subr.bf16.mxu0 %v2656_v52 }
 0x478   : > { %3061 = vmatmul.mubr.bf16.vlgmr.msra.gmra.mrb[32].mxu0 %v9502_v41 }
 0x479   : > { %3102 = vmatpush1.bf16.msra.mxu0 %v2509_v30  ;;  %3070 = vmatprep.mubr.bf16.mxu0 %v9503_v61 }
 0x47a   : > { %3103 = vmatprep.subr.bf16.mxu0 %v2662_v40 }
 0x47d   : > { %3104 = vmatpush1.bf16.msra.mxu0 %v2514_v12 }
 0x480   : > { %3071 = vmatmul.mubr.bf16.gmra.mrb[36].mxu0 %v9504_v26 }
 0x481   : > { %3080 = vmatprep.mubr.bf16.mxu0 %v7465_v46 }
 0x488   : > { %3081 = vmatmul.mubr.bf16.gmra.mrb[40].mxu0 %v7481_v39 }
 0x489   : > { %3090 = vmatprep.mubr.bf16.mxu0 %v7485_v18 }
 0x490   : > { %3091 = vmatmul.mubr.bf16.gmra.mrb[44].mxu0 %v7516_v17 }
 0x491   : > { %3133 = vmatprep.mubr.bf16.mxu0 %v9478_v6 }
 0x498   : > { %4696 = vmatmul.mubr.msk.bf16.vlgmr.msra.gmra.mrb[32].mxu0 %vm2723_vm9, %v7593_v19 }
 0x499   : > { %3143 = vmatprep.mubr.bf16.mxu0 %v9478_v6 }
 0x49d   : > { %v7816_v25 = vpop.f32.mrb[0].mxu0 }
 0x49e   : > { %v7818_v31 = vpop.f32.mrb[1].mxu0 }
 0x49f   : > { %v7820_v42 = vpop.f32.mrb[2].mxu0 }
 0x4a0   : > { %4697 = vmatmul.mubr.msk.bf16.gmra.mrb[36].mxu0 %vm2723_vm9, %v7612_v57  ;;  %v4980_v18 = vpack.i.bf16 %v7820_v42, %v7816_v25  ;;  %v7826_v46 = vpop.f32.mrb[3].mxu0 }
 0x4a1   : > { %3153 = vmatprep.mubr.bf16.mxu0 %v9478_v6 }
 0x4a5   : > { %v7829_v39 = vpop.f32.mrb[4].mxu0 }
 0x4a6   : > { %v7831_v17 = vpop.f32.mrb[5].mxu0 }
 0x4a7   : > { %v7833_v19 = vpop.f32.mrb[6].mxu0 }
 0x4a8   : > { %4698 = vmatmul.mubr.msk.bf16.gmra.mrb[40].mxu0 %vm2723_vm9, %v7637_v34  ;;  %v5000_v53 = vpack.i.bf16 %v7833_v19, %v7829_v39  ;;  %v7839_v57 = vpop.f32.mrb[7].mxu0 }
 0x4a9   : > { %3163 = vmatprep.mubr.bf16.mxu0 %v9478_v6 }
 0x4ad   : > { %v7842_v44 = vpop.f32.mrb[8].mxu0 }
 0x4ae   : > { %v7844_v54 = vpop.f32.mrb[9].mxu0 }
 0x4af   : > { %v7846_v37 = vpop.f32.mrb[10].mxu0 }
 0x4b0   : > { %4699 = vmatmul.mubr.msk.bf16.gmra.mrb[44].mxu0 %vm2723_vm9, %v7662_v56  ;;  %v5020_v21 = vpack.i.bf16 %v7846_v37, %v7842_v44  ;;  %v7852_v34 = vpop.f32.mrb[11].mxu0 }
 0x4b5   : > { %v7854_v8 = vpop.f32.mrb[12].mxu0 }
 0x4b6   : > { %v7856_v13 = vpop.f32.mrb[13].mxu0 }
 0x4b7   : > { %v7858_v16 = vpop.f32.mrb[14].mxu0 }
 0x4b8   : > { %v5040_v6 = vpack.i.bf16 %v7858_v16, %v7854_v8  ;;  %v7862_v22 = vpop.f32.mrb[15].mxu0 }
 0x4c1   : > { %v2989_v15 = vpop.f32.mrb[16].mxu0 }
 0x4c2   : > { %v2991_v55 = vpop.f32.mrb[17].mxu0 }
 0x4c3   : > { %v2993_v43 = vpop.f32.mrb[18].mxu0 }
 0x4c4   : > { %v2995_v56 = vpop.f32.mrb[19].mxu0 }
 0x4c9   : > { %v2999_v9 = vpop.f32.mrb[20].mxu0 }
 0x4ca   : > { %v3001_v7 = vpop.f32.mrb[21].mxu0 }
 0x4cb   : > { %v3003_v50 = vpop.f32.mrb[22].mxu0 }
 0x4cc   : > { %v3005_v0 = vpop.f32.mrb[23].mxu0 }
 0x4d1   : > { %v3009_v5 = vpop.f32.mrb[24].mxu0 }
 0x4d2   : > { %v3011_v2 = vpop.f32.mrb[25].mxu0 }
 0x4d3   : > { %v3013_v32 = vpop.f32.mrb[26].mxu0 }
 0x4d4   : > { %v3015_v60 = vpop.f32.mrb[27].mxu0 }
 0x4d9   : > { %v3019_v41 = vpop.f32.mrb[28].mxu0 }
 0x4da   : > { %v3021_v61 = vpop.f32.mrb[29].mxu0 }
 0x4db   : > { %v3023_v58 = vpop.f32.mrb[30].mxu0 }
 0x4dc   : > { %v3025_v51 = vpop.f32.mrb[31].mxu0 }
 0x520   : > { %v2916_v45 = vpop.f32.mrb[0].mxu1 }
 0x521   : > { %v7864_v1 = vadd.f32 %v2989_v15, %v2916_v45  ;;  %v2918_v23 = vpop.f32.mrb[1].mxu1  ;;  %v5224_v45 = vld [vmem:[%s8939_s5 + $0x10] ss:$8 sps:$4 sm:$0xff]  }
 0x522   : > { %v7866_v29 = vadd.f32 %v2991_v55, %v2918_v23  ;;  %v2920_v49 = vpop.f32.mrb[2].mxu1  ;;  %v5227_v23 = vld [vmem:[%s8939_s5 + $0x20] ss:$8 sps:$4 sm:$0xff]  }
 0x523   : > { %v4965_v38 = vpack.i.bf16 %v7864_v1, %v7818_v31  ;;  %v7870_v14 = vadd.f32 %v2993_v43, %v2920_v49  ;;  %v2922_v4 = vpop.f32.mrb[3].mxu1  ;;  %v5232_v49 = vld [vmem:[%s8939_s5 + $0x34] ss:$8 sps:$4 sm:$0xff]  }
 0x524   : > { %v4970_v26 = vpack.i.bf16 %v7826_v46, %v7866_v29  ;;  %v7874_v47 = vadd.f32 %v2995_v56, %v2922_v4  ;;  %v5235_v4 = vld [vmem:[%s8939_s5 + $0x44] ss:$8 sps:$4 sm:$0xff]  }
 0x525   : > { %4966 = vrot.lane.b32.xlu1 %v4965_v38, %s5406_s29  ;;  %v5230_v38 = vld [vmem:[%s8939_s5 + $0x30] ss:$8 sps:$4 sm:$0xff]  }
 0x526   : > { %v4975_v28 = vpack.i.bf16 %v7874_v47, %v7870_v14  ;;  %4971 = vrot.lane.b32.xlu0 %v4970_v26, %s5406_s29  ;;  %v5233_v26 = vld [vmem:[%s8939_s5 + $0x40] ss:$8 sps:$4 sm:$0xff]  }
 0x528   : > { %v2926_v10 = vpop.f32.mrb[4].mxu1 }
 0x529   : > { %v7880_v27 = vadd.f32 %v2999_v9, %v2926_v10  ;;  %v2928_v63 = vpop.f32.mrb[5].mxu1  ;;  %4976 = vrot.lane.b32.xlu1 %v4975_v28, %s5406_s29  ;;  %v5238_v28 = vld [vmem:[%s8939_s5 + $0x54] ss:$8 sps:$4 sm:$0xff]   ;;  %v5236_v10 = vld [vmem:[%s8939_s5 + $0x50] ss:$8 sps:$4 sm:$0xff]  }
 0x52a   : > { %v7883_v3 = vadd.f32 %v3001_v7, %v2928_v63  ;;  %4981 = vrot.lane.b32.xlu0 %v4980_v18, %s5406_s29  ;;  %v2930_v11 = vpop.f32.mrb[6].mxu1  ;;  %v5241_v63 = vld [vmem:[%s8939_s5 + $0x64] ss:$8 sps:$4 sm:$0xff]  }
 0x52b   : > { %v4985_v24 = vpack.i.bf16 %v7880_v27, %v7831_v17  ;;  %v7888_v30 = vadd.f32 %v3003_v50, %v2930_v11  ;;  %v2932_v35 = vpop.f32.mrb[7].mxu1  ;;  %v5239_v11 = vld [vmem:[%s8939_s5 + $0x60] ss:$8 sps:$4 sm:$0xff]  }
 0x52c   : > { %v4990_v48 = vpack.i.bf16 %v7839_v57, %v7883_v3  ;;  %v7892_v12 = vadd.f32 %v3005_v0, %v2932_v35  ;;  %v5242_v35 = vld [vmem:[%s8939_s5 + $0x70] ss:$8 sps:$4 sm:$0xff]  }
 0x52d   : > { %4986 = vrot.lane.b32.xlu1 %v4985_v24, %s5406_s29  ;;  %v5244_v24 = vld [vmem:[%s8939_s5 + $0x74] ss:$8 sps:$4 sm:$0xff]  }
 0x52e   : > { %9505 = vst [vmem:[#allocation21_spill] sm:$0xff] %v7892_v12  ;;  %v4995_v62 = vpack.i.bf16 %v7892_v12, %v7888_v30  ;;  %4991 = vrot.lane.b32.xlu0 %v4990_v48, %s5406_s29  ;;  %v5247_v48 = vld [vmem:[%s8939_s5 + $0x84] ss:$8 sps:$4 sm:$0xff]  }
 0x530   : > { %v2936_v33 = vpop.f32.mrb[8].mxu1 }
 0x531   : > { %v7898_v20 = vadd.f32 %v3009_v5, %v2936_v33  ;;  %v2938_v59 = vpop.f32.mrb[9].mxu1  ;;  %4996 = vrot.lane.b32.xlu1 %v4995_v62, %s5406_s29  ;;  %v5245_v62 = vld [vmem:[%s8939_s5 + $0x80] ss:$8 sps:$4 sm:$0xff]   ;;  %v5250_v33 = vld [vmem:[%s8939_s5 + $0x94] ss:$8 sps:$4 sm:$0xff]  }
 0x532   : > { %v7901_v36 = vadd.f32 %v3011_v2, %v2938_v59  ;;  %5001 = vrot.lane.b32.xlu0 %v5000_v53, %s5406_s29  ;;  %v2940_v52 = vpop.f32.mrb[10].mxu1 }
 0x533   : > { %v5005_v40 = vpack.i.bf16 %v7898_v20, %v7844_v54  ;;  %v7909_v18 = vadd.f32 %v3013_v32, %v2940_v52  ;;  %v2942_v15 = vpop.f32.mrb[11].mxu1  ;;  %v5248_v52 = vld [vmem:[%s8939_s5 + $0x90] ss:$8 sps:$4 sm:$0xff]  }
 0x534   : > { %9506 = vst [vmem:[#allocation16_spill] sm:$0xff] %v7901_v36  ;;  %v5010_v55 = vpack.i.bf16 %v7852_v34, %v7901_v36  ;;  %v7913_v43 = vadd.f32 %v3015_v60, %v2942_v15  ;;  %v5253_v15 = vld [vmem:[%s8939_s5 + $0xa4] ss:$8 sps:$4 sm:$0xff]  }
 0x535   : > { %5006 = vrot.lane.b32.xlu1 %v5005_v40, %s5406_s29 }
 0x536   : > { %9507 = vst [vmem:[#allocation25_spill] sm:$0xff] %v7913_v43  ;;  %v5015_v56 = vpack.i.bf16 %v7913_v43, %v7909_v18  ;;  %5011 = vrot.lane.b32.xlu0 %v5010_v55, %s5406_s29 }
 0x538   : > { %v2946_v53 = vpop.f32.mrb[12].mxu1 }
 0x539   : > { %v7919_v9 = vadd.f32 %v3019_v41, %v2946_v53  ;;  %v2948_v7 = vpop.f32.mrb[13].mxu1  ;;  %5016 = vrot.lane.b32.xlu1 %v5015_v56, %s5406_s29 }
 0x53a   : > { %v7922_v50 = vadd.f32 %v3021_v61, %v2948_v7  ;;  %5021 = vrot.lane.b32.xlu0 %v5020_v21, %s5406_s29  ;;  %v2950_v0 = vpop.f32.mrb[14].mxu1  ;;  %v5221_v21 = vld [vmem:[%s8939_s5] ss:$8 sps:$4 sm:$0xff]  }
 0x53b   : > { %v5025_v5 = vpack.i.bf16 %v7919_v9, %v7856_v13  ;;  %v7930_v2 = vadd.f32 %v3023_v58, %v2950_v0  ;;  %v2952_v32 = vpop.f32.mrb[15].mxu1  ;;  %v5223_v58 = vld [vmem:[%s8939_s5 + $0x4] ss:$8 sps:$4 sm:$0xff]   ;;  %v5251_v0 = vld [vmem:[%s8939_s5 + $0xa0] ss:$8 sps:$4 sm:$0xff]  }
 0x53c   : > { %9508 = vst [vmem:[#allocation17_spill] sm:$0xff] %v7922_v50  ;;  %v5030_v60 = vpack.i.bf16 %v7862_v22, %v7922_v50  ;;  %v7934_v41 = vadd.f32 %v3025_v51, %v2952_v32  ;;  %v5226_v51 = vld [vmem:[%s8939_s5 + $0x14] ss:$8 sps:$4 sm:$0xff]   ;;  %4322 = vmatprep.subr.bf16.mxu1 %v5223_v58 }
 0x53d   : > { %5026 = vrot.lane.b32.xlu1 %v5025_v5, %s5406_s29  ;;  %4323 = vmatpush1.bf16.msra.mxu1 %v5221_v21  ;;  %v5256_v5 = vld [vmem:[%s8939_s5 + $0xb4] ss:$8 sps:$4 sm:$0xff]   ;;  %v5259_v21 = vld [vmem:[%s8939_s5 + $0xc4] ss:$8 sps:$4 sm:$0xff]  }
 0x53e   : > { %9509 = vst [vmem:[#allocation18_spill] sm:$0xff] %v7934_v41  ;;  %v5035_v61 = vpack.i.bf16 %v7934_v41, %v7930_v2  ;;  %5031 = vrot.lane.b32.xlu0 %v5030_v60, %s5406_s29  ;;  %4324 = vmatprep.subr.bf16.mxu1 %v5226_v51  ;;  %v5254_v60 = vld [vmem:[%s8939_s5 + $0xb0] ss:$8 sps:$4 sm:$0xff]  }
 0x541   : > { %5036 = vrot.lane.b32.xlu1 %v5035_v61, %s5406_s29  ;;  %4325 = vmatpush1.bf16.msra.mxu1 %v5224_v45 }
 0x542   : > { %5041 = vrot.lane.b32.xlu0 %v5040_v6, %s5406_s29  ;;  %v5229_v6 = vld [vmem:[%s8939_s5 + $0x24] ss:$8 sps:$4 sm:$0xff]  }
 0x543   : > { %4326 = vmatprep.subr.bf16.mxu1 %v5229_v6 }
 0x545   : > { %4327 = vmatpush1.bf16.msra.mxu1 %v5227_v23  ;;  %v5257_v23 = vld [vmem:[%s8939_s5 + $0xc0] ss:$8 sps:$4 sm:$0xff]  }
 0x546   : > { %4328 = vmatprep.subr.bf16.mxu1 %v5232_v49 }
 0x549   : > { %4329 = vmatpush1.bf16.msra.mxu1 %v5230_v38 }
 0x54a   : > { %4330 = vmatprep.subr.bf16.mxu1 %v5235_v4  ;;  %v5265_v4 = vld [vmem:[%s8939_s5 + $0xe4] ss:$8 sps:$4 sm:$0xff]  }
 0x54d   : > { %4331 = vmatpush1.bf16.msra.mxu1 %v5233_v26 }
 0x54e   : > { %4332 = vmatprep.subr.bf16.mxu1 %v5238_v28 }
 0x551   : > { %4333 = vmatpush1.bf16.msra.mxu1 %v5236_v10 }
 0x552   : > { %4334 = vmatprep.subr.bf16.mxu1 %v5241_v63 }
 0x555   : > { %4335 = vmatpush1.bf16.msra.mxu1 %v5239_v11 }
 0x556   : > { %4336 = vmatprep.subr.bf16.mxu1 %v5244_v24 }
 0x559   : > { %4337 = vmatpush1.bf16.msra.mxu1 %v5242_v35 }
 0x55a   : > { %4338 = vmatprep.subr.bf16.mxu1 %v5247_v48 }
 0x55d   : > { %4339 = vmatpush1.bf16.msra.mxu1 %v5245_v62 }
 0x55e   : > { %4340 = vmatprep.subr.bf16.mxu1 %v5250_v33 }
 0x561   : > { %4341 = vmatpush1.bf16.msra.mxu1 %v5248_v52 }
 0x562   : > { %4342 = vmatprep.subr.bf16.mxu1 %v5253_v15  ;;  %v5262_v15 = vld [vmem:[%s8939_s5 + $0xd4] ss:$8 sps:$4 sm:$0xff]  }
 0x565   : > { %4343 = vmatpush1.bf16.msra.mxu1 %v5251_v0  ;;  %v5260_v0 = vld [vmem:[%s8939_s5 + $0xd0] ss:$8 sps:$4 sm:$0xff]  }
 0x566   : > { %4344 = vmatprep.subr.bf16.mxu1 %v5256_v5 }
 0x569   : > { %4345 = vmatpush1.bf16.msra.mxu1 %v5254_v60 }
 0x56a   : > { %4346 = vmatprep.subr.bf16.mxu1 %v5259_v21 }
 0x56b   : > { %v8002_v59 = vpop.f32.mrb[32].mxu0 }
 0x56c   : > { %v8007_v40 = vpop.f32.mrb[33].mxu0 }
 0x56d   : > { %v8014_v56 = vpop.f32.mrb[34].mxu0  ;;  %4347 = vmatpush1.bf16.msra.mxu1 %v5257_v23 }
 0x56e   : > { %v8016_v53 = vpop.f32.mrb[35].mxu0  ;;  %4348 = vmatprep.subr.bf16.mxu1 %v5262_v15 }
 0x571   : > { %4349 = vmatpush1.bf16.msra.mxu1 %v5260_v0 }
 0x572   : > { %4350 = vmatprep.subr.bf16.mxu1 %v5265_v4 }
 0x573   : > { %v8026_v32 = vpop.f32.mrb[36].mxu0 }
 0x574   : > { %v8031_v61 = vpop.f32.mrb[37].mxu0 }
 0x575   : > { %v8038_v51 = vpop.f32.mrb[38].mxu0 }
 0x576   : > { %v8040_v45 = vpop.f32.mrb[39].mxu0 }
 0x577   : > { %9510 = vst [vmem:[#allocation23_spill] sm:$0xff] %v8040_v45 }
 0x57b   : > { %v8047_v49 = vpop.f32.mrb[40].mxu0 }
 0x57c   : > { %v8049_v38 = vpop.f32.mrb[41].mxu0 }
 0x57d   : > { %9511 = vst [vmem:[#allocation19_spill] sm:$0xff] %v8049_v38  ;;  %v8053_v26 = vpop.f32.mrb[42].mxu0 }
 0x57e   : > { %v8055_v28 = vpop.f32.mrb[43].mxu0 }
 0x57f   : > { %9512 = vst [vmem:[#allocation20_spill] sm:$0xff] %v8055_v28 }
 0x583   : > { %v8059_v63 = vpop.f32.mrb[44].mxu0 }
 0x584   : > { %v8061_v11 = vpop.f32.mrb[45].mxu0 }
 0x585   : > { %9513 = vst [vmem:[#allocation31_spill] sm:$0xff] %v8061_v11  ;;  %v8065_v35 = vpop.f32.mrb[46].mxu0 }
 0x586   : > { %v8067_v48 = vpop.f32.mrb[47].mxu0 }
 0x587   : > { %9514 = vst [vmem:[#allocation22_spill] sm:$0xff] %v8067_v48 }
 0x597   : > { %v4967_v33 = vpop.permute.xlu1 %4966 }
 0x598   : > { %v8071_v52 = vpop.permute.xlu0 %4971  ;;  %v4969_v5 = vunpack.i.h.bf16 %v4967_v33  ;;  %v4968_v60 = vunpack.i.l.bf16 %v4967_v33  ;;  %v5263_v33 = vld [vmem:[%s8939_s5 + $0xe0] ss:$8 sps:$4 sm:$0xff]  }
 0x599   : > { %v9145_v21 = vunpack.i.l.bf16 %v8071_v52  ;;  %v4974_v62 = vunpack.i.h.bf16 %v8071_v52  ;;  %4351 = vmatpush1.bf16.msra.mxu1 %v5263_v33 }
 0x59a   : > { %v3319_v15 = vsel %vm478_vm0, %v4968_v60, %v4969_v5 }
 0x59b   : > { %v8080_v23 = vpop.permute.xlu1 %4976  ;;  %v3320_v0 = vsel %vm478_vm0, %v4969_v5, %v9145_v21 }
 0x59c   : > { %v9146_v10 = vunpack.i.h.bf16 %v8080_v23  ;;  %v4978_v24 = vunpack.i.l.bf16 %v8080_v23  ;;  %v4982_v6 = vpop.permute.xlu0 %4981 }
 0x59d   : > { %v4984_v7 = vunpack.i.h.bf16 %v4982_v6  ;;  %v4983_v58 = vunpack.i.l.bf16 %v4982_v6 }
 0x59e   : > { %v3324_v55 = vsel %vm478_vm0, %v4974_v62, %v4978_v24  ;;  %v3325_v41 = vsel %vm478_vm0, %v4978_v24, %v9146_v10 }
 0x59f   : > { %v8100_v43 = vmax.f32 %v7826_v46, %v3324_v55  ;;  %v8103_v6 = vmax.f32 %v7870_v14, %v3325_v41  ;;  %v3318_v50 = vsel %vm478_vm0, %v4983_v58, %v4968_v60  ;;  %v3323_v12 = vsel %vm478_vm0, %v4984_v7, %v4974_v62  ;;  %v4987_v36 = vpop.permute.xlu1 %4986  ;;  %v5268_v46 = vld [vmem:[%s8939_s5 + $0xf4] ss:$8 sps:$4 sm:$0xff]   ;;  %v5266_v41 = vld [vmem:[%s8939_s5 + $0xf0] ss:$8 sps:$4 sm:$0xff]  }
 0x5a0   : > { %v8108_v5 = vmax.f32 %v7816_v25, %v3318_v50  ;;  %v8111_v21 = vmax.f32 %v7820_v42, %v3323_v12  ;;  %v8113_v24 = vpop.permute.xlu0 %4991  ;;  %v8124_v55 = vmax.f32 %v7818_v31, %v3319_v15  ;;  %v8127_v25 = vmax.f32 %v7864_v1, %v3320_v0  ;;  %4352 = vmatprep.subr.bf16.mxu1 %v5268_v46 }
 0x5a1   : > { %9515 = vst [vmem:[#allocation24_spill] sm:$0xff] %v8103_v6  ;;  %v5055_v14 = vpack.i.bf16 %v8103_v6, %v8100_v43  ;;  %4353 = vmatpush1.bf16.msra.mxu1 %v5266_v41  ;;  %v4989_v31 = vunpack.i.h.bf16 %v4987_v36  ;;  %v4988_v58 = vunpack.i.l.bf16 %v4987_v36  ;;  %v9147_v1 = vunpack.i.l.bf16 %v8113_v24 }
 0x5a2   : > { %9516 = vst [vmem:[#allocation33_spill] sm:$0xff] %v8127_v25  ;;  %v5045_v42 = vpack.i.bf16 %v8111_v21, %v8108_v5  ;;  %v5050_v7 = vpack.i.bf16 %v8127_v25, %v8124_v55  ;;  %v9517_v62 = vpack.i.bf16 %v8007_v40, %v8002_v59  ;;  %v9518_v36 = vpack.i.bf16 %v8031_v61, %v8026_v32 }
 0x5a3   : > { %v8131_v12 = vpop.permute.xlu1 %4996  ;;  %5056 = vrot.lane.b32.xlu0 %v5055_v14, %s5408_s7  ;;  %v3329_v33 = vsel %vm478_vm0, %v4988_v58, %v4989_v31  ;;  %v3330_v15 = vsel %vm478_vm0, %v4989_v31, %v9147_v1  ;;  %v4994_v31 = vunpack.i.h.bf16 %v8113_v24 }
 0x5a4   : > { %v5002_v50 = vpop.permute.xlu0 %5001  ;;  %5046 = vrot.lane.b32.xlu1 %v5045_v42, %s5408_s7  ;;  %v9151_v0 = vunpack.i.h.bf16 %v8131_v12  ;;  %v4998_v46 = vunpack.i.l.bf16 %v8131_v12  ;;  %v8165_v10 = vmax.f32 %v7831_v17, %v3329_v33  ;;  %v9522_v17 = vpack.i.bf16 %v8040_v45, %v8038_v51 }
 0x5a5   : > { %v5004_v14 = vunpack.i.h.bf16 %v5002_v50  ;;  %v5003_v41 = vunpack.i.l.bf16 %v5002_v50  ;;  %v9521_v50 = vpack.i.bf16 %v8049_v38, %v8047_v49 }
 0x5a6   : > { %v3334_v1 = vsel %vm478_vm0, %v4994_v31, %v4998_v46  ;;  %v3335_v6 = vsel %vm478_vm0, %v4998_v46, %v9151_v0  ;;  %v9525_v46 = vpack.i.bf16 %v8055_v28, %v8053_v26 }
 0x5a7   : > { %v8138_v4 = vpop.permute.xlu1 %5006  ;;  %5061 = vrot.lane.b32.xlu0 %v9517_v62, %s5406_s29  ;;  %v9519_v62 = vpack.i.bf16 %v8016_v53, %v8014_v56  ;;  %v3333_v25 = vsel %vm478_vm0, %v5004_v14, %v4994_v31  ;;  %v8197_v31 = vmax.f32 %v7839_v57, %v3334_v1 }
 0x5a8   : > { %v8144_v60 = vpop.permute.xlu0 %5011  ;;  %5051 = vrot.lane.b32.xlu1 %v5050_v7, %s5408_s7  ;;  %v5008_v33 = vunpack.i.l.bf16 %v8138_v4  ;;  %v8206_v0 = vmax.f32 %v7833_v19, %v3333_v25 }
 0x5a9   : > { %v5014_v14 = vunpack.i.h.bf16 %v8144_v60 }
 0x5ab   : > { %5071 = vrot.lane.b32.xlu0 %v9518_v36, %s5406_s29  ;;  %v8157_v42 = vpop.permute.xlu1 %5016  ;;  %v8168_v36 = vmax.f32 %v7880_v27, %v3330_v15  ;;  %v5009_v27 = vunpack.i.h.bf16 %v8138_v4  ;;  %v8200_v4 = vmax.f32 %v7888_v30, %v3335_v6 }
 0x5ac   : > { %v5022_v7 = vpop.permute.xlu0 %5021  ;;  %5066 = vrot.lane.b32.xlu1 %v9519_v62, %s5406_s29  ;;  %v3328_v62 = vsel %vm478_vm0, %v5003_v41, %v4988_v58  ;;  %v9523_v41 = vpack.i.bf16 %v8061_v11, %v8059_v63  ;;  %v9527_v6 = vunpack.i.h.bf16 %v8157_v42 }
 0x5ad   : > { %9520 = vst [vmem:[#allocation26_spill] sm:$0xff] %v8168_v36  ;;  %9524 = vst [vmem:[#allocation27_spill] sm:$0xff] %v8200_v4  ;;  %v3339_v15 = vsel %vm478_vm0, %v5008_v33, %v5009_v27  ;;  %v5023_v11 = vunpack.i.l.bf16 %v5022_v7 }
 0x5af   : > { %5081 = vrot.lane.b32.xlu0 %v9521_v50, %s5406_s29  ;;  %v5018_v50 = vunpack.i.l.bf16 %v8157_v42  ;;  %v5027_v58 = vpop.permute.xlu1 %5026 }
 0x5b0   : > { %5076 = vrot.lane.b32.xlu1 %v9522_v17, %s5406_s29  ;;  %v8188_v38 = vpop.permute.xlu0 %5031  ;;  %v8203_v17 = vmax.f32 %v7829_v39, %v3328_v62  ;;  %v5100_v39 = vpack.i.bf16 %v8168_v36, %v8165_v10  ;;  %v5029_v25 = vunpack.i.h.bf16 %v5027_v58  ;;  %v5028_v1 = vunpack.i.l.bf16 %v5027_v58 }
 0x5b1   : > { %v3344_v30 = vsel %vm478_vm0, %v5014_v14, %v5018_v50  ;;  %v3345_v19 = vsel %vm478_vm0, %v5018_v50, %v9527_v6  ;;  %v5033_v62 = vunpack.i.l.bf16 %v8188_v38  ;;  %v5105_v50 = vpack.i.bf16 %v8200_v4, %v8197_v31 }
 0x5b2   : > { %v8235_v58 = vmax.f32 %v7844_v54, %v3339_v15  ;;  %v8244_v6 = vmax.f32 %v7909_v18, %v3345_v19  ;;  %v3338_v54 = vsel %vm478_vm0, %v5023_v11, %v5008_v33  ;;  %v5034_v18 = vunpack.i.h.bf16 %v8188_v38 }
 0x5b3   : > { %5091 = vrot.lane.b32.xlu0 %v9523_v41, %s5406_s29  ;;  %v9526_v41 = vunpack.i.l.bf16 %v8144_v60  ;;  %v8224_v28 = vpop.permute.xlu1 %5036  ;;  %v3350_v36 = vsel %vm478_vm0, %v5029_v25, %v5033_v62  ;;  %v8268_v33 = vmax.f32 %v7842_v44, %v3338_v54 }
 0x5b4   : > { %5086 = vrot.lane.b32.xlu1 %v9525_v46, %s5406_s29  ;;  %v5024_v46 = vunpack.i.h.bf16 %v5022_v7  ;;  %v5042_v45 = vpop.permute.xlu0 %5041 }
 0x5b5   : > { %v3340_v57 = vsel %vm478_vm0, %v5009_v27, %v9526_v41  ;;  %v9528_v27 = vpack.i.bf16 %v8067_v48, %v8065_v35  ;;  %v5110_v41 = vpack.i.bf16 %v8206_v0, %v8203_v17  ;;  %v5044_v48 = vunpack.i.h.bf16 %v5042_v45 }
 0x5b6   : > { %v8238_v7 = vmax.f32 %v7898_v20, %v3340_v57  ;;  %v5043_v4 = vunpack.i.l.bf16 %v5042_v45  ;;  %v3343_v15 = vsel %vm478_vm0, %v5024_v46, %v5014_v14  ;;  %v9160_v20 = vunpack.i.h.bf16 %v8224_v28 }
 0x5b7   : > { %5101 = vrot.lane.b32.xlu0 %v5100_v39, %s5408_s7  ;;  %v8241_v39 = vmax.f32 %v7852_v34, %v3344_v30  ;;  %v5038_v34 = vunpack.i.l.bf16 %v8224_v28  ;;  %v8261_v30 = vmax.f32 %v7919_v9, %v3350_v36  ;;  %v8271_v14 = vmax.f32 %v7846_v37, %v3343_v15 }
 0x5b8   : > { %5096 = vrot.lane.b32.xlu1 %v9528_v27, %s5406_s29  ;;  %v3349_v27 = vsel %vm478_vm0, %v5028_v1, %v5029_v25  ;;  %v5115_v11 = vpack.i.bf16 %v8238_v7, %v8235_v58  ;;  %v3348_v19 = vsel %vm478_vm0, %v5043_v4, %v5028_v1 }
 0x5b9   : > { %v8258_v57 = vmax.f32 %v7856_v13, %v3349_v27  ;;  %v5120_v45 = vpack.i.bf16 %v8244_v6, %v8241_v39  ;;  %v3353_v13 = vsel %vm478_vm0, %v5044_v48, %v5034_v18  ;;  %v3354_v25 = vsel %vm478_vm0, %v5034_v18, %v5038_v34 }
 0x5ba   : > { %v3355_v9 = vsel %vm478_vm0, %v5038_v34, %v9160_v20  ;;  %v8282_v44 = vmax.f32 %v7854_v8, %v3348_v19  ;;  %v8285_v37 = vmax.f32 %v7858_v16, %v3353_v13  ;;  %v8290_v48 = vmax.f32 %v7862_v22, %v3354_v25  ;;  %v5271_v22 = vld [vmem:[%s8939_s5 + $0x104] ss:$8 sps:$4 sm:$0xff]  }
 0x5bb   : > { %5111 = vrot.lane.b32.xlu0 %v5110_v41, %s5408_s7  ;;  %v5130_v36 = vpack.i.bf16 %v8261_v30, %v8258_v57  ;;  %v8293_v4 = vmax.f32 %v7930_v2, %v3355_v9  ;;  %v5125_v1 = vpack.i.bf16 %v8271_v14, %v8268_v33  ;;  %4395 = vmatprep.subr.bf16.mxu1 %v5271_v22  ;;  %v9529_v25 = vunpack.i.l.bf16 %v8071_v52 }
 0x5bc   : > { %5106 = vrot.lane.b32.xlu1 %v5105_v50, %s5408_s7  ;;  %v5140_v8 = vpack.i.bf16 %v8285_v37, %v8282_v44 }
 0x5bd   : > { %v5135_v16 = vpack.i.bf16 %v8293_v4, %v8290_v48 }
 0x5bf   : > { %5121 = vrot.lane.b32.xlu0 %v5120_v45, %s5408_s7 }
 0x5c0   : > { %5116 = vrot.lane.b32.xlu1 %v5115_v11, %s5408_s7 }
 0x5c3   : > { %5131 = vrot.lane.b32.xlu0 %v5130_v36, %s5408_s7 }
 0x5c4   : > { %5126 = vrot.lane.b32.xlu1 %v5125_v1, %s5408_s7 }
 0x5c7   : > { %5141 = vrot.lane.b32.xlu0 %v5140_v8, %s5408_s7 }
 0x5c8   : > { %5136 = vrot.lane.b32.xlu1 %v5135_v16, %s5408_s7 }
 0x615   : > { %v8308_v2 = vpop.permute.xlu0 %5056 }
 0x616   : > { %v5047_v46 = vpop.permute.xlu1 %5046  ;;  %v5058_v41 = vunpack.i.l.bf16 %v8308_v2  ;;  %v9158_v54 = vunpack.i.h.bf16 %v8308_v2 }
 0x617   : > { %v5049_v50 = vunpack.i.h.bf16 %v5047_v46  ;;  %v5048_v45 = vunpack.i.l.bf16 %v5047_v46 }
 0x618   : > { %v3604_v52 = vsel %vm880_vm2, %v5058_v41, %v9158_v54 }
 0x619   : > { %v8311_v27 = vpop.permute.xlu0 %5061  ;;  %v3603_v13 = vsel %vm880_vm2, %v5049_v50, %v5058_v41 }
 0x61a   : > { %v5064_v15 = vunpack.i.h.bf16 %v8311_v27  ;;  %v5063_v34 = vunpack.i.l.bf16 %v8311_v27  ;;  %v8316_v18 = vpop.permute.xlu1 %5051  ;;  %v9540_v27 = vunpack.i.h.bf16 %v8224_v28 }
 0x61b   : > { %v9159_v11 = vunpack.i.h.bf16 %v8316_v18  ;;  %v5053_v19 = vunpack.i.l.bf16 %v8316_v18 }
 0x61c   : > { %v3321_v9 = vsel %vm478_vm0, %v9529_v25, %v5063_v34  ;;  %v3322_v36 = vsel %vm478_vm0, %v5063_v34, %v5064_v15 }
 0x61d   : > { %v8328_v1 = vmax.f32 %v7866_v29, %v3321_v9  ;;  %v8331_v8 = vmax.f32 %v8002_v59, %v3322_v36  ;;  %v3598_v16 = vsel %vm880_vm2, %v5048_v45, %v5053_v19  ;;  %v3599_v22 = vsel %vm880_vm2, %v5053_v19, %v9159_v11  ;;  %v8337_v46 = vpop.permute.xlu0 %5071 }
 0x61e   : > { %v3686_v50 = vmax.f32 %v8108_v5, %v3598_v16  ;;  %v5074_v29 = vunpack.i.h.bf16 %v8337_v46  ;;  %v5073_v34 = vunpack.i.l.bf16 %v8337_v46  ;;  %v8345_v59 = vpop.permute.xlu1 %5066  ;;  %v3692_v45 = vmax.f32 %v8111_v21, %v3603_v13 }
 0x61f   : > { %v5069_v25 = vunpack.i.h.bf16 %v8345_v59  ;;  %v5068_v19 = vunpack.i.l.bf16 %v8345_v59  ;;  %v5145_v9 = vpack.i.bf16 %v8331_v8, %v8328_v1  ;;  %v9530_v36 = vunpack.i.l.bf16 %v8113_v24 }
 0x620   : > { %v3332_v5 = vsel %vm478_vm0, %v5073_v34, %v5074_v29  ;;  %v3687_v16 = vmax.f32 %v8124_v55, %v3599_v22  ;;  %v3734_v54 = vpack.c.bf16 %v3692_v45, %v3686_v50  ;;  %v3693_v21 = vmax.f32 %v8100_v43, %v3604_v52 }
 0x621   : > { %v3331_v41 = vsel %vm478_vm0, %v9530_v36, %v5073_v34  ;;  %v8359_v11 = vpop.permute.xlu0 %5081  ;;  %5146 = vrot.lane.b32.xlu1 %v5145_v9, %s5408_s7  ;;  %v9531_v13 = vunpack.i.h.bf16 %v8080_v23  ;;  %v3327_v24 = vsel %vm478_vm0, %v5068_v19, %v5069_v25  ;;  %v8375_v22 = vmax.f32 %v8026_v32, %v3332_v5 }
 0x622   : > { %v9165_v36 = vunpack.i.h.bf16 %v8359_v11  ;;  %v5083_v20 = vunpack.i.l.bf16 %v8359_v11  ;;  %v8369_v34 = vpop.permute.xlu1 %5076  ;;  %v8372_v55 = vmax.f32 %v7883_v3, %v3331_v41  ;;  %v9532_v52 = vunpack.i.l.bf16 %v8144_v60  ;;  %v5269_v3 = vld [vmem:[%s8939_s5 + $0x100] ss:$8 sps:$4 sm:$0xff]  }
 0x623   : > { %v3326_v59 = vsel %vm478_vm0, %v9531_v13, %v5068_v19  ;;  %v9163_v43 = vunpack.i.h.bf16 %v8369_v34  ;;  %v5078_v23 = vunpack.i.l.bf16 %v8369_v34  ;;  %v3735_v19 = vpack.c.bf16 %v3693_v21, %v3687_v16  ;;  %v9534_v13 = vld [vmem:[#allocation16_spill] sm:$0xff] }
 0x624   : > { %v3341_v50 = vsel %vm478_vm0, %v9532_v52, %v5083_v20  ;;  %v3342_v45 = vsel %vm478_vm0, %v5083_v20, %v9165_v36  ;;  %v8389_v32 = vmax.f32 %v7874_v47, %v3326_v59  ;;  %v8392_v9 = vmax.f32 %v8014_v56, %v3327_v24  ;;  %v9535_v59 = vld [vmem:[#allocation21_spill] sm:$0xff]  ;;  %v9543_v36 = vld [vmem:[#allocation20_spill] sm:$0xff] }
 0x625   : > { %v9533_v41 = vunpack.i.h.bf16 %v8131_v12  ;;  %v8397_v5 = vpop.permute.xlu0 %5091  ;;  %v8400_v52 = vmax.f32 %v9534_v13, %v3341_v50  ;;  %v3337_v20 = vsel %vm478_vm0, %v5078_v23, %v9163_v43  ;;  %4354 = vmatprep.mubr.bf16.mxu1 %v3735_v19  ;;  %v5274_v12 = vld [vmem:[%s8939_s5 + $0x114] ss:$8 sps:$4 sm:$0xff]   ;;  %v8411_v21 = vmax.f32 %v8047_v49, %v3342_v45 }
 0x626   : > { %v9161_v47 = vunpack.i.h.bf16 %v8397_v5  ;;  %v5093_v16 = vunpack.i.l.bf16 %v8397_v5  ;;  %v5087_v56 = vpop.permute.xlu1 %5086  ;;  %4355 = vmatmul.mubr.bf16.vlgmr.msra.gmra.mrb[16].mxu1 %v3734_v54  ;;  %v8419_v19 = vmax.f32 %v8038_v51, %v3337_v20  ;;  %v5272_v54 = vld [vmem:[%s8939_s5 + $0x110] ss:$8 sps:$4 sm:$0xff]   ;;  %v5150_v38 = vpack.i.bf16 %v8392_v9, %v8389_v32 }
 0x627   : > { %v3336_v60 = vsel %vm478_vm0, %v9533_v41, %v5078_v23  ;;  %v5155_v23 = vpack.i.bf16 %v8375_v22, %v8372_v55  ;;  %v5089_v50 = vunpack.i.h.bf16 %v5087_v56  ;;  %v5088_v45 = vunpack.i.l.bf16 %v5087_v56  ;;  %4396 = vmatpush1.bf16.msra.mxu1 %v5269_v3  ;;  %v5277_v3 = vld [vmem:[%s8939_s5 + $0x124] ss:$8 sps:$4 sm:$0xff]  }
 0x628   : > { %v8414_v24 = vmax.f32 %v9535_v59, %v3336_v60  ;;  %v3351_v41 = vsel %vm478_vm0, %v5033_v62, %v5093_v16  ;;  %v3352_v49 = vsel %vm478_vm0, %v5093_v16, %v9161_v47  ;;  %v9536_v60 = vld [vmem:[#allocation17_spill] sm:$0xff]  ;;  %v9538_v20 = vunpack.i.h.bf16 %v8157_v42  ;;  %4397 = vmatprep.subr.bf16.mxu1 %v5274_v12  ;;  %5151 = vrot.lane.b32.xlu0 %v5150_v38, %s5408_s7 }
 0x629   : > { %v8431_v13 = vmax.f32 %v9536_v60, %v3351_v41  ;;  %v8434_v51 = vmax.f32 %v8059_v63, %v3352_v49  ;;  %5156 = vrot.lane.b32.xlu1 %v5155_v23, %s5408_s7  ;;  %v8439_v62 = vpop.permute.xlu0 %5101  ;;  %v3347_v56 = vsel %vm478_vm0, %v5088_v45, %v5089_v50  ;;  %v9539_v41 = vld [vmem:[#allocation25_spill] sm:$0xff]  ;;  %v5165_v42 = vpack.i.bf16 %v8411_v21, %v8400_v52 }
 0x62a   : > { %v3346_v16 = vsel %vm478_vm0, %v9538_v20, %v5088_v45  ;;  %v9162_v63 = vunpack.i.h.bf16 %v8439_v62  ;;  %v5103_v59 = vunpack.i.l.bf16 %v8439_v62  ;;  %v8450_v23 = vpop.permute.xlu1 %5096  ;;  %v8456_v60 = vmax.f32 %v8053_v26, %v3347_v56  ;;  %v5275_v26 = vld [vmem:[%s8939_s5 + $0x120] ss:$8 sps:$4 sm:$0xff]  }
 0x62b   : > { %9537 = vst [vmem:[#allocation37_spill] sm:$0xff] %v8434_v51  ;;  %v8453_v49 = vmax.f32 %v9539_v41, %v3346_v16  ;;  %v8462_v45 = vmax.f32 %v8016_v53, %v5069_v25  ;;  %v9164_v20 = vunpack.i.h.bf16 %v8450_v23  ;;  %v5098_v47 = vunpack.i.l.bf16 %v8450_v23  ;;  %4398 = vmatpush1.bf16.msra.mxu1 %v5272_v54  ;;  %v5280_v54 = vld [vmem:[%s8939_s5 + $0x134] ss:$8 sps:$4 sm:$0xff]  }
 0x62c   : > { %v5160_v12 = vpack.i.bf16 %v8419_v19, %v8414_v24  ;;  %v8474_v38 = vmax.f32 %v8007_v40, %v5064_v15  ;;  %v3609_v53 = vsel %vm880_vm2, %v5103_v59, %v9162_v63  ;;  %v5175_v16 = vpack.i.bf16 %v8434_v51, %v8431_v13  ;;  %4399 = vmatprep.subr.bf16.mxu1 %v5277_v3  ;;  %v9541_v63 = vld [vmem:[#allocation18_spill] sm:$0xff] }
 0x62d   : > { %5166 = vrot.lane.b32.xlu1 %v5165_v42, %s5408_s7  ;;  %v5112_v25 = vpop.permute.xlu0 %5111  ;;  %v3356_v40 = vsel %vm478_vm0, %v9540_v27, %v5098_v47  ;;  %v3357_v15 = vsel %vm478_vm0, %v5098_v47, %v9164_v20  ;;  %v5170_v42 = vpack.i.bf16 %v8456_v60, %v8453_v49  ;;  %v8506_v47 = vmax.f32 %v8031_v61, %v5074_v29 }
 0x62e   : > { %v5114_v56 = vunpack.i.h.bf16 %v5112_v25  ;;  %v8491_v41 = vpop.permute.xlu1 %5106  ;;  %v8496_v3 = vmax.f32 %v9541_v63, %v3356_v40  ;;  %v8499_v43 = vmax.f32 %v8065_v35, %v3357_v15  ;;  %5161 = vrot.lane.b32.xlu0 %v5160_v12, %s5408_s7  ;;  %v5113_v28 = vunpack.i.l.bf16 %v5112_v25  ;;  %v5278_v35 = vld [vmem:[%s8939_s5 + $0x130] ss:$8 sps:$4 sm:$0xff]  }
 0x62f   : > { %v9167_v27 = vunpack.i.h.bf16 %v8491_v41  ;;  %v5185_v20 = vpack.i.bf16 %v8462_v45, %v8474_v38  ;;  %v8511_v51 = vmax.f32 %v9543_v36, %v5089_v50  ;;  %v5108_v63 = vunpack.i.l.bf16 %v8491_v41  ;;  %4400 = vmatpush1.bf16.msra.mxu1 %v5275_v26  ;;  %v5283_v36 = vld [vmem:[%s8939_s5 + $0x144] ss:$8 sps:$4 sm:$0xff]  }
 0x630   : > { %9542 = vst [vmem:[#allocation28_spill] sm:$0xff] %v8499_v43  ;;  %v3608_v12 = vsel %vm880_vm2, %v5113_v28, %v5103_v59  ;;  %v5180_v61 = vpack.i.bf16 %v8499_v43, %v8496_v3  ;;  %v3699_v29 = vmax.f32 %v8165_v10, %v3609_v53  ;;  %4401 = vmatprep.subr.bf16.mxu1 %v5280_v54  ;;  %v9544_v15 = vunpack.i.h.bf16 %v8359_v11 }
 0x631   : > { %5176 = vrot.lane.b32.xlu1 %v5175_v16, %s5408_s7  ;;  %v8519_v46 = vpop.permute.xlu0 %5121  ;;  %v3613_v50 = vsel %vm880_vm2, %v5114_v56, %v5108_v63  ;;  %v3614_v59 = vsel %vm880_vm2, %v5108_v63, %v9167_v27  ;;  %v3698_v40 = vmax.f32 %v8203_v17, %v3608_v12  ;;  %v9545_v56 = vld [vmem:[#allocation19_spill] sm:$0xff]  ;;  %v9546_v63 = vunpack.i.h.bf16 %v8369_v34 }
 0x632   : > { %v5123_v25 = vunpack.i.l.bf16 %v8519_v46  ;;  %v8533_v16 = vpop.permute.xlu1 %5116  ;;  %5171 = vrot.lane.b32.xlu0 %v5170_v42, %s5408_s7  ;;  %v3705_v54 = vmax.f32 %v8197_v31, %v3614_v59  ;;  %v8543_v28 = vmax.f32 %v9545_v56, %v9544_v15  ;;  %v9547_v27 = vld [vmem:[#allocation23_spill] sm:$0xff]  ;;  %v9548_v42 = vunpack.i.h.bf16 %v8519_v46  ;;  %v5286_v15 = vld [vmem:[%s8939_s5 + $0x154] ss:$8 sps:$4 sm:$0xff]  }
 0x633   : > { %v5118_v53 = vunpack.i.l.bf16 %v8533_v16  ;;  %v8548_v26 = vmax.f32 %v9547_v27, %v9546_v63  ;;  %v3704_v43 = vmax.f32 %v8206_v0, %v3613_v50  ;;  %4402 = vmatpush1.bf16.msra.mxu1 %v5278_v35  ;;  %v9549_v31 = vunpack.i.h.bf16 %v8533_v16  ;;  %v5281_v27 = vld [vmem:[%s8939_s5 + $0x140] ss:$8 sps:$4 sm:$0xff]  }
 0x634   : > { %v3624_v10 = vsel %vm880_vm2, %v5123_v25, %v9548_v42  ;;  %v3741_v12 = vpack.c.bf16 %v3705_v54, %v3699_v29  ;;  %4403 = vmatprep.subr.bf16.mxu1 %v5283_v36  ;;  %v9550_v54 = vunpack.i.h.bf16 %v8397_v5  ;;  %v9552_v56 = vunpack.i.h.bf16 %v8450_v23  ;;  %v9553_v63 = vld [vmem:[#allocation22_spill] sm:$0xff]  ;;  %v5284_v5 = vld [vmem:[%s8939_s5 + $0x150] ss:$8 sps:$4 sm:$0xff]  }
 0x635   : > { %5186 = vrot.lane.b32.xlu1 %v5185_v20, %s5408_s7  ;;  %v3619_v17 = vsel %vm880_vm2, %v5118_v53, %v9549_v31  ;;  %v8558_v11 = vpop.permute.xlu0 %5131  ;;  %v3717_v34 = vmax.f32 %v8241_v39, %v3624_v10  ;;  %v3740_v20 = vpack.c.bf16 %v3704_v43, %v3698_v40  ;;  %v5195_v39 = vpack.i.bf16 %v8511_v51, %v8543_v28  ;;  %v9551_v43 = vld [vmem:[#allocation31_spill] sm:$0xff]  ;;  %v3842_v23 = vld [vmem:[%s8938_s4] sm:$0xff] }
 0x636   : > { %v5134_v59 = vunpack.i.h.bf16 %v8558_v11  ;;  %v5133_v0 = vunpack.i.l.bf16 %v8558_v11  ;;  %v5127_v35 = vpop.permute.xlu1 %5126  ;;  %v3711_v50 = vmax.f32 %v8235_v58, %v3619_v17  ;;  %5181 = vrot.lane.b32.xlu0 %v5180_v61, %s5408_s7  ;;  %4364 = vmatprep.mubr.bf16.mxu1 %v3741_v12  ;;  %v5190_v36 = vpack.i.bf16 %v8548_v26, %v8506_v47 }
 0x637   : > { %v5129_v29 = vunpack.i.h.bf16 %v5127_v35  ;;  %v5128_v10 = vunpack.i.l.bf16 %v5127_v35  ;;  %v8578_v40 = vmax.f32 %v9551_v43, %v9550_v54  ;;  %4365 = vmatmul.mubr.bf16.gmra.mrb[20].mxu1 %v3740_v20  ;;  %v8583_v42 = vmax.f32 %v9553_v63, %v9552_v56  ;;  %v5292_v43 = vld [vmem:[%s8939_s5 + $0x174] ss:$8 sps:$4 sm:$0xff]   ;;  %v3843_v63 = vld [vmem:[%s8938_s4 + $0x8] sm:$0xff] }
 0x638   : > { %v3747_v58 = vpack.c.bf16 %v3717_v34, %v3711_v50  ;;  %4404 = vmatpush1.bf16.msra.mxu1 %v5281_v27  ;;  %v3629_v12 = vsel %vm880_vm2, %v5133_v0, %v5134_v59  ;;  %v5289_v27 = vld [vmem:[%s8939_s5 + $0x164] ss:$8 sps:$4 sm:$0xff]  }
 0x639   : > { %5196 = vrot.lane.b32.xlu1 %v5195_v39, %s5408_s7  ;;  %v3623_v61 = vsel %vm880_vm2, %v5129_v29, %v5123_v25  ;;  %v3618_v31 = vsel %vm880_vm2, %v5128_v10, %v5118_v53  ;;  %v5142_v17 = vpop.permute.xlu0 %5141  ;;  %4405 = vmatprep.subr.bf16.mxu1 %v5286_v15  ;;  %v5200_v10 = vpack.i.bf16 %v8583_v42, %v8578_v40  ;;  %v3844_v15 = vld [vmem:[%s8938_s4 + $0x10] sm:$0xff] }
 0x63a   : > { %v8597_v34 = vpop.permute.xlu1 %5136  ;;  %4374 = vmatprep.mubr.bf16.mxu1 %v3747_v58  ;;  %v3710_v25 = vmax.f32 %v8268_v33, %v3618_v31  ;;  %v3716_v53 = vmax.f32 %v8271_v14, %v3623_v61  ;;  %5191 = vrot.lane.b32.xlu0 %v5190_v36, %s5408_s7  ;;  %v5144_v35 = vunpack.i.h.bf16 %v5142_v17  ;;  %v5143_v20 = vunpack.i.l.bf16 %v5142_v17  ;;  %v5287_v14 = vld [vmem:[%s8939_s5 + $0x160] ss:$8 sps:$4 sm:$0xff]   ;;  %v5295_v17 = vld [vmem:[%s8939_s5 + $0x184] ss:$8 sps:$4 sm:$0xff]  }
 0x63b   : > { %v5139_v50 = vunpack.i.h.bf16 %v8597_v34  ;;  %v5138_v39 = vunpack.i.l.bf16 %v8597_v34  ;;  %v3723_v36 = vmax.f32 %v8258_v57, %v3629_v12  ;;  %v5290_v57 = vld [vmem:[%s8939_s5 + $0x170] ss:$8 sps:$4 sm:$0xff]   ;;  %v5293_v12 = vld [vmem:[%s8939_s5 + $0x180] ss:$8 sps:$4 sm:$0xff]  }
 0x63c   : > { %v3746_v29 = vpack.c.bf16 %v3716_v53, %v3710_v25  ;;  %4406 = vmatpush1.bf16.msra.mxu1 %v5284_v5  ;;  %v3628_v58 = vsel %vm880_vm2, %v5143_v20, %v5133_v0  ;;  %v3845_v5 = vld [vmem:[%s8938_s4 + $0x18] sm:$0xff]  ;;  %v3847_v25 = vld [vmem:[%s8938_s4 + $0x28] sm:$0xff] }
 0x63d   : > { %3852 = vperm.xlu1 %4964, %v3842_v23   ;;  %v3634_v33 = vsel %vm880_vm2, %v5138_v39, %v5139_v50  ;;  %4407 = vmatprep.subr.bf16.mxu1 %v5289_v27  ;;  %v3633_v56 = vsel %vm880_vm2, %v5144_v35, %v5138_v39  ;;  %v3722_v0 = vmax.f32 %v8282_v44, %v3628_v58  ;;  %v3848_v44 = vld [vmem:[%s8938_s4 + $0x30] sm:$0xff]  ;;  %v5301_v27 = vld [vmem:[%s8939_s5 + $0x1a4] ss:$8 sps:$4 sm:$0xff]   ;;  %v3849_v35 = vld [vmem:[%s8938_s4 + $0x38] sm:$0xff] }
 0x63e   : > { %v3729_v54 = vmax.f32 %v8290_v48, %v3634_v33  ;;  %5201 = vrot.lane.b32.xlu0 %v5200_v10, %s5408_s7  ;;  %v3846_v48 = vld [vmem:[%s8938_s4 + $0x20] sm:$0xff]  ;;  %v3728_v31 = vmax.f32 %v8285_v37, %v3633_v56  ;;  %v5298_v23 = vld [vmem:[%s8939_s5 + $0x194] ss:$8 sps:$4 sm:$0xff]   ;;  %v5296_v53 = vld [vmem:[%s8939_s5 + $0x190] ss:$8 sps:$4 sm:$0xff]  }
 0x63f   : > { %4375 = vmatmul.mubr.bf16.gmra.mrb[24].mxu1 %v3746_v29  ;;  %v5299_v20 = vld [vmem:[%s8939_s5 + $0x1a0] ss:$8 sps:$4 sm:$0xff]   ;;  %v5304_v39 = vld [vmem:[%s8939_s5 + $0x1b4] ss:$8 sps:$4 sm:$0xff]   ;;  %v5302_v29 = vld [vmem:[%s8939_s5 + $0x1b0] ss:$8 sps:$4 sm:$0xff]  }
 0x640   : > { %v3753_v61 = vpack.c.bf16 %v3729_v54, %v3723_v36  ;;  %4408 = vmatpush1.bf16.msra.mxu1 %v5287_v14  ;;  %v3752_v37 = vpack.c.bf16 %v3728_v31, %v3722_v0  ;;  %v5307_v10 = vld [vmem:[%s8939_s5 + $0x1c4] ss:$8 sps:$4 sm:$0xff]   ;;  %v5305_v33 = vld [vmem:[%s8939_s5 + $0x1c0] ss:$8 sps:$4 sm:$0xff]   ;;  %v5310_v14 = vld [vmem:[%s8939_s5 + $0x1d4] ss:$8 sps:$4 sm:$0xff]   ;;  %v9554_v0 = vunpack.i.h.bf16 %v8316_v18 }
 0x641   : > { %3862 = vperm.xlu1 %4964, %v3844_v15   ;;  %4409 = vmatprep.subr.bf16.mxu1 %v5292_v43  ;;  %v5308_v15 = vld [vmem:[%s8939_s5 + $0x1d0] ss:$8 sps:$4 sm:$0xff]   ;;  %v5313_v36 = vld [vmem:[%s8939_s5 + $0x1e4] ss:$8 sps:$4 sm:$0xff]   ;;  %v5311_v54 = vld [vmem:[%s8939_s5 + $0x1e0] ss:$8 sps:$4 sm:$0xff]  }
 0x642   : > { %4384 = vmatprep.mubr.bf16.mxu1 %v3753_v61  ;;  %3857 = vperm.xlu0 %4963, %v3843_v63   ;;  %v5316_v43 = vld [vmem:[%s8939_s5 + $0x1f4] ss:$8 sps:$4 sm:$0xff]   ;;  %v5314_v58 = vld [vmem:[%s8939_s5 + $0x1f0] ss:$8 sps:$4 sm:$0xff]   ;;  %v5319_v56 = vld [vmem:[%s8939_s5 + $0x204] ss:$8 sps:$4 sm:$0xff]  }
 0x644   : > { %4410 = vmatpush1.bf16.msra.mxu1 %v5290_v57 }
 0x645   : > { %3872 = vperm.xlu1 %4964, %v3846_v48   ;;  %4411 = vmatprep.subr.bf16.mxu1 %v5295_v17 }
 0x646   : > { %3867 = vperm.xlu0 %4963, %v3845_v5  }
 0x647   : > { %4385 = vmatmul.mubr.bf16.gmra.mrb[28].mxu1 %v3752_v37 }
 0x648   : > { %4412 = vmatpush1.bf16.msra.mxu1 %v5293_v12 }
 0x649   : > { %3882 = vperm.xlu1 %4964, %v3848_v44   ;;  %4413 = vmatprep.subr.bf16.mxu1 %v5298_v23 }
 0x64a   : > { %3877 = vperm.xlu0 %4963, %v3847_v25   ;;  %v9555_v25 = vunpack.i.h.bf16 %v8308_v2 }
 0x64c   : > { %4414 = vmatpush1.bf16.msra.mxu1 %v5296_v53 }
 0x64d   : > { %4415 = vmatprep.subr.bf16.mxu1 %v5301_v27  ;;  %v9556_v27 = vld [vmem:[#allocation33_spill] sm:$0xff] }
 0x64e   : > { %3887 = vperm.xlu0 %4963, %v3849_v35  }
 0x650   : > { %4416 = vmatpush1.bf16.msra.mxu1 %v5299_v20  ;;  %v9557_v20 = vld [vmem:[#allocation24_spill] sm:$0xff] }
 0x651   : > { %4417 = vmatprep.subr.bf16.mxu1 %v5304_v39 }
 0x654   : > { %4418 = vmatpush1.bf16.msra.mxu1 %v5302_v29 }
 0x655   : > { %4419 = vmatprep.subr.bf16.mxu1 %v5307_v10 }
 0x658   : > { %4420 = vmatpush1.bf16.msra.mxu1 %v5305_v33 }
 0x659   : > { %4421 = vmatprep.subr.bf16.mxu1 %v5310_v14 }
 0x65c   : > { %4422 = vmatpush1.bf16.msra.mxu1 %v5308_v15 }
 0x65d   : > { %4423 = vmatprep.subr.bf16.mxu1 %v5313_v36 }
 0x660   : > { %4424 = vmatpush1.bf16.msra.mxu1 %v5311_v54 }
 0x661   : > { %4425 = vmatprep.subr.bf16.mxu1 %v5316_v43 }
 0x664   : > { %4426 = vmatpush1.bf16.msra.mxu1 %v5314_v58  ;;  %v5317_v58 = vld [vmem:[%s8939_s5 + $0x200] ss:$8 sps:$4 sm:$0xff]  }
 0x665   : > { %4468 = vmatprep.subr.bf16.mxu1 %v5319_v56 }
 0x693   : > { %v8700_v63 = vpop.permute.xlu1 %5146 }
 0x694   : > { %v5149_v61 = vunpack.i.h.bf16 %v8700_v63  ;;  %v5148_v57 = vunpack.i.l.bf16 %v8700_v63 }
 0x696   : > { %v3600_v31 = vsel %vm880_vm2, %v9554_v0, %v5148_v57  ;;  %v3601_v17 = vsel %vm880_vm2, %v5148_v57, %v5149_v61  ;;  %v5322_v57 = vld [vmem:[%s8939_s5 + $0x214] ss:$8 sps:$4 sm:$0xff]   ;;  %v9558_v0 = vunpack.i.h.bf16 %v8491_v41 }
 0x697   : > { %v3688_v35 = vmax.f32 %v9556_v27, %v3600_v31  ;;  %v3689_v33 = vmax.f32 %v8328_v1, %v3601_v17  ;;  %v9559_v27 = vunpack.i.h.bf16 %v8439_v62  ;;  %v5325_v62 = vld [vmem:[%s8939_s5 + $0x224] ss:$8 sps:$4 sm:$0xff]  }
 0x69a   : > { %v8712_v5 = vpop.permute.xlu0 %5151 }
 0x69b   : > { %v8704_v48 = vpop.permute.xlu1 %5156  ;;  %v5154_v37 = vunpack.i.h.bf16 %v8712_v5  ;;  %v5153_v23 = vunpack.i.l.bf16 %v8712_v5 }
 0x69c   : > { %v5159_v12 = vunpack.i.h.bf16 %v8704_v48  ;;  %v5158_v44 = vunpack.i.l.bf16 %v8704_v48 }
 0x69d   : > { %v3605_v18 = vsel %vm880_vm2, %v9555_v25, %v5153_v23  ;;  %v3606_v53 = vsel %vm880_vm2, %v5153_v23, %v5154_v37 }
 0x69e   : > { %v3694_v39 = vmax.f32 %v9557_v20, %v3605_v18  ;;  %v3695_v14 = vmax.f32 %v8389_v32, %v3606_v53  ;;  %v3611_v2 = vsel %vm880_vm2, %v5158_v44, %v5159_v12  ;;  %v5320_v20 = vld [vmem:[%s8939_s5 + $0x210] ss:$8 sps:$4 sm:$0xff]  }
 0x69f   : > { %v8726_v29 = vpop.permute.xlu1 %5166  ;;  %v3701_v23 = vmax.f32 %v8372_v55, %v3611_v2 }
 0x6a0   : > { %v8728_v10 = vpop.permute.xlu0 %5161  ;;  %v3736_v54 = vpack.c.bf16 %v3694_v39, %v3688_v35  ;;  %v3737_v43 = vpack.c.bf16 %v3695_v14, %v3689_v33  ;;  %v5169_v56 = vunpack.i.h.bf16 %v8726_v29  ;;  %v5168_v1 = vunpack.i.l.bf16 %v8726_v29 }
 0x6a1   : > { %v5164_v15 = vunpack.i.h.bf16 %v8728_v10  ;;  %v5163_v36 = vunpack.i.l.bf16 %v8728_v10  ;;  %v3610_v35 = vsel %vm880_vm2, %v9559_v27, %v5158_v44  ;;  %v9560_v44 = vld [vmem:[#allocation27_spill] sm:$0xff] }
 0x6a2   : > { %4427 = vmatprep.mubr.bf16.mxu1 %v3737_v43  ;;  %v3621_v55 = vsel %vm880_vm2, %v5168_v1, %v5169_v56 }
 0x6a3   : > { %v3616_v32 = vsel %vm880_vm2, %v5163_v36, %v5164_v15  ;;  %v3615_v31 = vsel %vm880_vm2, %v9558_v0, %v5163_v36  ;;  %4428 = vmatmul.mubr.bf16.vlgmr.msra.gmra.mrb[16].mxu1 %v3736_v54  ;;  %v8773_v33 = vpop.permute.xlu1 %5176  ;;  %v9561_v36 = vld [vmem:[#allocation26_spill] sm:$0xff] }
 0x6a4   : > { %v8751_v17 = vpop.permute.xlu0 %5171  ;;  %v3707_v25 = vmax.f32 %v8414_v24, %v3616_v32  ;;  %4469 = vmatpush1.bf16.msra.mxu1 %v5317_v58  ;;  %v3706_v39 = vmax.f32 %v9560_v44, %v3615_v31  ;;  %v3700_v54 = vmax.f32 %v9561_v36, %v3610_v35  ;;  %v5323_v32 = vld [vmem:[%s8939_s5 + $0x220] ss:$8 sps:$4 sm:$0xff]   ;;  %v5179_v0 = vunpack.i.h.bf16 %v8773_v33  ;;  %v5334_v36 = vld [vmem:[%s8939_s5 + $0x254] ss:$8 sps:$4 sm:$0xff]  }
 0x6a5   : > { %v5174_v18 = vunpack.i.h.bf16 %v8751_v17  ;;  %v5173_v53 = vunpack.i.l.bf16 %v8751_v17  ;;  %4470 = vmatprep.subr.bf16.mxu1 %v5322_v57  ;;  %v3713_v57 = vmax.f32 %v8400_v52, %v3621_v55  ;;  %v5178_v31 = vunpack.i.l.bf16 %v8773_v33  ;;  %v5326_v55 = vld [vmem:[%s8939_s5 + $0x230] ss:$8 sps:$4 sm:$0xff]   ;;  %v5329_v44 = vld [vmem:[%s8939_s5 + $0x240] ss:$8 sps:$4 sm:$0xff]  }
 0x6a6   : > { %v3743_v41 = vpack.c.bf16 %v3707_v25, %v3701_v23  ;;  %v3742_v23 = vpack.c.bf16 %v3706_v39, %v3700_v54  ;;  %v9562_v25 = vunpack.i.h.bf16 %v8519_v46  ;;  %v9563_v52 = vunpack.i.h.bf16 %v8533_v16 }
 0x6a7   : > { %v3626_v24 = vsel %vm880_vm2, %v5173_v53, %v5174_v18  ;;  %v3631_v46 = vsel %vm880_vm2, %v5178_v31, %v5179_v0 }
 0x6a8   : > { %v8775_v14 = vpop.permute.xlu0 %5181  ;;  %4437 = vmatprep.mubr.bf16.mxu1 %v3743_v41  ;;  %v3719_v2 = vmax.f32 %v8453_v49, %v3626_v24  ;;  %4471 = vmatpush1.bf16.msra.mxu1 %v5320_v20  ;;  %v5328_v49 = vld [vmem:[%s8939_s5 + $0x234] ss:$8 sps:$4 sm:$0xff]   ;;  %v3625_v27 = vsel %vm880_vm2, %v9562_v25, %v5173_v53  ;;  %v3620_v20 = vsel %vm880_vm2, %v9563_v52, %v5168_v1  ;;  %v5331_v53 = vld [vmem:[%s8939_s5 + $0x244] ss:$8 sps:$4 sm:$0xff]   ;;  %v5187_v1 = vpop.permute.xlu1 %5186 }
 0x6a9   : > { %v5184_v43 = vunpack.i.h.bf16 %v8775_v14  ;;  %v5183_v58 = vunpack.i.l.bf16 %v8775_v14  ;;  %4472 = vmatprep.subr.bf16.mxu1 %v5325_v62  ;;  %v3718_v24 = vmax.f32 %v8244_v6, %v3625_v27  ;;  %v3712_v62 = vmax.f32 %v8238_v7, %v3620_v20  ;;  %v5346_v25 = vld [vmem:[%s8939_s5 + $0x294] ss:$8 sps:$4 sm:$0xff]   ;;  %v5344_v20 = vld [vmem:[%s8939_s5 + $0x290] ss:$8 sps:$4 sm:$0xff]  }
 0x6aa   : > { %v3749_v35 = vpack.c.bf16 %v3719_v2, %v3713_v57  ;;  %v3725_v39 = vmax.f32 %v8431_v13, %v3631_v46  ;;  %v5189_v54 = vunpack.i.h.bf16 %v5187_v1  ;;  %v5188_v6 = vunpack.i.l.bf16 %v5187_v1  ;;  %v5332_v13 = vld [vmem:[%s8939_s5 + $0x250] ss:$8 sps:$4 sm:$0xff]   ;;  %v5337_v57 = vld [vmem:[%s8939_s5 + $0x264] ss:$8 sps:$4 sm:$0xff]  }
 0x6ab   : > { %v3636_v41 = vsel %vm880_vm2, %v5183_v58, %v5184_v43  ;;  %4438 = vmatmul.mubr.bf16.gmra.mrb[20].mxu1 %v3742_v23  ;;  %v3748_v2 = vpack.c.bf16 %v3718_v24, %v3712_v62  ;;  %v5340_v23 = vld [vmem:[%s8939_s5 + $0x274] ss:$8 sps:$4 sm:$0xff]  }
 0x6ac   : > { %4473 = vmatpush1.bf16.msra.mxu1 %v5323_v32  ;;  %4447 = vmatprep.mubr.bf16.mxu1 %v3749_v35  ;;  %v3731_v16 = vmax.f32 %v8496_v3, %v3636_v41  ;;  %v3635_v3 = vsel %vm880_vm2, %v5139_v50, %v5183_v58  ;;  %v3630_v32 = vsel %vm880_vm2, %v5134_v59, %v5178_v31  ;;  %v5335_v59 = vld [vmem:[%s8939_s5 + $0x260] ss:$8 sps:$4 sm:$0xff]  }
 0x6ad   : > { %4474 = vmatprep.subr.bf16.mxu1 %v5328_v49  ;;  %v3730_v34 = vmax.f32 %v8293_v4, %v3635_v3  ;;  %v3697_v50 = vmax.f32 %v8462_v45, %v5189_v54  ;;  %v3691_v58 = vmax.f32 %v8474_v38, %v5188_v6  ;;  %v3724_v11 = vmax.f32 %v8261_v30, %v3630_v32  ;;  %v5338_v30 = vld [vmem:[%s8939_s5 + $0x270] ss:$8 sps:$4 sm:$0xff]   ;;  %v5343_v4 = vld [vmem:[%s8939_s5 + $0x284] ss:$8 sps:$4 sm:$0xff]   ;;  %v5192_v45 = vpop.permute.xlu0 %5191  ;;  %v5341_v38 = vld [vmem:[%s8939_s5 + $0x280] ss:$8 sps:$4 sm:$0xff]  }
 0x6ae   : > { %v3755_v7 = vpack.c.bf16 %v3731_v16, %v3725_v39  ;;  %v3602_v27 = vsel %vm880_vm2, %v5149_v61, %v5188_v6  ;;  %v3607_v35 = vsel %vm880_vm2, %v5154_v37, %v5189_v54  ;;  %v5194_v41 = vunpack.i.h.bf16 %v5192_v45 }
 0x6af   : > { %v3754_v31 = vpack.c.bf16 %v3730_v34, %v3724_v11  ;;  %v3739_v49 = vpack.c.bf16 %v3697_v50, %v3691_v58  ;;  %v5193_v52 = vunpack.i.l.bf16 %v5192_v45  ;;  %v3696_v46 = vmax.f32 %v8392_v9, %v3607_v35 }
 0x6b0   : > { %4475 = vmatpush1.bf16.msra.mxu1 %v5326_v55  ;;  %v3690_v55 = vmax.f32 %v8331_v8, %v3602_v27  ;;  %v3709_v63 = vmax.f32 %v8548_v26, %v5194_v41  ;;  %v3617_v8 = vsel %vm880_vm2, %v5164_v15, %v5194_v41 }
 0x6b1   : > { %4476 = vmatprep.subr.bf16.mxu1 %v5331_v53  ;;  %v5197_v53 = vpop.permute.xlu1 %5196  ;;  %v3703_v61 = vmax.f32 %v8506_v47, %v5193_v52  ;;  %v3612_v16 = vsel %vm880_vm2, %v5159_v12, %v5193_v52  ;;  %v3708_v47 = vmax.f32 %v8419_v19, %v3617_v8 }
 0x6b2   : > { %v3738_v5 = vpack.c.bf16 %v3696_v46, %v3690_v55  ;;  %v5199_v37 = vunpack.i.h.bf16 %v5197_v53  ;;  %v5198_v24 = vunpack.i.l.bf16 %v5197_v53  ;;  %v3702_v9 = vmax.f32 %v8375_v22, %v3612_v16 }
 0x6b3   : > { %4448 = vmatmul.mubr.bf16.gmra.mrb[24].mxu1 %v3748_v2  ;;  %v3745_v1 = vpack.c.bf16 %v3709_v63, %v3703_v61 }
 0x6b4   : > { %4477 = vmatpush1.bf16.msra.mxu1 %v5329_v44  ;;  %4457 = vmatprep.mubr.bf16.mxu1 %v3755_v7  ;;  %v3721_v26 = vmax.f32 %v8511_v51, %v5199_v37  ;;  %v3715_v62 = vmax.f32 %v8543_v28, %v5198_v24  ;;  %v5202_v44 = vpop.permute.xlu0 %5201  ;;  %v3622_v48 = vsel %vm880_vm2, %v5169_v56, %v5198_v24 }
 0x6b5   : > { %4478 = vmatprep.subr.bf16.mxu1 %v5334_v36  ;;  %v3744_v12 = vpack.c.bf16 %v3708_v47, %v3702_v9  ;;  %v3627_v10 = vsel %vm880_vm2, %v5174_v18, %v5199_v37  ;;  %v5204_v39 = vunpack.i.h.bf16 %v5202_v44  ;;  %v5203_v2 = vunpack.i.l.bf16 %v5202_v44 }
 0x6b6   : > { %v3751_v15 = vpack.c.bf16 %v3721_v26, %v3715_v62  ;;  %v3714_v22 = vmax.f32 %v8411_v21, %v3622_v48  ;;  %v3720_v19 = vmax.f32 %v8456_v60, %v3627_v10  ;;  %v9564_v21 = vld [vmem:[#allocation37_spill] sm:$0xff]  ;;  %v9565_v60 = vld [vmem:[#allocation28_spill] sm:$0xff] }
 0x6b7   : > { %v3733_v51 = vmax.f32 %v8583_v42, %v5204_v39  ;;  %v3727_v28 = vmax.f32 %v8578_v40, %v5203_v2  ;;  %v3632_v56 = vsel %vm880_vm2, %v5179_v0, %v5203_v2  ;;  %v3637_v17 = vsel %vm880_vm2, %v5184_v43, %v5204_v39 }
 0x6b8   : > { %4479 = vmatpush1.bf16.msra.mxu1 %v5332_v13  ;;  %v3750_v29 = vpack.c.bf16 %v3720_v19, %v3714_v22  ;;  %v3726_v36 = vmax.f32 %v9564_v21, %v3632_v56  ;;  %v3732_v54 = vmax.f32 %v9565_v60, %v3637_v17 }
 0x6b9   : > { %4480 = vmatprep.subr.bf16.mxu1 %v5337_v57  ;;  %v3757_v18 = vpack.c.bf16 %v3733_v51, %v3727_v28 }
 0x6ba   : > { %v3756_v42 = vpack.c.bf16 %v3732_v54, %v3726_v36 }
 0x6bb   : > { %4458 = vmatmul.mubr.bf16.gmra.mrb[28].mxu1 %v3754_v31 }
 0x6bc   : > { %4481 = vmatpush1.bf16.msra.mxu1 %v5335_v59  ;;  %4784 = vmatprep.mubr.msk.bf16.mxu1 %vm2723_vm9, %v3739_v49  ;;  %v3853_v40 = vpop.permute.xlu1 %3852 }
 0x6bd   : > { %4482 = vmatprep.subr.bf16.mxu1 %v5340_v23 }
 0x6c0   : > { %4483 = vmatpush1.bf16.msra.mxu1 %v5338_v30  ;;  %v3863_v58 = vpop.permute.xlu1 %3862 }
 0x6c1   : > { %4484 = vmatprep.subr.bf16.mxu1 %v5343_v4  ;;  %v3858_v14 = vpop.permute.xlu0 %3857 }
 0x6c4   : > { %4485 = vmatpush1.bf16.msra.mxu1 %v5341_v38  ;;  %v3873_v35 = vpop.permute.xlu1 %3872 }
 0x6c5   : > { %4486 = vmatprep.subr.bf16.mxu1 %v5346_v25  ;;  %v3868_v23 = vpop.permute.xlu0 %3867 }
 0x6c8   : > { %4487 = vmatpush1.bf16.msra.mxu1 %v5344_v20  ;;  %v3883_v16 = vpop.permute.xlu1 %3882 }
 0x6c9   : > { %v3878_v55 = vpop.permute.xlu0 %3877 }
 0x6cb   : > { %4501 = vmatmul.mubr.bf16.vlgmr.msra.gmra.mrb[16].mxu1 %v3738_v5 }
 0x6cc   : > { %4785 = vmatprep.mubr.msk.bf16.mxu1 %vm2723_vm9, %v3745_v1 }
 0x6cd   : > { %v3888_v47 = vpop.permute.xlu0 %3887 }
 0x6d3   : > { %4511 = vmatmul.mubr.bf16.gmra.mrb[20].mxu1 %v3744_v12 }
 0x6d4   : > { %4786 = vmatprep.mubr.msk.bf16.mxu1 %vm2723_vm9, %v3751_v15 }
 0x6db   : > { %4521 = vmatmul.mubr.bf16.gmra.mrb[24].mxu1 %v3750_v29 }
 0x6dc   : > { %4787 = vmatprep.mubr.msk.bf16.mxu1 %vm2723_vm9, %v3757_v18 }
 0x6e3   : > { %4531 = vmatmul.mubr.bf16.gmra.mrb[28].mxu1 %v3756_v42 }
 0x79e   : > { %v4502_v6 = vpop.f32.mrb[16].mxu1 }
 0x79f   : > { %v4823_v33 = vadd.f32 %v4502_v6, %v3853_v40  ;;  %v4504_v0 = vpop.f32.mrb[17].mxu1 }
 0x7a0   : > { %v4824_v3 = vadd.f32 %v4504_v0, %v3853_v40  ;;  %v4506_v43 = vpop.f32.mrb[18].mxu1 }
 0x7a1   : > { %v4825_v32 = vadd.f32 %v4506_v43, %v3858_v14  ;;  %v4508_v13 = vpop.f32.mrb[19].mxu1 }
 0x7a2   : > { %v4799_v57 = vpack.c.bf16 %v4824_v3, %v4823_v33  ;;  %v4826_v34 = vadd.f32 %v4508_v13, %v3858_v14 }
 0x7a4   : > { %4592 = vst.msk [vmem:[%s8901_s18] sm:$0xff] %vm8903_vm12, %v4799_v57  ;;  %v4800_v50 = vpack.c.bf16 %v4826_v34, %v4825_v32 }
 0x7a6   : > { %4593 = vst.msk [vmem:[%s8901_s18 + $0x8] sm:$0xff] %vm8903_vm12, %v4800_v50  ;;  %v4512_v11 = vpop.f32.mrb[20].mxu1 }
 0x7a7   : > { %v4827_v59 = vadd.f32 %v4512_v11, %v3863_v58  ;;  %v4514_v31 = vpop.f32.mrb[21].mxu1 }
 0x7a8   : > { %v4828_v49 = vadd.f32 %v4514_v31, %v3863_v58  ;;  %v4516_v30 = vpop.f32.mrb[22].mxu1 }
 0x7a9   : > { %v4829_v4 = vadd.f32 %v4516_v30, %v3868_v23  ;;  %v4518_v45 = vpop.f32.mrb[23].mxu1 }
 0x7aa   : > { %v4801_v38 = vpack.c.bf16 %v4828_v49, %v4827_v59  ;;  %v4830_v25 = vadd.f32 %v4518_v45, %v3868_v23 }
 0x7ac   : > { %4594 = vst.msk [vmem:[%s8901_s18 + $0x10] sm:$0xff] %vm8903_vm12, %v4801_v38  ;;  %v4802_v27 = vpack.c.bf16 %v4830_v25, %v4829_v4 }
 0x7ae   : > { %4595 = vst.msk [vmem:[%s8901_s18 + $0x18] sm:$0xff] %vm8903_vm12, %v4802_v27  ;;  %v4522_v41 = vpop.f32.mrb[24].mxu1 }
 0x7af   : > { %v4831_v52 = vadd.f32 %v4522_v41, %v3873_v35  ;;  %v4524_v20 = vpop.f32.mrb[25].mxu1 }
 0x7b0   : > { %v4832_v46 = vadd.f32 %v4524_v20, %v3873_v35  ;;  %v4526_v53 = vpop.f32.mrb[26].mxu1 }
 0x7b1   : > { %v4833_v63 = vadd.f32 %v4526_v53, %v3878_v55  ;;  %v4528_v61 = vpop.f32.mrb[27].mxu1 }
 0x7b2   : > { %v4803_v5 = vpack.c.bf16 %v4832_v46, %v4831_v52  ;;  %v4834_v37 = vadd.f32 %v4528_v61, %v3878_v55 }
 0x7b4   : > { %4596 = vst.msk [vmem:[%s8901_s18 + $0x20] sm:$0xff] %vm8903_vm12, %v4803_v5  ;;  %v4804_v24 = vpack.c.bf16 %v4834_v37, %v4833_v63 }
 0x7b6   : > { %4597 = vst.msk [vmem:[%s8901_s18 + $0x28] sm:$0xff] %vm8903_vm12, %v4804_v24  ;;  %v4532_v8 = vpop.f32.mrb[28].mxu1 }
 0x7b7   : > { %v4835_v1 = vadd.f32 %v4532_v8, %v3883_v16  ;;  %v4534_v9 = vpop.f32.mrb[29].mxu1 }
 0x7b8   : > { %v4836_v26 = vadd.f32 %v4534_v9, %v3883_v16  ;;  %v4536_v62 = vpop.f32.mrb[30].mxu1 }
 0x7b9   : > { %v4837_v44 = vadd.f32 %v4536_v62, %v3888_v47  ;;  %v4538_v48 = vpop.f32.mrb[31].mxu1 }
 0x7ba   : > { %v4805_v12 = vpack.c.bf16 %v4836_v26, %v4835_v1  ;;  %v4838_v10 = vadd.f32 %v4538_v48, %v3888_v47 }
 0x7bc   : > { %4598 = vst.msk [vmem:[%s8901_s18 + $0x30] sm:$0xff] %vm8903_vm12, %v4805_v12  ;;  %v4806_v15 = vpack.c.bf16 %v4838_v10, %v4837_v44 }
 0x7be   : > { %4599 = vst.msk [vmem:[%s8901_s18 + $0x38] sm:$0xff] %vm8903_vm12, %v4806_v15 }
 0x7bf PF: > { %s17_s21 = sadd.s32 1, %s5392_s21  }
 0x7c0   : > { %p14_p3 = scmp.ge.s32.totalorder %s17_s21, 4  }
 0x7c2   :  { %16 = sbr.rel (!%p14_p3) target bundleno = 1 (0x1), region = 79 }
 0x7c9   :  { %4621 = vsyncpa [#allocation4], 1 }
 0x7ca   :  { %4623 = vsyncpa [#allocation4 + $0x1], 1 }

// kernel: convnet_forward.3
= control target key start
LH: loop header
LB: loop body
LE: loop exit
PB: predicated region body
PF: predicated region fallthrough
CT: control target
= control target key end

     0   :  { %10 = vsyncpa [#allocation3], 0  ;;  %s9175_s0 = inlined_call_operand.vmem [shape: bf16[2,9216], index: 0, kind: input, shape index: {}]   ;;  %s9176_s1 = inlined_call_operand.hbm [shape: bf16[9216,128], index: 1, kind: input, shape index: {}]   ;;  %s9177_s2 = inlined_call_operand.hbm [shape: f32[1,128], index: 2, kind: input, shape index: {}]   ;;  %s9178_s3 = inlined_call_operand.vmem [shape: bf16[128,10], index: 3, kind: input, shape index: {}]   ;;  %s9179_s4 = inlined_call_operand.hbm [shape: f32[1,10], index: 4, kind: input, shape index: {}]   ;;  %s9180_s5 = inlined_call_operand.hbm [shape: f32[2,10], index: 5, kind: output, shape index: {}]  }
   0x1   :  { %11 = vsyncpa [#allocation6], 0 }
   0x2   :  { %12 = vsyncpa [#allocation4], 0  ;;  %s8896_s18 = smov [#allocation5]   ;;  %s8897_s20 = smov [#allocation2]  }
   0x3   :  { %s33_s19 = sshll.u32 %s8896_s18, 4  ;;  %s20_s21 = sshll.u32 %s8897_s20, 4  ;;  %s34_s19 = int_to_ptr.vmem [resolvable:$true] %s33_s19  ;;  %s8935_s21 = int_to_ptr.vmem [resolvable:$true] %s20_s21 }
   0x4   :  { %s8802_s24 = scalar_lea.hbm %s9177_s2, 16 }
   0x5   :  { %p8803_p0 = scmp.ne.s32.totalorder %s9177_s2, %s8802_s24  ;;  %p8806_p1 = scmp.lt.u32.totalorder %s8802_s24, %s9177_s2 }
   0x7   :  { %p8808_p2 = pnand %p8806_p1, %p8803_p0 }
   0x9   :  { %8811 = shalt.err (!%p8808_p2)
}
   0xa   :  { %s8812_s29 = scalar_lea.vmem %s34_s19, 16  ;;  %s8816_s30 = scalar_lea.vmem %s34_s19, 32 }
   0xb   :  { %p8813_p3 = scmp.ne.s32.totalorder %s34_s19, %s8812_s29  ;;  %p8817_p4 = scmp.lt.s32.totalorder %s34_s19, %s34_s19 }
   0xc   :  { %p8818_p5 = scmp.lt.s32.totalorder %s8816_s30, %s8812_s29 }
   0xe   :  { %p8819_p6 = por %p8818_p5, %p8817_p4 }
  0x10   :  { %p8820_p7 = pnand %p8819_p6, %p8813_p3 }
  0x12   :  { %8823 = shalt.err (!%p8820_p7)
}
  0x13   :  { %36 = dma.hbm_to_vmem [thread:$0]  %s9177_s2, 16, %s34_s19, [#allocation6]  }
  0x14   :  { %s8824_s10 = scalar_lea.hbm %s9176_s1, 73728 }
  0x15   :  { %p8825_p8 = scmp.ne.s32.totalorder %s9176_s1, %s8824_s10  ;;  %p8828_p9 = scmp.lt.u32.totalorder %s8824_s10, %s9176_s1 }
  0x17   :  { %p8830_p10 = pnand %p8828_p9, %p8825_p8 }
  0x19   :  { %8833 = shalt.err (!%p8830_p10)
}
  0x1a   :  { %s8834_s15 = scalar_lea.vmem %s8935_s21, 73728  ;;  %p8839_p12 = scmp.lt.s32.totalorder %s8935_s21, %s8935_s21 }
  0x1b   :  { %p8835_p11 = scmp.ne.s32.totalorder %s8935_s21, %s8834_s15  ;;  %p8840_p13 = scmp.lt.s32.totalorder %s8834_s15, %s8834_s15 }
  0x1d   :  { %p8841_p0 = por %p8840_p13, %p8839_p12 }
  0x1f   :  { %p8842_p1 = pnand %p8841_p0, %p8835_p11 }
  0x21   :  { %8845 = shalt.err (!%p8842_p1)
}
  0x22   :  { %s8898_s2 = smov 64   ;;  %s8899_s16 = smov 4  }
  0x23   :  { %26 = dma.hbm_to_vmem [thread:$0]  %s9176_s1, 73728, %s8935_s21, [#allocation3], %s8898_s2, %s8898_s2, %s8899_s16  }
  0x24   :  { %s8900_s19 = smov [#allocation7]   ;;  %s8846_s24 = scalar_lea.hbm %s9179_s4, 16 }
  0x25   :  { %s45_s20 = sshll.u32 %s8900_s19, 4  ;;  %p8847_p2 = scmp.ne.s32.totalorder %s9179_s4, %s8846_s24  ;;  %s46_s20 = int_to_ptr.vmem [resolvable:$true] %s45_s20 }
  0x26   :  { %p8850_p3 = scmp.lt.u32.totalorder %s8846_s24, %s9179_s4 }
  0x28   :  { %p8852_p4 = pnand %p8850_p3, %p8847_p2 }
  0x2a   :  { %8855 = shalt.err (!%p8852_p4)
}
  0x2b   :  { %s8856_s29 = scalar_lea.vmem %s46_s20, 16  ;;  %s8860_s1 = scalar_lea.vmem %s46_s20, 32 }
  0x2c   :  { %p8857_p5 = scmp.ne.s32.totalorder %s46_s20, %s8856_s29  ;;  %p8861_p6 = scmp.lt.s32.totalorder %s46_s20, %s46_s20 }
  0x2d   :  { %p8862_p7 = scmp.lt.s32.totalorder %s8860_s1, %s8856_s29 }
  0x2f   :  { %p8863_p8 = por %p8862_p7, %p8861_p6 }
  0x31   :  { %p8864_p9 = pnand %p8863_p8, %p8857_p5 }
  0x33   :  { %8867 = shalt.err (!%p8864_p9)
}
  0x34   :  { %48 = dma.hbm_to_vmem [thread:$0]  %s9179_s4, 16, %s46_s20, [#allocation6]  }
  0x35   :  { %8890 = dma.done.wait [#allocation3], 73728  }
  0x36   :  { %8891 = vsyncadd [#allocation3], 4294893568 }
  0x37   :  { %8892 = dma.done.wait [#allocation6], 32  }
  0x38   :  { %8893 = vsyncadd [#allocation6], 4294967264  ;;  %v8205_v0 = vld [vmem:[#allocation2 + $0x40] sm:$0xff]   ;;  %v8209_v4 = vld [vmem:[#allocation2 + $0x48] sm:$0xff]   ;;  %v8901_v22 = vmov 1966171168   ;;  %v1240_v24 = vlaneseq }
  0x39   :  { %v8206_v1 = vld [vmem:[#allocation2 + $0xc0] sm:$0xff]   ;;  %7375 = vmatprep.subr.bf16.mxu0 %v8205_v0  ;;  %v8210_v5 = vld [vmem:[#allocation2 + $0xc8] sm:$0xff]   ;;  %v8213_v8 = vld [vmem:[#allocation2 + $0x50] sm:$0xff]   ;;  %v1238_v23 = vunpack.c.l.s4 %v8901_v22  ;;  %vm8903_vm0 = vmmov 0   ;;  %vm6758_vm1 = vcmask 74752  }
  0x3a   :  { %v8207_v2 = vld [vmem:[#allocation2] sm:$0xff]   ;;  %7397 = vmatprep.subr.bf16.mxu1 %v8206_v1  ;;  %v8211_v6 = vld [vmem:[#allocation2 + $0x8] sm:$0xff]   ;;  %v8214_v9 = vld [vmem:[#allocation2 + $0xd0] sm:$0xff]   ;;  %v1241_v30 = vshrl.u32 %v1240_v24, 7 }
  0x3b   :  { %v8208_v3 = vld [vmem:[#allocation2 + $0x80] sm:$0xff]   ;;  %7376 = vmatpush3.bf16.msra.mxu0 %v8207_v2  ;;  %v8212_v7 = vld [vmem:[#allocation2 + $0x88] sm:$0xff]   ;;  %v8215_v10 = vld [vmem:[#allocation2 + $0x10] sm:$0xff]   ;;  %v1239_v29 = vunpack.c.0.s8 %v1238_v23 }
  0x3c   :  { %7398 = vmatpush3.bf16.msra.mxu1 %v8208_v3  ;;  %7377 = vmatprep.subr.bf16.mxu0 %v8209_v4  ;;  %v8216_v11 = vld [vmem:[#allocation2 + $0x90] sm:$0xff]   ;;  %v8217_v12 = vld [vmem:[#allocation2 + $0x58] sm:$0xff]   ;;  %v8221_v16 = vld [vmem:[#allocation2 + $0x60] sm:$0xff]  }
  0x3d   :  { %7399 = vmatprep.subr.bf16.mxu1 %v8210_v5  ;;  %v8218_v13 = vld [vmem:[#allocation2 + $0xd8] sm:$0xff]   ;;  %v8222_v17 = vld [vmem:[#allocation2 + $0xe0] sm:$0xff]   ;;  %v8225_v20 = vld [vmem:[#allocation2 + $0x68] sm:$0xff]   ;;  %v8978_v35 = vsub.s32 %v1239_v29, %v1241_v30 }
  0x3e   :  { %v8219_v14 = vld [vmem:[#allocation2 + $0x18] sm:$0xff]   ;;  %v8223_v18 = vld [vmem:[#allocation2 + $0x20] sm:$0xff]   ;;  %v8226_v21 = vld [vmem:[#allocation2 + $0xe8] sm:$0xff]  }
  0x3f   :  { %7378 = vmatpush3.bf16.msra.mxu0 %v8211_v6  ;;  %v8220_v15 = vld [vmem:[#allocation2 + $0x98] sm:$0xff]   ;;  %v8224_v19 = vld [vmem:[#allocation2 + $0xa0] sm:$0xff]   ;;  %v8227_v25 = vld [vmem:[#allocation2 + $0x28] sm:$0xff]  }
  0x40   :  { %7400 = vmatpush3.bf16.msra.mxu1 %v8212_v7  ;;  %7379 = vmatprep.subr.bf16.mxu0 %v8213_v8  ;;  %v8228_v26 = vld [vmem:[#allocation2 + $0xa8] sm:$0xff]   ;;  %v8229_v27 = vld [vmem:[#allocation2 + $0x70] sm:$0xff]   ;;  %v8233_v33 = vld [vmem:[#allocation2 + $0x78] sm:$0xff]  }
  0x41   :  { %7401 = vmatprep.subr.bf16.mxu1 %v8214_v9  ;;  %v8230_v28 = vld [vmem:[#allocation2 + $0xf0] sm:$0xff]   ;;  %v8234_v34 = vld [vmem:[#allocation2 + $0xf8] sm:$0xff]   ;;  %v59_v38 = vld [vmem:[%s9175_s0] sm:$0xff] }
  0x42   :  { %v8231_v31 = vld [vmem:[#allocation2 + $0x30] sm:$0xff]   ;;  %v8235_v36 = vld [vmem:[#allocation2 + $0x38] sm:$0xff]   ;;  %v1236_v39 = vcombine.high %v59_v38, %v59_v38  ;;  %v1243_v40 = vrot.slane %v59_v38, %v8978_v35  ;;  %v8238_v41 = vld [vmem:[#allocation2 + $0x140] sm:$0xff]  }
  0x43   :  { %7380 = vmatpush3.bf16.msra.mxu0 %v8215_v10  ;;  %v8232_v32 = vld [vmem:[#allocation2 + $0xb0] sm:$0xff]   ;;  %v8236_v37 = vld [vmem:[#allocation2 + $0xb8] sm:$0xff]   ;;  %v8239_v42 = vld [vmem:[#allocation2 + $0x1c0] sm:$0xff]  }
  0x44   :  { %7402 = vmatpush3.bf16.msra.mxu1 %v8216_v11  ;;  %7381 = vmatprep.subr.bf16.mxu0 %v8217_v12  ;;  %v1251_v43 = vcombine.high %v1243_v40, %v1243_v40  ;;  %v1259_v44 = vrot.slane %v1243_v40, %v8978_v35  ;;  %v8986_v45 = vrot.slane %v1236_v39, %v8978_v35  ;;  %v8240_v46 = vld [vmem:[#allocation2 + $0x100] sm:$0xff]   ;;  %v8242_v51 = vld [vmem:[#allocation2 + $0x148] sm:$0xff]   ;;  %v8246_v58 = vld [vmem:[#allocation2 + $0x150] sm:$0xff]  }
  0x45   :  { %7403 = vmatprep.subr.bf16.mxu1 %v8218_v13  ;;  %v8241_v48 = vld [vmem:[#allocation2 + $0x180] sm:$0xff]   ;;  %v8243_v53 = vld [vmem:[#allocation2 + $0x1c8] sm:$0xff]   ;;  %v8247_v59 = vld [vmem:[#allocation2 + $0x1d0] sm:$0xff]  }
  0x46   :  { %v1273_v47 = vrot.slane %v1251_v43, %v8978_v35  ;;  %v1252_v49 = vcombine.high %v8986_v45, %v8986_v45  ;;  %v1281_v50 = vcombine.high %v1259_v44, %v1259_v44  ;;  %v8244_v55 = vld [vmem:[#allocation2 + $0x108] sm:$0xff]   ;;  %v8248_v60 = vld [vmem:[#allocation2 + $0x110] sm:$0xff]   ;;  %v8250_v62 = vld [vmem:[#allocation2 + $0x158] sm:$0xff]  }
  0x47   :  { %7382 = vmatpush3.bf16.msra.mxu0 %v8219_v14  ;;  %v8245_v56 = vld [vmem:[#allocation2 + $0x188] sm:$0xff]   ;;  %v8249_v61 = vld [vmem:[#allocation2 + $0x190] sm:$0xff]   ;;  %v8251_v63 = vld [vmem:[#allocation2 + $0x1d8] sm:$0xff]  }
  0x48   :  { %7404 = vmatpush3.bf16.msra.mxu1 %v8220_v15  ;;  %7383 = vmatprep.subr.bf16.mxu0 %v8221_v16  ;;  %v1283_v52 = vcombine.high %v1273_v47, %v1273_v47  ;;  %v1280_v54 = vrot.slane %v1252_v49, %v8978_v35  ;;  %v8252_v0 = vld [vmem:[#allocation2 + $0x118] sm:$0xff]   ;;  %v8254_v2 = vld [vmem:[#allocation2 + $0x160] sm:$0xff]   ;;  %v8258_v6 = vld [vmem:[#allocation2 + $0x168] sm:$0xff]  }
  0x49   :  { %7405 = vmatprep.subr.bf16.mxu1 %v8222_v17  ;;  %5237 = vmatprep.mubr.bf16.mxu0 %v1273_v47  ;;  %v8253_v1 = vld [vmem:[#allocation2 + $0x198] sm:$0xff]   ;;  %v8255_v3 = vld [vmem:[#allocation2 + $0x1e0] sm:$0xff]   ;;  %v8259_v7 = vld [vmem:[#allocation2 + $0x1e8] sm:$0xff]  }
  0x4a   :  { %5277 = vmatprep.mubr.bf16.mxu1 %v1283_v52  ;;  %v1284_v57 = vcombine.high %v1280_v54, %v1280_v54  ;;  %v8256_v4 = vld [vmem:[#allocation2 + $0x120] sm:$0xff]   ;;  %v8260_v8 = vld [vmem:[#allocation2 + $0x128] sm:$0xff]   ;;  %v8262_v10 = vld [vmem:[#allocation2 + $0x170] sm:$0xff]  }
  0x4b   :  { %7384 = vmatpush3.bf16.msra.mxu0 %v8223_v18  ;;  %v8257_v5 = vld [vmem:[#allocation2 + $0x1a0] sm:$0xff]   ;;  %v8261_v9 = vld [vmem:[#allocation2 + $0x1a8] sm:$0xff]   ;;  %v8263_v11 = vld [vmem:[#allocation2 + $0x1f0] sm:$0xff]   ;;  %v1266_v18 = vrot.slane %v8986_v45, %v8978_v35 }
  0x4c   :  { %7406 = vmatpush3.bf16.msra.mxu1 %v8224_v19  ;;  %7385 = vmatprep.subr.bf16.mxu0 %v8225_v20  ;;  %v8264_v12 = vld [vmem:[#allocation2 + $0x130] sm:$0xff]   ;;  %v8266_v14 = vld [vmem:[#allocation2 + $0x178] sm:$0xff]   ;;  %v8270_v19 = vld [vmem:[#allocation2 + $0x240] sm:$0xff]  }
  0x4d   :  { %7407 = vmatprep.subr.bf16.mxu1 %v8226_v21  ;;  %v8265_v13 = vld [vmem:[#allocation2 + $0x1b0] sm:$0xff]   ;;  %v8267_v15 = vld [vmem:[#allocation2 + $0x1f8] sm:$0xff]   ;;  %v8271_v20 = vld [vmem:[#allocation2 + $0x2c0] sm:$0xff]   ;;  %v1282_v23 = vcombine.high %v1266_v18, %v1266_v18 }
  0x4e   :  { %v8268_v16 = vld [vmem:[#allocation2 + $0x138] sm:$0xff]   ;;  %v8272_v21 = vld [vmem:[#allocation2 + $0x200] sm:$0xff]   ;;  %v8274_v24 = vld [vmem:[#allocation2 + $0x248] sm:$0xff]  }
  0x4f   :  { %7386 = vmatpush3.bf16.msra.mxu0 %v8227_v25  ;;  %v8269_v17 = vld [vmem:[#allocation2 + $0x1b8] sm:$0xff]   ;;  %v8273_v22 = vld [vmem:[#allocation2 + $0x280] sm:$0xff]   ;;  %v8275_v25 = vld [vmem:[#allocation2 + $0x2c8] sm:$0xff]  }
  0x50   :  { %7408 = vmatpush3.bf16.msra.mxu1 %v8228_v26  ;;  %7387 = vmatprep.subr.bf16.mxu0 %v8229_v27  ;;  %v8276_v26 = vld [vmem:[#allocation2 + $0x208] sm:$0xff]   ;;  %v8279_v29 = vld [vmem:[#allocation2 + $0x2d0] sm:$0xff]   ;;  %v8287_v38 = vld [vmem:[#allocation2 + $0x2e0] sm:$0xff]  }
  0x51   :  { %7409 = vmatprep.subr.bf16.mxu1 %v8230_v28  ;;  %v8277_v27 = vld [vmem:[#allocation2 + $0x288] sm:$0xff]   ;;  %v8278_v28 = vld [vmem:[#allocation2 + $0x250] sm:$0xff]   ;;  %v8288_v39 = vld [vmem:[#allocation2 + $0x220] sm:$0xff]  }
  0x52   :  { %v8280_v30 = vld [vmem:[#allocation2 + $0x210] sm:$0xff]   ;;  %v8289_v40 = vld [vmem:[#allocation2 + $0x2a0] sm:$0xff]   ;;  %v8292_v43 = vld [vmem:[#allocation2 + $0x228] sm:$0xff]  }
  0x53   :  { %7388 = vmatpush3.bf16.msra.mxu0 %v8231_v31  ;;  %v8281_v31 = vld [vmem:[#allocation2 + $0x290] sm:$0xff]   ;;  %v8298_v49 = vld [vmem:[#allocation2 + $0x278] sm:$0xff]   ;;  %v60_v52 = vld [vmem:[%s9175_s0 + $0x8] sm:$0xff] }
  0x54   :  { %7410 = vmatpush3.bf16.msra.mxu1 %v8232_v32  ;;  %7389 = vmatprep.subr.bf16.mxu0 %v8233_v33  ;;  %v8282_v32 = vld [vmem:[#allocation2 + $0x258] sm:$0xff]   ;;  %v8294_v45 = vld [vmem:[#allocation2 + $0x270] sm:$0xff]  }
  0x55   :  { %7411 = vmatprep.subr.bf16.mxu1 %v8234_v34  ;;  %v8283_v33 = vld [vmem:[#allocation2 + $0x2d8] sm:$0xff]   ;;  %v8296_v47 = vld [vmem:[#allocation2 + $0x230] sm:$0xff]  }
  0x56   :  { %v8284_v34 = vld [vmem:[#allocation2 + $0x218] sm:$0xff]  }
  0x57   :  { %7390 = vmatpush3.bf16.msra.mxu0 %v8235_v36  ;;  %v8285_v36 = vld [vmem:[#allocation2 + $0x298] sm:$0xff]  }
  0x58   :  { %7412 = vmatpush3.bf16.msra.mxu1 %v8236_v37  ;;  %7419 = vmatprep.subr.bf16.mxu0 %v8238_v41  ;;  %v8286_v37 = vld [vmem:[#allocation2 + $0x260] sm:$0xff]   ;;  %v8290_v41 = vld [vmem:[#allocation2 + $0x268] sm:$0xff]  }
  0x59   :  { %7441 = vmatprep.subr.bf16.mxu1 %v8239_v42  ;;  %v8291_v42 = vld [vmem:[#allocation2 + $0x2e8] sm:$0xff]  }
  0x5a   :  { %5238 = vmatmul.mubr.bf16.vlgmr.msra.gmra.mrb[0].mxu0 %v1259_v44  ;;  %v8293_v44 = vld [vmem:[#allocation2 + $0x2a8] sm:$0xff]  }
  0x5b   :  { %7420 = vmatpush3.bf16.msra.mxu0 %v8240_v46  ;;  %5278 = vmatmul.mubr.bf16.vlgmr.msra.gmra.mrb[0].mxu1 %v1281_v50  ;;  %v8295_v46 = vld [vmem:[#allocation2 + $0x2f0] sm:$0xff]   ;;  %v8299_v50 = vld [vmem:[#allocation2 + $0x2f8] sm:$0xff]  }
  0x5c   :  { %7421 = vmatprep.subr.bf16.mxu0 %v8242_v51  ;;  %7442 = vmatpush3.bf16.msra.mxu1 %v8241_v48  ;;  %v8297_v48 = vld [vmem:[#allocation2 + $0x2b0] sm:$0xff]   ;;  %v8300_v51 = vld [vmem:[#allocation2 + $0x238] sm:$0xff]  }
  0x5d   :  { %5317 = vmatprep.mubr.bf16.mxu0 %v1280_v54  ;;  %7443 = vmatprep.subr.bf16.mxu1 %v8243_v53  ;;  %v8301_v53 = vld [vmem:[#allocation2 + $0x2b8] sm:$0xff]   ;;  %v1292_v54 = vrot.slane %v60_v52, %v8978_v35 }
  0x5e   :  { %5357 = vmatprep.mubr.bf16.mxu1 %v1284_v57 }
  0x5f   :  { %7422 = vmatpush3.bf16.msra.mxu0 %v8244_v55  ;;  %v1285_v55 = vcombine.high %v60_v52, %v60_v52  ;;  %v1300_v57 = vcombine.high %v1292_v54, %v1292_v54  ;;  %v8351_v52 = vld [vmem:[#allocation2 + $0x460] sm:$0xff]  }
  0x60   :  { %7423 = vmatprep.subr.bf16.mxu0 %v8246_v58  ;;  %7444 = vmatpush3.bf16.msra.mxu1 %v8245_v56  ;;  %v8302_v56 = vld [vmem:[#allocation2 + $0x340] sm:$0xff]   ;;  %v1308_v58 = vrot.slane %v1292_v54, %v8978_v35 }
  0x61   :  { %7445 = vmatprep.subr.bf16.mxu1 %v8247_v59  ;;  %v8303_v59 = vld [vmem:[#allocation2 + $0x3c0] sm:$0xff]  }
  0x62   :  { %v8353_v54 = vld [vmem:[#allocation2 + $0x420] sm:$0xff]  }
  0x63   :  { %7424 = vmatpush3.bf16.msra.mxu0 %v8248_v60  ;;  %v9000_v60 = vrot.slane %v1285_v55, %v8978_v35  ;;  %v8354_v55 = vld [vmem:[#allocation2 + $0x4a0] sm:$0xff]  }
  0x64   :  { %7425 = vmatprep.subr.bf16.mxu0 %v8250_v62  ;;  %7446 = vmatpush3.bf16.msra.mxu1 %v8249_v61  ;;  %v8304_v61 = vld [vmem:[#allocation2 + $0x300] sm:$0xff]   ;;  %v1322_v62 = vrot.slane %v1300_v57, %v8978_v35  ;;  %v8356_v57 = vld [vmem:[#allocation2 + $0x4e8] sm:$0xff]  }
  0x65   :  { %7447 = vmatprep.subr.bf16.mxu1 %v8251_v63  ;;  %v8305_v63 = vld [vmem:[#allocation2 + $0x380] sm:$0xff]  }
  0x67   :  { %7426 = vmatpush3.bf16.msra.mxu0 %v8252_v0  ;;  %v1301_v0 = vcombine.high %v9000_v60, %v9000_v60 }
  0x68   :  { %7427 = vmatprep.subr.bf16.mxu0 %v8254_v2  ;;  %7448 = vmatpush3.bf16.msra.mxu1 %v8253_v1  ;;  %v1330_v1 = vcombine.high %v1308_v58, %v1308_v58  ;;  %v8306_v2 = vld [vmem:[#allocation2 + $0x348] sm:$0xff]  }
  0x69   :  { %7449 = vmatprep.subr.bf16.mxu1 %v8255_v3  ;;  %v1332_v3 = vcombine.high %v1322_v62, %v1322_v62 }
  0x6b   :  { %7428 = vmatpush3.bf16.msra.mxu0 %v8256_v4  ;;  %v8307_v4 = vld [vmem:[#allocation2 + $0x3c8] sm:$0xff]  }
  0x6c   :  { %7429 = vmatprep.subr.bf16.mxu0 %v8258_v6  ;;  %7450 = vmatpush3.bf16.msra.mxu1 %v8257_v5  ;;  %v1329_v5 = vrot.slane %v1301_v0, %v8978_v35  ;;  %v8308_v6 = vld [vmem:[#allocation2 + $0x308] sm:$0xff]   ;;  %v8363_v0 = vld [vmem:[#allocation2 + $0x478] sm:$0xff]  }
  0x6d   :  { %7451 = vmatprep.subr.bf16.mxu1 %v8259_v7  ;;  %v8309_v7 = vld [vmem:[#allocation2 + $0x388] sm:$0xff]  }
  0x6f   :  { %7430 = vmatpush3.bf16.msra.mxu0 %v8260_v8  ;;  %v1333_v8 = vcombine.high %v1329_v5, %v1329_v5 }
  0x70   :  { %7431 = vmatprep.subr.bf16.mxu0 %v8262_v10  ;;  %7452 = vmatpush3.bf16.msra.mxu1 %v8261_v9  ;;  %v8310_v9 = vld [vmem:[#allocation2 + $0x350] sm:$0xff]  }
  0x71   :  { %7453 = vmatprep.subr.bf16.mxu1 %v8263_v11  ;;  %v8311_v10 = vld [vmem:[#allocation2 + $0x3d0] sm:$0xff]  }
  0x72   :  { %v8312_v11 = vld [vmem:[#allocation2 + $0x310] sm:$0xff]  }
  0x73   :  { %7432 = vmatpush3.bf16.msra.mxu0 %v8264_v12  ;;  %v8313_v12 = vld [vmem:[#allocation2 + $0x390] sm:$0xff]  }
  0x74   :  { %7433 = vmatprep.subr.bf16.mxu0 %v8266_v14  ;;  %7454 = vmatpush3.bf16.msra.mxu1 %v8265_v13  ;;  %v8314_v13 = vld [vmem:[#allocation2 + $0x358] sm:$0xff]  }
  0x75   :  { %7455 = vmatprep.subr.bf16.mxu1 %v8267_v15  ;;  %v8315_v14 = vld [vmem:[#allocation2 + $0x3d8] sm:$0xff]  }
  0x76   :  { %v8316_v15 = vld [vmem:[#allocation2 + $0x318] sm:$0xff]  }
  0x77   :  { %7434 = vmatpush3.bf16.msra.mxu0 %v8268_v16  ;;  %v8317_v16 = vld [vmem:[#allocation2 + $0x398] sm:$0xff]  }
  0x78   :  { %7463 = vmatprep.subr.bf16.mxu0 %v8270_v19  ;;  %7456 = vmatpush3.bf16.msra.mxu1 %v8269_v17  ;;  %v8318_v17 = vld [vmem:[#allocation2 + $0x360] sm:$0xff]  }
  0x79   :  { %7485 = vmatprep.subr.bf16.mxu1 %v8271_v20  ;;  %v8320_v19 = vld [vmem:[#allocation2 + $0x320] sm:$0xff]  }
  0x7a   :  { %5318 = vmatmul.mubr.bf16.vlgmr.msra.gmra.mrb[4].mxu0 %v1266_v18  ;;  %v8319_v18 = vld [vmem:[#allocation2 + $0x3e0] sm:$0xff]  }
  0x7b   :  { %7464 = vmatpush3.bf16.msra.mxu0 %v8272_v21  ;;  %5358 = vmatmul.mubr.bf16.vlgmr.msra.gmra.mrb[4].mxu1 %v1282_v23  ;;  %v8321_v20 = vld [vmem:[#allocation2 + $0x3a0] sm:$0xff]   ;;  %v8322_v21 = vld [vmem:[#allocation2 + $0x368] sm:$0xff]  }
  0x7c   :  { %7465 = vmatprep.subr.bf16.mxu0 %v8274_v24  ;;  %7486 = vmatpush3.bf16.msra.mxu1 %v8273_v22  ;;  %v8323_v22 = vld [vmem:[#allocation2 + $0x3e8] sm:$0xff]  }
  0x7d   :  { %7487 = vmatprep.subr.bf16.mxu1 %v8275_v25  ;;  %5397 = vmatprep.mubr.bf16.mxu0 %v1322_v62  ;;  %v8324_v23 = vld [vmem:[#allocation2 + $0x328] sm:$0xff]   ;;  %v8326_v25 = vld [vmem:[#allocation2 + $0x370] sm:$0xff]  }
  0x7e   :  { %5437 = vmatprep.mubr.bf16.mxu1 %v1332_v3  ;;  %v8325_v24 = vld [vmem:[#allocation2 + $0x3a8] sm:$0xff]   ;;  %v8361_v62 = vld [vmem:[#allocation2 + $0x430] sm:$0xff]  }
  0x7f   :  { %7466 = vmatpush3.bf16.msra.mxu0 %v8276_v26  ;;  %v8327_v26 = vld [vmem:[#allocation2 + $0x3f0] sm:$0xff]  }
  0x80   :  { %7467 = vmatprep.subr.bf16.mxu0 %v8278_v28  ;;  %7488 = vmatpush3.bf16.msra.mxu1 %v8277_v27  ;;  %v8328_v27 = vld [vmem:[#allocation2 + $0x330] sm:$0xff]  }
  0x81   :  { %7489 = vmatprep.subr.bf16.mxu1 %v8279_v29  ;;  %v8329_v28 = vld [vmem:[#allocation2 + $0x3b0] sm:$0xff]   ;;  %v8330_v29 = vld [vmem:[#allocation2 + $0x378] sm:$0xff]  }
  0x82   :  { %v61_v3 = vld [vmem:[%s9175_s0 + $0x10] sm:$0xff] }
  0x83   :  { %7468 = vmatpush3.bf16.msra.mxu0 %v8280_v30  ;;  %v8331_v30 = vld [vmem:[#allocation2 + $0x3f8] sm:$0xff]  }
  0x84   :  { %7469 = vmatprep.subr.bf16.mxu0 %v8282_v32  ;;  %7490 = vmatpush3.bf16.msra.mxu1 %v8281_v31  ;;  %v8332_v31 = vld [vmem:[#allocation2 + $0x338] sm:$0xff]  }
  0x85   :  { %7491 = vmatprep.subr.bf16.mxu1 %v8283_v33  ;;  %v8333_v32 = vld [vmem:[#allocation2 + $0x3b8] sm:$0xff]   ;;  %v1315_v33 = vrot.slane %v9000_v60, %v8978_v35  ;;  %v8359_v60 = vld [vmem:[#allocation2 + $0x470] sm:$0xff]  }
  0x87   :  { %7470 = vmatpush3.bf16.msra.mxu0 %v8284_v34  ;;  %v8335_v34 = vld [vmem:[#allocation2 + $0x440] sm:$0xff]  }
  0x88   :  { %7471 = vmatprep.subr.bf16.mxu0 %v8286_v37  ;;  %7492 = vmatpush3.bf16.msra.mxu1 %v8285_v36  ;;  %v8336_v36 = vld [vmem:[#allocation2 + $0x4c0] sm:$0xff]  }
  0x89   :  { %7493 = vmatprep.subr.bf16.mxu1 %v8287_v38  ;;  %v8337_v37 = vld [vmem:[#allocation2 + $0x400] sm:$0xff]  }
  0x8a   :  { %v8338_v38 = vld [vmem:[#allocation2 + $0x480] sm:$0xff]  }
  0x8b   :  { %7472 = vmatpush3.bf16.msra.mxu0 %v8288_v39  ;;  %v1331_v39 = vcombine.high %v1315_v33, %v1315_v33 }
  0x8c   :  { %7473 = vmatprep.subr.bf16.mxu0 %v8290_v41  ;;  %7494 = vmatpush3.bf16.msra.mxu1 %v8289_v40  ;;  %v8339_v40 = vld [vmem:[#allocation2 + $0x448] sm:$0xff]  }
  0x8d   :  { %7495 = vmatprep.subr.bf16.mxu1 %v8291_v42  ;;  %v8340_v41 = vld [vmem:[#allocation2 + $0x4c8] sm:$0xff]  }
  0x8e   :  { %v8341_v42 = vld [vmem:[#allocation2 + $0x408] sm:$0xff]  }
  0x8f   :  { %7474 = vmatpush3.bf16.msra.mxu0 %v8292_v43  ;;  %v8342_v43 = vld [vmem:[#allocation2 + $0x488] sm:$0xff]  }
  0x90   :  { %7475 = vmatprep.subr.bf16.mxu0 %v8294_v45  ;;  %7496 = vmatpush3.bf16.msra.mxu1 %v8293_v44  ;;  %v8343_v44 = vld [vmem:[#allocation2 + $0x450] sm:$0xff]  }
  0x91   :  { %7497 = vmatprep.subr.bf16.mxu1 %v8295_v46  ;;  %v8344_v45 = vld [vmem:[#allocation2 + $0x4d0] sm:$0xff]  }
  0x92   :  { %v8345_v46 = vld [vmem:[#allocation2 + $0x410] sm:$0xff]  }
  0x93   :  { %7476 = vmatpush3.bf16.msra.mxu0 %v8296_v47  ;;  %v8346_v47 = vld [vmem:[#allocation2 + $0x490] sm:$0xff]  }
  0x94   :  { %7477 = vmatprep.subr.bf16.mxu0 %v8298_v49  ;;  %7498 = vmatpush3.bf16.msra.mxu1 %v8297_v48  ;;  %v8347_v48 = vld [vmem:[#allocation2 + $0x458] sm:$0xff]  }
  0x95   :  { %7499 = vmatprep.subr.bf16.mxu1 %v8299_v50  ;;  %v8348_v49 = vld [vmem:[#allocation2 + $0x4d8] sm:$0xff]  }
  0x96   :  { %v8349_v50 = vld [vmem:[#allocation2 + $0x418] sm:$0xff]  }
  0x97   :  { %7478 = vmatpush3.bf16.msra.mxu0 %v8300_v51  ;;  %v8350_v51 = vld [vmem:[#allocation2 + $0x498] sm:$0xff]  }
  0x98   :  { %7507 = vmatprep.subr.bf16.mxu0 %v8302_v56  ;;  %7500 = vmatpush3.bf16.msra.mxu1 %v8301_v53  ;;  %v8352_v53 = vld [vmem:[#allocation2 + $0x4e0] sm:$0xff]   ;;  %v8355_v56 = vld [vmem:[#allocation2 + $0x468] sm:$0xff]  }
  0x99   :  { %7529 = vmatprep.subr.bf16.mxu1 %v8303_v59  ;;  %v8358_v59 = vld [vmem:[#allocation2 + $0x4a8] sm:$0xff]  }
  0x9a   :  { %5398 = vmatmul.mubr.bf16.vlgmr.msra.gmra.mrb[8].mxu0 %v1308_v58  ;;  %v8357_v58 = vld [vmem:[#allocation2 + $0x428] sm:$0xff]  }
  0x9b   :  { %7508 = vmatpush3.bf16.msra.mxu0 %v8304_v61  ;;  %5438 = vmatmul.mubr.bf16.vlgmr.msra.gmra.mrb[8].mxu1 %v1330_v1  ;;  %v8360_v61 = vld [vmem:[#allocation2 + $0x4f0] sm:$0xff]   ;;  %v8364_v1 = vld [vmem:[#allocation2 + $0x4f8] sm:$0xff]  }
  0x9c   :  { %7509 = vmatprep.subr.bf16.mxu0 %v8306_v2  ;;  %7530 = vmatpush3.bf16.msra.mxu1 %v8305_v63  ;;  %v8362_v63 = vld [vmem:[#allocation2 + $0x4b0] sm:$0xff]   ;;  %v8365_v2 = vld [vmem:[#allocation2 + $0x438] sm:$0xff]  }
  0x9d   :  { %5477 = vmatprep.mubr.bf16.mxu0 %v1329_v5  ;;  %7531 = vmatprep.subr.bf16.mxu1 %v8307_v4  ;;  %v8366_v4 = vld [vmem:[#allocation2 + $0x4b8] sm:$0xff]   ;;  %v1341_v5 = vrot.slane %v61_v3, %v8978_v35 }
  0x9e   :  { %5517 = vmatprep.mubr.bf16.mxu1 %v1333_v8 }
  0x9f   :  { %7510 = vmatpush3.bf16.msra.mxu0 %v8308_v6  ;;  %v1334_v6 = vcombine.high %v61_v3, %v61_v3  ;;  %v1349_v8 = vcombine.high %v1341_v5, %v1341_v5  ;;  %v8416_v3 = vld [vmem:[#allocation2 + $0x660] sm:$0xff]  }
  0xa0   :  { %7511 = vmatprep.subr.bf16.mxu0 %v8310_v9  ;;  %7532 = vmatpush3.bf16.msra.mxu1 %v8309_v7  ;;  %v8367_v7 = vld [vmem:[#allocation2 + $0x540] sm:$0xff]   ;;  %v1357_v9 = vrot.slane %v1341_v5, %v8978_v35 }
  0xa1   :  { %7533 = vmatprep.subr.bf16.mxu1 %v8311_v10  ;;  %v8368_v10 = vld [vmem:[#allocation2 + $0x5c0] sm:$0xff]  }
  0xa2   :  { %v8418_v5 = vld [vmem:[#allocation2 + $0x620] sm:$0xff]  }
  0xa3   :  { %7512 = vmatpush3.bf16.msra.mxu0 %v8312_v11  ;;  %v9014_v11 = vrot.slane %v1334_v6, %v8978_v35  ;;  %v8419_v6 = vld [vmem:[#allocation2 + $0x6a0] sm:$0xff]  }
  0xa4   :  { %7513 = vmatprep.subr.bf16.mxu0 %v8314_v13  ;;  %7534 = vmatpush3.bf16.msra.mxu1 %v8313_v12  ;;  %v8369_v12 = vld [vmem:[#allocation2 + $0x500] sm:$0xff]   ;;  %v1371_v13 = vrot.slane %v1349_v8, %v8978_v35  ;;  %v8421_v8 = vld [vmem:[#allocation2 + $0x6e8] sm:$0xff]  }
  0xa5   :  { %7535 = vmatprep.subr.bf16.mxu1 %v8315_v14  ;;  %v8370_v14 = vld [vmem:[#allocation2 + $0x580] sm:$0xff]  }
  0xa7   :  { %7514 = vmatpush3.bf16.msra.mxu0 %v8316_v15  ;;  %v1350_v15 = vcombine.high %v9014_v11, %v9014_v11 }
  0xa8   :  { %7515 = vmatprep.subr.bf16.mxu0 %v8318_v17  ;;  %7536 = vmatpush3.bf16.msra.mxu1 %v8317_v16  ;;  %v1379_v16 = vcombine.high %v1357_v9, %v1357_v9  ;;  %v8371_v17 = vld [vmem:[#allocation2 + $0x548] sm:$0xff]  }
  0xa9   :  { %7537 = vmatprep.subr.bf16.mxu1 %v8319_v18  ;;  %v1381_v18 = vcombine.high %v1371_v13, %v1371_v13 }
  0xab   :  { %7516 = vmatpush3.bf16.msra.mxu0 %v8320_v19  ;;  %v8372_v19 = vld [vmem:[#allocation2 + $0x5c8] sm:$0xff]  }
  0xac   :  { %7517 = vmatprep.subr.bf16.mxu0 %v8322_v21  ;;  %7538 = vmatpush3.bf16.msra.mxu1 %v8321_v20  ;;  %v1378_v20 = vrot.slane %v1350_v15, %v8978_v35  ;;  %v8373_v21 = vld [vmem:[#allocation2 + $0x508] sm:$0xff]   ;;  %v8428_v15 = vld [vmem:[#allocation2 + $0x678] sm:$0xff]  }
  0xad   :  { %7539 = vmatprep.subr.bf16.mxu1 %v8323_v22  ;;  %v8374_v22 = vld [vmem:[#allocation2 + $0x588] sm:$0xff]  }
  0xaf   :  { %7518 = vmatpush3.bf16.msra.mxu0 %v8324_v23  ;;  %v1382_v23 = vcombine.high %v1378_v20, %v1378_v20 }
  0xb0   :  { %7519 = vmatprep.subr.bf16.mxu0 %v8326_v25  ;;  %7540 = vmatpush3.bf16.msra.mxu1 %v8325_v24  ;;  %v8375_v24 = vld [vmem:[#allocation2 + $0x550] sm:$0xff]  }
  0xb1   :  { %7541 = vmatprep.subr.bf16.mxu1 %v8327_v26  ;;  %v8376_v25 = vld [vmem:[#allocation2 + $0x5d0] sm:$0xff]  }
  0xb2   :  { %v8377_v26 = vld [vmem:[#allocation2 + $0x510] sm:$0xff]  }
  0xb3   :  { %7520 = vmatpush3.bf16.msra.mxu0 %v8328_v27  ;;  %v8378_v27 = vld [vmem:[#allocation2 + $0x590] sm:$0xff]  }
  0xb4   :  { %7521 = vmatprep.subr.bf16.mxu0 %v8330_v29  ;;  %7542 = vmatpush3.bf16.msra.mxu1 %v8329_v28  ;;  %v8379_v28 = vld [vmem:[#allocation2 + $0x558] sm:$0xff]  }
  0xb5   :  { %7543 = vmatprep.subr.bf16.mxu1 %v8331_v30  ;;  %v8380_v29 = vld [vmem:[#allocation2 + $0x5d8] sm:$0xff]  }
  0xb6   :  { %v8381_v30 = vld [vmem:[#allocation2 + $0x518] sm:$0xff]  }
  0xb7   :  { %7522 = vmatpush3.bf16.msra.mxu0 %v8332_v31  ;;  %v8382_v31 = vld [vmem:[#allocation2 + $0x598] sm:$0xff]  }
  0xb8   :  { %7551 = vmatprep.subr.bf16.mxu0 %v8335_v34  ;;  %7544 = vmatpush3.bf16.msra.mxu1 %v8333_v32  ;;  %v8383_v32 = vld [vmem:[#allocation2 + $0x560] sm:$0xff]  }
  0xb9   :  { %7573 = vmatprep.subr.bf16.mxu1 %v8336_v36  ;;  %v8385_v34 = vld [vmem:[#allocation2 + $0x520] sm:$0xff]  }
  0xba   :  { %5478 = vmatmul.mubr.bf16.vlgmr.msra.gmra.mrb[12].mxu0 %v1315_v33  ;;  %v8384_v33 = vld [vmem:[#allocation2 + $0x5e0] sm:$0xff]  }
  0xbb   :  { %7552 = vmatpush3.bf16.msra.mxu0 %v8337_v37  ;;  %5518 = vmatmul.mubr.bf16.vlgmr.msra.gmra.mrb[12].mxu1 %v1331_v39  ;;  %v8386_v36 = vld [vmem:[#allocation2 + $0x5a0] sm:$0xff]   ;;  %v8387_v37 = vld [vmem:[#allocation2 + $0x568] sm:$0xff]  }
  0xbc   :  { %7553 = vmatprep.subr.bf16.mxu0 %v8339_v40  ;;  %7574 = vmatpush3.bf16.msra.mxu1 %v8338_v38  ;;  %v8388_v38 = vld [vmem:[#allocation2 + $0x5e8] sm:$0xff]  }
  0xbd   :  { %7575 = vmatprep.subr.bf16.mxu1 %v8340_v41  ;;  %5557 = vmatprep.mubr.bf16.mxu0 %v1371_v13  ;;  %v8389_v39 = vld [vmem:[#allocation2 + $0x528] sm:$0xff]   ;;  %v8391_v41 = vld [vmem:[#allocation2 + $0x570] sm:$0xff]  }
  0xbe   :  { %5597 = vmatprep.mubr.bf16.mxu1 %v1381_v18  ;;  %v8390_v40 = vld [vmem:[#allocation2 + $0x5a8] sm:$0xff]   ;;  %v8426_v13 = vld [vmem:[#allocation2 + $0x630] sm:$0xff]   ;;  %v62_v18 = vld [vmem:[%s9175_s0 + $0x18] sm:$0xff] }
  0xbf   :  { %7554 = vmatpush3.bf16.msra.mxu0 %v8341_v42  ;;  %v8392_v42 = vld [vmem:[#allocation2 + $0x5f0] sm:$0xff]  }
  0xc0   :  { %7555 = vmatprep.subr.bf16.mxu0 %v8343_v44  ;;  %7576 = vmatpush3.bf16.msra.mxu1 %v8342_v43  ;;  %v8393_v43 = vld [vmem:[#allocation2 + $0x530] sm:$0xff]  }
  0xc1   :  { %7577 = vmatprep.subr.bf16.mxu1 %v8344_v45  ;;  %v8394_v44 = vld [vmem:[#allocation2 + $0x5b0] sm:$0xff]   ;;  %v8395_v45 = vld [vmem:[#allocation2 + $0x578] sm:$0xff]  }
  0xc3   :  { %7556 = vmatpush3.bf16.msra.mxu0 %v8345_v46  ;;  %v8396_v46 = vld [vmem:[#allocation2 + $0x5f8] sm:$0xff]  }
  0xc4   :  { %7557 = vmatprep.subr.bf16.mxu0 %v8347_v48  ;;  %7578 = vmatpush3.bf16.msra.mxu1 %v8346_v47  ;;  %v8397_v47 = vld [vmem:[#allocation2 + $0x538] sm:$0xff]  }
  0xc5   :  { %7579 = vmatprep.subr.bf16.mxu1 %v8348_v49  ;;  %v8398_v48 = vld [vmem:[#allocation2 + $0x5b8] sm:$0xff]   ;;  %v1364_v49 = vrot.slane %v9014_v11, %v8978_v35  ;;  %v8424_v11 = vld [vmem:[#allocation2 + $0x670] sm:$0xff]  }
  0xc7   :  { %7558 = vmatpush3.bf16.msra.mxu0 %v8349_v50  ;;  %v8400_v50 = vld [vmem:[#allocation2 + $0x640] sm:$0xff]  }
  0xc8   :  { %7559 = vmatprep.subr.bf16.mxu0 %v8351_v52  ;;  %7580 = vmatpush3.bf16.msra.mxu1 %v8350_v51  ;;  %v8401_v51 = vld [vmem:[#allocation2 + $0x6c0] sm:$0xff]  }
  0xc9   :  { %7581 = vmatprep.subr.bf16.mxu1 %v8352_v53  ;;  %v8402_v52 = vld [vmem:[#allocation2 + $0x600] sm:$0xff]  }
  0xca   :  { %v8403_v53 = vld [vmem:[#allocation2 + $0x680] sm:$0xff]  }
  0xcb   :  { %7560 = vmatpush3.bf16.msra.mxu0 %v8353_v54  ;;  %v1380_v54 = vcombine.high %v1364_v49, %v1364_v49 }
  0xcc   :  { %7561 = vmatprep.subr.bf16.mxu0 %v8355_v56  ;;  %7582 = vmatpush3.bf16.msra.mxu1 %v8354_v55  ;;  %v8404_v55 = vld [vmem:[#allocation2 + $0x648] sm:$0xff]  }
  0xcd   :  { %7583 = vmatprep.subr.bf16.mxu1 %v8356_v57  ;;  %v8405_v56 = vld [vmem:[#allocation2 + $0x6c8] sm:$0xff]  }
  0xce   :  { %v8406_v57 = vld [vmem:[#allocation2 + $0x608] sm:$0xff]  }
  0xcf   :  { %7562 = vmatpush3.bf16.msra.mxu0 %v8357_v58  ;;  %v8407_v58 = vld [vmem:[#allocation2 + $0x688] sm:$0xff]  }
  0xd0   :  { %7563 = vmatprep.subr.bf16.mxu0 %v8359_v60  ;;  %7584 = vmatpush3.bf16.msra.mxu1 %v8358_v59  ;;  %v8408_v59 = vld [vmem:[#allocation2 + $0x650] sm:$0xff]  }
  0xd1   :  { %7585 = vmatprep.subr.bf16.mxu1 %v8360_v61  ;;  %v8409_v60 = vld [vmem:[#allocation2 + $0x6d0] sm:$0xff]  }
  0xd2   :  { %v8410_v61 = vld [vmem:[#allocation2 + $0x610] sm:$0xff]  }
  0xd3   :  { %7564 = vmatpush3.bf16.msra.mxu0 %v8361_v62  ;;  %v8411_v62 = vld [vmem:[#allocation2 + $0x690] sm:$0xff]  }
  0xd4   :  { %7565 = vmatprep.subr.bf16.mxu0 %v8363_v0  ;;  %7586 = vmatpush3.bf16.msra.mxu1 %v8362_v63  ;;  %v8412_v63 = vld [vmem:[#allocation2 + $0x658] sm:$0xff]  }
  0xd5   :  { %7587 = vmatprep.subr.bf16.mxu1 %v8364_v1  ;;  %v8413_v0 = vld [vmem:[#allocation2 + $0x6d8] sm:$0xff]  }
  0xd6   :  { %v8414_v1 = vld [vmem:[#allocation2 + $0x618] sm:$0xff]  }
  0xd7   :  { %7566 = vmatpush3.bf16.msra.mxu0 %v8365_v2  ;;  %v8415_v2 = vld [vmem:[#allocation2 + $0x698] sm:$0xff]  }
  0xd8   :  { %7595 = vmatprep.subr.bf16.mxu0 %v8367_v7  ;;  %7588 = vmatpush3.bf16.msra.mxu1 %v8366_v4  ;;  %v8417_v4 = vld [vmem:[#allocation2 + $0x6e0] sm:$0xff]   ;;  %v8420_v7 = vld [vmem:[#allocation2 + $0x668] sm:$0xff]  }
  0xd9   :  { %7617 = vmatprep.subr.bf16.mxu1 %v8368_v10  ;;  %v8423_v10 = vld [vmem:[#allocation2 + $0x6a8] sm:$0xff]  }
  0xda   :  { %5558 = vmatmul.mubr.bf16.vlgmr.msra.gmra.mrb[16].mxu0 %v1357_v9  ;;  %v8422_v9 = vld [vmem:[#allocation2 + $0x628] sm:$0xff]  }
  0xdb   :  { %7596 = vmatpush3.bf16.msra.mxu0 %v8369_v12  ;;  %5598 = vmatmul.mubr.bf16.vlgmr.msra.gmra.mrb[16].mxu1 %v1379_v16  ;;  %v8425_v12 = vld [vmem:[#allocation2 + $0x6f0] sm:$0xff]   ;;  %v8429_v16 = vld [vmem:[#allocation2 + $0x6f8] sm:$0xff]  }
  0xdc   :  { %7597 = vmatprep.subr.bf16.mxu0 %v8371_v17  ;;  %7618 = vmatpush3.bf16.msra.mxu1 %v8370_v14  ;;  %v8427_v14 = vld [vmem:[#allocation2 + $0x6b0] sm:$0xff]   ;;  %v8430_v17 = vld [vmem:[#allocation2 + $0x638] sm:$0xff]  }
  0xdd   :  { %5637 = vmatprep.mubr.bf16.mxu0 %v1378_v20  ;;  %7619 = vmatprep.subr.bf16.mxu1 %v8372_v19  ;;  %v1390_v19 = vrot.slane %v62_v18, %v8978_v35  ;;  %v8432_v20 = vld [vmem:[#allocation2 + $0x740] sm:$0xff]  }
  0xde   :  { %5677 = vmatprep.mubr.bf16.mxu1 %v1382_v23 }
  0xdf   :  { %7598 = vmatpush3.bf16.msra.mxu0 %v8373_v21  ;;  %v1383_v21 = vcombine.high %v62_v18, %v62_v18  ;;  %v1398_v23 = vcombine.high %v1390_v19, %v1390_v19 }
  0xe0   :  { %7599 = vmatprep.subr.bf16.mxu0 %v8375_v24  ;;  %7620 = vmatpush3.bf16.msra.mxu1 %v8374_v22  ;;  %v8431_v22 = vld [vmem:[#allocation2 + $0x6b8] sm:$0xff]   ;;  %v1406_v24 = vrot.slane %v1390_v19, %v8978_v35  ;;  %v8469_v19 = vld [vmem:[#allocation2 + $0x848] sm:$0xff]  }
  0xe1   :  { %7621 = vmatprep.subr.bf16.mxu1 %v8376_v25  ;;  %v8433_v25 = vld [vmem:[#allocation2 + $0x7c0] sm:$0xff]  }
  0xe3   :  { %7600 = vmatpush3.bf16.msra.mxu0 %v8377_v26  ;;  %v9028_v26 = vrot.slane %v1383_v21, %v8978_v35  ;;  %v8471_v21 = vld [vmem:[#allocation2 + $0x808] sm:$0xff]  }
  0xe4   :  { %7601 = vmatprep.subr.bf16.mxu0 %v8379_v28  ;;  %7622 = vmatpush3.bf16.msra.mxu1 %v8378_v27  ;;  %v1420_v27 = vrot.slane %v1398_v23, %v8978_v35  ;;  %v8434_v28 = vld [vmem:[#allocation2 + $0x700] sm:$0xff]   ;;  %v8473_v23 = vld [vmem:[#allocation2 + $0x850] sm:$0xff]  }
  0xe5   :  { %7623 = vmatprep.subr.bf16.mxu1 %v8380_v29  ;;  %v1399_v29 = vcombine.high %v9028_v26, %v9028_v26 }
  0xe7   :  { %7602 = vmatpush3.bf16.msra.mxu0 %v8381_v30  ;;  %v1428_v30 = vcombine.high %v1406_v24, %v1406_v24 }
  0xe8   :  { %7603 = vmatprep.subr.bf16.mxu0 %v8383_v32  ;;  %7624 = vmatpush3.bf16.msra.mxu1 %v8382_v31  ;;  %v8436_v31 = vld [vmem:[#allocation2 + $0x748] sm:$0xff]   ;;  %v1430_v32 = vcombine.high %v1420_v27, %v1420_v27 }
  0xe9   :  { %7625 = vmatprep.subr.bf16.mxu1 %v8384_v33  ;;  %v8435_v33 = vld [vmem:[#allocation2 + $0x780] sm:$0xff]  }
  0xeb   :  { %7604 = vmatpush3.bf16.msra.mxu0 %v8385_v34  ;;  %v1427_v34 = vrot.slane %v1399_v29, %v8978_v35  ;;  %v8479_v29 = vld [vmem:[#allocation2 + $0x818] sm:$0xff]  }
  0xec   :  { %7605 = vmatprep.subr.bf16.mxu0 %v8387_v37  ;;  %7626 = vmatpush3.bf16.msra.mxu1 %v8386_v36  ;;  %v8437_v36 = vld [vmem:[#allocation2 + $0x7c8] sm:$0xff]  }
  0xed   :  { %7627 = vmatprep.subr.bf16.mxu1 %v8388_v38  ;;  %v8438_v37 = vld [vmem:[#allocation2 + $0x708] sm:$0xff]   ;;  %v1431_v38 = vcombine.high %v1427_v34, %v1427_v34 }
  0xef   :  { %7606 = vmatpush3.bf16.msra.mxu0 %v8389_v39  ;;  %v8440_v39 = vld [vmem:[#allocation2 + $0x750] sm:$0xff]  }
  0xf0   :  { %7607 = vmatprep.subr.bf16.mxu0 %v8391_v41  ;;  %7628 = vmatpush3.bf16.msra.mxu1 %v8390_v40  ;;  %v8439_v40 = vld [vmem:[#allocation2 + $0x788] sm:$0xff]   ;;  %v8441_v41 = vld [vmem:[#allocation2 + $0x7d0] sm:$0xff]  }
  0xf1   :  { %7629 = vmatprep.subr.bf16.mxu1 %v8392_v42  ;;  %v8442_v42 = vld [vmem:[#allocation2 + $0x710] sm:$0xff]  }
  0xf3   :  { %7608 = vmatpush3.bf16.msra.mxu0 %v8393_v43  ;;  %v8444_v43 = vld [vmem:[#allocation2 + $0x758] sm:$0xff]  }
  0xf4   :  { %7609 = vmatprep.subr.bf16.mxu0 %v8395_v45  ;;  %7630 = vmatpush3.bf16.msra.mxu1 %v8394_v44  ;;  %v8443_v44 = vld [vmem:[#allocation2 + $0x790] sm:$0xff]   ;;  %v8445_v45 = vld [vmem:[#allocation2 + $0x7d8] sm:$0xff]  }
  0xf5   :  { %7631 = vmatprep.subr.bf16.mxu1 %v8396_v46  ;;  %v8446_v46 = vld [vmem:[#allocation2 + $0x718] sm:$0xff]  }
  0xf7   :  { %7610 = vmatpush3.bf16.msra.mxu0 %v8397_v47  ;;  %v8448_v47 = vld [vmem:[#allocation2 + $0x760] sm:$0xff]  }
  0xf8   :  { %7639 = vmatprep.subr.bf16.mxu0 %v8400_v50  ;;  %7632 = vmatpush3.bf16.msra.mxu1 %v8398_v48  ;;  %v8447_v48 = vld [vmem:[#allocation2 + $0x798] sm:$0xff]   ;;  %v8450_v50 = vld [vmem:[#allocation2 + $0x720] sm:$0xff]  }
  0xf9   :  { %7661 = vmatprep.subr.bf16.mxu1 %v8401_v51  ;;  %v8452_v51 = vld [vmem:[#allocation2 + $0x768] sm:$0xff]  }
  0xfa   :  { %5638 = vmatmul.mubr.bf16.vlgmr.msra.gmra.mrb[20].mxu0 %v1364_v49  ;;  %v8449_v49 = vld [vmem:[#allocation2 + $0x7e0] sm:$0xff]  }
  0xfb   :  { %7640 = vmatpush3.bf16.msra.mxu0 %v8402_v52  ;;  %5678 = vmatmul.mubr.bf16.vlgmr.msra.gmra.mrb[20].mxu1 %v1380_v54  ;;  %v8451_v52 = vld [vmem:[#allocation2 + $0x7a0] sm:$0xff]  }
  0xfc   :  { %7641 = vmatprep.subr.bf16.mxu0 %v8404_v55  ;;  %7662 = vmatpush3.bf16.msra.mxu1 %v8403_v53  ;;  %v8453_v53 = vld [vmem:[#allocation2 + $0x7e8] sm:$0xff]   ;;  %v6789_v54 = vld [vmem:[#allocation5] ss:$0 sm:$0xff] }
  0xfd   :  { %7663 = vmatprep.subr.bf16.mxu1 %v8405_v56  ;;  %5717 = vmatprep.mubr.bf16.mxu0 %v1420_v27  ;;  %v8454_v55 = vld [vmem:[#allocation2 + $0x728] sm:$0xff]   ;;  %v8477_v27 = vld [vmem:[#allocation2 + $0x858] sm:$0xff]  }
  0xfe   :  { %5757 = vmatprep.mubr.bf16.mxu1 %v1430_v32  ;;  %v8482_v32 = vld [vmem:[#allocation2 + $0x8e0] sm:$0xff]  }
  0xff   :  { %7642 = vmatpush3.bf16.msra.mxu0 %v8406_v57  ;;  %v8456_v57 = vld [vmem:[#allocation2 + $0x770] sm:$0xff]  }
 0x100   :  { %7643 = vmatprep.subr.bf16.mxu0 %v8408_v59  ;;  %7664 = vmatpush3.bf16.msra.mxu1 %v8407_v58  ;;  %v8455_v59 = vld [vmem:[#allocation2 + $0x7a8] sm:$0xff]  }
 0x101   :  { %7665 = vmatprep.subr.bf16.mxu1 %v8409_v60 }
 0x103   :  { %7644 = vmatpush3.bf16.msra.mxu0 %v8410_v61 }
 0x104   :  { %7645 = vmatprep.subr.bf16.mxu0 %v8412_v63  ;;  %7666 = vmatpush3.bf16.msra.mxu1 %v8411_v62  ;;  %v8457_v63 = vld [vmem:[#allocation2 + $0x7f0] sm:$0xff]  }
 0x105   :  { %7667 = vmatprep.subr.bf16.mxu1 %v8413_v0  ;;  %v8458_v0 = vld [vmem:[#allocation2 + $0x730] sm:$0xff]  }
 0x107   :  { %7646 = vmatpush3.bf16.msra.mxu0 %v8414_v1 }
 0x108   :  { %7647 = vmatprep.subr.bf16.mxu0 %v8416_v3  ;;  %7668 = vmatpush3.bf16.msra.mxu1 %v8415_v2  ;;  %v8459_v3 = vld [vmem:[#allocation2 + $0x7b0] sm:$0xff]  }
 0x109   :  { %7669 = vmatprep.subr.bf16.mxu1 %v8417_v4 }
 0x10b   :  { %7648 = vmatpush3.bf16.msra.mxu0 %v8418_v5 }
 0x10c   :  { %7649 = vmatprep.subr.bf16.mxu0 %v8420_v7  ;;  %7670 = vmatpush3.bf16.msra.mxu1 %v8419_v6  ;;  %v8460_v7 = vld [vmem:[#allocation2 + $0x778] sm:$0xff]  }
 0x10d   :  { %7671 = vmatprep.subr.bf16.mxu1 %v8421_v8 }
 0x10f   :  { %7650 = vmatpush3.bf16.msra.mxu0 %v8422_v9  ;;  %v8461_v9 = vld [vmem:[#allocation2 + $0x7f8] sm:$0xff]  }
 0x110   :  { %7651 = vmatprep.subr.bf16.mxu0 %v8424_v11  ;;  %7672 = vmatpush3.bf16.msra.mxu1 %v8423_v10  ;;  %v8462_v11 = vld [vmem:[#allocation2 + $0x738] sm:$0xff]  }
 0x111   :  { %7673 = vmatprep.subr.bf16.mxu1 %v8425_v12  ;;  %v8463_v12 = vld [vmem:[#allocation2 + $0x7b8] sm:$0xff]  }
 0x113   :  { %7652 = vmatpush3.bf16.msra.mxu0 %v8426_v13  ;;  %v1413_v13 = vrot.slane %v9028_v26, %v8978_v35  ;;  %v8476_v26 = vld [vmem:[#allocation2 + $0x890] sm:$0xff]  }
 0x114   :  { %7653 = vmatprep.subr.bf16.mxu0 %v8428_v15  ;;  %7674 = vmatpush3.bf16.msra.mxu1 %v8427_v14  ;;  %v8465_v14 = vld [vmem:[#allocation2 + $0x840] sm:$0xff]  }
 0x115   :  { %7675 = vmatprep.subr.bf16.mxu1 %v8429_v16  ;;  %v8466_v15 = vld [vmem:[#allocation2 + $0x8c0] sm:$0xff]   ;;  %v1429_v18 = vcombine.high %v1413_v13, %v1413_v13 }
 0x116   :  { %v8467_v16 = vld [vmem:[#allocation2 + $0x800] sm:$0xff]  }
 0x117   :  { %7654 = vmatpush3.bf16.msra.mxu0 %v8430_v17  ;;  %v8468_v17 = vld [vmem:[#allocation2 + $0x880] sm:$0xff]  }
 0x118   :  { %7683 = vmatprep.subr.bf16.mxu0 %v8432_v20  ;;  %7676 = vmatpush3.bf16.msra.mxu1 %v8431_v22  ;;  %v8470_v20 = vld [vmem:[#allocation2 + $0x8c8] sm:$0xff]  }
 0x119   :  { %7705 = vmatprep.subr.bf16.mxu1 %v8433_v25  ;;  %v8472_v22 = vld [vmem:[#allocation2 + $0x888] sm:$0xff]   ;;  %v8475_v25 = vld [vmem:[#allocation2 + $0x810] sm:$0xff]  }
 0x11a   :  { %5718 = vmatmul.mubr.bf16.vlgmr.msra.gmra.mrb[24].mxu0 %v1406_v24  ;;  %v8474_v24 = vld [vmem:[#allocation2 + $0x8d0] sm:$0xff]  }
 0x11b   :  { %7684 = vmatpush3.bf16.msra.mxu0 %v8434_v28  ;;  %5758 = vmatmul.mubr.bf16.vlgmr.msra.gmra.mrb[24].mxu1 %v1428_v30  ;;  %v8478_v28 = vld [vmem:[#allocation2 + $0x8d8] sm:$0xff]  }
 0x11c   :  { %7685 = vmatprep.subr.bf16.mxu0 %v8436_v31  ;;  %7706 = vmatpush3.bf16.msra.mxu1 %v8435_v33  ;;  %v8480_v30 = vld [vmem:[#allocation2 + $0x898] sm:$0xff]   ;;  %v8481_v31 = vld [vmem:[#allocation2 + $0x860] sm:$0xff]  }
 0x11d   :  { %5797 = vmatprep.mubr.bf16.mxu0 %v1427_v34  ;;  %7707 = vmatprep.subr.bf16.mxu1 %v8437_v36  ;;  %v8483_v33 = vld [vmem:[#allocation2 + $0x820] sm:$0xff]   ;;  %v8485_v36 = vld [vmem:[#allocation2 + $0x868] sm:$0xff]  }
 0x11e   :  { %5837 = vmatprep.mubr.bf16.mxu1 %v1431_v38  ;;  %v8484_v34 = vld [vmem:[#allocation2 + $0x8a0] sm:$0xff]   ;;  %v8487_v38 = vld [vmem:[#allocation2 + $0x828] sm:$0xff]  }
 0x11f   :  { %7686 = vmatpush3.bf16.msra.mxu0 %v8438_v37  ;;  %v8486_v37 = vld [vmem:[#allocation2 + $0x8e8] sm:$0xff]  }
 0x120   :  { %7687 = vmatprep.subr.bf16.mxu0 %v8440_v39  ;;  %7708 = vmatpush3.bf16.msra.mxu1 %v8439_v40  ;;  %v8488_v39 = vld [vmem:[#allocation2 + $0x8a8] sm:$0xff]  }
 0x121   :  { %7709 = vmatprep.subr.bf16.mxu1 %v8441_v41  ;;  %v8489_v41 = vld [vmem:[#allocation2 + $0x870] sm:$0xff]  }
 0x123   :  { %7688 = vmatpush3.bf16.msra.mxu0 %v8442_v42 }
 0x124   :  { %7689 = vmatprep.subr.bf16.mxu0 %v8444_v43  ;;  %7710 = vmatpush3.bf16.msra.mxu1 %v8443_v44  ;;  %v8490_v43 = vld [vmem:[#allocation2 + $0x8f0] sm:$0xff]  }
 0x125   :  { %7711 = vmatprep.subr.bf16.mxu1 %v8445_v45 }
 0x127   :  { %7690 = vmatpush3.bf16.msra.mxu0 %v8446_v46 }
 0x128   :  { %7691 = vmatprep.subr.bf16.mxu0 %v8448_v47  ;;  %7712 = vmatpush3.bf16.msra.mxu1 %v8447_v48 }
 0x129   :  { %7713 = vmatprep.subr.bf16.mxu1 %v8449_v49  ;;  %v8491_v49 = vld [vmem:[#allocation2 + $0x830] sm:$0xff]  }
 0x12b   :  { %7692 = vmatpush3.bf16.msra.mxu0 %v8450_v50  ;;  %v8492_v50 = vld [vmem:[#allocation2 + $0x8b0] sm:$0xff]  }
 0x12c   :  { %7693 = vmatprep.subr.bf16.mxu0 %v8452_v51  ;;  %7714 = vmatpush3.bf16.msra.mxu1 %v8451_v52 }
 0x12d   :  { %v7391_v56 = vpop.f32.mrb[0].mxu0  ;;  %7715 = vmatprep.subr.bf16.mxu1 %v8453_v53 }
 0x12e   :  { %v7392_v58 = vpop.f32.mrb[1].mxu0  ;;  %v7413_v60 = vpop.f32.mrb[0].mxu1 }
 0x12f   :  { %v7393_v61 = vadd.f32 %v7392_v58, %v7391_v56  ;;  %v7394_v62 = vpop.f32.mrb[2].mxu0  ;;  %v7414_v1 = vpop.f32.mrb[1].mxu1  ;;  %7694 = vmatpush3.bf16.msra.mxu0 %v8454_v55  ;;  %v8494_v56 = vld [vmem:[#allocation2 + $0x8f8] sm:$0xff]  }
 0x130   :  { %v7395_v2 = vpop.f32.mrb[3].mxu0  ;;  %v7415_v5 = vadd.f32 %v7414_v1, %v7413_v60  ;;  %v7416_v6 = vpop.f32.mrb[2].mxu1  ;;  %7695 = vmatprep.subr.bf16.mxu0 %v8456_v57  ;;  %7716 = vmatpush3.bf16.msra.mxu1 %v8455_v59  ;;  %v8495_v58 = vld [vmem:[#allocation2 + $0x838] sm:$0xff]   ;;  %v63_v59 = vld [vmem:[%s9175_s0 + $0x20] sm:$0xff] }
 0x131   :  { %v5240_v4 = vadd.f32 %v7393_v61, %v6789_v54  ;;  %v7417_v8 = vpop.f32.mrb[3].mxu1  ;;  %7717 = vmatprep.subr.bf16.mxu1 %v8457_v63  ;;  %v8493_v54 = vld [vmem:[#allocation2 + $0x878] sm:$0xff]   ;;  %v1439_v60 = vrot.slane %v63_v59, %v8978_v35  ;;  %v8497_v61 = vld [vmem:[#allocation2 + $0x940] sm:$0xff]   ;;  %v1432_v62 = vcombine.high %v63_v59, %v63_v59  ;;  %v8534_v59 = vld [vmem:[#allocation2 + $0xa48] sm:$0xff]  }
 0x132   :  { %v8496_v63 = vld [vmem:[#allocation2 + $0x8b8] sm:$0xff]   ;;  %v8498_v2 = vld [vmem:[#allocation2 + $0x9c0] sm:$0xff]  }
 0x133   :  { %v9034_v10 = vadd.f32 %v7415_v5, %v5240_v4  ;;  %7696 = vmatpush3.bf16.msra.mxu0 %v8458_v0  ;;  %v1447_v0 = vcombine.high %v1439_v60, %v1439_v60  ;;  %v1455_v1 = vrot.slane %v1439_v60, %v8978_v35  ;;  %v8499_v4 = vld [vmem:[#allocation2 + $0x900] sm:$0xff]   ;;  %v8535_v60 = vld [vmem:[#allocation2 + $0xac8] sm:$0xff]  }
 0x134   :  { %7697 = vmatprep.subr.bf16.mxu0 %v8460_v7  ;;  %7718 = vmatpush3.bf16.msra.mxu1 %v8459_v3  ;;  %v9047_v3 = vrot.slane %v1432_v62, %v8978_v35  ;;  %v8500_v6 = vld [vmem:[#allocation2 + $0x980] sm:$0xff]   ;;  %v8537_v62 = vld [vmem:[#allocation2 + $0xa88] sm:$0xff]  }
 0x135   :  { %7719 = vmatprep.subr.bf16.mxu1 %v8461_v9  ;;  %v1469_v5 = vrot.slane %v1447_v0, %v8978_v35  ;;  %v1477_v8 = vcombine.high %v1455_v1, %v1455_v1  ;;  %v8501_v9 = vld [vmem:[#allocation2 + $0x948] sm:$0xff]   ;;  %v8539_v0 = vld [vmem:[#allocation2 + $0xad0] sm:$0xff]  }
 0x136   :  { %v1448_v7 = vcombine.high %v9047_v3, %v9047_v3 }
 0x137   :  { %7698 = vmatpush3.bf16.msra.mxu0 %v8462_v11  ;;  %v8502_v11 = vld [vmem:[#allocation2 + $0x9c8] sm:$0xff]  }
 0x138   :  { %7727 = vmatprep.subr.bf16.mxu0 %v8465_v14  ;;  %7720 = vmatpush3.bf16.msra.mxu1 %v8463_v12  ;;  %v1476_v12 = vrot.slane %v1448_v7, %v8978_v35  ;;  %v8504_v14 = vld [vmem:[#allocation2 + $0x988] sm:$0xff]   ;;  %v8546_v7 = vld [vmem:[#allocation2 + $0xa60] sm:$0xff]  }
 0x139   :  { %7749 = vmatprep.subr.bf16.mxu1 %v8466_v15 }
 0x13a   :  { %5798 = vmatmul.mubr.bf16.vlgmr.msra.gmra.mrb[28].mxu0 %v1413_v13  ;;  %v8503_v13 = vld [vmem:[#allocation2 + $0x908] sm:$0xff]   ;;  %v1480_v15 = vcombine.high %v1476_v12, %v1476_v12 }
 0x13b   :  { %7728 = vmatpush3.bf16.msra.mxu0 %v8467_v16  ;;  %5838 = vmatmul.mubr.bf16.vlgmr.msra.gmra.mrb[28].mxu1 %v1429_v18  ;;  %v8505_v16 = vld [vmem:[#allocation2 + $0x950] sm:$0xff]  }
 0x13c   :  { %7729 = vmatprep.subr.bf16.mxu0 %v8469_v19  ;;  %7750 = vmatpush3.bf16.msra.mxu1 %v8468_v17  ;;  %v8506_v17 = vld [vmem:[#allocation2 + $0x9d0] sm:$0xff]  }
 0x13d   :  { %7751 = vmatprep.subr.bf16.mxu1 %v8470_v20  ;;  %5877 = vmatprep.mubr.bf16.mxu0 %v1469_v5  ;;  %v8507_v18 = vld [vmem:[#allocation2 + $0x910] sm:$0xff]   ;;  %v8509_v20 = vld [vmem:[#allocation2 + $0x958] sm:$0xff]  }
 0x13e   :  { %v8508_v19 = vld [vmem:[#allocation2 + $0x990] sm:$0xff]  }
 0x13f   :  { %7730 = vmatpush3.bf16.msra.mxu0 %v8471_v21  ;;  %v8510_v21 = vld [vmem:[#allocation2 + $0x9d8] sm:$0xff]  }
 0x140   :  { %7731 = vmatprep.subr.bf16.mxu0 %v8473_v23  ;;  %7752 = vmatpush3.bf16.msra.mxu1 %v8472_v22  ;;  %v8511_v22 = vld [vmem:[#allocation2 + $0x918] sm:$0xff]  }
 0x141   :  { %7753 = vmatprep.subr.bf16.mxu1 %v8474_v24  ;;  %v8512_v23 = vld [vmem:[#allocation2 + $0x998] sm:$0xff]   ;;  %v8513_v24 = vld [vmem:[#allocation2 + $0x960] sm:$0xff]  }
 0x143   :  { %7732 = vmatpush3.bf16.msra.mxu0 %v8475_v25  ;;  %v8514_v25 = vld [vmem:[#allocation2 + $0x9e0] sm:$0xff]  }
 0x144   :  { %7733 = vmatprep.subr.bf16.mxu0 %v8477_v27  ;;  %7754 = vmatpush3.bf16.msra.mxu1 %v8476_v26  ;;  %v8515_v26 = vld [vmem:[#allocation2 + $0x920] sm:$0xff]  }
 0x145   :  { %7755 = vmatprep.subr.bf16.mxu1 %v8478_v28  ;;  %v8516_v27 = vld [vmem:[#allocation2 + $0x9a0] sm:$0xff]   ;;  %v8517_v28 = vld [vmem:[#allocation2 + $0x968] sm:$0xff]  }
 0x147   :  { %7734 = vmatpush3.bf16.msra.mxu0 %v8479_v29  ;;  %v8518_v29 = vld [vmem:[#allocation2 + $0x9e8] sm:$0xff]  }
 0x148   :  { %7735 = vmatprep.subr.bf16.mxu0 %v8481_v31  ;;  %7756 = vmatpush3.bf16.msra.mxu1 %v8480_v30  ;;  %v8519_v30 = vld [vmem:[#allocation2 + $0x928] sm:$0xff]  }
 0x149   :  { %7757 = vmatprep.subr.bf16.mxu1 %v8482_v32  ;;  %v8520_v32 = vld [vmem:[#allocation2 + $0x9a8] sm:$0xff]  }
 0x14b   :  { %7736 = vmatpush3.bf16.msra.mxu0 %v8483_v33 }
 0x14c   :  { %7737 = vmatprep.subr.bf16.mxu0 %v8485_v36  ;;  %7758 = vmatpush3.bf16.msra.mxu1 %v8484_v34  ;;  %v8521_v34 = vld [vmem:[#allocation2 + $0x970] sm:$0xff]  }
 0x14d   :  { %v7435_v40 = vpop.f32.mrb[4].mxu0  ;;  %7759 = vmatprep.subr.bf16.mxu1 %v8486_v37 }
 0x14e   :  { %v7436_v42 = vpop.f32.mrb[5].mxu0  ;;  %v7457_v44 = vpop.f32.mrb[4].mxu1 }
 0x14f   :  { %v7437_v45 = vadd.f32 %v7436_v42, %v7435_v40  ;;  %v7438_v46 = vpop.f32.mrb[6].mxu0  ;;  %v7458_v47 = vpop.f32.mrb[5].mxu1  ;;  %7738 = vmatpush3.bf16.msra.mxu0 %v8487_v38  ;;  %v8523_v40 = vld [vmem:[#allocation2 + $0x930] sm:$0xff]  }
 0x150   :  { %v7439_v48 = vpop.f32.mrb[7].mxu0  ;;  %v7459_v52 = vadd.f32 %v7458_v47, %v7457_v44  ;;  %v7460_v53 = vpop.f32.mrb[6].mxu1  ;;  %7739 = vmatprep.subr.bf16.mxu0 %v8489_v41  ;;  %7760 = vmatpush3.bf16.msra.mxu1 %v8488_v39  ;;  %v8522_v39 = vld [vmem:[#allocation2 + $0x9f0] sm:$0xff]  }
 0x151   :  { %v5320_v51 = vadd.f32 %v7437_v45, %v9034_v10  ;;  %v7461_v55 = vpop.f32.mrb[7].mxu1  ;;  %7761 = vmatprep.subr.bf16.mxu1 %v8490_v43  ;;  %v1479_v10 = vcombine.high %v1469_v5, %v1469_v5  ;;  %v8524_v46 = vld [vmem:[#allocation2 + $0x9b0] sm:$0xff]   ;;  %v8525_v48 = vld [vmem:[#allocation2 + $0x978] sm:$0xff]   ;;  %v1462_v53 = vrot.slane %v9047_v3, %v8978_v35 }
 0x152   :  { %v8531_v55 = vld [vmem:[#allocation2 + $0xac0] sm:$0xff]   ;;  %v8542_v3 = vld [vmem:[#allocation2 + $0xa58] sm:$0xff]  }
 0x153   :  { %v9039_v57 = vadd.f32 %v7459_v52, %v5320_v51  ;;  %7740 = vmatpush3.bf16.msra.mxu0 %v8491_v49  ;;  %5917 = vmatprep.mubr.bf16.mxu1 %v1479_v10  ;;  %v8527_v51 = vld [vmem:[#allocation2 + $0x938] sm:$0xff]   ;;  %v8549_v10 = vld [vmem:[#allocation2 + $0xaa0] sm:$0xff]  }
 0x154   :  { %7741 = vmatprep.subr.bf16.mxu0 %v8493_v54  ;;  %7762 = vmatpush3.bf16.msra.mxu1 %v8492_v50  ;;  %v8526_v50 = vld [vmem:[#allocation2 + $0x9f8] sm:$0xff]   ;;  %v8530_v54 = vld [vmem:[#allocation2 + $0xa40] sm:$0xff]  }
 0x155   :  { %7763 = vmatprep.subr.bf16.mxu1 %v8494_v56  ;;  %v8528_v52 = vld [vmem:[#allocation2 + $0x9b8] sm:$0xff]   ;;  %v8532_v56 = vld [vmem:[#allocation2 + $0xa00] sm:$0xff]  }
 0x156   :  { %v8544_v5 = vld [vmem:[#allocation2 + $0xa18] sm:$0xff]  }
 0x157   :  { %7742 = vmatpush3.bf16.msra.mxu0 %v8495_v58  ;;  %v1478_v58 = vcombine.high %v1462_v53, %v1462_v53 }
 0x158   :  { %7771 = vmatprep.subr.bf16.mxu0 %v8497_v61  ;;  %7764 = vmatpush3.bf16.msra.mxu1 %v8496_v63  ;;  %v8536_v61 = vld [vmem:[#allocation2 + $0xa08] sm:$0xff]   ;;  %v8538_v63 = vld [vmem:[#allocation2 + $0xa50] sm:$0xff]  }
 0x159   :  { %7793 = vmatprep.subr.bf16.mxu1 %v8498_v2  ;;  %v8541_v2 = vld [vmem:[#allocation2 + $0xa90] sm:$0xff]  }
 0x15a   :  { %5878 = vmatmul.mubr.bf16.vlgmr.msra.gmra.mrb[32].mxu0 %v1455_v1  ;;  %v8540_v1 = vld [vmem:[#allocation2 + $0xa10] sm:$0xff]  }
 0x15b   :  { %7772 = vmatpush3.bf16.msra.mxu0 %v8499_v4  ;;  %5918 = vmatmul.mubr.bf16.vlgmr.msra.gmra.mrb[32].mxu1 %v1477_v8  ;;  %v8543_v4 = vld [vmem:[#allocation2 + $0xad8] sm:$0xff]   ;;  %v8547_v8 = vld [vmem:[#allocation2 + $0xae0] sm:$0xff]  }
 0x15c   :  { %7773 = vmatprep.subr.bf16.mxu0 %v8501_v9  ;;  %7794 = vmatpush3.bf16.msra.mxu1 %v8500_v6  ;;  %v8545_v6 = vld [vmem:[#allocation2 + $0xa98] sm:$0xff]   ;;  %v8548_v9 = vld [vmem:[#allocation2 + $0xa20] sm:$0xff]  }
 0x15d   :  { %5957 = vmatprep.mubr.bf16.mxu0 %v1476_v12  ;;  %7795 = vmatprep.subr.bf16.mxu1 %v8502_v11  ;;  %v8550_v11 = vld [vmem:[#allocation2 + $0xa68] sm:$0xff]  }
 0x15e   :  { %5997 = vmatprep.mubr.bf16.mxu1 %v1480_v15  ;;  %v8551_v12 = vld [vmem:[#allocation2 + $0xae8] sm:$0xff]  }
 0x15f   :  { %7774 = vmatpush3.bf16.msra.mxu0 %v8503_v13  ;;  %v8552_v13 = vld [vmem:[#allocation2 + $0xa28] sm:$0xff]  }
 0x160   :  { %7775 = vmatprep.subr.bf16.mxu0 %v8505_v16  ;;  %7796 = vmatpush3.bf16.msra.mxu1 %v8504_v14  ;;  %v8553_v15 = vld [vmem:[#allocation2 + $0xaa8] sm:$0xff]  }
 0x161   :  { %7797 = vmatprep.subr.bf16.mxu1 %v8506_v17  ;;  %v8554_v17 = vld [vmem:[#allocation2 + $0xa70] sm:$0xff]  }
 0x163   :  { %7776 = vmatpush3.bf16.msra.mxu0 %v8507_v18 }
 0x164   :  { %7777 = vmatprep.subr.bf16.mxu0 %v8509_v20  ;;  %7798 = vmatpush3.bf16.msra.mxu1 %v8508_v19 }
 0x165   :  { %7799 = vmatprep.subr.bf16.mxu1 %v8510_v21 }
 0x167   :  { %7778 = vmatpush3.bf16.msra.mxu0 %v8511_v22 }
 0x168   :  { %7779 = vmatprep.subr.bf16.mxu0 %v8513_v24  ;;  %7800 = vmatpush3.bf16.msra.mxu1 %v8512_v23  ;;  %v8555_v23 = vld [vmem:[#allocation2 + $0xaf0] sm:$0xff]  }
 0x169   :  { %7801 = vmatprep.subr.bf16.mxu1 %v8514_v25  ;;  %v8556_v24 = vld [vmem:[#allocation2 + $0xa30] sm:$0xff]  }
 0x16b   :  { %7780 = vmatpush3.bf16.msra.mxu0 %v8515_v26 }
 0x16c   :  { %7781 = vmatprep.subr.bf16.mxu0 %v8517_v28  ;;  %7802 = vmatpush3.bf16.msra.mxu1 %v8516_v27  ;;  %v8557_v28 = vld [vmem:[#allocation2 + $0xab0] sm:$0xff]  }
 0x16d   :  { %v7479_v31 = vpop.f32.mrb[8].mxu0  ;;  %7803 = vmatprep.subr.bf16.mxu1 %v8518_v29 }
 0x16e   :  { %v7480_v33 = vpop.f32.mrb[9].mxu0  ;;  %v7501_v36 = vpop.f32.mrb[8].mxu1 }
 0x16f   :  { %v7481_v37 = vadd.f32 %v7480_v33, %v7479_v31  ;;  %v7482_v38 = vpop.f32.mrb[10].mxu0  ;;  %v7502_v41 = vpop.f32.mrb[9].mxu1  ;;  %7782 = vmatpush3.bf16.msra.mxu0 %v8519_v30  ;;  %v8558_v30 = vld [vmem:[#allocation2 + $0xa78] sm:$0xff]  }
 0x170   :  { %v7483_v42 = vpop.f32.mrb[11].mxu0  ;;  %v7503_v44 = vadd.f32 %v7502_v41, %v7501_v36  ;;  %v7504_v45 = vpop.f32.mrb[10].mxu1  ;;  %7783 = vmatprep.subr.bf16.mxu0 %v8521_v34  ;;  %7804 = vmatpush3.bf16.msra.mxu1 %v8520_v32  ;;  %v8559_v32 = vld [vmem:[#allocation2 + $0xaf8] sm:$0xff]   ;;  %v64_v34 = vld [vmem:[%s9175_s0 + $0x28] sm:$0xff] }
 0x171   :  { %v5400_v43 = vadd.f32 %v7481_v37, %v9039_v57  ;;  %v7505_v47 = vpop.f32.mrb[11].mxu1  ;;  %7805 = vmatprep.subr.bf16.mxu1 %v8522_v39  ;;  %v8533_v57 = vld [vmem:[#allocation2 + $0xa80] sm:$0xff]   ;;  %v8560_v33 = vld [vmem:[#allocation2 + $0xa38] sm:$0xff]   ;;  %v1488_v36 = vrot.slane %v64_v34, %v8978_v35  ;;  %v1481_v38 = vcombine.high %v64_v34, %v64_v34  ;;  %v8599_v34 = vld [vmem:[#allocation2 + $0xc48] sm:$0xff]  }
 0x172   :  { %v8562_v37 = vld [vmem:[#allocation2 + $0xb40] sm:$0xff]   ;;  %v8561_v39 = vld [vmem:[#allocation2 + $0xab8] sm:$0xff]  }
 0x173   :  { %v9054_v49 = vadd.f32 %v7503_v44, %v5400_v43  ;;  %7784 = vmatpush3.bf16.msra.mxu0 %v8523_v40  ;;  %v1496_v40 = vcombine.high %v1488_v36, %v1488_v36  ;;  %v1504_v41 = vrot.slane %v1488_v36, %v8978_v35  ;;  %v8563_v42 = vld [vmem:[#allocation2 + $0xbc0] sm:$0xff]   ;;  %v9067_v43 = vrot.slane %v1481_v38, %v8978_v35  ;;  %v8600_v36 = vld [vmem:[#allocation2 + $0xcc8] sm:$0xff]  }
 0x174   :  { %7785 = vmatprep.subr.bf16.mxu0 %v8525_v48  ;;  %7806 = vmatpush3.bf16.msra.mxu1 %v8524_v46  ;;  %v8564_v44 = vld [vmem:[#allocation2 + $0xb00] sm:$0xff]   ;;  %v8602_v38 = vld [vmem:[#allocation2 + $0xc88] sm:$0xff]  }
 0x175   :  { %7807 = vmatprep.subr.bf16.mxu1 %v8526_v50  ;;  %v1518_v45 = vrot.slane %v1496_v40, %v8978_v35  ;;  %v8565_v46 = vld [vmem:[#allocation2 + $0xb80] sm:$0xff]   ;;  %v1497_v47 = vcombine.high %v9067_v43, %v9067_v43  ;;  %v1526_v48 = vcombine.high %v1504_v41, %v1504_v41  ;;  %v8604_v40 = vld [vmem:[#allocation2 + $0xcd0] sm:$0xff]  }
 0x177   :  { %7786 = vmatpush3.bf16.msra.mxu0 %v8527_v51  ;;  %v1528_v50 = vcombine.high %v1518_v45, %v1518_v45  ;;  %v8567_v51 = vld [vmem:[#allocation2 + $0xbc8] sm:$0xff]  }
 0x178   :  { %7815 = vmatprep.subr.bf16.mxu0 %v8530_v54  ;;  %7808 = vmatpush3.bf16.msra.mxu1 %v8528_v52  ;;  %v1525_v52 = vrot.slane %v1497_v47, %v8978_v35  ;;  %v8569_v54 = vld [vmem:[#allocation2 + $0xb88] sm:$0xff]   ;;  %v8611_v47 = vld [vmem:[#allocation2 + $0xc60] sm:$0xff]  }
 0x179   :  { %7837 = vmatprep.subr.bf16.mxu1 %v8531_v55 }
 0x17a   :  { %5958 = vmatmul.mubr.bf16.vlgmr.msra.gmra.mrb[36].mxu0 %v1462_v53  ;;  %v8568_v53 = vld [vmem:[#allocation2 + $0xb08] sm:$0xff]   ;;  %v1529_v55 = vcombine.high %v1525_v52, %v1525_v52 }
 0x17b   :  { %7816 = vmatpush3.bf16.msra.mxu0 %v8532_v56  ;;  %5998 = vmatmul.mubr.bf16.vlgmr.msra.gmra.mrb[36].mxu1 %v1478_v58  ;;  %v8570_v56 = vld [vmem:[#allocation2 + $0xb50] sm:$0xff]  }
 0x17c   :  { %7817 = vmatprep.subr.bf16.mxu0 %v8534_v59  ;;  %7838 = vmatpush3.bf16.msra.mxu1 %v8533_v57  ;;  %v8571_v57 = vld [vmem:[#allocation2 + $0xbd0] sm:$0xff]  }
 0x17d   :  { %7839 = vmatprep.subr.bf16.mxu1 %v8535_v60  ;;  %6037 = vmatprep.mubr.bf16.mxu0 %v1518_v45  ;;  %v8572_v58 = vld [vmem:[#allocation2 + $0xb10] sm:$0xff]   ;;  %v8574_v60 = vld [vmem:[#allocation2 + $0xb58] sm:$0xff]  }
 0x17e   :  { %6077 = vmatprep.mubr.bf16.mxu1 %v1528_v50  ;;  %v8573_v59 = vld [vmem:[#allocation2 + $0xb90] sm:$0xff]   ;;  %v8609_v45 = vld [vmem:[#allocation2 + $0xc18] sm:$0xff]   ;;  %v8614_v50 = vld [vmem:[#allocation2 + $0xca0] sm:$0xff]  }
 0x17f   :  { %7818 = vmatpush3.bf16.msra.mxu0 %v8536_v61  ;;  %v8575_v61 = vld [vmem:[#allocation2 + $0xbd8] sm:$0xff]  }
 0x180   :  { %7819 = vmatprep.subr.bf16.mxu0 %v8538_v63  ;;  %7840 = vmatpush3.bf16.msra.mxu1 %v8537_v62  ;;  %v8576_v62 = vld [vmem:[#allocation2 + $0xb18] sm:$0xff]  }
 0x181   :  { %7841 = vmatprep.subr.bf16.mxu1 %v8539_v0  ;;  %v8577_v63 = vld [vmem:[#allocation2 + $0xb98] sm:$0xff]   ;;  %v8578_v0 = vld [vmem:[#allocation2 + $0xb60] sm:$0xff]  }
 0x183   :  { %7820 = vmatpush3.bf16.msra.mxu0 %v8540_v1  ;;  %v8579_v1 = vld [vmem:[#allocation2 + $0xbe0] sm:$0xff]  }
 0x184   :  { %7821 = vmatprep.subr.bf16.mxu0 %v8542_v3  ;;  %7842 = vmatpush3.bf16.msra.mxu1 %v8541_v2  ;;  %v8580_v2 = vld [vmem:[#allocation2 + $0xb20] sm:$0xff]  }
 0x185   :  { %7843 = vmatprep.subr.bf16.mxu1 %v8543_v4  ;;  %v8581_v3 = vld [vmem:[#allocation2 + $0xba0] sm:$0xff]   ;;  %v8582_v4 = vld [vmem:[#allocation2 + $0xb68] sm:$0xff]  }
 0x187   :  { %7822 = vmatpush3.bf16.msra.mxu0 %v8544_v5  ;;  %v8583_v5 = vld [vmem:[#allocation2 + $0xbe8] sm:$0xff]  }
 0x188   :  { %7823 = vmatprep.subr.bf16.mxu0 %v8546_v7  ;;  %7844 = vmatpush3.bf16.msra.mxu1 %v8545_v6  ;;  %v8584_v7 = vld [vmem:[#allocation2 + $0xb28] sm:$0xff]  }
 0x189   :  { %7845 = vmatprep.subr.bf16.mxu1 %v8547_v8 }
 0x18b   :  { %7824 = vmatpush3.bf16.msra.mxu0 %v8548_v9  ;;  %v8585_v9 = vld [vmem:[#allocation2 + $0xba8] sm:$0xff]  }
 0x18c   :  { %7825 = vmatprep.subr.bf16.mxu0 %v8550_v11  ;;  %7846 = vmatpush3.bf16.msra.mxu1 %v8549_v10 }
 0x18d   :  { %v7523_v14 = vpop.f32.mrb[12].mxu0  ;;  %7847 = vmatprep.subr.bf16.mxu1 %v8551_v12 }
 0x18e   :  { %v7524_v16 = vpop.f32.mrb[13].mxu0  ;;  %v7545_v18 = vpop.f32.mrb[12].mxu1 }
 0x18f   :  { %v7525_v19 = vadd.f32 %v7524_v16, %v7523_v14  ;;  %v7526_v20 = vpop.f32.mrb[14].mxu0  ;;  %v7546_v21 = vpop.f32.mrb[13].mxu1  ;;  %7826 = vmatpush3.bf16.msra.mxu0 %v8552_v13  ;;  %v8586_v13 = vld [vmem:[#allocation2 + $0xb70] sm:$0xff]  }
 0x190   :  { %v7527_v22 = vpop.f32.mrb[15].mxu0  ;;  %v7547_v26 = vadd.f32 %v7546_v21, %v7545_v18  ;;  %v7548_v27 = vpop.f32.mrb[14].mxu1  ;;  %7827 = vmatprep.subr.bf16.mxu0 %v8554_v17  ;;  %7848 = vmatpush3.bf16.msra.mxu1 %v8553_v15  ;;  %v8587_v14 = vld [vmem:[#allocation2 + $0xbf0] sm:$0xff]  }
 0x191   :  { %v5480_v25 = vadd.f32 %v7525_v19, %v9054_v49  ;;  %v7549_v29 = vpop.f32.mrb[15].mxu1  ;;  %7849 = vmatprep.subr.bf16.mxu1 %v8555_v23  ;;  %v8566_v49 = vld [vmem:[#allocation2 + $0xb48] sm:$0xff]   ;;  %v8588_v20 = vld [vmem:[#allocation2 + $0xb30] sm:$0xff]   ;;  %v8593_v27 = vld [vmem:[#allocation2 + $0xbb8] sm:$0xff]  }
 0x192   :  { %v8589_v22 = vld [vmem:[#allocation2 + $0xbb0] sm:$0xff]   ;;  %v8595_v29 = vld [vmem:[#allocation2 + $0xc40] sm:$0xff]  }
 0x193   :  { %v9059_v31 = vadd.f32 %v7547_v26, %v5480_v25  ;;  %7828 = vmatpush3.bf16.msra.mxu0 %v8556_v24  ;;  %v8590_v24 = vld [vmem:[#allocation2 + $0xb78] sm:$0xff]  }
 0x194   :  { %7829 = vmatprep.subr.bf16.mxu0 %v8558_v30  ;;  %7850 = vmatpush3.bf16.msra.mxu1 %v8557_v28  ;;  %v8591_v25 = vld [vmem:[#allocation2 + $0xbf8] sm:$0xff]   ;;  %v1511_v28 = vrot.slane %v9067_v43, %v8978_v35  ;;  %v8596_v30 = vld [vmem:[#allocation2 + $0xcc0] sm:$0xff]  }
 0x195   :  { %7851 = vmatprep.subr.bf16.mxu1 %v8559_v32  ;;  %v8592_v26 = vld [vmem:[#allocation2 + $0xb38] sm:$0xff]   ;;  %v8598_v32 = vld [vmem:[#allocation2 + $0xc80] sm:$0xff]  }
 0x196   :  { %v8607_v43 = vld [vmem:[#allocation2 + $0xc58] sm:$0xff]  }
 0x197   :  { %7830 = vmatpush3.bf16.msra.mxu0 %v8560_v33  ;;  %v1527_v33 = vcombine.high %v1511_v28, %v1511_v28 }
 0x198   :  { %7859 = vmatprep.subr.bf16.mxu0 %v8562_v37  ;;  %7852 = vmatpush3.bf16.msra.mxu1 %v8561_v39  ;;  %v8601_v37 = vld [vmem:[#allocation2 + $0xc08] sm:$0xff]   ;;  %v8603_v39 = vld [vmem:[#allocation2 + $0xc50] sm:$0xff]  }
 0x199   :  { %7881 = vmatprep.subr.bf16.mxu1 %v8563_v42  ;;  %v8606_v42 = vld [vmem:[#allocation2 + $0xc90] sm:$0xff]  }
 0x19a   :  { %6038 = vmatmul.mubr.bf16.vlgmr.msra.gmra.mrb[40].mxu0 %v1504_v41  ;;  %v8605_v41 = vld [vmem:[#allocation2 + $0xc10] sm:$0xff]  }
 0x19b   :  { %7860 = vmatpush3.bf16.msra.mxu0 %v8564_v44  ;;  %6078 = vmatmul.mubr.bf16.vlgmr.msra.gmra.mrb[40].mxu1 %v1526_v48  ;;  %v8608_v44 = vld [vmem:[#allocation2 + $0xcd8] sm:$0xff]   ;;  %v8612_v48 = vld [vmem:[#allocation2 + $0xce0] sm:$0xff]  }
 0x19c   :  { %7861 = vmatprep.subr.bf16.mxu0 %v8566_v49  ;;  %7882 = vmatpush3.bf16.msra.mxu1 %v8565_v46  ;;  %v8610_v46 = vld [vmem:[#allocation2 + $0xc98] sm:$0xff]   ;;  %v8613_v49 = vld [vmem:[#allocation2 + $0xc20] sm:$0xff]  }
 0x19d   :  { %6117 = vmatprep.mubr.bf16.mxu0 %v1525_v52  ;;  %7883 = vmatprep.subr.bf16.mxu1 %v8567_v51  ;;  %v8615_v51 = vld [vmem:[#allocation2 + $0xc68] sm:$0xff]  }
 0x19e   :  { %6157 = vmatprep.mubr.bf16.mxu1 %v1529_v55  ;;  %v8616_v52 = vld [vmem:[#allocation2 + $0xce8] sm:$0xff]  }
 0x19f   :  { %7862 = vmatpush3.bf16.msra.mxu0 %v8568_v53 }
 0x1a0   :  { %7863 = vmatprep.subr.bf16.mxu0 %v8570_v56  ;;  %7884 = vmatpush3.bf16.msra.mxu1 %v8569_v54  ;;  %v8617_v54 = vld [vmem:[#allocation2 + $0xc28] sm:$0xff]   ;;  %v8619_v56 = vld [vmem:[#allocation2 + $0xc70] sm:$0xff]  }
 0x1a1   :  { %7885 = vmatprep.subr.bf16.mxu1 %v8571_v57 }
 0x1a3   :  { %7864 = vmatpush3.bf16.msra.mxu0 %v8572_v58 }
 0x1a4   :  { %7865 = vmatprep.subr.bf16.mxu0 %v8574_v60  ;;  %7886 = vmatpush3.bf16.msra.mxu1 %v8573_v59 }
 0x1a5   :  { %7887 = vmatprep.subr.bf16.mxu1 %v8575_v61  ;;  %v8618_v61 = vld [vmem:[#allocation2 + $0xca8] sm:$0xff]  }
 0x1a7   :  { %7866 = vmatpush3.bf16.msra.mxu0 %v8576_v62 }
 0x1a8   :  { %7867 = vmatprep.subr.bf16.mxu0 %v8578_v0  ;;  %7888 = vmatpush3.bf16.msra.mxu1 %v8577_v63  ;;  %v8620_v63 = vld [vmem:[#allocation2 + $0xcf0] sm:$0xff]  }
 0x1a9   :  { %7889 = vmatprep.subr.bf16.mxu1 %v8579_v1 }
 0x1ab   :  { %7868 = vmatpush3.bf16.msra.mxu0 %v8580_v2 }
 0x1ac   :  { %7869 = vmatprep.subr.bf16.mxu0 %v8582_v4  ;;  %7890 = vmatpush3.bf16.msra.mxu1 %v8581_v3  ;;  %v8621_v3 = vld [vmem:[#allocation2 + $0xc30] sm:$0xff]  }
 0x1ad   :  { %v7567_v6 = vpop.f32.mrb[16].mxu0  ;;  %7891 = vmatprep.subr.bf16.mxu1 %v8583_v5  ;;  %v8623_v5 = vld [vmem:[#allocation2 + $0xc78] sm:$0xff]  }
 0x1ae   :  { %v7568_v8 = vpop.f32.mrb[17].mxu0  ;;  %v7589_v10 = vpop.f32.mrb[16].mxu1 }
 0x1af   :  { %v7569_v11 = vadd.f32 %v7568_v8, %v7567_v6  ;;  %v7570_v12 = vpop.f32.mrb[18].mxu0  ;;  %v7590_v15 = vpop.f32.mrb[17].mxu1  ;;  %7870 = vmatpush3.bf16.msra.mxu0 %v8584_v7  ;;  %v8622_v7 = vld [vmem:[#allocation2 + $0xcb0] sm:$0xff]   ;;  %v8624_v8 = vld [vmem:[#allocation2 + $0xcf8] sm:$0xff]  }
 0x1b0   :  { %v7571_v16 = vpop.f32.mrb[19].mxu0  ;;  %v7591_v18 = vadd.f32 %v7590_v15, %v7589_v10  ;;  %v7592_v19 = vpop.f32.mrb[18].mxu1  ;;  %7871 = vmatprep.subr.bf16.mxu0 %v8586_v13  ;;  %7892 = vmatpush3.bf16.msra.mxu1 %v8585_v9  ;;  %v8625_v9 = vld [vmem:[#allocation2 + $0xc38] sm:$0xff]   ;;  %v65_v10 = vld [vmem:[%s9175_s0 + $0x30] sm:$0xff]  ;;  %v8627_v12 = vld [vmem:[#allocation2 + $0xd40] sm:$0xff]  }
 0x1b1   :  { %v5560_v17 = vadd.f32 %v7569_v11, %v9059_v31  ;;  %v7593_v21 = vpop.f32.mrb[19].mxu1  ;;  %7893 = vmatprep.subr.bf16.mxu1 %v8587_v14  ;;  %v8597_v31 = vld [vmem:[#allocation2 + $0xc00] sm:$0xff]   ;;  %v1537_v11 = vrot.slane %v65_v10, %v8978_v35  ;;  %v1530_v13 = vcombine.high %v65_v10, %v65_v10  ;;  %v8626_v14 = vld [vmem:[#allocation2 + $0xcb8] sm:$0xff]   ;;  %v8664_v10 = vld [vmem:[#allocation2 + $0xe48] sm:$0xff]  }
 0x1b2   :  { %v8629_v19 = vld [vmem:[#allocation2 + $0xd00] sm:$0xff]  }
 0x1b3   :  { %v9074_v23 = vadd.f32 %v7591_v18, %v5560_v17  ;;  %7872 = vmatpush3.bf16.msra.mxu0 %v8588_v20  ;;  %v1545_v15 = vcombine.high %v1537_v11, %v1537_v11  ;;  %v1553_v16 = vrot.slane %v1537_v11, %v8978_v35  ;;  %v8628_v17 = vld [vmem:[#allocation2 + $0xdc0] sm:$0xff]   ;;  %v9087_v18 = vrot.slane %v1530_v13, %v8978_v35  ;;  %v8665_v11 = vld [vmem:[#allocation2 + $0xec8] sm:$0xff]  }
 0x1b4   :  { %7873 = vmatprep.subr.bf16.mxu0 %v8590_v24  ;;  %7894 = vmatpush3.bf16.msra.mxu1 %v8589_v22  ;;  %v8630_v21 = vld [vmem:[#allocation2 + $0xd80] sm:$0xff]   ;;  %v8631_v24 = vld [vmem:[#allocation2 + $0xd48] sm:$0xff]  }
 0x1b5   :  { %7895 = vmatprep.subr.bf16.mxu1 %v8591_v25  ;;  %v1567_v20 = vrot.slane %v1545_v15, %v8978_v35  ;;  %v1546_v22 = vcombine.high %v9087_v18, %v9087_v18  ;;  %v8667_v13 = vld [vmem:[#allocation2 + $0xe88] sm:$0xff]   ;;  %v8669_v15 = vld [vmem:[#allocation2 + $0xed0] sm:$0xff]  }
 0x1b7   :  { %7874 = vmatpush3.bf16.msra.mxu0 %v8592_v26  ;;  %v1577_v25 = vcombine.high %v1567_v20, %v1567_v20  ;;  %v8632_v26 = vld [vmem:[#allocation2 + $0xdc8] sm:$0xff]  }
 0x1b8   :  { %7903 = vmatprep.subr.bf16.mxu0 %v8595_v29  ;;  %7896 = vmatpush3.bf16.msra.mxu1 %v8593_v27  ;;  %v1574_v27 = vrot.slane %v1546_v22, %v8978_v35  ;;  %v8634_v29 = vld [vmem:[#allocation2 + $0xd88] sm:$0xff]   ;;  %v8676_v22 = vld [vmem:[#allocation2 + $0xe60] sm:$0xff]  }
 0x1b9   :  { %7925 = vmatprep.subr.bf16.mxu1 %v8596_v30 }
 0x1ba   :  { %6118 = vmatmul.mubr.bf16.vlgmr.msra.gmra.mrb[44].mxu0 %v1511_v28  ;;  %v8633_v28 = vld [vmem:[#allocation2 + $0xd08] sm:$0xff]   ;;  %v1578_v30 = vcombine.high %v1574_v27, %v1574_v27 }
 0x1bb   :  { %7904 = vmatpush3.bf16.msra.mxu0 %v8597_v31  ;;  %6158 = vmatmul.mubr.bf16.vlgmr.msra.gmra.mrb[44].mxu1 %v1527_v33  ;;  %v8635_v31 = vld [vmem:[#allocation2 + $0xd50] sm:$0xff]  }
 0x1bc   :  { %7905 = vmatprep.subr.bf16.mxu0 %v8599_v34  ;;  %7926 = vmatpush3.bf16.msra.mxu1 %v8598_v32  ;;  %v8636_v32 = vld [vmem:[#allocation2 + $0xdd0] sm:$0xff]  }
 0x1bd   :  { %7927 = vmatprep.subr.bf16.mxu1 %v8600_v36  ;;  %6197 = vmatprep.mubr.bf16.mxu0 %v1567_v20  ;;  %v8637_v33 = vld [vmem:[#allocation2 + $0xd10] sm:$0xff]   ;;  %v8639_v36 = vld [vmem:[#allocation2 + $0xd58] sm:$0xff]  }
 0x1be   :  { %6237 = vmatprep.mubr.bf16.mxu1 %v1577_v25  ;;  %v8638_v34 = vld [vmem:[#allocation2 + $0xd90] sm:$0xff]   ;;  %v8674_v20 = vld [vmem:[#allocation2 + $0xe18] sm:$0xff]   ;;  %v8679_v25 = vld [vmem:[#allocation2 + $0xea0] sm:$0xff]  }
 0x1bf   :  { %7906 = vmatpush3.bf16.msra.mxu0 %v8601_v37  ;;  %v8640_v37 = vld [vmem:[#allocation2 + $0xdd8] sm:$0xff]  }
 0x1c0   :  { %7907 = vmatprep.subr.bf16.mxu0 %v8603_v39  ;;  %7928 = vmatpush3.bf16.msra.mxu1 %v8602_v38  ;;  %v8641_v38 = vld [vmem:[#allocation2 + $0xd18] sm:$0xff]  }
 0x1c1   :  { %7929 = vmatprep.subr.bf16.mxu1 %v8604_v40  ;;  %v8642_v39 = vld [vmem:[#allocation2 + $0xd98] sm:$0xff]   ;;  %v8643_v40 = vld [vmem:[#allocation2 + $0xd60] sm:$0xff]  }
 0x1c3   :  { %7908 = vmatpush3.bf16.msra.mxu0 %v8605_v41  ;;  %v8644_v41 = vld [vmem:[#allocation2 + $0xde0] sm:$0xff]  }
 0x1c4   :  { %7909 = vmatprep.subr.bf16.mxu0 %v8607_v43  ;;  %7930 = vmatpush3.bf16.msra.mxu1 %v8606_v42  ;;  %v8645_v42 = vld [vmem:[#allocation2 + $0xd20] sm:$0xff]  }
 0x1c5   :  { %7931 = vmatprep.subr.bf16.mxu1 %v8608_v44  ;;  %v8646_v43 = vld [vmem:[#allocation2 + $0xda0] sm:$0xff]   ;;  %v8647_v44 = vld [vmem:[#allocation2 + $0xd68] sm:$0xff]  }
 0x1c7   :  { %7910 = vmatpush3.bf16.msra.mxu0 %v8609_v45  ;;  %v8648_v45 = vld [vmem:[#allocation2 + $0xde8] sm:$0xff]  }
 0x1c8   :  { %7911 = vmatprep.subr.bf16.mxu0 %v8611_v47  ;;  %7932 = vmatpush3.bf16.msra.mxu1 %v8610_v46  ;;  %v8649_v47 = vld [vmem:[#allocation2 + $0xd28] sm:$0xff]  }
 0x1c9   :  { %7933 = vmatprep.subr.bf16.mxu1 %v8612_v48 }
 0x1cb   :  { %7912 = vmatpush3.bf16.msra.mxu0 %v8613_v49  ;;  %v8650_v49 = vld [vmem:[#allocation2 + $0xda8] sm:$0xff]  }
 0x1cc   :  { %7913 = vmatprep.subr.bf16.mxu0 %v8615_v51  ;;  %7934 = vmatpush3.bf16.msra.mxu1 %v8614_v50 }
 0x1cd   :  { %v7611_v53 = vpop.f32.mrb[20].mxu0  ;;  %7935 = vmatprep.subr.bf16.mxu1 %v8616_v52 }
 0x1ce   :  { %v7612_v55 = vpop.f32.mrb[21].mxu0  ;;  %v7633_v57 = vpop.f32.mrb[20].mxu1 }
 0x1cf   :  { %v7613_v58 = vadd.f32 %v7612_v55, %v7611_v53  ;;  %v7614_v59 = vpop.f32.mrb[22].mxu0  ;;  %v7634_v60 = vpop.f32.mrb[21].mxu1  ;;  %7914 = vmatpush3.bf16.msra.mxu0 %v8617_v54  ;;  %v8651_v53 = vld [vmem:[#allocation2 + $0xd70] sm:$0xff]  }
 0x1d0   :  { %v7615_v62 = vpop.f32.mrb[23].mxu0  ;;  %v7635_v1 = vadd.f32 %v7634_v60, %v7633_v57  ;;  %v7636_v2 = vpop.f32.mrb[22].mxu1  ;;  %7915 = vmatprep.subr.bf16.mxu0 %v8619_v56  ;;  %7936 = vmatpush3.bf16.msra.mxu1 %v8618_v61  ;;  %v8652_v54 = vld [vmem:[#allocation2 + $0xdf0] sm:$0xff]  }
 0x1d1   :  { %v5640_v0 = vadd.f32 %v7613_v58, %v9074_v23  ;;  %v7637_v4 = vpop.f32.mrb[23].mxu1  ;;  %7937 = vmatprep.subr.bf16.mxu1 %v8620_v63  ;;  %v1575_v23 = vcombine.high %v1553_v16, %v1553_v16  ;;  %v8653_v60 = vld [vmem:[#allocation2 + $0xd30] sm:$0xff]   ;;  %v8657_v2 = vld [vmem:[#allocation2 + $0xd38] sm:$0xff]  }
 0x1d2   :  { %v8654_v62 = vld [vmem:[#allocation2 + $0xdb0] sm:$0xff]   ;;  %v1560_v4 = vrot.slane %v9087_v18, %v8978_v35  ;;  %v8672_v18 = vld [vmem:[#allocation2 + $0xe58] sm:$0xff]  }
 0x1d3   :  { %v9079_v6 = vadd.f32 %v7635_v1, %v5640_v0  ;;  %7916 = vmatpush3.bf16.msra.mxu0 %v8621_v3  ;;  %v8655_v0 = vld [vmem:[#allocation2 + $0xd78] sm:$0xff]  }
 0x1d4   :  { %7917 = vmatprep.subr.bf16.mxu0 %v8623_v5  ;;  %7938 = vmatpush3.bf16.msra.mxu1 %v8622_v7  ;;  %v8656_v1 = vld [vmem:[#allocation2 + $0xdf8] sm:$0xff]   ;;  %v8660_v5 = vld [vmem:[#allocation2 + $0xe40] sm:$0xff]  }
 0x1d5   :  { %7939 = vmatprep.subr.bf16.mxu1 %v8624_v8  ;;  %v8658_v3 = vld [vmem:[#allocation2 + $0xdb8] sm:$0xff]   ;;  %v8662_v7 = vld [vmem:[#allocation2 + $0xe00] sm:$0xff]  }
 0x1d6   :  { %v8663_v8 = vld [vmem:[#allocation2 + $0xe80] sm:$0xff]  }
 0x1d7   :  { %7918 = vmatpush3.bf16.msra.mxu0 %v8625_v9  ;;  %v1576_v9 = vcombine.high %v1560_v4, %v1560_v4 }
 0x1d8   :  { %7947 = vmatprep.subr.bf16.mxu0 %v8627_v12  ;;  %7940 = vmatpush3.bf16.msra.mxu1 %v8626_v14  ;;  %v8666_v12 = vld [vmem:[#allocation2 + $0xe08] sm:$0xff]   ;;  %v8668_v14 = vld [vmem:[#allocation2 + $0xe50] sm:$0xff]  }
 0x1d9   :  { %7969 = vmatprep.subr.bf16.mxu1 %v8628_v17  ;;  %v8671_v17 = vld [vmem:[#allocation2 + $0xe90] sm:$0xff]  }
 0x1da   :  { %6198 = vmatmul.mubr.bf16.vlgmr.msra.gmra.mrb[48].mxu0 %v1553_v16  ;;  %v8670_v16 = vld [vmem:[#allocation2 + $0xe10] sm:$0xff]  }
 0x1db   :  { %7948 = vmatpush3.bf16.msra.mxu0 %v8629_v19  ;;  %6238 = vmatmul.mubr.bf16.vlgmr.msra.gmra.mrb[48].mxu1 %v1575_v23  ;;  %v8673_v19 = vld [vmem:[#allocation2 + $0xed8] sm:$0xff]   ;;  %v8677_v23 = vld [vmem:[#allocation2 + $0xee0] sm:$0xff]  }
 0x1dc   :  { %7949 = vmatprep.subr.bf16.mxu0 %v8631_v24  ;;  %7970 = vmatpush3.bf16.msra.mxu1 %v8630_v21  ;;  %v8675_v21 = vld [vmem:[#allocation2 + $0xe98] sm:$0xff]   ;;  %v8678_v24 = vld [vmem:[#allocation2 + $0xe20] sm:$0xff]  }
 0x1dd   :  { %6277 = vmatprep.mubr.bf16.mxu0 %v1574_v27  ;;  %7971 = vmatprep.subr.bf16.mxu1 %v8632_v26  ;;  %v8680_v26 = vld [vmem:[#allocation2 + $0xe68] sm:$0xff]  }
 0x1de   :  { %6317 = vmatprep.mubr.bf16.mxu1 %v1578_v30  ;;  %v8681_v27 = vld [vmem:[#allocation2 + $0xee8] sm:$0xff]  }
 0x1df   :  { %7950 = vmatpush3.bf16.msra.mxu0 %v8633_v28 }
 0x1e0   :  { %7951 = vmatprep.subr.bf16.mxu0 %v8635_v31  ;;  %7972 = vmatpush3.bf16.msra.mxu1 %v8634_v29  ;;  %v8682_v29 = vld [vmem:[#allocation2 + $0xe28] sm:$0xff]   ;;  %v8684_v31 = vld [vmem:[#allocation2 + $0xe70] sm:$0xff]  }
 0x1e1   :  { %7973 = vmatprep.subr.bf16.mxu1 %v8636_v32 }
 0x1e3   :  { %7952 = vmatpush3.bf16.msra.mxu0 %v8637_v33 }
 0x1e4   :  { %7953 = vmatprep.subr.bf16.mxu0 %v8639_v36  ;;  %7974 = vmatpush3.bf16.msra.mxu1 %v8638_v34 }
 0x1e5   :  { %7975 = vmatprep.subr.bf16.mxu1 %v8640_v37  ;;  %v8683_v37 = vld [vmem:[#allocation2 + $0xea8] sm:$0xff]  }
 0x1e7   :  { %7954 = vmatpush3.bf16.msra.mxu0 %v8641_v38 }
 0x1e8   :  { %7955 = vmatprep.subr.bf16.mxu0 %v8643_v40  ;;  %7976 = vmatpush3.bf16.msra.mxu1 %v8642_v39  ;;  %v8685_v39 = vld [vmem:[#allocation2 + $0xef0] sm:$0xff]  }
 0x1e9   :  { %7977 = vmatprep.subr.bf16.mxu1 %v8644_v41 }
 0x1eb   :  { %7956 = vmatpush3.bf16.msra.mxu0 %v8645_v42 }
 0x1ec   :  { %7957 = vmatprep.subr.bf16.mxu0 %v8647_v44  ;;  %7978 = vmatpush3.bf16.msra.mxu1 %v8646_v43  ;;  %v8686_v43 = vld [vmem:[#allocation2 + $0xe30] sm:$0xff]  }
 0x1ed   :  { %v7655_v46 = vpop.f32.mrb[24].mxu0  ;;  %7979 = vmatprep.subr.bf16.mxu1 %v8648_v45  ;;  %v8688_v45 = vld [vmem:[#allocation2 + $0xe78] sm:$0xff]  }
 0x1ee   :  { %v7656_v48 = vpop.f32.mrb[25].mxu0  ;;  %v7677_v50 = vpop.f32.mrb[24].mxu1 }
 0x1ef   :  { %v7657_v51 = vadd.f32 %v7656_v48, %v7655_v46  ;;  %v7658_v52 = vpop.f32.mrb[26].mxu0  ;;  %v7678_v55 = vpop.f32.mrb[25].mxu1  ;;  %7958 = vmatpush3.bf16.msra.mxu0 %v8649_v47  ;;  %v8687_v47 = vld [vmem:[#allocation2 + $0xeb0] sm:$0xff]   ;;  %v8689_v48 = vld [vmem:[#allocation2 + $0xef8] sm:$0xff]  }
 0x1f0   :  { %v7659_v56 = vpop.f32.mrb[27].mxu0  ;;  %v7679_v58 = vadd.f32 %v7678_v55, %v7677_v50  ;;  %v7680_v59 = vpop.f32.mrb[26].mxu1  ;;  %7959 = vmatprep.subr.bf16.mxu0 %v8651_v53  ;;  %7980 = vmatpush3.bf16.msra.mxu1 %v8650_v49  ;;  %v8690_v49 = vld [vmem:[#allocation2 + $0xe38] sm:$0xff]   ;;  %v8692_v52 = vld [vmem:[#allocation2 + $0xf40] sm:$0xff]  }
 0x1f1   :  { %v5720_v57 = vadd.f32 %v7657_v51, %v9079_v6  ;;  %v7681_v61 = vpop.f32.mrb[27].mxu1  ;;  %7981 = vmatprep.subr.bf16.mxu1 %v8652_v54  ;;  %v8661_v6 = vld [vmem:[#allocation2 + $0xec0] sm:$0xff]   ;;  %v66_v50 = vld [vmem:[%s9175_s0 + $0x38] sm:$0xff] }
 0x1f2   :  { %v1586_v51 = vrot.slane %v66_v50, %v8978_v35  ;;  %v1579_v53 = vcombine.high %v66_v50, %v66_v50  ;;  %v8691_v54 = vld [vmem:[#allocation2 + $0xeb8] sm:$0xff]   ;;  %v8694_v59 = vld [vmem:[#allocation2 + $0xf00] sm:$0xff]   ;;  %v8729_v50 = vld [vmem:[#allocation2 + $0x1048] sm:$0xff]  }
 0x1f3   :  { %v9094_v63 = vadd.f32 %v7679_v58, %v5720_v57  ;;  %7960 = vmatpush3.bf16.msra.mxu0 %v8653_v60  ;;  %v8693_v57 = vld [vmem:[#allocation2 + $0xfc0] sm:$0xff]  }
 0x1f4   :  { %7961 = vmatprep.subr.bf16.mxu0 %v8655_v0  ;;  %7982 = vmatpush3.bf16.msra.mxu1 %v8654_v62  ;;  %v1594_v55 = vcombine.high %v1586_v51, %v1586_v51  ;;  %v1602_v56 = vrot.slane %v1586_v51, %v8978_v35  ;;  %v9107_v58 = vrot.slane %v1579_v53, %v8978_v35  ;;  %v8695_v61 = vld [vmem:[#allocation2 + $0xf80] sm:$0xff]   ;;  %v8696_v0 = vld [vmem:[#allocation2 + $0xf48] sm:$0xff]  }
 0x1f5   :  { %7983 = vmatprep.subr.bf16.mxu1 %v8656_v1  ;;  %v8730_v51 = vld [vmem:[#allocation2 + $0x10c8] sm:$0xff]  }
 0x1f6   :  { %v1616_v60 = vrot.slane %v1594_v55, %v8978_v35  ;;  %v1595_v62 = vcombine.high %v9107_v58, %v9107_v58  ;;  %v8732_v53 = vld [vmem:[#allocation2 + $0x1088] sm:$0xff]   ;;  %v8734_v55 = vld [vmem:[#allocation2 + $0x10d0] sm:$0xff]  }
 0x1f7   :  { %7962 = vmatpush3.bf16.msra.mxu0 %v8657_v2  ;;  %v8697_v2 = vld [vmem:[#allocation2 + $0xfc8] sm:$0xff]  }
 0x1f8   :  { %7991 = vmatprep.subr.bf16.mxu0 %v8660_v5  ;;  %7984 = vmatpush3.bf16.msra.mxu1 %v8658_v3  ;;  %v1626_v1 = vcombine.high %v1616_v60, %v1616_v60  ;;  %v1623_v3 = vrot.slane %v1595_v62, %v8978_v35  ;;  %v8699_v5 = vld [vmem:[#allocation2 + $0xf88] sm:$0xff]   ;;  %v8741_v62 = vld [vmem:[#allocation2 + $0x1060] sm:$0xff]  }
 0x1f9   :  { %8013 = vmatprep.subr.bf16.mxu1 %v8661_v6 }
 0x1fa   :  { %6278 = vmatmul.mubr.bf16.vlgmr.msra.gmra.mrb[52].mxu0 %v1560_v4  ;;  %v8698_v4 = vld [vmem:[#allocation2 + $0xf08] sm:$0xff]   ;;  %v1627_v6 = vcombine.high %v1623_v3, %v1623_v3 }
 0x1fb   :  { %7992 = vmatpush3.bf16.msra.mxu0 %v8662_v7  ;;  %6318 = vmatmul.mubr.bf16.vlgmr.msra.gmra.mrb[52].mxu1 %v1576_v9  ;;  %v8700_v7 = vld [vmem:[#allocation2 + $0xf50] sm:$0xff]  }
 0x1fc   :  { %7993 = vmatprep.subr.bf16.mxu0 %v8664_v10  ;;  %8014 = vmatpush3.bf16.msra.mxu1 %v8663_v8  ;;  %v8701_v8 = vld [vmem:[#allocation2 + $0xfd0] sm:$0xff]  }
 0x1fd   :  { %8015 = vmatprep.subr.bf16.mxu1 %v8665_v11  ;;  %6357 = vmatprep.mubr.bf16.mxu0 %v1616_v60  ;;  %v8702_v9 = vld [vmem:[#allocation2 + $0xf10] sm:$0xff]   ;;  %v8704_v11 = vld [vmem:[#allocation2 + $0xf58] sm:$0xff]  }
 0x1fe   :  { %6397 = vmatprep.mubr.bf16.mxu1 %v1626_v1  ;;  %v8703_v10 = vld [vmem:[#allocation2 + $0xf90] sm:$0xff]   ;;  %v8739_v60 = vld [vmem:[#allocation2 + $0x1018] sm:$0xff]   ;;  %v8744_v1 = vld [vmem:[#allocation2 + $0x10a0] sm:$0xff]  }
 0x1ff   :  { %7994 = vmatpush3.bf16.msra.mxu0 %v8666_v12  ;;  %v8705_v12 = vld [vmem:[#allocation2 + $0xfd8] sm:$0xff]  }
 0x200   :  { %7995 = vmatprep.subr.bf16.mxu0 %v8668_v14  ;;  %8016 = vmatpush3.bf16.msra.mxu1 %v8667_v13  ;;  %v8706_v13 = vld [vmem:[#allocation2 + $0xf18] sm:$0xff]  }
 0x201   :  { %8017 = vmatprep.subr.bf16.mxu1 %v8669_v15  ;;  %v8707_v14 = vld [vmem:[#allocation2 + $0xf98] sm:$0xff]   ;;  %v8708_v15 = vld [vmem:[#allocation2 + $0xf60] sm:$0xff]  }
 0x203   :  { %7996 = vmatpush3.bf16.msra.mxu0 %v8670_v16  ;;  %v8709_v16 = vld [vmem:[#allocation2 + $0xfe0] sm:$0xff]  }
 0x204   :  { %7997 = vmatprep.subr.bf16.mxu0 %v8672_v18  ;;  %8018 = vmatpush3.bf16.msra.mxu1 %v8671_v17  ;;  %v8710_v17 = vld [vmem:[#allocation2 + $0xf20] sm:$0xff]  }
 0x205   :  { %8019 = vmatprep.subr.bf16.mxu1 %v8673_v19  ;;  %v8711_v18 = vld [vmem:[#allocation2 + $0xfa0] sm:$0xff]   ;;  %v8712_v19 = vld [vmem:[#allocation2 + $0xf68] sm:$0xff]  }
 0x207   :  { %7998 = vmatpush3.bf16.msra.mxu0 %v8674_v20  ;;  %v8713_v20 = vld [vmem:[#allocation2 + $0xfe8] sm:$0xff]  }
 0x208   :  { %7999 = vmatprep.subr.bf16.mxu0 %v8676_v22  ;;  %8020 = vmatpush3.bf16.msra.mxu1 %v8675_v21  ;;  %v8714_v22 = vld [vmem:[#allocation2 + $0xf28] sm:$0xff]  }
 0x209   :  { %8021 = vmatprep.subr.bf16.mxu1 %v8677_v23 }
 0x20b   :  { %8000 = vmatpush3.bf16.msra.mxu0 %v8678_v24  ;;  %v8715_v24 = vld [vmem:[#allocation2 + $0xfa8] sm:$0xff]  }
 0x20c   :  { %8001 = vmatprep.subr.bf16.mxu0 %v8680_v26  ;;  %8022 = vmatpush3.bf16.msra.mxu1 %v8679_v25 }
 0x20d   :  { %v7699_v28 = vpop.f32.mrb[28].mxu0  ;;  %8023 = vmatprep.subr.bf16.mxu1 %v8681_v27 }
 0x20e   :  { %v7700_v30 = vpop.f32.mrb[29].mxu0  ;;  %v7721_v32 = vpop.f32.mrb[28].mxu1 }
 0x20f   :  { %v7701_v33 = vadd.f32 %v7700_v30, %v7699_v28  ;;  %v7702_v34 = vpop.f32.mrb[30].mxu0  ;;  %v7722_v36 = vpop.f32.mrb[29].mxu1  ;;  %8002 = vmatpush3.bf16.msra.mxu0 %v8682_v29  ;;  %v8716_v28 = vld [vmem:[#allocation2 + $0xf70] sm:$0xff]  }
 0x210   :  { %v7703_v38 = vpop.f32.mrb[31].mxu0  ;;  %v7723_v41 = vadd.f32 %v7722_v36, %v7721_v32  ;;  %v7724_v42 = vpop.f32.mrb[30].mxu1  ;;  %8003 = vmatprep.subr.bf16.mxu0 %v8684_v31  ;;  %8024 = vmatpush3.bf16.msra.mxu1 %v8683_v37  ;;  %v8717_v29 = vld [vmem:[#allocation2 + $0xff0] sm:$0xff]  }
 0x211   :  { %v5800_v40 = vadd.f32 %v7701_v33, %v9094_v63  ;;  %v7725_v44 = vpop.f32.mrb[31].mxu1  ;;  %8025 = vmatprep.subr.bf16.mxu1 %v8685_v39  ;;  %v1624_v63 = vcombine.high %v1602_v56, %v1602_v56  ;;  %v8718_v36 = vld [vmem:[#allocation2 + $0xf30] sm:$0xff]   ;;  %v8722_v42 = vld [vmem:[#allocation2 + $0xf38] sm:$0xff]  }
 0x212   :  { %v8719_v38 = vld [vmem:[#allocation2 + $0xfb0] sm:$0xff]   ;;  %v1609_v44 = vrot.slane %v9107_v58, %v8978_v35  ;;  %v8737_v58 = vld [vmem:[#allocation2 + $0x1058] sm:$0xff]  }
 0x213   :  { %v9099_v46 = vadd.f32 %v7723_v41, %v5800_v40  ;;  %8004 = vmatpush3.bf16.msra.mxu0 %v8686_v43  ;;  %v8720_v40 = vld [vmem:[#allocation2 + $0xf78] sm:$0xff]  }
 0x214   :  { %8005 = vmatprep.subr.bf16.mxu0 %v8688_v45  ;;  %8026 = vmatpush3.bf16.msra.mxu1 %v8687_v47  ;;  %v8721_v41 = vld [vmem:[#allocation2 + $0xff8] sm:$0xff]   ;;  %v8725_v45 = vld [vmem:[#allocation2 + $0x1040] sm:$0xff]  }
 0x215   :  { %8027 = vmatprep.subr.bf16.mxu1 %v8689_v48  ;;  %v8723_v43 = vld [vmem:[#allocation2 + $0xfb8] sm:$0xff]   ;;  %v8727_v47 = vld [vmem:[#allocation2 + $0x1000] sm:$0xff]  }
 0x216   :  { %v8728_v48 = vld [vmem:[#allocation2 + $0x1080] sm:$0xff]  }
 0x217   :  { %8006 = vmatpush3.bf16.msra.mxu0 %v8690_v49  ;;  %v1625_v49 = vcombine.high %v1609_v44, %v1609_v44 }
 0x218   :  { %8035 = vmatprep.subr.bf16.mxu0 %v8692_v52  ;;  %8028 = vmatpush3.bf16.msra.mxu1 %v8691_v54  ;;  %v8731_v52 = vld [vmem:[#allocation2 + $0x1008] sm:$0xff]   ;;  %v8733_v54 = vld [vmem:[#allocation2 + $0x1050] sm:$0xff]  }
 0x219   :  { %8057 = vmatprep.subr.bf16.mxu1 %v8693_v57  ;;  %v8736_v57 = vld [vmem:[#allocation2 + $0x1090] sm:$0xff]  }
 0x21a   :  { %6358 = vmatmul.mubr.bf16.vlgmr.msra.gmra.mrb[56].mxu0 %v1602_v56  ;;  %v8735_v56 = vld [vmem:[#allocation2 + $0x1010] sm:$0xff]  }
 0x21b   :  { %8036 = vmatpush3.bf16.msra.mxu0 %v8694_v59  ;;  %6398 = vmatmul.mubr.bf16.vlgmr.msra.gmra.mrb[56].mxu1 %v1624_v63  ;;  %v8738_v59 = vld [vmem:[#allocation2 + $0x10d8] sm:$0xff]   ;;  %v8742_v63 = vld [vmem:[#allocation2 + $0x10e0] sm:$0xff]  }
 0x21c   :  { %8037 = vmatprep.subr.bf16.mxu0 %v8696_v0  ;;  %8058 = vmatpush3.bf16.msra.mxu1 %v8695_v61  ;;  %v8740_v61 = vld [vmem:[#allocation2 + $0x1098] sm:$0xff]   ;;  %v8743_v0 = vld [vmem:[#allocation2 + $0x1020] sm:$0xff]  }
 0x21d   :  { %6437 = vmatprep.mubr.bf16.mxu0 %v1623_v3  ;;  %8059 = vmatprep.subr.bf16.mxu1 %v8697_v2  ;;  %v8745_v2 = vld [vmem:[#allocation2 + $0x1068] sm:$0xff]  }
 0x21e   :  { %6477 = vmatprep.mubr.bf16.mxu1 %v1627_v6  ;;  %v8746_v3 = vld [vmem:[#allocation2 + $0x10e8] sm:$0xff]  }
 0x21f   :  { %8038 = vmatpush3.bf16.msra.mxu0 %v8698_v4 }
 0x220   :  { %8039 = vmatprep.subr.bf16.mxu0 %v8700_v7  ;;  %8060 = vmatpush3.bf16.msra.mxu1 %v8699_v5  ;;  %v8747_v5 = vld [vmem:[#allocation2 + $0x1028] sm:$0xff]   ;;  %v8749_v7 = vld [vmem:[#allocation2 + $0x1070] sm:$0xff]  }
 0x221   :  { %8061 = vmatprep.subr.bf16.mxu1 %v8701_v8 }
 0x223   :  { %8040 = vmatpush3.bf16.msra.mxu0 %v8702_v9 }
 0x224   :  { %8041 = vmatprep.subr.bf16.mxu0 %v8704_v11  ;;  %8062 = vmatpush3.bf16.msra.mxu1 %v8703_v10 }
 0x225   :  { %8063 = vmatprep.subr.bf16.mxu1 %v8705_v12  ;;  %v8748_v12 = vld [vmem:[#allocation2 + $0x10a8] sm:$0xff]  }
 0x227   :  { %8042 = vmatpush3.bf16.msra.mxu0 %v8706_v13 }
 0x228   :  { %8043 = vmatprep.subr.bf16.mxu0 %v8708_v15  ;;  %8064 = vmatpush3.bf16.msra.mxu1 %v8707_v14  ;;  %v8750_v14 = vld [vmem:[#allocation2 + $0x10f0] sm:$0xff]  }
 0x229   :  { %8065 = vmatprep.subr.bf16.mxu1 %v8709_v16 }
 0x22b   :  { %8044 = vmatpush3.bf16.msra.mxu0 %v8710_v17 }
 0x22c   :  { %8045 = vmatprep.subr.bf16.mxu0 %v8712_v19  ;;  %8066 = vmatpush3.bf16.msra.mxu1 %v8711_v18  ;;  %v8751_v18 = vld [vmem:[#allocation2 + $0x1030] sm:$0xff]  }
 0x22d   :  { %v7743_v21 = vpop.f32.mrb[32].mxu0  ;;  %8067 = vmatprep.subr.bf16.mxu1 %v8713_v20  ;;  %v8753_v20 = vld [vmem:[#allocation2 + $0x1078] sm:$0xff]  }
 0x22e   :  { %v7744_v23 = vpop.f32.mrb[33].mxu0  ;;  %v7765_v25 = vpop.f32.mrb[32].mxu1 }
 0x22f   :  { %v7745_v26 = vadd.f32 %v7744_v23, %v7743_v21  ;;  %v7746_v27 = vpop.f32.mrb[34].mxu0  ;;  %v7766_v30 = vpop.f32.mrb[33].mxu1  ;;  %8046 = vmatpush3.bf16.msra.mxu0 %v8714_v22  ;;  %v8752_v22 = vld [vmem:[#allocation2 + $0x10b0] sm:$0xff]   ;;  %v8754_v23 = vld [vmem:[#allocation2 + $0x10f8] sm:$0xff]  }
 0x230   :  { %v7747_v31 = vpop.f32.mrb[35].mxu0  ;;  %v7767_v33 = vadd.f32 %v7766_v30, %v7765_v25  ;;  %v7768_v34 = vpop.f32.mrb[34].mxu1  ;;  %8047 = vmatprep.subr.bf16.mxu0 %v8716_v28  ;;  %8068 = vmatpush3.bf16.msra.mxu1 %v8715_v24  ;;  %v8755_v24 = vld [vmem:[#allocation2 + $0x1038] sm:$0xff]   ;;  %v67_v25 = vld [vmem:[%s9175_s0 + $0x40] sm:$0xff] }
 0x231   :  { %v5880_v32 = vadd.f32 %v7745_v26, %v9099_v46  ;;  %v7769_v37 = vpop.f32.mrb[35].mxu1  ;;  %8069 = vmatprep.subr.bf16.mxu1 %v8717_v29  ;;  %v8726_v46 = vld [vmem:[#allocation2 + $0x10c0] sm:$0xff]   ;;  %v1635_v26 = vrot.slane %v67_v25, %v8978_v35  ;;  %v1628_v28 = vcombine.high %v67_v25, %v67_v25  ;;  %v8756_v29 = vld [vmem:[#allocation2 + $0x10b8] sm:$0xff]  }
 0x232   :  { %v8757_v27 = vld [vmem:[#allocation2 + $0x1140] sm:$0xff]  }
 0x233   :  { %v9114_v39 = vadd.f32 %v7767_v33, %v5880_v32  ;;  %8048 = vmatpush3.bf16.msra.mxu0 %v8718_v36  ;;  %v1643_v30 = vcombine.high %v1635_v26, %v1635_v26  ;;  %v1651_v31 = vrot.slane %v1635_v26, %v8978_v35  ;;  %v8758_v32 = vld [vmem:[#allocation2 + $0x11c0] sm:$0xff]   ;;  %v9127_v33 = vrot.slane %v1628_v28, %v8978_v35 }
 0x234   :  { %8049 = vmatprep.subr.bf16.mxu0 %v8720_v40  ;;  %8070 = vmatpush3.bf16.msra.mxu1 %v8719_v38  ;;  %v8759_v34 = vld [vmem:[#allocation2 + $0x1100] sm:$0xff]   ;;  %v8761_v40 = vld [vmem:[#allocation2 + $0x1148] sm:$0xff]  }
 0x235   :  { %8071 = vmatprep.subr.bf16.mxu1 %v8721_v41  ;;  %v1665_v36 = vrot.slane %v1643_v30, %v8978_v35  ;;  %v8760_v37 = vld [vmem:[#allocation2 + $0x1180] sm:$0xff]   ;;  %v1644_v38 = vcombine.high %v9127_v33, %v9127_v33 }
 0x237   :  { %8050 = vmatpush3.bf16.msra.mxu0 %v8722_v42  ;;  %v1675_v41 = vcombine.high %v1665_v36, %v1665_v36  ;;  %v8762_v42 = vld [vmem:[#allocation2 + $0x11c8] sm:$0xff]  }
 0x238   :  { %8079 = vmatprep.subr.bf16.mxu0 %v8725_v45  ;;  %8072 = vmatpush3.bf16.msra.mxu1 %v8723_v43  ;;  %v1672_v43 = vrot.slane %v1644_v38, %v8978_v35  ;;  %v8764_v45 = vld [vmem:[#allocation2 + $0x1188] sm:$0xff]  }
 0x239   :  { %8101 = vmatprep.subr.bf16.mxu1 %v8726_v46 }
 0x23a   :  { %6438 = vmatmul.mubr.bf16.vlgmr.msra.gmra.mrb[60].mxu0 %v1609_v44  ;;  %v8763_v44 = vld [vmem:[#allocation2 + $0x1108] sm:$0xff]   ;;  %v1676_v46 = vcombine.high %v1672_v43, %v1672_v43 }
 0x23b   :  { %8080 = vmatpush3.bf16.msra.mxu0 %v8727_v47  ;;  %6478 = vmatmul.mubr.bf16.vlgmr.msra.gmra.mrb[60].mxu1 %v1625_v49  ;;  %v8765_v47 = vld [vmem:[#allocation2 + $0x1150] sm:$0xff]  }
 0x23c   :  { %8081 = vmatprep.subr.bf16.mxu0 %v8729_v50  ;;  %8102 = vmatpush3.bf16.msra.mxu1 %v8728_v48  ;;  %v8766_v48 = vld [vmem:[#allocation2 + $0x11d0] sm:$0xff]  }
 0x23d   :  { %8103 = vmatprep.subr.bf16.mxu1 %v8730_v51  ;;  %6517 = vmatprep.mubr.bf16.mxu0 %v1665_v36  ;;  %v8767_v49 = vld [vmem:[#allocation2 + $0x1110] sm:$0xff]   ;;  %v8769_v51 = vld [vmem:[#allocation2 + $0x1158] sm:$0xff]  }
 0x23e   :  { %6557 = vmatprep.mubr.bf16.mxu1 %v1675_v41  ;;  %v8768_v50 = vld [vmem:[#allocation2 + $0x1190] sm:$0xff]  }
 0x23f   :  { %8082 = vmatpush3.bf16.msra.mxu0 %v8731_v52  ;;  %v8770_v52 = vld [vmem:[#allocation2 + $0x11d8] sm:$0xff]  }
 0x240   :  { %8083 = vmatprep.subr.bf16.mxu0 %v8733_v54  ;;  %8104 = vmatpush3.bf16.msra.mxu1 %v8732_v53  ;;  %v8771_v53 = vld [vmem:[#allocation2 + $0x1118] sm:$0xff]  }
 0x241   :  { %8105 = vmatprep.subr.bf16.mxu1 %v8734_v55  ;;  %v8772_v54 = vld [vmem:[#allocation2 + $0x1198] sm:$0xff]   ;;  %v8773_v55 = vld [vmem:[#allocation2 + $0x1160] sm:$0xff]  }
 0x243   :  { %8084 = vmatpush3.bf16.msra.mxu0 %v8735_v56  ;;  %v8774_v56 = vld [vmem:[#allocation2 + $0x11e0] sm:$0xff]  }
 0x244   :  { %8085 = vmatprep.subr.bf16.mxu0 %v8737_v58  ;;  %8106 = vmatpush3.bf16.msra.mxu1 %v8736_v57  ;;  %v8775_v57 = vld [vmem:[#allocation2 + $0x1120] sm:$0xff]  }
 0x245   :  { %8107 = vmatprep.subr.bf16.mxu1 %v8738_v59  ;;  %v8776_v58 = vld [vmem:[#allocation2 + $0x11a0] sm:$0xff]   ;;  %v8777_v59 = vld [vmem:[#allocation2 + $0x1168] sm:$0xff]  }
 0x247   :  { %8086 = vmatpush3.bf16.msra.mxu0 %v8739_v60  ;;  %v8778_v60 = vld [vmem:[#allocation2 + $0x11e8] sm:$0xff]  }
 0x248   :  { %8087 = vmatprep.subr.bf16.mxu0 %v8741_v62  ;;  %8108 = vmatpush3.bf16.msra.mxu1 %v8740_v61  ;;  %v8779_v62 = vld [vmem:[#allocation2 + $0x1128] sm:$0xff]  }
 0x249   :  { %8109 = vmatprep.subr.bf16.mxu1 %v8742_v63 }
 0x24b   :  { %8088 = vmatpush3.bf16.msra.mxu0 %v8743_v0  ;;  %v8780_v0 = vld [vmem:[#allocation2 + $0x11a8] sm:$0xff]  }
 0x24c   :  { %8089 = vmatprep.subr.bf16.mxu0 %v8745_v2  ;;  %8110 = vmatpush3.bf16.msra.mxu1 %v8744_v1 }
 0x24d   :  { %v7787_v4 = vpop.f32.mrb[36].mxu0  ;;  %8111 = vmatprep.subr.bf16.mxu1 %v8746_v3 }
 0x24e   :  { %v7788_v6 = vpop.f32.mrb[37].mxu0  ;;  %v7809_v8 = vpop.f32.mrb[36].mxu1 }
 0x24f   :  { %v7789_v9 = vadd.f32 %v7788_v6, %v7787_v4  ;;  %v7790_v10 = vpop.f32.mrb[38].mxu0  ;;  %v7810_v11 = vpop.f32.mrb[37].mxu1  ;;  %8090 = vmatpush3.bf16.msra.mxu0 %v8747_v5  ;;  %v8781_v4 = vld [vmem:[#allocation2 + $0x1170] sm:$0xff]  }
 0x250   :  { %v7791_v13 = vpop.f32.mrb[39].mxu0  ;;  %v7811_v16 = vadd.f32 %v7810_v11, %v7809_v8  ;;  %v7812_v17 = vpop.f32.mrb[38].mxu1  ;;  %8091 = vmatprep.subr.bf16.mxu0 %v8749_v7  ;;  %8112 = vmatpush3.bf16.msra.mxu1 %v8748_v12  ;;  %v8782_v5 = vld [vmem:[#allocation2 + $0x11f0] sm:$0xff]  }
 0x251   :  { %v5960_v15 = vadd.f32 %v7789_v9, %v9114_v39  ;;  %v7813_v19 = vpop.f32.mrb[39].mxu1  ;;  %8113 = vmatprep.subr.bf16.mxu1 %v8750_v14  ;;  %v1673_v39 = vcombine.high %v1651_v31, %v1651_v31  ;;  %v8783_v11 = vld [vmem:[#allocation2 + $0x1130] sm:$0xff]   ;;  %v8787_v17 = vld [vmem:[#allocation2 + $0x1138] sm:$0xff]  }
 0x252   :  { %v8784_v13 = vld [vmem:[#allocation2 + $0x11b0] sm:$0xff]   ;;  %v1658_v19 = vrot.slane %v9127_v33, %v8978_v35 }
 0x253   :  { %v9119_v21 = vadd.f32 %v7811_v16, %v5960_v15  ;;  %8092 = vmatpush3.bf16.msra.mxu0 %v8751_v18  ;;  %v8785_v15 = vld [vmem:[#allocation2 + $0x1178] sm:$0xff]  }
 0x254   :  { %8093 = vmatprep.subr.bf16.mxu0 %v8753_v20  ;;  %8114 = vmatpush3.bf16.msra.mxu1 %v8752_v22  ;;  %v8786_v16 = vld [vmem:[#allocation2 + $0x11f8] sm:$0xff]   ;;  %v1674_v20 = vcombine.high %v1658_v19, %v1658_v19 }
 0x255   :  { %8115 = vmatprep.subr.bf16.mxu1 %v8754_v23  ;;  %v8788_v18 = vld [vmem:[#allocation2 + $0x11b8] sm:$0xff]  }
 0x257   :  { %8094 = vmatpush3.bf16.msra.mxu0 %v8755_v24 }
 0x258   :  { %8123 = vmatprep.subr.bf16.mxu0 %v8757_v27  ;;  %8116 = vmatpush3.bf16.msra.mxu1 %v8756_v29 }
 0x259   :  { %8145 = vmatprep.subr.bf16.mxu1 %v8758_v32 }
 0x25a   :  { %6518 = vmatmul.mubr.bf16.vlgmr.msra.gmra.mrb[64].mxu0 %v1651_v31 }
 0x25b   :  { %8124 = vmatpush3.bf16.msra.mxu0 %v8759_v34  ;;  %6558 = vmatmul.mubr.bf16.vlgmr.msra.gmra.mrb[64].mxu1 %v1673_v39 }
 0x25c   :  { %8125 = vmatprep.subr.bf16.mxu0 %v8761_v40  ;;  %8146 = vmatpush3.bf16.msra.mxu1 %v8760_v37 }
 0x25d   :  { %6597 = vmatprep.mubr.bf16.mxu0 %v1672_v43  ;;  %8147 = vmatprep.subr.bf16.mxu1 %v8762_v42 }
 0x25e   :  { %6637 = vmatprep.mubr.bf16.mxu1 %v1676_v46  ;;  %v8902_v46 = vmov 0.0  }
 0x25f   :  { %8126 = vmatpush3.bf16.msra.mxu0 %v8763_v44 }
 0x260   :  { %8127 = vmatprep.subr.bf16.mxu0 %v8765_v47  ;;  %8148 = vmatpush3.bf16.msra.mxu1 %v8764_v45  ;;  %v8790_v45 = vld [vmem:[%s9178_s3] sm:$0xff]   ;;  %v8791_v47 = vld [vmem:[%s9178_s3 + $0x8] sm:$0xff]  }
 0x261   :  { %8149 = vmatprep.subr.bf16.mxu1 %v8766_v48  ;;  %v8792_v48 = vld [vmem:[%s9178_s3 + $0x10] sm:$0xff]  }
 0x263   :  { %8128 = vmatpush3.bf16.msra.mxu0 %v8767_v49  ;;  %v8793_v49 = vld [vmem:[%s9178_s3 + $0x18] sm:$0xff]  }
 0x264   :  { %8129 = vmatprep.subr.bf16.mxu0 %v8769_v51  ;;  %8150 = vmatpush3.bf16.msra.mxu1 %v8768_v50  ;;  %v8794_v50 = vld [vmem:[%s9178_s3 + $0x20] sm:$0xff]  }
 0x265   :  { %8151 = vmatprep.subr.bf16.mxu1 %v8770_v52 }
 0x267   :  { %8130 = vmatpush3.bf16.msra.mxu0 %v8771_v53 }
 0x268   :  { %8131 = vmatprep.subr.bf16.mxu0 %v8773_v55  ;;  %8152 = vmatpush3.bf16.msra.mxu1 %v8772_v54 }
 0x269   :  { %8153 = vmatprep.subr.bf16.mxu1 %v8774_v56 }
 0x26b   :  { %8132 = vmatpush3.bf16.msra.mxu0 %v8775_v57 }
 0x26c   :  { %8133 = vmatprep.subr.bf16.mxu0 %v8777_v59  ;;  %8154 = vmatpush3.bf16.msra.mxu1 %v8776_v58  ;;  %v8795_v58 = vld [vmem:[%s9178_s3 + $0x28] sm:$0xff]  }
 0x26d   :  { %v7831_v61 = vpop.f32.mrb[40].mxu0  ;;  %8155 = vmatprep.subr.bf16.mxu1 %v8778_v60 }
 0x26e   :  { %v7832_v63 = vpop.f32.mrb[41].mxu0  ;;  %v7853_v1 = vpop.f32.mrb[40].mxu1 }
 0x26f   :  { %v7833_v2 = vadd.f32 %v7832_v63, %v7831_v61  ;;  %v7834_v3 = vpop.f32.mrb[42].mxu0  ;;  %v7854_v6 = vpop.f32.mrb[41].mxu1  ;;  %8134 = vmatpush3.bf16.msra.mxu0 %v8779_v62 }
 0x270   :  { %v7835_v7 = vpop.f32.mrb[43].mxu0  ;;  %v7855_v9 = vadd.f32 %v7854_v6, %v7853_v1  ;;  %v7856_v10 = vpop.f32.mrb[42].mxu1  ;;  %8135 = vmatprep.subr.bf16.mxu0 %v8781_v4  ;;  %8156 = vmatpush3.bf16.msra.mxu1 %v8780_v0  ;;  %v8796_v0 = vld [vmem:[%s9178_s3 + $0x30] sm:$0xff]   ;;  %v8797_v1 = vld [vmem:[%s9178_s3 + $0x38] sm:$0xff]   ;;  %s8904_s3 = smov [#allocation8]  }
 0x271   :  { %v6040_v8 = vadd.f32 %v7833_v2, %v9119_v21  ;;  %v7857_v12 = vpop.f32.mrb[43].mxu1  ;;  %8157 = vmatprep.subr.bf16.mxu1 %v8782_v5  ;;  %s6779_s10 = sshll.u32 %s8904_s3, 4  ;;  %s6780_s10 = int_to_ptr.vmem [resolvable:$true] %s6779_s10 }
 0x272   :  { %s8868_s11 = scalar_lea.vmem %s6780_s10, 32  ;;  %p8873_p11 = scmp.lt.s32.totalorder %s6780_s10, %s6780_s10 }
 0x273   :  { %v6080_v14 = vadd.f32 %v7855_v9, %v6040_v8  ;;  %8136 = vmatpush3.bf16.msra.mxu0 %v8783_v11  ;;  %p8869_p10 = scmp.ne.s32.totalorder %s6780_s10, %s8868_s11  ;;  %p8874_p12 = scmp.lt.s32.totalorder %s8868_s11, %s8868_s11 }
 0x274   :  { %8137 = vmatprep.subr.bf16.mxu0 %v8785_v15  ;;  %8158 = vmatpush3.bf16.msra.mxu1 %v8784_v13 }
 0x275   :  { %8159 = vmatprep.subr.bf16.mxu1 %v8786_v16  ;;  %p8875_p13 = por %p8874_p12, %p8873_p11 }
 0x277   :  { %8138 = vmatpush3.bf16.msra.mxu0 %v8787_v17  ;;  %p8876_p0 = pnand %p8875_p13, %p8869_p10 }
 0x278   :  { %8160 = vmatpush3.bf16.msra.mxu1 %v8788_v18  ;;  %8176 = vmatprep.subr.bf16.mxu0 %v8902_v46 }
 0x27a   :  { %6598 = vmatmul.mubr.bf16.vlgmr.msra.gmra.mrb[68].mxu0 %v1658_v19 }
 0x27b   :  { %6638 = vmatmul.mubr.bf16.vlgmr.msra.gmra.mrb[68].mxu1 %v1674_v20  ;;  %8177 = vmatpush3.bf16.msra.mxu0 %v8790_v45 }
 0x27c   :  { %8178 = vmatprep.subr.bf16.mxu0 %v8902_v46  ;;  %8192 = vmatprep.mubr.msk.bf16.mxu0 %vm8903_vm0, %v8902_v46 }
 0x27f   :  { %8179 = vmatpush3.bf16.msra.mxu0 %v8791_v47 }
 0x280   :  { %8180 = vmatprep.subr.bf16.mxu0 %v8902_v46 }
 0x283   :  { %8181 = vmatpush3.bf16.msra.mxu0 %v8792_v48 }
 0x284   :  { %8182 = vmatprep.subr.bf16.mxu0 %v8902_v46 }
 0x287   :  { %8183 = vmatpush3.bf16.msra.mxu0 %v8793_v49 }
 0x288   :  { %8184 = vmatprep.subr.bf16.mxu0 %v8902_v46 }
 0x28b   :  { %8185 = vmatpush3.bf16.msra.mxu0 %v8794_v50 }
 0x28c   :  { %8186 = vmatprep.subr.bf16.mxu0 %v8902_v46 }
 0x28d   :  { %v7875_v21 = vpop.f32.mrb[44].mxu0 }
 0x28e   :  { %v7876_v22 = vpop.f32.mrb[45].mxu0  ;;  %v7897_v23 = vpop.f32.mrb[44].mxu1 }
 0x28f   :  { %v7877_v24 = vadd.f32 %v7876_v22, %v7875_v21  ;;  %v7878_v25 = vpop.f32.mrb[46].mxu0  ;;  %v7898_v26 = vpop.f32.mrb[45].mxu1  ;;  %8187 = vmatpush3.bf16.msra.mxu0 %v8795_v58 }
 0x290   :  { %v7879_v27 = vpop.f32.mrb[47].mxu0  ;;  %v7899_v29 = vadd.f32 %v7898_v26, %v7897_v23  ;;  %v7900_v30 = vpop.f32.mrb[46].mxu1  ;;  %8188 = vmatprep.subr.bf16.mxu0 %v8902_v46 }
 0x291   :  { %v6120_v28 = vadd.f32 %v7877_v24, %v6080_v14  ;;  %v7901_v31 = vpop.f32.mrb[47].mxu1 }
 0x293   :  { %v6160_v32 = vadd.f32 %v7899_v29, %v6120_v28  ;;  %8189 = vmatpush3.bf16.msra.mxu0 %v8796_v0 }
 0x294   :  { %8190 = vmatprep.subr.bf16.mxu0 %v8902_v46 }
 0x297   :  { %8191 = vmatpush3.bf16.msra.mxu0 %v8797_v1 }
 0x2ad   :  { %v7919_v35 = vpop.f32.mrb[48].mxu0 }
 0x2ae   :  { %v7920_v33 = vpop.f32.mrb[49].mxu0  ;;  %v7941_v34 = vpop.f32.mrb[48].mxu1 }
 0x2af   :  { %v7921_v36 = vadd.f32 %v7920_v33, %v7919_v35  ;;  %v7922_v37 = vpop.f32.mrb[50].mxu0  ;;  %v7942_v38 = vpop.f32.mrb[49].mxu1 }
 0x2b0   :  { %v7923_v39 = vpop.f32.mrb[51].mxu0  ;;  %v7943_v41 = vadd.f32 %v7942_v38, %v7941_v34  ;;  %v7944_v42 = vpop.f32.mrb[50].mxu1 }
 0x2b1   :  { %v6200_v40 = vadd.f32 %v7921_v36, %v6160_v32  ;;  %v7945_v43 = vpop.f32.mrb[51].mxu1 }
 0x2b3   :  { %v6240_v44 = vadd.f32 %v7943_v41, %v6200_v40 }
 0x2cd   :  { %v7963_v51 = vpop.f32.mrb[52].mxu0 }
 0x2ce   :  { %v7964_v52 = vpop.f32.mrb[53].mxu0  ;;  %v7985_v53 = vpop.f32.mrb[52].mxu1 }
 0x2cf   :  { %v7965_v54 = vadd.f32 %v7964_v52, %v7963_v51  ;;  %v7966_v55 = vpop.f32.mrb[54].mxu0  ;;  %v7986_v56 = vpop.f32.mrb[53].mxu1  ;;  %v7366_v52 = vld [vmem:[#allocation7] ss:$0 sm:$0xff] }
 0x2d0   :  { %v7967_v57 = vpop.f32.mrb[55].mxu0  ;;  %v7987_v60 = vadd.f32 %v7986_v56, %v7985_v53  ;;  %v7988_v61 = vpop.f32.mrb[54].mxu1 }
 0x2d1   :  { %v6280_v59 = vadd.f32 %v7965_v54, %v6240_v44  ;;  %v7989_v62 = vpop.f32.mrb[55].mxu1 }
 0x2d3   :  { %v6320_v63 = vadd.f32 %v7987_v60, %v6280_v59 }
 0x2ed   :  { %v8007_v2 = vpop.f32.mrb[56].mxu0 }
 0x2ee   :  { %v8008_v3 = vpop.f32.mrb[57].mxu0  ;;  %v8029_v4 = vpop.f32.mrb[56].mxu1 }
 0x2ef   :  { %v8009_v5 = vadd.f32 %v8008_v3, %v8007_v2  ;;  %v8010_v6 = vpop.f32.mrb[58].mxu0  ;;  %v8030_v7 = vpop.f32.mrb[57].mxu1 }
 0x2f0   :  { %v8011_v8 = vpop.f32.mrb[59].mxu0  ;;  %v8031_v10 = vadd.f32 %v8030_v7, %v8029_v4  ;;  %v8032_v11 = vpop.f32.mrb[58].mxu1 }
 0x2f1   :  { %v6360_v9 = vadd.f32 %v8009_v5, %v6320_v63  ;;  %v8033_v12 = vpop.f32.mrb[59].mxu1 }
 0x2f3   :  { %v6400_v13 = vadd.f32 %v8031_v10, %v6360_v9 }
 0x30d   :  { %v8051_v14 = vpop.f32.mrb[60].mxu0 }
 0x30e   :  { %v8052_v15 = vpop.f32.mrb[61].mxu0  ;;  %v8073_v16 = vpop.f32.mrb[60].mxu1 }
 0x30f   :  { %v8053_v17 = vadd.f32 %v8052_v15, %v8051_v14  ;;  %v8054_v18 = vpop.f32.mrb[62].mxu0  ;;  %v8074_v19 = vpop.f32.mrb[61].mxu1 }
 0x310   :  { %v8055_v20 = vpop.f32.mrb[63].mxu0  ;;  %v8075_v22 = vadd.f32 %v8074_v19, %v8073_v16  ;;  %v8076_v23 = vpop.f32.mrb[62].mxu1 }
 0x311   :  { %v6440_v21 = vadd.f32 %v8053_v17, %v6400_v13  ;;  %v8077_v24 = vpop.f32.mrb[63].mxu1 }
 0x313   :  { %v6480_v25 = vadd.f32 %v8075_v22, %v6440_v21 }
 0x32d   :  { %v8095_v26 = vpop.f32.mrb[64].mxu0 }
 0x32e   :  { %v8096_v27 = vpop.f32.mrb[65].mxu0  ;;  %v8117_v28 = vpop.f32.mrb[64].mxu1 }
 0x32f   :  { %v8097_v29 = vadd.f32 %v8096_v27, %v8095_v26  ;;  %v8098_v30 = vpop.f32.mrb[66].mxu0  ;;  %v8118_v31 = vpop.f32.mrb[65].mxu1 }
 0x330   :  { %v8099_v32 = vpop.f32.mrb[67].mxu0  ;;  %v8119_v33 = vadd.f32 %v8118_v31, %v8117_v28  ;;  %v8120_v34 = vpop.f32.mrb[66].mxu1 }
 0x331   :  { %v6520_v35 = vadd.f32 %v8097_v29, %v6480_v25  ;;  %v8121_v36 = vpop.f32.mrb[67].mxu1 }
 0x333   :  { %v6560_v37 = vadd.f32 %v8119_v33, %v6520_v35 }
 0x34d   :  { %v8139_v38 = vpop.f32.mrb[68].mxu0 }
 0x34e   :  { %v8140_v39 = vpop.f32.mrb[69].mxu0  ;;  %v8161_v40 = vpop.f32.mrb[68].mxu1 }
 0x34f   :  { %v8141_v41 = vadd.f32 %v8140_v39, %v8139_v38  ;;  %v8142_v42 = vpop.f32.mrb[70].mxu0  ;;  %v8162_v43 = vpop.f32.mrb[69].mxu1 }
 0x350   :  { %v8143_v44 = vpop.f32.mrb[71].mxu0  ;;  %v8163_v46 = vadd.f32 %v8162_v43, %v8161_v40  ;;  %v8164_v47 = vpop.f32.mrb[70].mxu1 }
 0x351   :  { %v6600_v45 = vadd.f32 %v8141_v41, %v6560_v37  ;;  %v8165_v48 = vpop.f32.mrb[71].mxu1 }
 0x353   :  { %v6640_v49 = vadd.f32 %v8163_v46, %v6600_v45 }
 0x355   :  { %v6645_v50 = vmax.f32 %v6640_v49, 0.0 }
 0x357   :  { %v6646_v51 = vpack.c.bf16 %v6645_v50, %v6645_v50 }
 0x359   :  { %8193 = vmatmul.mubr.bf16.vlgmr.msra.gmra.mrb[72].mxu0 %v6646_v51 }
 0x42c   :  { %v6752_v53 = vpop.f32.mrb[72].mxu0 }
 0x42d   :  { %v6753_v54 = vadd.f32 %v7366_v52, %v6752_v53  ;;  %v8194_v55 = vpop.f32.mrb[73].mxu0 }
 0x42e   :  { %v6755_v56 = vpop.f32.mrb[74].mxu0 }
 0x42f   :  { %v8195_v57 = vpop.f32.mrb[75].mxu0  ;;  %v6759_v58 = vsel %vm6758_vm1, %v6753_v54, -inf }
 0x430   :  { %6760 = vmax.xlane.f32.xlu0 %v6759_v58 }
 0x4bd   :  { %v6761_v59 = vpop.xlane.xlu0 %6760 }
 0x4be   :  { %v6762_v60 = vsub.f32 %v6753_v54, %v6761_v59 }
 0x4c0   :  { %v6763_v61 = vmul.f32 1.442695, %v6762_v60 }
 0x4c2   :  { %8798 = vpow2.f32 %v6763_v61 }
 0x4cc   :  { %v8799_v62 = vpop.eup %8798 }
 0x4cd   :  { %v6765_v63 = vsel %vm6758_vm1, %v8799_v62, 0.0 }
 0x4ce   :  { %6766 = vadd.xlane.f32.xlu0 %v6765_v63 }
 0x55b   :  { %v6767_v0 = vpop.xlane.xlu0 %6766 }
 0x55c   :  { %8800 = vlog2.f32 %v6767_v0 }
 0x566   :  { %v8801_v1 = vpop.eup %8800 }
 0x567   :  { %v6769_v2 = vmul.f32 0.6931472, %v8801_v1 }
 0x569   :  { %v6770_v3 = vadd.f32 %v6769_v2, %v6761_v59 }
 0x56b   :  { %v6771_v4 = vsub.f32 %v6753_v54, %v6770_v3 }
 0x56d   :  { %6772 = vst.msk [vmem:[#allocation8] sm:$0x3] %vm6758_vm1, %v6771_v4 }
 0x56e   :  { %8879 = shalt.err (!%p8876_p0)
}
 0x56f   :  { %s8880_s14 = scalar_lea.hbm %s9180_s5, 32 }
 0x570   :  { %p8881_p1 = scmp.ne.s32.totalorder %s9180_s5, %s8880_s14  ;;  %p8884_p2 = scmp.lt.u32.totalorder %s8880_s14, %s9180_s5 }
 0x572   :  { %p8886_p3 = pnand %p8884_p2, %p8881_p1 }
 0x574   :  { %8889 = shalt.err (!%p8886_p3)
}
 0x575   :  { %6782 = dma.vmem_to_hbm [thread:$0]  %s6780_s10, 32, %s9180_s5, [#allocation4]  }
 0x576   :  { %8894 = dma.done.wait [#allocation4], 32  }
 0x577   :  { %8895 = vsyncadd [#allocation4], 4294967264 }
 0x578   :  { %6786 = vsyncpa [#allocation3], 1 }
 0x579   :  { %6787 = vsyncpa [#allocation6], 1 }
 0x57a   :  { %6788 = vsyncpa [#allocation4], 1 }

</bundles_post_ra>
